<compile_context>
chip_gen: v7x
topology: tpu7x:2x2x1
jax: 0.10.0
libtpu: 0.0.40
codegen_flags: <defaults>
</compile_context>

<pallas_src>
import functools
import math

import jax
import jax.numpy as jnp
import numpy as np
from jax import lax
from jax.experimental import pallas as pl
from jax.experimental.pallas import tpu as pltpu  # noqa: F401  (TPU backend)


_LN_EPS = 1e-5
_BN_EPS = 1e-5
_NEG_INF = -1e9

# Per-encoder-layer parameter ordering shared by prepare/flatten and the kernel.
_LAYER_KEYS = ("wqkv", "bqkv", "wo", "bo", "ln1g", "ln1b",
               "w1", "b1", "w2", "b2", "ln2g", "ln2b")


# ---------------------------------------------------------------------------
# Whole-forward fused kernel
# ---------------------------------------------------------------------------

def _make_fused_kernel(*, num_layers, nhead0, nhead1, d0, d1, has_fuse):
    """Builds the kernel computing the whole MemTransformerEncoder forward.

    Argument order (all VMEM refs, full arrays, no grid):
      x0 (B*S0,d0), x1 (B*S1,d1), bias0 (B*S0,B*S0), bias1 (B*S1,B*S1),
      12 stream-0 layer params (_LAYER_KEYS order),
      12 stream-1 layer params (_LAYER_KEYS order),
      norm_g, norm_b, norm2_g, norm2_b,
      [pblock, fw0, fw1, fb_eff, bn_g, bn_b]   (only if has_fuse)
      o0 (B*S0,d0), o1 (B*S1,d1)               (outputs)
    """

    def kernel(*refs):
        it = iter(refs)
        x0_ref = next(it)
        x1_ref = next(it)
        bias0_ref = next(it)
        bias1_ref = next(it)
        p0 = tuple(next(it) for _ in range(len(_LAYER_KEYS)))
        p1 = tuple(next(it) for _ in range(len(_LAYER_KEYS)))
        ng_ref = next(it)
        nb_ref = next(it)
        n2g_ref = next(it)
        n2b_ref = next(it)
        if has_fuse:
            pb_ref = next(it)
            fw0_ref = next(it)
            fw1_ref = next(it)
            fb_ref = next(it)
            bng_ref = next(it)
            bnb_ref = next(it)
        o0_ref, o1_ref = refs[-2], refs[-1]

        def _ln(v, g_ref, b_ref):
            mu = jnp.mean(v, axis=-1, keepdims=True)
            c = v - mu
            var = jnp.mean(c * c, axis=-1, keepdims=True)
            return c * lax.rsqrt(var + _LN_EPS) * g_ref[...] + b_ref[...]

        def _encoder_layer(x, bias, pr, nhead, D):
            (wqkv_r, bqkv_r, wo_r, bo_r, ln1g_r, ln1b_r,
             w1_r, b1_r, w2_r, b2_r, ln2g_r, ln2b_r) = pr
            dh = D // nhead
            # Dense QKV projection on the flattened (B*S, D) slab; the
            # 1/sqrt(dh) attention scale is folded into the Q columns outside
            # the kernel.
            qkv = (jnp.dot(x, wqkv_r[...], preferred_element_type=jnp.float32)
                   + bqkv_r[...])                                   # (R, 3D)
            heads = []
            for h in range(nhead):                                  # static unroll
                qh = qkv[:, h * dh:(h + 1) * dh]
                kh = qkv[:, D + h * dh:D + (h + 1) * dh]
                vh = qkv[:, 2 * D + h * dh:2 * D + (h + 1) * dh]
                s = lax.dot_general(qh, kh, (((1,), (1,)), ((), ())),
                                    preferred_element_type=jnp.float32)
                s = s + bias                 # additive block-diagonal batch mask
                s = s - jnp.max(s, axis=-1, keepdims=True)
                p = jnp.exp(s)
                inv = pl.reciprocal(jnp.sum(p, axis=-1, keepdims=True),
                                    approx=True)
                heads.append(
                    jnp.dot(p, vh, preferred_element_type=jnp.float32) * inv)
            attn = jnp.concatenate(heads, axis=-1)                  # (R, D)
            x = (x + jnp.dot(attn, wo_r[...],
                             preferred_element_type=jnp.float32) + bo_r[...])
            x = _ln(x, ln1g_r, ln1b_r)
            hid = jnp.maximum(
                jnp.dot(x, w1_r[...], preferred_element_type=jnp.float32)
                + b1_r[...], 0.0)
            x = (x + jnp.dot(hid, w2_r[...],
                             preferred_element_type=jnp.float32) + b2_r[...])
            return _ln(x, ln2g_r, ln2b_r)

        x0 = x0_ref[...]
        x1 = x1_ref[...]
        bias0 = bias0_ref[...]
        bias1 = bias1_ref[...]

        for i in range(num_layers):            # clones share parameters
            x0 = _encoder_layer(x0, bias0, p0, nhead0, d0)
            x1 = _encoder_layer(x1, bias1, p1, nhead1, d1)
            if has_fuse and i < num_layers - 1:
                # Conv3d + AdaptiveAvgPool3d folded into one block-diagonal
                # pooling matmul over the flattened stream-1 slab, then the
                # fuse Linear, training-mode BatchNorm1d (biased stats over all
                # B*S0 positions) and ReLU.
                pooled = jnp.dot(pb_ref[...], x1,
                                 preferred_element_type=jnp.float32)  # (R0,d1)
                y = (jnp.dot(x0, fw0_ref[...],
                             preferred_element_type=jnp.float32)
                     + jnp.dot(pooled, fw1_ref[...],
                               preferred_element_type=jnp.float32)
                     + fb_ref[...])                                   # (R0,d0)
                mean = jnp.mean(y, axis=0, keepdims=True)
                c = y - mean
                var = jnp.mean(c * c, axis=0, keepdims=True)
                x0 = jnp.maximum(
                    c * lax.rsqrt(var + _BN_EPS) * bng_ref[...] + bnb_ref[...],
                    0.0)
            # memory / memory2 are None (constructor defaults) -> branch skipped.

        # Model-level final LayerNorms (self.norm / self.norm2).
        x0 = _ln(x0, ng_ref, nb_ref)
        x1 = _ln(x1, n2g_ref, n2b_ref)
        o0_ref[...] = x0.astype(o0_ref.dtype)
        o1_ref[...] = x1.astype(o1_ref.dtype)

    return kernel


# ---------------------------------------------------------------------------
# One-time parameter preparation (hoisted out of the jitted per-forward path)
# ---------------------------------------------------------------------------

def adaptive_pool_matrix(din, dout):
    """Row i averages input[floor(i*din/dout) : ceil((i+1)*din/dout)]."""
    P = np.zeros((dout, din), dtype=np.float32)
    for i in range(dout):
        start = (i * din) // dout
        end = ((i + 1) * din + dout - 1) // dout
        P[i, start:end] = 1.0 / (end - start)
    return jnp.asarray(P)


def prepare_params(params, *, B, S0, S1, d0, d1, nhead0, nhead1, num_layers):
    """Reorganise torch-layout parameters for the fused kernel (run once)."""

    def prep_layer(p, nhead, D):
        dh = D // nhead
        scale = 1.0 / math.sqrt(dh)
        F = p["lin1_w"].shape[1]
        w_in, b_in = p["in_proj_w"], p["in_proj_b"]          # (D,3D), (3D,)
        wqkv = jnp.concatenate([w_in[:, :D] * scale, w_in[:, D:]], axis=1)
        bqkv = jnp.concatenate([b_in[:D] * scale, b_in[D:]]).reshape(1, 3 * D)
        return dict(
            wqkv=wqkv, bqkv=bqkv,
            wo=p["out_proj_w"], bo=p["out_proj_b"].reshape(1, D),
            ln1g=p["ln1_g"].reshape(1, D), ln1b=p["ln1_b"].reshape(1, D),
            w1=p["lin1_w"], b1=p["lin1_b"].reshape(1, F),
            w2=p["lin2_w"], b2=p["lin2_b"].reshape(1, D),
            ln2g=p["ln2_g"].reshape(1, D), ln2b=p["ln2_b"].reshape(1, D))

    def batch_bias(S):
        ids = np.repeat(np.arange(B), S)
        same = ids[:, None] == ids[None, :]
        return jnp.asarray(np.where(same, 0.0, _NEG_INF).astype(np.float32))

    prep = dict(
        bias0=batch_bias(S0), bias1=batch_bias(S1),
        enc=prep_layer(params["enc"], nhead0, d0),
        fenc=prep_layer(params["fenc"], nhead1, d1),
        norm=(params["norm_g"].reshape(1, d0), params["norm_b"].reshape(1, d0)),
        norm2=(params["norm2_g"].reshape(1, d1),
               params["norm2_b"].reshape(1, d1)),
        fuse=())

    if num_layers > 1:
        assert S0 == 23, "fuse/concat path requires output0 sequence length 23"
        # Conv3d(1->1, k=[1,1,1], pad=[1,0,0]) + AdaptiveAvgPool3d((23,B,d1))
        # collapse to w_conv * (P_inner @ output1); the zero-padded depth rows
        # contribute only the conv bias, which is folded into the fuse bias.
        P_inner = adaptive_pool_matrix(S1 + 2, 23)[:, 1:S1 + 1]      # (23, S1)
        p_eff = params["conv_w"] * P_inner
        pblock = jnp.kron(jnp.eye(B, dtype=jnp.float32), p_eff)     # (B*23,B*S1)
        fw0 = params["fuse_w"][:d0, :]
        fw1 = params["fuse_w"][d0:, :]
        fb_eff = (params["fuse_b"]
                  + params["conv_b"] * jnp.sum(fw1, axis=0)).reshape(1, d0)
        prep["fuse"] = (pblock, fw0, fw1, fb_eff,
                        params["bn_g"].reshape(1, d0),
                        params["bn_b"].reshape(1, d0))
    return prep


# ---------------------------------------------------------------------------
# Forward wrapper: one pallas_call for the whole model
# ---------------------------------------------------------------------------

def mem_transformer_encoder_fwd(src0, src1, prep, *, num_layers, nhead0, nhead1):
    S0, B, d0 = src0.shape
    S1, _, d1 = src1.shape
    R0, R1 = B * S0, B * S1
    has_fuse = num_layers > 1

    # Batch-major flatten: row (b*S + s) corresponds to torch's [s, b, :].
    x0 = jnp.transpose(src0, (1, 0, 2)).reshape(R0, d0)
    x1 = jnp.transpose(src1, (1, 0, 2)).reshape(R1, d1)

    enc = [prep["enc"][k] for k in _LAYER_KEYS]
    fenc = [prep["fenc"][k] for k in _LAYER_KEYS]
    args = [x0, x1, prep["bias0"], prep["bias1"], *enc, *fenc,
            *prep["norm"], *prep["norm2"], *prep["fuse"]]

    F0 = prep["enc"]["w1"].shape[1]
    F1 = prep["fenc"]["w1"].shape[1]

    def layer_flops(R, D, F):
        return R * (8 * D * D + 4 * R * D + 4 * D * F)

    flops = num_layers * (layer_flops(R0, d0, F0) + layer_flops(R1, d1, F1))
    if has_fuse:
        flops += (num_layers - 1) * R0 * (2 * R1 * d1 + 2 * d0 * d0 + 2 * d1 * d0)
    transc = num_layers * (nhead0 * R0 * R0 + nhead1 * R1 * R1)
    bytes_acc = sum(int(a.size) * 4 for a in args) + (R0 * d0 + R1 * d1) * 4

    kernel = _make_fused_kernel(num_layers=num_layers, nhead0=nhead0,
                                nhead1=nhead1, d0=d0, d1=d1, has_fuse=has_fuse)
    out0f, out1f = pl.pallas_call(
        kernel,
        out_shape=(jax.ShapeDtypeStruct((R0, d0), jnp.float32),
                   jax.ShapeDtypeStruct((R1, d1), jnp.float32)),
        cost_estimate=pl.CostEstimate(flops=int(flops),
                                      transcendentals=int(transc),
                                      bytes_accessed=int(bytes_acc)),
    )(*args)

    return [out0f.reshape(B, S0, d0).transpose(1, 0, 2),
            out1f.reshape(B, S1, d1).transpose(1, 0, 2)]


# ---------------------------------------------------------------------------
# Deterministic parameter init (weights stored as (in, out) == W^T of torch)
# ---------------------------------------------------------------------------

def init_linear_params(key, in_dim, out_dim):
    k1, k2 = jax.random.split(key)
    w = jax.random.normal(k1, (in_dim, out_dim), jnp.float32) / math.sqrt(in_dim)
    b = jax.random.normal(k2, (out_dim,), jnp.float32) * 0.01
    return w, b


def init_encoder_layer_params(key, d_model, dim_ff):
    ks = jax.random.split(key, 4)
    in_w, in_b = init_linear_params(ks[0], d_model, 3 * d_model)
    out_w, out_b = init_linear_params(ks[1], d_model, d_model)
    l1_w, l1_b = init_linear_params(ks[2], d_model, dim_ff)
    l2_w, l2_b = init_linear_params(ks[3], dim_ff, d_model)
    ones = jnp.ones((d_model,), jnp.float32)
    zeros = jnp.zeros((d_model,), jnp.float32)
    return dict(in_proj_w=in_w, in_proj_b=in_b,
                out_proj_w=out_w, out_proj_b=out_b,
                lin1_w=l1_w, lin1_b=l1_b, lin2_w=l2_w, lin2_b=l2_b,
                ln1_g=ones, ln1_b=zeros, ln2_g=ones, ln2_b=zeros)


if __name__ == "__main__":
    d0, d1 = 64, 32            # input_dims
    num_layers = 2
    nhead0, nhead1 = 4, 4
    ff0, ff1 = 128, 64
    B = 2
    S0 = 23                    # required by the fuse/concat path
    S1 = 16

    root = jax.random.PRNGKey(0)
    ks = jax.random.split(root, 8)

    params = dict(
        enc=init_encoder_layer_params(ks[0], d0, ff0),
        fenc=init_encoder_layer_params(ks[1], d1, ff1),
        conv_w=jax.random.normal(ks[3], (), jnp.float32) * 0.5 + 1.0,
        conv_b=jax.random.normal(ks[4], (), jnp.float32) * 0.1,
        bn_g=jnp.ones((d0,), jnp.float32), bn_b=jnp.zeros((d0,), jnp.float32),
        norm_g=jnp.ones((d0,), jnp.float32), norm_b=jnp.zeros((d0,), jnp.float32),
        norm2_g=jnp.ones((d1,), jnp.float32), norm2_b=jnp.zeros((d1,), jnp.float32),
    )
    params["fuse_w"], params["fuse_b"] = init_linear_params(ks[2], d0 + d1, d0)

    k_in0, k_in1 = jax.random.split(ks[5])
    src0 = jax.random.normal(k_in0, (S0, B, d0), jnp.float32)
    src1 = jax.random.normal(k_in1, (S1, B, d1), jnp.float32)

    # One-time parameter preparation, hoisted outside the jitted forward.
    prep = prepare_params(params, B=B, S0=S0, S1=S1, d0=d0, d1=d1,
                          nhead0=nhead0, nhead1=nhead1, num_layers=num_layers)

    fwd = jax.jit(functools.partial(
        mem_transformer_encoder_fwd, num_layers=num_layers,
        nhead0=nhead0, nhead1=nhead1))

    out0, out1 = fwd(src0, src1, prep)
    jax.block_until_ready((out0, out1))

    assert out0.shape == (S0, B, d0) and out1.shape == (S1, B, d1)
    assert bool(jnp.all(jnp.isfinite(out0))) and bool(jnp.all(jnp.isfinite(out1)))
    print("KERNEL_OK")
</pallas_src>

<mosaic_0001>
module attributes {stable_mosaic.version = 11 : i64} {
  func.func @kernel(%arg0: memref<46x64xf32, #tpu.memory_space<vmem>>, %arg1: memref<32x32xf32, #tpu.memory_space<vmem>>, %arg2: memref<46x46xf32, #tpu.memory_space<vmem>>, %arg3: memref<32x32xf32, #tpu.memory_space<vmem>>, %arg4: memref<64x192xf32, #tpu.memory_space<vmem>>, %arg5: memref<1x192xf32, #tpu.memory_space<vmem>>, %arg6: memref<64x64xf32, #tpu.memory_space<vmem>>, %arg7: memref<1x64xf32, #tpu.memory_space<vmem>>, %arg8: memref<1x64xf32, #tpu.memory_space<vmem>>, %arg9: memref<1x64xf32, #tpu.memory_space<vmem>>, %arg10: memref<64x128xf32, #tpu.memory_space<vmem>>, %arg11: memref<1x128xf32, #tpu.memory_space<vmem>>, %arg12: memref<128x64xf32, #tpu.memory_space<vmem>>, %arg13: memref<1x64xf32, #tpu.memory_space<vmem>>, %arg14: memref<1x64xf32, #tpu.memory_space<vmem>>, %arg15: memref<1x64xf32, #tpu.memory_space<vmem>>, %arg16: memref<32x96xf32, #tpu.memory_space<vmem>>, %arg17: memref<1x96xf32, #tpu.memory_space<vmem>>, %arg18: memref<32x32xf32, #tpu.memory_space<vmem>>, %arg19: memref<1x32xf32, #tpu.memory_space<vmem>>, %arg20: memref<1x32xf32, #tpu.memory_space<vmem>>, %arg21: memref<1x32xf32, #tpu.memory_space<vmem>>, %arg22: memref<32x64xf32, #tpu.memory_space<vmem>>, %arg23: memref<1x64xf32, #tpu.memory_space<vmem>>, %arg24: memref<64x32xf32, #tpu.memory_space<vmem>>, %arg25: memref<1x32xf32, #tpu.memory_space<vmem>>, %arg26: memref<1x32xf32, #tpu.memory_space<vmem>>, %arg27: memref<1x32xf32, #tpu.memory_space<vmem>>, %arg28: memref<1x64xf32, #tpu.memory_space<vmem>>, %arg29: memref<1x64xf32, #tpu.memory_space<vmem>>, %arg30: memref<1x32xf32, #tpu.memory_space<vmem>>, %arg31: memref<1x32xf32, #tpu.memory_space<vmem>>, %arg32: memref<46x32xf32, #tpu.memory_space<vmem>>, %arg33: memref<64x64xf32, #tpu.memory_space<vmem>>, %arg34: memref<32x64xf32, #tpu.memory_space<vmem>>, %arg35: memref<1x64xf32, #tpu.memory_space<vmem>>, %arg36: memref<1x64xf32, #tpu.memory_space<vmem>>, %arg37: memref<1x64xf32, #tpu.memory_space<vmem>>, %arg38: memref<46x64xf32, #tpu.memory_space<vmem>>, %arg39: memref<32x32xf32, #tpu.memory_space<vmem>>) attributes {dimension_semantics = [], scalar_prefetch = 0 : i64, scratch_operands = 0 : i64, tpu.core_type = #tpu.core_type<tc>} {
    %c0 = arith.constant 0 : index
    %c0_0 = arith.constant 0 : index
    %0 = vector.load %arg0[%c0, %c0_0] : memref<46x64xf32, #tpu.memory_space<vmem>>, vector<46x64xf32>
    %c0_1 = arith.constant 0 : index
    %c0_2 = arith.constant 0 : index
    %1 = vector.load %arg1[%c0_1, %c0_2] : memref<32x32xf32, #tpu.memory_space<vmem>>, vector<32x32xf32>
    %c0_3 = arith.constant 0 : index
    %c0_4 = arith.constant 0 : index
    %2 = vector.load %arg2[%c0_3, %c0_4] : memref<46x46xf32, #tpu.memory_space<vmem>>, vector<46x46xf32>
    %c0_5 = arith.constant 0 : index
    %c0_6 = arith.constant 0 : index
    %3 = vector.load %arg3[%c0_5, %c0_6] : memref<32x32xf32, #tpu.memory_space<vmem>>, vector<32x32xf32>
    %c0_7 = arith.constant 0 : index
    %c0_8 = arith.constant 0 : index
    %4 = vector.load %arg4[%c0_7, %c0_8] : memref<64x192xf32, #tpu.memory_space<vmem>>, vector<64x192xf32>
    %cst = arith.constant dense<0.000000e+00> : vector<46x192xf32>
    %5 = tpu.matmul %0, %4, %cst {dimension_numbers = #tpu.dot_dimension_numbers<[1], [0], [0], [1], [0, 0, 1, 1], [], []>} : vector<46x64xf32>, vector<64x192xf32>, vector<46x192xf32> -> vector<46x192xf32>
    %c0_9 = arith.constant 0 : index
    %c0_10 = arith.constant 0 : index
    %6 = vector.load %arg5[%c0_9, %c0_10] : memref<1x192xf32, #tpu.memory_space<vmem>>, vector<1x192xf32>
    %7 = vector.broadcast %6 : vector<1x192xf32> to vector<46x192xf32>
    %8 = arith.addf %5, %7 : vector<46x192xf32>
    %9 = vector.extract_strided_slice %8 {offsets = [0, 0], sizes = [46, 16], strides = [1, 1]} : vector<46x192xf32> to vector<46x16xf32>
    %10 = vector.extract_strided_slice %8 {offsets = [0, 64], sizes = [46, 16], strides = [1, 1]} : vector<46x192xf32> to vector<46x16xf32>
    %11 = vector.extract_strided_slice %8 {offsets = [0, 128], sizes = [46, 16], strides = [1, 1]} : vector<46x192xf32> to vector<46x16xf32>
    %cst_11 = arith.constant dense<0.000000e+00> : vector<46x46xf32>
    %12 = tpu.matmul %9, %10, %cst_11 {dimension_numbers = #tpu.dot_dimension_numbers<[1], [1], [0], [0], [0, 0, 1, 0], [], []>} : vector<46x16xf32>, vector<46x16xf32>, vector<46x46xf32> -> vector<46x46xf32>
    %13 = arith.addf %12, %2 : vector<46x46xf32>
    %cst_12 = arith.constant dense<0xFF800000> : vector<46xf32>
    %14 = vector.multi_reduction <maximumf>, %13, %cst_12 [1] : vector<46x46xf32> to vector<46xf32>
    %15 = vector.shape_cast %14 : vector<46xf32> to vector<46x1xf32>
    %16 = vector.broadcast %15 : vector<46x1xf32> to vector<46x46xf32>
    %17 = arith.subf %13, %16 : vector<46x46xf32>
    %18 = math.exp %17 : vector<46x46xf32>
    %cst_13 = arith.constant dense<0.000000e+00> : vector<46xf32>
    %19 = vector.multi_reduction <add>, %18, %cst_13 [1] : vector<46x46xf32> to vector<46xf32>
    %20 = vector.shape_cast %19 : vector<46xf32> to vector<46x1xf32>
    %21 = tpu.reciprocal %20 {approx = true} : vector<46x1xf32> -> vector<46x1xf32>
    %cst_14 = arith.constant dense<0.000000e+00> : vector<46x16xf32>
    %22 = tpu.matmul %18, %11, %cst_14 {dimension_numbers = #tpu.dot_dimension_numbers<[1], [0], [0], [1], [0, 0, 1, 1], [], []>} : vector<46x46xf32>, vector<46x16xf32>, vector<46x16xf32> -> vector<46x16xf32>
    %23 = vector.broadcast %21 : vector<46x1xf32> to vector<46x16xf32>
    %24 = arith.mulf %22, %23 : vector<46x16xf32>
    %25 = vector.extract_strided_slice %8 {offsets = [0, 16], sizes = [46, 16], strides = [1, 1]} : vector<46x192xf32> to vector<46x16xf32>
    %26 = vector.extract_strided_slice %8 {offsets = [0, 80], sizes = [46, 16], strides = [1, 1]} : vector<46x192xf32> to vector<46x16xf32>
    %27 = vector.extract_strided_slice %8 {offsets = [0, 144], sizes = [46, 16], strides = [1, 1]} : vector<46x192xf32> to vector<46x16xf32>
    %cst_15 = arith.constant dense<0.000000e+00> : vector<46x46xf32>
    %28 = tpu.matmul %25, %26, %cst_15 {dimension_numbers = #tpu.dot_dimension_numbers<[1], [1], [0], [0], [0, 0, 1, 0], [], []>} : vector<46x16xf32>, vector<46x16xf32>, vector<46x46xf32> -> vector<46x46xf32>
    %29 = arith.addf %28, %2 : vector<46x46xf32>
    %cst_16 = arith.constant dense<0xFF800000> : vector<46xf32>
    %30 = vector.multi_reduction <maximumf>, %29, %cst_16 [1] : vector<46x46xf32> to vector<46xf32>
    %31 = vector.shape_cast %30 : vector<46xf32> to vector<46x1xf32>
    %32 = vector.broadcast %31 : vector<46x1xf32> to vector<46x46xf32>
    %33 = arith.subf %29, %32 : vector<46x46xf32>
    %34 = math.exp %33 : vector<46x46xf32>
    %cst_17 = arith.constant dense<0.000000e+00> : vector<46xf32>
    %35 = vector.multi_reduction <add>, %34, %cst_17 [1] : vector<46x46xf32> to vector<46xf32>
    %36 = vector.shape_cast %35 : vector<46xf32> to vector<46x1xf32>
    %37 = tpu.reciprocal %36 {approx = true} : vector<46x1xf32> -> vector<46x1xf32>
    %cst_18 = arith.constant dense<0.000000e+00> : vector<46x16xf32>
    %38 = tpu.matmul %34, %27, %cst_18 {dimension_numbers = #tpu.dot_dimension_numbers<[1], [0], [0], [1], [0, 0, 1, 1], [], []>} : vector<46x46xf32>, vector<46x16xf32>, vector<46x16xf32> -> vector<46x16xf32>
    %39 = vector.broadcast %37 : vector<46x1xf32> to vector<46x16xf32>
    %40 = arith.mulf %38, %39 : vector<46x16xf32>
    %41 = vector.extract_strided_slice %8 {offsets = [0, 32], sizes = [46, 16], strides = [1, 1]} : vector<46x192xf32> to vector<46x16xf32>
    %42 = vector.extract_strided_slice %8 {offsets = [0, 96], sizes = [46, 16], strides = [1, 1]} : vector<46x192xf32> to vector<46x16xf32>
    %43 = vector.extract_strided_slice %8 {offsets = [0, 160], sizes = [46, 16], strides = [1, 1]} : vector<46x192xf32> to vector<46x16xf32>
    %cst_19 = arith.constant dense<0.000000e+00> : vector<46x46xf32>
    %44 = tpu.matmul %41, %42, %cst_19 {dimension_numbers = #tpu.dot_dimension_numbers<[1], [1], [0], [0], [0, 0, 1, 0], [], []>} : vector<46x16xf32>, vector<46x16xf32>, vector<46x46xf32> -> vector<46x46xf32>
    %45 = arith.addf %44, %2 : vector<46x46xf32>
    %cst_20 = arith.constant dense<0xFF800000> : vector<46xf32>
    %46 = vector.multi_reduction <maximumf>, %45, %cst_20 [1] : vector<46x46xf32> to vector<46xf32>
    %47 = vector.shape_cast %46 : vector<46xf32> to vector<46x1xf32>
    %48 = vector.broadcast %47 : vector<46x1xf32> to vector<46x46xf32>
    %49 = arith.subf %45, %48 : vector<46x46xf32>
    %50 = math.exp %49 : vector<46x46xf32>
    %cst_21 = arith.constant dense<0.000000e+00> : vector<46xf32>
    %51 = vector.multi_reduction <add>, %50, %cst_21 [1] : vector<46x46xf32> to vector<46xf32>
    %52 = vector.shape_cast %51 : vector<46xf32> to vector<46x1xf32>
    %53 = tpu.reciprocal %52 {approx = true} : vector<46x1xf32> -> vector<46x1xf32>
    %cst_22 = arith.constant dense<0.000000e+00> : vector<46x16xf32>
    %54 = tpu.matmul %50, %43, %cst_22 {dimension_numbers = #tpu.dot_dimension_numbers<[1], [0], [0], [1], [0, 0, 1, 1], [], []>} : vector<46x46xf32>, vector<46x16xf32>, vector<46x16xf32> -> vector<46x16xf32>
    %55 = vector.broadcast %53 : vector<46x1xf32> to vector<46x16xf32>
    %56 = arith.mulf %54, %55 : vector<46x16xf32>
    %57 = vector.extract_strided_slice %8 {offsets = [0, 48], sizes = [46, 16], strides = [1, 1]} : vector<46x192xf32> to vector<46x16xf32>
    %58 = vector.extract_strided_slice %8 {offsets = [0, 112], sizes = [46, 16], strides = [1, 1]} : vector<46x192xf32> to vector<46x16xf32>
    %59 = vector.extract_strided_slice %8 {offsets = [0, 176], sizes = [46, 16], strides = [1, 1]} : vector<46x192xf32> to vector<46x16xf32>
    %cst_23 = arith.constant dense<0.000000e+00> : vector<46x46xf32>
    %60 = tpu.matmul %57, %58, %cst_23 {dimension_numbers = #tpu.dot_dimension_numbers<[1], [1], [0], [0], [0, 0, 1, 0], [], []>} : vector<46x16xf32>, vector<46x16xf32>, vector<46x46xf32> -> vector<46x46xf32>
    %61 = arith.addf %60, %2 : vector<46x46xf32>
    %cst_24 = arith.constant dense<0xFF800000> : vector<46xf32>
    %62 = vector.multi_reduction <maximumf>, %61, %cst_24 [1] : vector<46x46xf32> to vector<46xf32>
    %63 = vector.shape_cast %62 : vector<46xf32> to vector<46x1xf32>
    %64 = vector.broadcast %63 : vector<46x1xf32> to vector<46x46xf32>
    %65 = arith.subf %61, %64 : vector<46x46xf32>
    %66 = math.exp %65 : vector<46x46xf32>
    %cst_25 = arith.constant dense<0.000000e+00> : vector<46xf32>
    %67 = vector.multi_reduction <add>, %66, %cst_25 [1] : vector<46x46xf32> to vector<46xf32>
    %68 = vector.shape_cast %67 : vector<46xf32> to vector<46x1xf32>
    %69 = tpu.reciprocal %68 {approx = true} : vector<46x1xf32> -> vector<46x1xf32>
    %cst_26 = arith.constant dense<0.000000e+00> : vector<46x16xf32>
    %70 = tpu.matmul %66, %59, %cst_26 {dimension_numbers = #tpu.dot_dimension_numbers<[1], [0], [0], [1], [0, 0, 1, 1], [], []>} : vector<46x46xf32>, vector<46x16xf32>, vector<46x16xf32> -> vector<46x16xf32>
    %71 = vector.broadcast %69 : vector<46x1xf32> to vector<46x16xf32>
    %72 = arith.mulf %70, %71 : vector<46x16xf32>
    %73 = tpu.concatenate %24, %40, %56, %72 in 1 : vector<46x16xf32>, vector<46x16xf32>, vector<46x16xf32>, vector<46x16xf32> -> vector<46x64xf32>
    %c0_27 = arith.constant 0 : index
    %c0_28 = arith.constant 0 : index
    %74 = vector.load %arg6[%c0_27, %c0_28] : memref<64x64xf32, #tpu.memory_space<vmem>>, vector<64x64xf32>
    %cst_29 = arith.constant dense<0.000000e+00> : vector<46x64xf32>
    %75 = tpu.matmul %73, %74, %cst_29 {dimension_numbers = #tpu.dot_dimension_numbers<[1], [0], [0], [1], [0, 0, 1, 1], [], []>} : vector<46x64xf32>, vector<64x64xf32>, vector<46x64xf32> -> vector<46x64xf32>
    %76 = arith.addf %0, %75 : vector<46x64xf32>
    %c0_30 = arith.constant 0 : index
    %c0_31 = arith.constant 0 : index
    %77 = vector.load %arg7[%c0_30, %c0_31] : memref<1x64xf32, #tpu.memory_space<vmem>>, vector<1x64xf32>
    %78 = vector.broadcast %77 : vector<1x64xf32> to vector<46x64xf32>
    %79 = arith.addf %76, %78 : vector<46x64xf32>
    %cst_32 = arith.constant dense<0.000000e+00> : vector<46xf32>
    %80 = vector.multi_reduction <add>, %79, %cst_32 [1] : vector<46x64xf32> to vector<46xf32>
    %81 = vector.shape_cast %80 : vector<46xf32> to vector<46x1xf32>
    %cst_33 = arith.constant 6.400000e+01 : f32
    %82 = vector.broadcast %cst_33 : f32 to vector<46x1xf32>
    %83 = arith.divf %81, %82 : vector<46x1xf32>
    %84 = vector.broadcast %83 : vector<46x1xf32> to vector<46x64xf32>
    %85 = arith.subf %79, %84 : vector<46x64xf32>
    %86 = arith.mulf %85, %85 : vector<46x64xf32>
    %cst_34 = arith.constant dense<0.000000e+00> : vector<46xf32>
    %87 = vector.multi_reduction <add>, %86, %cst_34 [1] : vector<46x64xf32> to vector<46xf32>
    %88 = vector.shape_cast %87 : vector<46xf32> to vector<46x1xf32>
    %cst_35 = arith.constant 6.400000e+01 : f32
    %89 = vector.broadcast %cst_35 : f32 to vector<46x1xf32>
    %90 = arith.divf %88, %89 : vector<46x1xf32>
    %cst_36 = arith.constant 9.99999974E-6 : f32
    %91 = vector.broadcast %cst_36 : f32 to vector<46x1xf32>
    %92 = arith.addf %90, %91 : vector<46x1xf32>
    %93 = math.rsqrt %92 : vector<46x1xf32>
    %94 = vector.broadcast %93 : vector<46x1xf32> to vector<46x64xf32>
    %95 = arith.mulf %85, %94 : vector<46x64xf32>
    %c0_37 = arith.constant 0 : index
    %c0_38 = arith.constant 0 : index
    %96 = vector.load %arg8[%c0_37, %c0_38] : memref<1x64xf32, #tpu.memory_space<vmem>>, vector<1x64xf32>
    %97 = vector.broadcast %96 : vector<1x64xf32> to vector<46x64xf32>
    %98 = arith.mulf %95, %97 : vector<46x64xf32>
    %c0_39 = arith.constant 0 : index
    %c0_40 = arith.constant 0 : index
    %99 = vector.load %arg9[%c0_39, %c0_40] : memref<1x64xf32, #tpu.memory_space<vmem>>, vector<1x64xf32>
    %100 = vector.broadcast %99 : vector<1x64xf32> to vector<46x64xf32>
    %101 = arith.addf %98, %100 : vector<46x64xf32>
    %c0_41 = arith.constant 0 : index
    %c0_42 = arith.constant 0 : index
    %102 = vector.load %arg10[%c0_41, %c0_42] : memref<64x128xf32, #tpu.memory_space<vmem>>, vector<64x128xf32>
    %cst_43 = arith.constant dense<0.000000e+00> : vector<46x128xf32>
    %103 = tpu.matmul %101, %102, %cst_43 {dimension_numbers = #tpu.dot_dimension_numbers<[1], [0], [0], [1], [0, 0, 1, 1], [], []>} : vector<46x64xf32>, vector<64x128xf32>, vector<46x128xf32> -> vector<46x128xf32>
    %c0_44 = arith.constant 0 : index
    %c0_45 = arith.constant 0 : index
    %104 = vector.load %arg11[%c0_44, %c0_45] : memref<1x128xf32, #tpu.memory_space<vmem>>, vector<1x128xf32>
    %105 = vector.broadcast %104 : vector<1x128xf32> to vector<46x128xf32>
    %106 = arith.addf %103, %105 : vector<46x128xf32>
    %cst_46 = arith.constant 0.000000e+00 : f32
    %107 = vector.broadcast %cst_46 : f32 to vector<46x128xf32>
    %108 = arith.maximumf %106, %107 : vector<46x128xf32>
    %c0_47 = arith.constant 0 : index
    %c0_48 = arith.constant 0 : index
    %109 = vector.load %arg12[%c0_47, %c0_48] : memref<128x64xf32, #tpu.memory_space<vmem>>, vector<128x64xf32>
    %cst_49 = arith.constant dense<0.000000e+00> : vector<46x64xf32>
    %110 = tpu.matmul %108, %109, %cst_49 {dimension_numbers = #tpu.dot_dimension_numbers<[1], [0], [0], [1], [0, 0, 1, 1], [], []>} : vector<46x128xf32>, vector<128x64xf32>, vector<46x64xf32> -> vector<46x64xf32>
    %111 = arith.addf %101, %110 : vector<46x64xf32>
    %c0_50 = arith.constant 0 : index
    %c0_51 = arith.constant 0 : index
    %112 = vector.load %arg13[%c0_50, %c0_51] : memref<1x64xf32, #tpu.memory_space<vmem>>, vector<1x64xf32>
    %113 = vector.broadcast %112 : vector<1x64xf32> to vector<46x64xf32>
    %114 = arith.addf %111, %113 : vector<46x64xf32>
    %cst_52 = arith.constant dense<0.000000e+00> : vector<46xf32>
    %115 = vector.multi_reduction <add>, %114, %cst_52 [1] : vector<46x64xf32> to vector<46xf32>
    %116 = vector.shape_cast %115 : vector<46xf32> to vector<46x1xf32>
    %cst_53 = arith.constant 6.400000e+01 : f32
    %117 = vector.broadcast %cst_53 : f32 to vector<46x1xf32>
    %118 = arith.divf %116, %117 : vector<46x1xf32>
    %119 = vector.broadcast %118 : vector<46x1xf32> to vector<46x64xf32>
    %120 = arith.subf %114, %119 : vector<46x64xf32>
    %121 = arith.mulf %120, %120 : vector<46x64xf32>
    %cst_54 = arith.constant dense<0.000000e+00> : vector<46xf32>
    %122 = vector.multi_reduction <add>, %121, %cst_54 [1] : vector<46x64xf32> to vector<46xf32>
    %123 = vector.shape_cast %122 : vector<46xf32> to vector<46x1xf32>
    %cst_55 = arith.constant 6.400000e+01 : f32
    %124 = vector.broadcast %cst_55 : f32 to vector<46x1xf32>
    %125 = arith.divf %123, %124 : vector<46x1xf32>
    %cst_56 = arith.constant 9.99999974E-6 : f32
    %126 = vector.broadcast %cst_56 : f32 to vector<46x1xf32>
    %127 = arith.addf %125, %126 : vector<46x1xf32>
    %128 = math.rsqrt %127 : vector<46x1xf32>
    %129 = vector.broadcast %128 : vector<46x1xf32> to vector<46x64xf32>
    %130 = arith.mulf %120, %129 : vector<46x64xf32>
    %c0_57 = arith.constant 0 : index
    %c0_58 = arith.constant 0 : index
    %131 = vector.load %arg14[%c0_57, %c0_58] : memref<1x64xf32, #tpu.memory_space<vmem>>, vector<1x64xf32>
    %132 = vector.broadcast %131 : vector<1x64xf32> to vector<46x64xf32>
    %133 = arith.mulf %130, %132 : vector<46x64xf32>
    %c0_59 = arith.constant 0 : index
    %c0_60 = arith.constant 0 : index
    %134 = vector.load %arg15[%c0_59, %c0_60] : memref<1x64xf32, #tpu.memory_space<vmem>>, vector<1x64xf32>
    %135 = vector.broadcast %134 : vector<1x64xf32> to vector<46x64xf32>
    %136 = arith.addf %133, %135 : vector<46x64xf32>
    %c0_61 = arith.constant 0 : index
    %c0_62 = arith.constant 0 : index
    %137 = vector.load %arg16[%c0_61, %c0_62] : memref<32x96xf32, #tpu.memory_space<vmem>>, vector<32x96xf32>
    %cst_63 = arith.constant dense<0.000000e+00> : vector<32x96xf32>
    %138 = tpu.matmul %1, %137, %cst_63 {dimension_numbers = #tpu.dot_dimension_numbers<[1], [0], [0], [1], [0, 0, 1, 1], [], []>} : vector<32x32xf32>, vector<32x96xf32>, vector<32x96xf32> -> vector<32x96xf32>
    %c0_64 = arith.constant 0 : index
    %c0_65 = arith.constant 0 : index
    %139 = vector.load %arg17[%c0_64, %c0_65] : memref<1x96xf32, #tpu.memory_space<vmem>>, vector<1x96xf32>
    %140 = vector.broadcast %139 : vector<1x96xf32> to vector<32x96xf32>
    %141 = arith.addf %138, %140 : vector<32x96xf32>
    %142 = vector.extract_strided_slice %141 {offsets = [0, 0], sizes = [32, 8], strides = [1, 1]} : vector<32x96xf32> to vector<32x8xf32>
    %143 = vector.extract_strided_slice %141 {offsets = [0, 32], sizes = [32, 8], strides = [1, 1]} : vector<32x96xf32> to vector<32x8xf32>
    %144 = vector.extract_strided_slice %141 {offsets = [0, 64], sizes = [32, 8], strides = [1, 1]} : vector<32x96xf32> to vector<32x8xf32>
    %cst_66 = arith.constant dense<0.000000e+00> : vector<32x32xf32>
    %145 = tpu.matmul %142, %143, %cst_66 {dimension_numbers = #tpu.dot_dimension_numbers<[1], [1], [0], [0], [0, 0, 1, 0], [], []>} : vector<32x8xf32>, vector<32x8xf32>, vector<32x32xf32> -> vector<32x32xf32>
    %146 = arith.addf %145, %3 : vector<32x32xf32>
    %cst_67 = arith.constant dense<0xFF800000> : vector<32xf32>
    %147 = vector.multi_reduction <maximumf>, %146, %cst_67 [1] : vector<32x32xf32> to vector<32xf32>
    %148 = vector.shape_cast %147 : vector<32xf32> to vector<32x1xf32>
    %149 = vector.broadcast %148 : vector<32x1xf32> to vector<32x32xf32>
    %150 = arith.subf %146, %149 : vector<32x32xf32>
    %151 = math.exp %150 : vector<32x32xf32>
    %cst_68 = arith.constant dense<0.000000e+00> : vector<32xf32>
    %152 = vector.multi_reduction <add>, %151, %cst_68 [1] : vector<32x32xf32> to vector<32xf32>
    %153 = vector.shape_cast %152 : vector<32xf32> to vector<32x1xf32>
    %154 = tpu.reciprocal %153 {approx = true} : vector<32x1xf32> -> vector<32x1xf32>
    %cst_69 = arith.constant dense<0.000000e+00> : vector<32x8xf32>
    %155 = tpu.matmul %151, %144, %cst_69 {dimension_numbers = #tpu.dot_dimension_numbers<[1], [0], [0], [1], [0, 0, 1, 1], [], []>} : vector<32x32xf32>, vector<32x8xf32>, vector<32x8xf32> -> vector<32x8xf32>
    %156 = vector.broadcast %154 : vector<32x1xf32> to vector<32x8xf32>
    %157 = arith.mulf %155, %156 : vector<32x8xf32>
    %158 = vector.extract_strided_slice %141 {offsets = [0, 8], sizes = [32, 8], strides = [1, 1]} : vector<32x96xf32> to vector<32x8xf32>
    %159 = vector.extract_strided_slice %141 {offsets = [0, 40], sizes = [32, 8], strides = [1, 1]} : vector<32x96xf32> to vector<32x8xf32>
    %160 = vector.extract_strided_slice %141 {offsets = [0, 72], sizes = [32, 8], strides = [1, 1]} : vector<32x96xf32> to vector<32x8xf32>
    %cst_70 = arith.constant dense<0.000000e+00> : vector<32x32xf32>
    %161 = tpu.matmul %158, %159, %cst_70 {dimension_numbers = #tpu.dot_dimension_numbers<[1], [1], [0], [0], [0, 0, 1, 0], [], []>} : vector<32x8xf32>, vector<32x8xf32>, vector<32x32xf32> -> vector<32x32xf32>
    %162 = arith.addf %161, %3 : vector<32x32xf32>
    %cst_71 = arith.constant dense<0xFF800000> : vector<32xf32>
    %163 = vector.multi_reduction <maximumf>, %162, %cst_71 [1] : vector<32x32xf32> to vector<32xf32>
    %164 = vector.shape_cast %163 : vector<32xf32> to vector<32x1xf32>
    %165 = vector.broadcast %164 : vector<32x1xf32> to vector<32x32xf32>
    %166 = arith.subf %162, %165 : vector<32x32xf32>
    %167 = math.exp %166 : vector<32x32xf32>
    %cst_72 = arith.constant dense<0.000000e+00> : vector<32xf32>
    %168 = vector.multi_reduction <add>, %167, %cst_72 [1] : vector<32x32xf32> to vector<32xf32>
    %169 = vector.shape_cast %168 : vector<32xf32> to vector<32x1xf32>
    %170 = tpu.reciprocal %169 {approx = true} : vector<32x1xf32> -> vector<32x1xf32>
    %cst_73 = arith.constant dense<0.000000e+00> : vector<32x8xf32>
    %171 = tpu.matmul %167, %160, %cst_73 {dimension_numbers = #tpu.dot_dimension_numbers<[1], [0], [0], [1], [0, 0, 1, 1], [], []>} : vector<32x32xf32>, vector<32x8xf32>, vector<32x8xf32> -> vector<32x8xf32>
    %172 = vector.broadcast %170 : vector<32x1xf32> to vector<32x8xf32>
    %173 = arith.mulf %171, %172 : vector<32x8xf32>
    %174 = vector.extract_strided_slice %141 {offsets = [0, 16], sizes = [32, 8], strides = [1, 1]} : vector<32x96xf32> to vector<32x8xf32>
    %175 = vector.extract_strided_slice %141 {offsets = [0, 48], sizes = [32, 8], strides = [1, 1]} : vector<32x96xf32> to vector<32x8xf32>
    %176 = vector.extract_strided_slice %141 {offsets = [0, 80], sizes = [32, 8], strides = [1, 1]} : vector<32x96xf32> to vector<32x8xf32>
    %cst_74 = arith.constant dense<0.000000e+00> : vector<32x32xf32>
    %177 = tpu.matmul %174, %175, %cst_74 {dimension_numbers = #tpu.dot_dimension_numbers<[1], [1], [0], [0], [0, 0, 1, 0], [], []>} : vector<32x8xf32>, vector<32x8xf32>, vector<32x32xf32> -> vector<32x32xf32>
    %178 = arith.addf %177, %3 : vector<32x32xf32>
    %cst_75 = arith.constant dense<0xFF800000> : vector<32xf32>
    %179 = vector.multi_reduction <maximumf>, %178, %cst_75 [1] : vector<32x32xf32> to vector<32xf32>
    %180 = vector.shape_cast %179 : vector<32xf32> to vector<32x1xf32>
    %181 = vector.broadcast %180 : vector<32x1xf32> to vector<32x32xf32>
    %182 = arith.subf %178, %181 : vector<32x32xf32>
    %183 = math.exp %182 : vector<32x32xf32>
    %cst_76 = arith.constant dense<0.000000e+00> : vector<32xf32>
    %184 = vector.multi_reduction <add>, %183, %cst_76 [1] : vector<32x32xf32> to vector<32xf32>
    %185 = vector.shape_cast %184 : vector<32xf32> to vector<32x1xf32>
    %186 = tpu.reciprocal %185 {approx = true} : vector<32x1xf32> -> vector<32x1xf32>
    %cst_77 = arith.constant dense<0.000000e+00> : vector<32x8xf32>
    %187 = tpu.matmul %183, %176, %cst_77 {dimension_numbers = #tpu.dot_dimension_numbers<[1], [0], [0], [1], [0, 0, 1, 1], [], []>} : vector<32x32xf32>, vector<32x8xf32>, vector<32x8xf32> -> vector<32x8xf32>
    %188 = vector.broadcast %186 : vector<32x1xf32> to vector<32x8xf32>
    %189 = arith.mulf %187, %188 : vector<32x8xf32>
    %190 = vector.extract_strided_slice %141 {offsets = [0, 24], sizes = [32, 8], strides = [1, 1]} : vector<32x96xf32> to vector<32x8xf32>
    %191 = vector.extract_strided_slice %141 {offsets = [0, 56], sizes = [32, 8], strides = [1, 1]} : vector<32x96xf32> to vector<32x8xf32>
    %192 = vector.extract_strided_slice %141 {offsets = [0, 88], sizes = [32, 8], strides = [1, 1]} : vector<32x96xf32> to vector<32x8xf32>
    %cst_78 = arith.constant dense<0.000000e+00> : vector<32x32xf32>
    %193 = tpu.matmul %190, %191, %cst_78 {dimension_numbers = #tpu.dot_dimension_numbers<[1], [1], [0], [0], [0, 0, 1, 0], [], []>} : vector<32x8xf32>, vector<32x8xf32>, vector<32x32xf32> -> vector<32x32xf32>
    %194 = arith.addf %193, %3 : vector<32x32xf32>
    %cst_79 = arith.constant dense<0xFF800000> : vector<32xf32>
    %195 = vector.multi_reduction <maximumf>, %194, %cst_79 [1] : vector<32x32xf32> to vector<32xf32>
    %196 = vector.shape_cast %195 : vector<32xf32> to vector<32x1xf32>
    %197 = vector.broadcast %196 : vector<32x1xf32> to vector<32x32xf32>
    %198 = arith.subf %194, %197 : vector<32x32xf32>
    %199 = math.exp %198 : vector<32x32xf32>
    %cst_80 = arith.constant dense<0.000000e+00> : vector<32xf32>
    %200 = vector.multi_reduction <add>, %199, %cst_80 [1] : vector<32x32xf32> to vector<32xf32>
    %201 = vector.shape_cast %200 : vector<32xf32> to vector<32x1xf32>
    %202 = tpu.reciprocal %201 {approx = true} : vector<32x1xf32> -> vector<32x1xf32>
    %cst_81 = arith.constant dense<0.000000e+00> : vector<32x8xf32>
    %203 = tpu.matmul %199, %192, %cst_81 {dimension_numbers = #tpu.dot_dimension_numbers<[1], [0], [0], [1], [0, 0, 1, 1], [], []>} : vector<32x32xf32>, vector<32x8xf32>, vector<32x8xf32> -> vector<32x8xf32>
    %204 = vector.broadcast %202 : vector<32x1xf32> to vector<32x8xf32>
    %205 = arith.mulf %203, %204 : vector<32x8xf32>
    %206 = tpu.concatenate %157, %173, %189, %205 in 1 : vector<32x8xf32>, vector<32x8xf32>, vector<32x8xf32>, vector<32x8xf32> -> vector<32x32xf32>
    %c0_82 = arith.constant 0 : index
    %c0_83 = arith.constant 0 : index
    %207 = vector.load %arg18[%c0_82, %c0_83] : memref<32x32xf32, #tpu.memory_space<vmem>>, vector<32x32xf32>
    %cst_84 = arith.constant dense<0.000000e+00> : vector<32x32xf32>
    %208 = tpu.matmul %206, %207, %cst_84 {dimension_numbers = #tpu.dot_dimension_numbers<[1], [0], [0], [1], [0, 0, 1, 1], [], []>} : vector<32x32xf32>, vector<32x32xf32>, vector<32x32xf32> -> vector<32x32xf32>
    %209 = arith.addf %1, %208 : vector<32x32xf32>
    %c0_85 = arith.constant 0 : index
    %c0_86 = arith.constant 0 : index
    %210 = vector.load %arg19[%c0_85, %c0_86] : memref<1x32xf32, #tpu.memory_space<vmem>>, vector<1x32xf32>
    %211 = vector.broadcast %210 : vector<1x32xf32> to vector<32x32xf32>
    %212 = arith.addf %209, %211 : vector<32x32xf32>
    %cst_87 = arith.constant dense<0.000000e+00> : vector<32xf32>
    %213 = vector.multi_reduction <add>, %212, %cst_87 [1] : vector<32x32xf32> to vector<32xf32>
    %214 = vector.shape_cast %213 : vector<32xf32> to vector<32x1xf32>
    %cst_88 = arith.constant 3.200000e+01 : f32
    %215 = vector.broadcast %cst_88 : f32 to vector<32x1xf32>
    %216 = arith.divf %214, %215 : vector<32x1xf32>
    %217 = vector.broadcast %216 : vector<32x1xf32> to vector<32x32xf32>
    %218 = arith.subf %212, %217 : vector<32x32xf32>
    %219 = arith.mulf %218, %218 : vector<32x32xf32>
    %cst_89 = arith.constant dense<0.000000e+00> : vector<32xf32>
    %220 = vector.multi_reduction <add>, %219, %cst_89 [1] : vector<32x32xf32> to vector<32xf32>
    %221 = vector.shape_cast %220 : vector<32xf32> to vector<32x1xf32>
    %cst_90 = arith.constant 3.200000e+01 : f32
    %222 = vector.broadcast %cst_90 : f32 to vector<32x1xf32>
    %223 = arith.divf %221, %222 : vector<32x1xf32>
    %cst_91 = arith.constant 9.99999974E-6 : f32
    %224 = vector.broadcast %cst_91 : f32 to vector<32x1xf32>
    %225 = arith.addf %223, %224 : vector<32x1xf32>
    %226 = math.rsqrt %225 : vector<32x1xf32>
    %227 = vector.broadcast %226 : vector<32x1xf32> to vector<32x32xf32>
    %228 = arith.mulf %218, %227 : vector<32x32xf32>
    %c0_92 = arith.constant 0 : index
    %c0_93 = arith.constant 0 : index
    %229 = vector.load %arg20[%c0_92, %c0_93] : memref<1x32xf32, #tpu.memory_space<vmem>>, vector<1x32xf32>
    %230 = vector.broadcast %229 : vector<1x32xf32> to vector<32x32xf32>
    %231 = arith.mulf %228, %230 : vector<32x32xf32>
    %c0_94 = arith.constant 0 : index
    %c0_95 = arith.constant 0 : index
    %232 = vector.load %arg21[%c0_94, %c0_95] : memref<1x32xf32, #tpu.memory_space<vmem>>, vector<1x32xf32>
    %233 = vector.broadcast %232 : vector<1x32xf32> to vector<32x32xf32>
    %234 = arith.addf %231, %233 : vector<32x32xf32>
    %c0_96 = arith.constant 0 : index
    %c0_97 = arith.constant 0 : index
    %235 = vector.load %arg22[%c0_96, %c0_97] : memref<32x64xf32, #tpu.memory_space<vmem>>, vector<32x64xf32>
    %cst_98 = arith.constant dense<0.000000e+00> : vector<32x64xf32>
    %236 = tpu.matmul %234, %235, %cst_98 {dimension_numbers = #tpu.dot_dimension_numbers<[1], [0], [0], [1], [0, 0, 1, 1], [], []>} : vector<32x32xf32>, vector<32x64xf32>, vector<32x64xf32> -> vector<32x64xf32>
    %c0_99 = arith.constant 0 : index
    %c0_100 = arith.constant 0 : index
    %237 = vector.load %arg23[%c0_99, %c0_100] : memref<1x64xf32, #tpu.memory_space<vmem>>, vector<1x64xf32>
    %238 = vector.broadcast %237 : vector<1x64xf32> to vector<32x64xf32>
    %239 = arith.addf %236, %238 : vector<32x64xf32>
    %cst_101 = arith.constant 0.000000e+00 : f32
    %240 = vector.broadcast %cst_101 : f32 to vector<32x64xf32>
    %241 = arith.maximumf %239, %240 : vector<32x64xf32>
    %c0_102 = arith.constant 0 : index
    %c0_103 = arith.constant 0 : index
    %242 = vector.load %arg24[%c0_102, %c0_103] : memref<64x32xf32, #tpu.memory_space<vmem>>, vector<64x32xf32>
    %cst_104 = arith.constant dense<0.000000e+00> : vector<32x32xf32>
    %243 = tpu.matmul %241, %242, %cst_104 {dimension_numbers = #tpu.dot_dimension_numbers<[1], [0], [0], [1], [0, 0, 1, 1], [], []>} : vector<32x64xf32>, vector<64x32xf32>, vector<32x32xf32> -> vector<32x32xf32>
    %244 = arith.addf %234, %243 : vector<32x32xf32>
    %c0_105 = arith.constant 0 : index
    %c0_106 = arith.constant 0 : index
    %245 = vector.load %arg25[%c0_105, %c0_106] : memref<1x32xf32, #tpu.memory_space<vmem>>, vector<1x32xf32>
    %246 = vector.broadcast %245 : vector<1x32xf32> to vector<32x32xf32>
    %247 = arith.addf %244, %246 : vector<32x32xf32>
    %cst_107 = arith.constant dense<0.000000e+00> : vector<32xf32>
    %248 = vector.multi_reduction <add>, %247, %cst_107 [1] : vector<32x32xf32> to vector<32xf32>
    %249 = vector.shape_cast %248 : vector<32xf32> to vector<32x1xf32>
    %cst_108 = arith.constant 3.200000e+01 : f32
    %250 = vector.broadcast %cst_108 : f32 to vector<32x1xf32>
    %251 = arith.divf %249, %250 : vector<32x1xf32>
    %252 = vector.broadcast %251 : vector<32x1xf32> to vector<32x32xf32>
    %253 = arith.subf %247, %252 : vector<32x32xf32>
    %254 = arith.mulf %253, %253 : vector<32x32xf32>
    %cst_109 = arith.constant dense<0.000000e+00> : vector<32xf32>
    %255 = vector.multi_reduction <add>, %254, %cst_109 [1] : vector<32x32xf32> to vector<32xf32>
    %256 = vector.shape_cast %255 : vector<32xf32> to vector<32x1xf32>
    %cst_110 = arith.constant 3.200000e+01 : f32
    %257 = vector.broadcast %cst_110 : f32 to vector<32x1xf32>
    %258 = arith.divf %256, %257 : vector<32x1xf32>
    %cst_111 = arith.constant 9.99999974E-6 : f32
    %259 = vector.broadcast %cst_111 : f32 to vector<32x1xf32>
    %260 = arith.addf %258, %259 : vector<32x1xf32>
    %261 = math.rsqrt %260 : vector<32x1xf32>
    %262 = vector.broadcast %261 : vector<32x1xf32> to vector<32x32xf32>
    %263 = arith.mulf %253, %262 : vector<32x32xf32>
    %c0_112 = arith.constant 0 : index
    %c0_113 = arith.constant 0 : index
    %264 = vector.load %arg26[%c0_112, %c0_113] : memref<1x32xf32, #tpu.memory_space<vmem>>, vector<1x32xf32>
    %265 = vector.broadcast %264 : vector<1x32xf32> to vector<32x32xf32>
    %266 = arith.mulf %263, %265 : vector<32x32xf32>
    %c0_114 = arith.constant 0 : index
    %c0_115 = arith.constant 0 : index
    %267 = vector.load %arg27[%c0_114, %c0_115] : memref<1x32xf32, #tpu.memory_space<vmem>>, vector<1x32xf32>
    %268 = vector.broadcast %267 : vector<1x32xf32> to vector<32x32xf32>
    %269 = arith.addf %266, %268 : vector<32x32xf32>
    %c0_116 = arith.constant 0 : index
    %c0_117 = arith.constant 0 : index
    %270 = vector.load %arg32[%c0_116, %c0_117] : memref<46x32xf32, #tpu.memory_space<vmem>>, vector<46x32xf32>
    %cst_118 = arith.constant dense<0.000000e+00> : vector<46x32xf32>
    %271 = tpu.matmul %270, %269, %cst_118 {dimension_numbers = #tpu.dot_dimension_numbers<[1], [0], [0], [1], [0, 0, 1, 1], [], []>} : vector<46x32xf32>, vector<32x32xf32>, vector<46x32xf32> -> vector<46x32xf32>
    %c0_119 = arith.constant 0 : index
    %c0_120 = arith.constant 0 : index
    %272 = vector.load %arg33[%c0_119, %c0_120] : memref<64x64xf32, #tpu.memory_space<vmem>>, vector<64x64xf32>
    %cst_121 = arith.constant dense<0.000000e+00> : vector<46x64xf32>
    %273 = tpu.matmul %136, %272, %cst_121 {dimension_numbers = #tpu.dot_dimension_numbers<[1], [0], [0], [1], [0, 0, 1, 1], [], []>} : vector<46x64xf32>, vector<64x64xf32>, vector<46x64xf32> -> vector<46x64xf32>
    %c0_122 = arith.constant 0 : index
    %c0_123 = arith.constant 0 : index
    %274 = vector.load %arg34[%c0_122, %c0_123] : memref<32x64xf32, #tpu.memory_space<vmem>>, vector<32x64xf32>
    %cst_124 = arith.constant dense<0.000000e+00> : vector<46x64xf32>
    %275 = tpu.matmul %271, %274, %cst_124 {dimension_numbers = #tpu.dot_dimension_numbers<[1], [0], [0], [1], [0, 0, 1, 1], [], []>} : vector<46x32xf32>, vector<32x64xf32>, vector<46x64xf32> -> vector<46x64xf32>
    %276 = arith.addf %273, %275 : vector<46x64xf32>
    %c0_125 = arith.constant 0 : index
    %c0_126 = arith.constant 0 : index
    %277 = vector.load %arg35[%c0_125, %c0_126] : memref<1x64xf32, #tpu.memory_space<vmem>>, vector<1x64xf32>
    %278 = vector.broadcast %277 : vector<1x64xf32> to vector<46x64xf32>
    %279 = arith.addf %276, %278 : vector<46x64xf32>
    %cst_127 = arith.constant dense<0.000000e+00> : vector<64xf32>
    %280 = vector.multi_reduction <add>, %279, %cst_127 [0] : vector<46x64xf32> to vector<64xf32>
    %281 = vector.shape_cast %280 : vector<64xf32> to vector<1x64xf32>
    %cst_128 = arith.constant 4.600000e+01 : f32
    %282 = vector.broadcast %cst_128 : f32 to vector<1x64xf32>
    %283 = arith.divf %281, %282 : vector<1x64xf32>
    %284 = vector.broadcast %283 : vector<1x64xf32> to vector<46x64xf32>
    %285 = arith.subf %279, %284 : vector<46x64xf32>
    %286 = arith.mulf %285, %285 : vector<46x64xf32>
    %cst_129 = arith.constant dense<0.000000e+00> : vector<64xf32>
    %287 = vector.multi_reduction <add>, %286, %cst_129 [0] : vector<46x64xf32> to vector<64xf32>
    %288 = vector.shape_cast %287 : vector<64xf32> to vector<1x64xf32>
    %cst_130 = arith.constant 4.600000e+01 : f32
    %289 = vector.broadcast %cst_130 : f32 to vector<1x64xf32>
    %290 = arith.divf %288, %289 : vector<1x64xf32>
    %cst_131 = arith.constant 9.99999974E-6 : f32
    %291 = vector.broadcast %cst_131 : f32 to vector<1x64xf32>
    %292 = arith.addf %290, %291 : vector<1x64xf32>
    %293 = math.rsqrt %292 : vector<1x64xf32>
    %294 = vector.broadcast %293 : vector<1x64xf32> to vector<46x64xf32>
    %295 = arith.mulf %285, %294 : vector<46x64xf32>
    %c0_132 = arith.constant 0 : index
    %c0_133 = arith.constant 0 : index
    %296 = vector.load %arg36[%c0_132, %c0_133] : memref<1x64xf32, #tpu.memory_space<vmem>>, vector<1x64xf32>
    %297 = vector.broadcast %296 : vector<1x64xf32> to vector<46x64xf32>
    %298 = arith.mulf %295, %297 : vector<46x64xf32>
    %c0_134 = arith.constant 0 : index
    %c0_135 = arith.constant 0 : index
    %299 = vector.load %arg37[%c0_134, %c0_135] : memref<1x64xf32, #tpu.memory_space<vmem>>, vector<1x64xf32>
    %300 = vector.broadcast %299 : vector<1x64xf32> to vector<46x64xf32>
    %301 = arith.addf %298, %300 : vector<46x64xf32>
    %cst_136 = arith.constant 0.000000e+00 : f32
    %302 = vector.broadcast %cst_136 : f32 to vector<46x64xf32>
    %303 = arith.maximumf %301, %302 : vector<46x64xf32>
    %c0_137 = arith.constant 0 : index
    %c0_138 = arith.constant 0 : index
    %304 = vector.load %arg4[%c0_137, %c0_138] : memref<64x192xf32, #tpu.memory_space<vmem>>, vector<64x192xf32>
    %cst_139 = arith.constant dense<0.000000e+00> : vector<46x192xf32>
    %305 = tpu.matmul %303, %304, %cst_139 {dimension_numbers = #tpu.dot_dimension_numbers<[1], [0], [0], [1], [0, 0, 1, 1], [], []>} : vector<46x64xf32>, vector<64x192xf32>, vector<46x192xf32> -> vector<46x192xf32>
    %c0_140 = arith.constant 0 : index
    %c0_141 = arith.constant 0 : index
    %306 = vector.load %arg5[%c0_140, %c0_141] : memref<1x192xf32, #tpu.memory_space<vmem>>, vector<1x192xf32>
    %307 = vector.broadcast %306 : vector<1x192xf32> to vector<46x192xf32>
    %308 = arith.addf %305, %307 : vector<46x192xf32>
    %309 = vector.extract_strided_slice %308 {offsets = [0, 0], sizes = [46, 16], strides = [1, 1]} : vector<46x192xf32> to vector<46x16xf32>
    %310 = vector.extract_strided_slice %308 {offsets = [0, 64], sizes = [46, 16], strides = [1, 1]} : vector<46x192xf32> to vector<46x16xf32>
    %311 = vector.extract_strided_slice %308 {offsets = [0, 128], sizes = [46, 16], strides = [1, 1]} : vector<46x192xf32> to vector<46x16xf32>
    %cst_142 = arith.constant dense<0.000000e+00> : vector<46x46xf32>
    %312 = tpu.matmul %309, %310, %cst_142 {dimension_numbers = #tpu.dot_dimension_numbers<[1], [1], [0], [0], [0, 0, 1, 0], [], []>} : vector<46x16xf32>, vector<46x16xf32>, vector<46x46xf32> -> vector<46x46xf32>
    %313 = arith.addf %312, %2 : vector<46x46xf32>
    %cst_143 = arith.constant dense<0xFF800000> : vector<46xf32>
    %314 = vector.multi_reduction <maximumf>, %313, %cst_143 [1] : vector<46x46xf32> to vector<46xf32>
    %315 = vector.shape_cast %314 : vector<46xf32> to vector<46x1xf32>
    %316 = vector.broadcast %315 : vector<46x1xf32> to vector<46x46xf32>
    %317 = arith.subf %313, %316 : vector<46x46xf32>
    %318 = math.exp %317 : vector<46x46xf32>
    %cst_144 = arith.constant dense<0.000000e+00> : vector<46xf32>
    %319 = vector.multi_reduction <add>, %318, %cst_144 [1] : vector<46x46xf32> to vector<46xf32>
    %320 = vector.shape_cast %319 : vector<46xf32> to vector<46x1xf32>
    %321 = tpu.reciprocal %320 {approx = true} : vector<46x1xf32> -> vector<46x1xf32>
    %cst_145 = arith.constant dense<0.000000e+00> : vector<46x16xf32>
    %322 = tpu.matmul %318, %311, %cst_145 {dimension_numbers = #tpu.dot_dimension_numbers<[1], [0], [0], [1], [0, 0, 1, 1], [], []>} : vector<46x46xf32>, vector<46x16xf32>, vector<46x16xf32> -> vector<46x16xf32>
    %323 = vector.broadcast %321 : vector<46x1xf32> to vector<46x16xf32>
    %324 = arith.mulf %322, %323 : vector<46x16xf32>
    %325 = vector.extract_strided_slice %308 {offsets = [0, 16], sizes = [46, 16], strides = [1, 1]} : vector<46x192xf32> to vector<46x16xf32>
    %326 = vector.extract_strided_slice %308 {offsets = [0, 80], sizes = [46, 16], strides = [1, 1]} : vector<46x192xf32> to vector<46x16xf32>
    %327 = vector.extract_strided_slice %308 {offsets = [0, 144], sizes = [46, 16], strides = [1, 1]} : vector<46x192xf32> to vector<46x16xf32>
    %cst_146 = arith.constant dense<0.000000e+00> : vector<46x46xf32>
    %328 = tpu.matmul %325, %326, %cst_146 {dimension_numbers = #tpu.dot_dimension_numbers<[1], [1], [0], [0], [0, 0, 1, 0], [], []>} : vector<46x16xf32>, vector<46x16xf32>, vector<46x46xf32> -> vector<46x46xf32>
    %329 = arith.addf %328, %2 : vector<46x46xf32>
    %cst_147 = arith.constant dense<0xFF800000> : vector<46xf32>
    %330 = vector.multi_reduction <maximumf>, %329, %cst_147 [1] : vector<46x46xf32> to vector<46xf32>
    %331 = vector.shape_cast %330 : vector<46xf32> to vector<46x1xf32>
    %332 = vector.broadcast %331 : vector<46x1xf32> to vector<46x46xf32>
    %333 = arith.subf %329, %332 : vector<46x46xf32>
    %334 = math.exp %333 : vector<46x46xf32>
    %cst_148 = arith.constant dense<0.000000e+00> : vector<46xf32>
    %335 = vector.multi_reduction <add>, %334, %cst_148 [1] : vector<46x46xf32> to vector<46xf32>
    %336 = vector.shape_cast %335 : vector<46xf32> to vector<46x1xf32>
    %337 = tpu.reciprocal %336 {approx = true} : vector<46x1xf32> -> vector<46x1xf32>
    %cst_149 = arith.constant dense<0.000000e+00> : vector<46x16xf32>
    %338 = tpu.matmul %334, %327, %cst_149 {dimension_numbers = #tpu.dot_dimension_numbers<[1], [0], [0], [1], [0, 0, 1, 1], [], []>} : vector<46x46xf32>, vector<46x16xf32>, vector<46x16xf32> -> vector<46x16xf32>
    %339 = vector.broadcast %337 : vector<46x1xf32> to vector<46x16xf32>
    %340 = arith.mulf %338, %339 : vector<46x16xf32>
    %341 = vector.extract_strided_slice %308 {offsets = [0, 32], sizes = [46, 16], strides = [1, 1]} : vector<46x192xf32> to vector<46x16xf32>
    %342 = vector.extract_strided_slice %308 {offsets = [0, 96], sizes = [46, 16], strides = [1, 1]} : vector<46x192xf32> to vector<46x16xf32>
    %343 = vector.extract_strided_slice %308 {offsets = [0, 160], sizes = [46, 16], strides = [1, 1]} : vector<46x192xf32> to vector<46x16xf32>
    %cst_150 = arith.constant dense<0.000000e+00> : vector<46x46xf32>
    %344 = tpu.matmul %341, %342, %cst_150 {dimension_numbers = #tpu.dot_dimension_numbers<[1], [1], [0], [0], [0, 0, 1, 0], [], []>} : vector<46x16xf32>, vector<46x16xf32>, vector<46x46xf32> -> vector<46x46xf32>
    %345 = arith.addf %344, %2 : vector<46x46xf32>
    %cst_151 = arith.constant dense<0xFF800000> : vector<46xf32>
    %346 = vector.multi_reduction <maximumf>, %345, %cst_151 [1] : vector<46x46xf32> to vector<46xf32>
    %347 = vector.shape_cast %346 : vector<46xf32> to vector<46x1xf32>
    %348 = vector.broadcast %347 : vector<46x1xf32> to vector<46x46xf32>
    %349 = arith.subf %345, %348 : vector<46x46xf32>
    %350 = math.exp %349 : vector<46x46xf32>
    %cst_152 = arith.constant dense<0.000000e+00> : vector<46xf32>
    %351 = vector.multi_reduction <add>, %350, %cst_152 [1] : vector<46x46xf32> to vector<46xf32>
    %352 = vector.shape_cast %351 : vector<46xf32> to vector<46x1xf32>
    %353 = tpu.reciprocal %352 {approx = true} : vector<46x1xf32> -> vector<46x1xf32>
    %cst_153 = arith.constant dense<0.000000e+00> : vector<46x16xf32>
    %354 = tpu.matmul %350, %343, %cst_153 {dimension_numbers = #tpu.dot_dimension_numbers<[1], [0], [0], [1], [0, 0, 1, 1], [], []>} : vector<46x46xf32>, vector<46x16xf32>, vector<46x16xf32> -> vector<46x16xf32>
    %355 = vector.broadcast %353 : vector<46x1xf32> to vector<46x16xf32>
    %356 = arith.mulf %354, %355 : vector<46x16xf32>
    %357 = vector.extract_strided_slice %308 {offsets = [0, 48], sizes = [46, 16], strides = [1, 1]} : vector<46x192xf32> to vector<46x16xf32>
    %358 = vector.extract_strided_slice %308 {offsets = [0, 112], sizes = [46, 16], strides = [1, 1]} : vector<46x192xf32> to vector<46x16xf32>
    %359 = vector.extract_strided_slice %308 {offsets = [0, 176], sizes = [46, 16], strides = [1, 1]} : vector<46x192xf32> to vector<46x16xf32>
    %cst_154 = arith.constant dense<0.000000e+00> : vector<46x46xf32>
    %360 = tpu.matmul %357, %358, %cst_154 {dimension_numbers = #tpu.dot_dimension_numbers<[1], [1], [0], [0], [0, 0, 1, 0], [], []>} : vector<46x16xf32>, vector<46x16xf32>, vector<46x46xf32> -> vector<46x46xf32>
    %361 = arith.addf %360, %2 : vector<46x46xf32>
    %cst_155 = arith.constant dense<0xFF800000> : vector<46xf32>
    %362 = vector.multi_reduction <maximumf>, %361, %cst_155 [1] : vector<46x46xf32> to vector<46xf32>
    %363 = vector.shape_cast %362 : vector<46xf32> to vector<46x1xf32>
    %364 = vector.broadcast %363 : vector<46x1xf32> to vector<46x46xf32>
    %365 = arith.subf %361, %364 : vector<46x46xf32>
    %366 = math.exp %365 : vector<46x46xf32>
    %cst_156 = arith.constant dense<0.000000e+00> : vector<46xf32>
    %367 = vector.multi_reduction <add>, %366, %cst_156 [1] : vector<46x46xf32> to vector<46xf32>
    %368 = vector.shape_cast %367 : vector<46xf32> to vector<46x1xf32>
    %369 = tpu.reciprocal %368 {approx = true} : vector<46x1xf32> -> vector<46x1xf32>
    %cst_157 = arith.constant dense<0.000000e+00> : vector<46x16xf32>
    %370 = tpu.matmul %366, %359, %cst_157 {dimension_numbers = #tpu.dot_dimension_numbers<[1], [0], [0], [1], [0, 0, 1, 1], [], []>} : vector<46x46xf32>, vector<46x16xf32>, vector<46x16xf32> -> vector<46x16xf32>
    %371 = vector.broadcast %369 : vector<46x1xf32> to vector<46x16xf32>
    %372 = arith.mulf %370, %371 : vector<46x16xf32>
    %373 = tpu.concatenate %324, %340, %356, %372 in 1 : vector<46x16xf32>, vector<46x16xf32>, vector<46x16xf32>, vector<46x16xf32> -> vector<46x64xf32>
    %c0_158 = arith.constant 0 : index
    %c0_159 = arith.constant 0 : index
    %374 = vector.load %arg6[%c0_158, %c0_159] : memref<64x64xf32, #tpu.memory_space<vmem>>, vector<64x64xf32>
    %cst_160 = arith.constant dense<0.000000e+00> : vector<46x64xf32>
    %375 = tpu.matmul %373, %374, %cst_160 {dimension_numbers = #tpu.dot_dimension_numbers<[1], [0], [0], [1], [0, 0, 1, 1], [], []>} : vector<46x64xf32>, vector<64x64xf32>, vector<46x64xf32> -> vector<46x64xf32>
    %376 = arith.addf %303, %375 : vector<46x64xf32>
    %c0_161 = arith.constant 0 : index
    %c0_162 = arith.constant 0 : index
    %377 = vector.load %arg7[%c0_161, %c0_162] : memref<1x64xf32, #tpu.memory_space<vmem>>, vector<1x64xf32>
    %378 = vector.broadcast %377 : vector<1x64xf32> to vector<46x64xf32>
    %379 = arith.addf %376, %378 : vector<46x64xf32>
    %cst_163 = arith.constant dense<0.000000e+00> : vector<46xf32>
    %380 = vector.multi_reduction <add>, %379, %cst_163 [1] : vector<46x64xf32> to vector<46xf32>
    %381 = vector.shape_cast %380 : vector<46xf32> to vector<46x1xf32>
    %cst_164 = arith.constant 6.400000e+01 : f32
    %382 = vector.broadcast %cst_164 : f32 to vector<46x1xf32>
    %383 = arith.divf %381, %382 : vector<46x1xf32>
    %384 = vector.broadcast %383 : vector<46x1xf32> to vector<46x64xf32>
    %385 = arith.subf %379, %384 : vector<46x64xf32>
    %386 = arith.mulf %385, %385 : vector<46x64xf32>
    %cst_165 = arith.constant dense<0.000000e+00> : vector<46xf32>
    %387 = vector.multi_reduction <add>, %386, %cst_165 [1] : vector<46x64xf32> to vector<46xf32>
    %388 = vector.shape_cast %387 : vector<46xf32> to vector<46x1xf32>
    %cst_166 = arith.constant 6.400000e+01 : f32
    %389 = vector.broadcast %cst_166 : f32 to vector<46x1xf32>
    %390 = arith.divf %388, %389 : vector<46x1xf32>
    %cst_167 = arith.constant 9.99999974E-6 : f32
    %391 = vector.broadcast %cst_167 : f32 to vector<46x1xf32>
    %392 = arith.addf %390, %391 : vector<46x1xf32>
    %393 = math.rsqrt %392 : vector<46x1xf32>
    %394 = vector.broadcast %393 : vector<46x1xf32> to vector<46x64xf32>
    %395 = arith.mulf %385, %394 : vector<46x64xf32>
    %c0_168 = arith.constant 0 : index
    %c0_169 = arith.constant 0 : index
    %396 = vector.load %arg8[%c0_168, %c0_169] : memref<1x64xf32, #tpu.memory_space<vmem>>, vector<1x64xf32>
    %397 = vector.broadcast %396 : vector<1x64xf32> to vector<46x64xf32>
    %398 = arith.mulf %395, %397 : vector<46x64xf32>
    %c0_170 = arith.constant 0 : index
    %c0_171 = arith.constant 0 : index
    %399 = vector.load %arg9[%c0_170, %c0_171] : memref<1x64xf32, #tpu.memory_space<vmem>>, vector<1x64xf32>
    %400 = vector.broadcast %399 : vector<1x64xf32> to vector<46x64xf32>
    %401 = arith.addf %398, %400 : vector<46x64xf32>
    %c0_172 = arith.constant 0 : index
    %c0_173 = arith.constant 0 : index
    %402 = vector.load %arg10[%c0_172, %c0_173] : memref<64x128xf32, #tpu.memory_space<vmem>>, vector<64x128xf32>
    %cst_174 = arith.constant dense<0.000000e+00> : vector<46x128xf32>
    %403 = tpu.matmul %401, %402, %cst_174 {dimension_numbers = #tpu.dot_dimension_numbers<[1], [0], [0], [1], [0, 0, 1, 1], [], []>} : vector<46x64xf32>, vector<64x128xf32>, vector<46x128xf32> -> vector<46x128xf32>
    %c0_175 = arith.constant 0 : index
    %c0_176 = arith.constant 0 : index
    %404 = vector.load %arg11[%c0_175, %c0_176] : memref<1x128xf32, #tpu.memory_space<vmem>>, vector<1x128xf32>
    %405 = vector.broadcast %404 : vector<1x128xf32> to vector<46x128xf32>
    %406 = arith.addf %403, %405 : vector<46x128xf32>
    %cst_177 = arith.constant 0.000000e+00 : f32
    %407 = vector.broadcast %cst_177 : f32 to vector<46x128xf32>
    %408 = arith.maximumf %406, %407 : vector<46x128xf32>
    %c0_178 = arith.constant 0 : index
    %c0_179 = arith.constant 0 : index
    %409 = vector.load %arg12[%c0_178, %c0_179] : memref<128x64xf32, #tpu.memory_space<vmem>>, vector<128x64xf32>
    %cst_180 = arith.constant dense<0.000000e+00> : vector<46x64xf32>
    %410 = tpu.matmul %408, %409, %cst_180 {dimension_numbers = #tpu.dot_dimension_numbers<[1], [0], [0], [1], [0, 0, 1, 1], [], []>} : vector<46x128xf32>, vector<128x64xf32>, vector<46x64xf32> -> vector<46x64xf32>
    %411 = arith.addf %401, %410 : vector<46x64xf32>
    %c0_181 = arith.constant 0 : index
    %c0_182 = arith.constant 0 : index
    %412 = vector.load %arg13[%c0_181, %c0_182] : memref<1x64xf32, #tpu.memory_space<vmem>>, vector<1x64xf32>
    %413 = vector.broadcast %412 : vector<1x64xf32> to vector<46x64xf32>
    %414 = arith.addf %411, %413 : vector<46x64xf32>
    %cst_183 = arith.constant dense<0.000000e+00> : vector<46xf32>
    %415 = vector.multi_reduction <add>, %414, %cst_183 [1] : vector<46x64xf32> to vector<46xf32>
    %416 = vector.shape_cast %415 : vector<46xf32> to vector<46x1xf32>
    %cst_184 = arith.constant 6.400000e+01 : f32
    %417 = vector.broadcast %cst_184 : f32 to vector<46x1xf32>
    %418 = arith.divf %416, %417 : vector<46x1xf32>
    %419 = vector.broadcast %418 : vector<46x1xf32> to vector<46x64xf32>
    %420 = arith.subf %414, %419 : vector<46x64xf32>
    %421 = arith.mulf %420, %420 : vector<46x64xf32>
    %cst_185 = arith.constant dense<0.000000e+00> : vector<46xf32>
    %422 = vector.multi_reduction <add>, %421, %cst_185 [1] : vector<46x64xf32> to vector<46xf32>
    %423 = vector.shape_cast %422 : vector<46xf32> to vector<46x1xf32>
    %cst_186 = arith.constant 6.400000e+01 : f32
    %424 = vector.broadcast %cst_186 : f32 to vector<46x1xf32>
    %425 = arith.divf %423, %424 : vector<46x1xf32>
    %cst_187 = arith.constant 9.99999974E-6 : f32
    %426 = vector.broadcast %cst_187 : f32 to vector<46x1xf32>
    %427 = arith.addf %425, %426 : vector<46x1xf32>
    %428 = math.rsqrt %427 : vector<46x1xf32>
    %429 = vector.broadcast %428 : vector<46x1xf32> to vector<46x64xf32>
    %430 = arith.mulf %420, %429 : vector<46x64xf32>
    %c0_188 = arith.constant 0 : index
    %c0_189 = arith.constant 0 : index
    %431 = vector.load %arg14[%c0_188, %c0_189] : memref<1x64xf32, #tpu.memory_space<vmem>>, vector<1x64xf32>
    %432 = vector.broadcast %431 : vector<1x64xf32> to vector<46x64xf32>
    %433 = arith.mulf %430, %432 : vector<46x64xf32>
    %c0_190 = arith.constant 0 : index
    %c0_191 = arith.constant 0 : index
    %434 = vector.load %arg15[%c0_190, %c0_191] : memref<1x64xf32, #tpu.memory_space<vmem>>, vector<1x64xf32>
    %435 = vector.broadcast %434 : vector<1x64xf32> to vector<46x64xf32>
    %436 = arith.addf %433, %435 : vector<46x64xf32>
    %c0_192 = arith.constant 0 : index
    %c0_193 = arith.constant 0 : index
    %437 = vector.load %arg16[%c0_192, %c0_193] : memref<32x96xf32, #tpu.memory_space<vmem>>, vector<32x96xf32>
    %cst_194 = arith.constant dense<0.000000e+00> : vector<32x96xf32>
    %438 = tpu.matmul %269, %437, %cst_194 {dimension_numbers = #tpu.dot_dimension_numbers<[1], [0], [0], [1], [0, 0, 1, 1], [], []>} : vector<32x32xf32>, vector<32x96xf32>, vector<32x96xf32> -> vector<32x96xf32>
    %c0_195 = arith.constant 0 : index
    %c0_196 = arith.constant 0 : index
    %439 = vector.load %arg17[%c0_195, %c0_196] : memref<1x96xf32, #tpu.memory_space<vmem>>, vector<1x96xf32>
    %440 = vector.broadcast %439 : vector<1x96xf32> to vector<32x96xf32>
    %441 = arith.addf %438, %440 : vector<32x96xf32>
    %442 = vector.extract_strided_slice %441 {offsets = [0, 0], sizes = [32, 8], strides = [1, 1]} : vector<32x96xf32> to vector<32x8xf32>
    %443 = vector.extract_strided_slice %441 {offsets = [0, 32], sizes = [32, 8], strides = [1, 1]} : vector<32x96xf32> to vector<32x8xf32>
    %444 = vector.extract_strided_slice %441 {offsets = [0, 64], sizes = [32, 8], strides = [1, 1]} : vector<32x96xf32> to vector<32x8xf32>
    %cst_197 = arith.constant dense<0.000000e+00> : vector<32x32xf32>
    %445 = tpu.matmul %442, %443, %cst_197 {dimension_numbers = #tpu.dot_dimension_numbers<[1], [1], [0], [0], [0, 0, 1, 0], [], []>} : vector<32x8xf32>, vector<32x8xf32>, vector<32x32xf32> -> vector<32x32xf32>
    %446 = arith.addf %445, %3 : vector<32x32xf32>
    %cst_198 = arith.constant dense<0xFF800000> : vector<32xf32>
    %447 = vector.multi_reduction <maximumf>, %446, %cst_198 [1] : vector<32x32xf32> to vector<32xf32>
    %448 = vector.shape_cast %447 : vector<32xf32> to vector<32x1xf32>
    %449 = vector.broadcast %448 : vector<32x1xf32> to vector<32x32xf32>
    %450 = arith.subf %446, %449 : vector<32x32xf32>
    %451 = math.exp %450 : vector<32x32xf32>
    %cst_199 = arith.constant dense<0.000000e+00> : vector<32xf32>
    %452 = vector.multi_reduction <add>, %451, %cst_199 [1] : vector<32x32xf32> to vector<32xf32>
    %453 = vector.shape_cast %452 : vector<32xf32> to vector<32x1xf32>
    %454 = tpu.reciprocal %453 {approx = true} : vector<32x1xf32> -> vector<32x1xf32>
    %cst_200 = arith.constant dense<0.000000e+00> : vector<32x8xf32>
    %455 = tpu.matmul %451, %444, %cst_200 {dimension_numbers = #tpu.dot_dimension_numbers<[1], [0], [0], [1], [0, 0, 1, 1], [], []>} : vector<32x32xf32>, vector<32x8xf32>, vector<32x8xf32> -> vector<32x8xf32>
    %456 = vector.broadcast %454 : vector<32x1xf32> to vector<32x8xf32>
    %457 = arith.mulf %455, %456 : vector<32x8xf32>
    %458 = vector.extract_strided_slice %441 {offsets = [0, 8], sizes = [32, 8], strides = [1, 1]} : vector<32x96xf32> to vector<32x8xf32>
    %459 = vector.extract_strided_slice %441 {offsets = [0, 40], sizes = [32, 8], strides = [1, 1]} : vector<32x96xf32> to vector<32x8xf32>
    %460 = vector.extract_strided_slice %441 {offsets = [0, 72], sizes = [32, 8], strides = [1, 1]} : vector<32x96xf32> to vector<32x8xf32>
    %cst_201 = arith.constant dense<0.000000e+00> : vector<32x32xf32>
    %461 = tpu.matmul %458, %459, %cst_201 {dimension_numbers = #tpu.dot_dimension_numbers<[1], [1], [0], [0], [0, 0, 1, 0], [], []>} : vector<32x8xf32>, vector<32x8xf32>, vector<32x32xf32> -> vector<32x32xf32>
    %462 = arith.addf %461, %3 : vector<32x32xf32>
    %cst_202 = arith.constant dense<0xFF800000> : vector<32xf32>
    %463 = vector.multi_reduction <maximumf>, %462, %cst_202 [1] : vector<32x32xf32> to vector<32xf32>
    %464 = vector.shape_cast %463 : vector<32xf32> to vector<32x1xf32>
    %465 = vector.broadcast %464 : vector<32x1xf32> to vector<32x32xf32>
    %466 = arith.subf %462, %465 : vector<32x32xf32>
    %467 = math.exp %466 : vector<32x32xf32>
    %cst_203 = arith.constant dense<0.000000e+00> : vector<32xf32>
    %468 = vector.multi_reduction <add>, %467, %cst_203 [1] : vector<32x32xf32> to vector<32xf32>
    %469 = vector.shape_cast %468 : vector<32xf32> to vector<32x1xf32>
    %470 = tpu.reciprocal %469 {approx = true} : vector<32x1xf32> -> vector<32x1xf32>
    %cst_204 = arith.constant dense<0.000000e+00> : vector<32x8xf32>
    %471 = tpu.matmul %467, %460, %cst_204 {dimension_numbers = #tpu.dot_dimension_numbers<[1], [0], [0], [1], [0, 0, 1, 1], [], []>} : vector<32x32xf32>, vector<32x8xf32>, vector<32x8xf32> -> vector<32x8xf32>
    %472 = vector.broadcast %470 : vector<32x1xf32> to vector<32x8xf32>
    %473 = arith.mulf %471, %472 : vector<32x8xf32>
    %474 = vector.extract_strided_slice %441 {offsets = [0, 16], sizes = [32, 8], strides = [1, 1]} : vector<32x96xf32> to vector<32x8xf32>
    %475 = vector.extract_strided_slice %441 {offsets = [0, 48], sizes = [32, 8], strides = [1, 1]} : vector<32x96xf32> to vector<32x8xf32>
    %476 = vector.extract_strided_slice %441 {offsets = [0, 80], sizes = [32, 8], strides = [1, 1]} : vector<32x96xf32> to vector<32x8xf32>
    %cst_205 = arith.constant dense<0.000000e+00> : vector<32x32xf32>
    %477 = tpu.matmul %474, %475, %cst_205 {dimension_numbers = #tpu.dot_dimension_numbers<[1], [1], [0], [0], [0, 0, 1, 0], [], []>} : vector<32x8xf32>, vector<32x8xf32>, vector<32x32xf32> -> vector<32x32xf32>
    %478 = arith.addf %477, %3 : vector<32x32xf32>
    %cst_206 = arith.constant dense<0xFF800000> : vector<32xf32>
    %479 = vector.multi_reduction <maximumf>, %478, %cst_206 [1] : vector<32x32xf32> to vector<32xf32>
    %480 = vector.shape_cast %479 : vector<32xf32> to vector<32x1xf32>
    %481 = vector.broadcast %480 : vector<32x1xf32> to vector<32x32xf32>
    %482 = arith.subf %478, %481 : vector<32x32xf32>
    %483 = math.exp %482 : vector<32x32xf32>
    %cst_207 = arith.constant dense<0.000000e+00> : vector<32xf32>
    %484 = vector.multi_reduction <add>, %483, %cst_207 [1] : vector<32x32xf32> to vector<32xf32>
    %485 = vector.shape_cast %484 : vector<32xf32> to vector<32x1xf32>
    %486 = tpu.reciprocal %485 {approx = true} : vector<32x1xf32> -> vector<32x1xf32>
    %cst_208 = arith.constant dense<0.000000e+00> : vector<32x8xf32>
    %487 = tpu.matmul %483, %476, %cst_208 {dimension_numbers = #tpu.dot_dimension_numbers<[1], [0], [0], [1], [0, 0, 1, 1], [], []>} : vector<32x32xf32>, vector<32x8xf32>, vector<32x8xf32> -> vector<32x8xf32>
    %488 = vector.broadcast %486 : vector<32x1xf32> to vector<32x8xf32>
    %489 = arith.mulf %487, %488 : vector<32x8xf32>
    %490 = vector.extract_strided_slice %441 {offsets = [0, 24], sizes = [32, 8], strides = [1, 1]} : vector<32x96xf32> to vector<32x8xf32>
    %491 = vector.extract_strided_slice %441 {offsets = [0, 56], sizes = [32, 8], strides = [1, 1]} : vector<32x96xf32> to vector<32x8xf32>
    %492 = vector.extract_strided_slice %441 {offsets = [0, 88], sizes = [32, 8], strides = [1, 1]} : vector<32x96xf32> to vector<32x8xf32>
    %cst_209 = arith.constant dense<0.000000e+00> : vector<32x32xf32>
    %493 = tpu.matmul %490, %491, %cst_209 {dimension_numbers = #tpu.dot_dimension_numbers<[1], [1], [0], [0], [0, 0, 1, 0], [], []>} : vector<32x8xf32>, vector<32x8xf32>, vector<32x32xf32> -> vector<32x32xf32>
    %494 = arith.addf %493, %3 : vector<32x32xf32>
    %cst_210 = arith.constant dense<0xFF800000> : vector<32xf32>
    %495 = vector.multi_reduction <maximumf>, %494, %cst_210 [1] : vector<32x32xf32> to vector<32xf32>
    %496 = vector.shape_cast %495 : vector<32xf32> to vector<32x1xf32>
    %497 = vector.broadcast %496 : vector<32x1xf32> to vector<32x32xf32>
    %498 = arith.subf %494, %497 : vector<32x32xf32>
    %499 = math.exp %498 : vector<32x32xf32>
    %cst_211 = arith.constant dense<0.000000e+00> : vector<32xf32>
    %500 = vector.multi_reduction <add>, %499, %cst_211 [1] : vector<32x32xf32> to vector<32xf32>
    %501 = vector.shape_cast %500 : vector<32xf32> to vector<32x1xf32>
    %502 = tpu.reciprocal %501 {approx = true} : vector<32x1xf32> -> vector<32x1xf32>
    %cst_212 = arith.constant dense<0.000000e+00> : vector<32x8xf32>
    %503 = tpu.matmul %499, %492, %cst_212 {dimension_numbers = #tpu.dot_dimension_numbers<[1], [0], [0], [1], [0, 0, 1, 1], [], []>} : vector<32x32xf32>, vector<32x8xf32>, vector<32x8xf32> -> vector<32x8xf32>
    %504 = vector.broadcast %502 : vector<32x1xf32> to vector<32x8xf32>
    %505 = arith.mulf %503, %504 : vector<32x8xf32>
    %506 = tpu.concatenate %457, %473, %489, %505 in 1 : vector<32x8xf32>, vector<32x8xf32>, vector<32x8xf32>, vector<32x8xf32> -> vector<32x32xf32>
    %c0_213 = arith.constant 0 : index
    %c0_214 = arith.constant 0 : index
    %507 = vector.load %arg18[%c0_213, %c0_214] : memref<32x32xf32, #tpu.memory_space<vmem>>, vector<32x32xf32>
    %cst_215 = arith.constant dense<0.000000e+00> : vector<32x32xf32>
    %508 = tpu.matmul %506, %507, %cst_215 {dimension_numbers = #tpu.dot_dimension_numbers<[1], [0], [0], [1], [0, 0, 1, 1], [], []>} : vector<32x32xf32>, vector<32x32xf32>, vector<32x32xf32> -> vector<32x32xf32>
    %509 = arith.addf %269, %508 : vector<32x32xf32>
    %c0_216 = arith.constant 0 : index
    %c0_217 = arith.constant 0 : index
    %510 = vector.load %arg19[%c0_216, %c0_217] : memref<1x32xf32, #tpu.memory_space<vmem>>, vector<1x32xf32>
    %511 = vector.broadcast %510 : vector<1x32xf32> to vector<32x32xf32>
    %512 = arith.addf %509, %511 : vector<32x32xf32>
    %cst_218 = arith.constant dense<0.000000e+00> : vector<32xf32>
    %513 = vector.multi_reduction <add>, %512, %cst_218 [1] : vector<32x32xf32> to vector<32xf32>
    %514 = vector.shape_cast %513 : vector<32xf32> to vector<32x1xf32>
    %cst_219 = arith.constant 3.200000e+01 : f32
    %515 = vector.broadcast %cst_219 : f32 to vector<32x1xf32>
    %516 = arith.divf %514, %515 : vector<32x1xf32>
    %517 = vector.broadcast %516 : vector<32x1xf32> to vector<32x32xf32>
    %518 = arith.subf %512, %517 : vector<32x32xf32>
    %519 = arith.mulf %518, %518 : vector<32x32xf32>
    %cst_220 = arith.constant dense<0.000000e+00> : vector<32xf32>
    %520 = vector.multi_reduction <add>, %519, %cst_220 [1] : vector<32x32xf32> to vector<32xf32>
    %521 = vector.shape_cast %520 : vector<32xf32> to vector<32x1xf32>
    %cst_221 = arith.constant 3.200000e+01 : f32
    %522 = vector.broadcast %cst_221 : f32 to vector<32x1xf32>
    %523 = arith.divf %521, %522 : vector<32x1xf32>
    %cst_222 = arith.constant 9.99999974E-6 : f32
    %524 = vector.broadcast %cst_222 : f32 to vector<32x1xf32>
    %525 = arith.addf %523, %524 : vector<32x1xf32>
    %526 = math.rsqrt %525 : vector<32x1xf32>
    %527 = vector.broadcast %526 : vector<32x1xf32> to vector<32x32xf32>
    %528 = arith.mulf %518, %527 : vector<32x32xf32>
    %c0_223 = arith.constant 0 : index
    %c0_224 = arith.constant 0 : index
    %529 = vector.load %arg20[%c0_223, %c0_224] : memref<1x32xf32, #tpu.memory_space<vmem>>, vector<1x32xf32>
    %530 = vector.broadcast %529 : vector<1x32xf32> to vector<32x32xf32>
    %531 = arith.mulf %528, %530 : vector<32x32xf32>
    %c0_225 = arith.constant 0 : index
    %c0_226 = arith.constant 0 : index
    %532 = vector.load %arg21[%c0_225, %c0_226] : memref<1x32xf32, #tpu.memory_space<vmem>>, vector<1x32xf32>
    %533 = vector.broadcast %532 : vector<1x32xf32> to vector<32x32xf32>
    %534 = arith.addf %531, %533 : vector<32x32xf32>
    %c0_227 = arith.constant 0 : index
    %c0_228 = arith.constant 0 : index
    %535 = vector.load %arg22[%c0_227, %c0_228] : memref<32x64xf32, #tpu.memory_space<vmem>>, vector<32x64xf32>
    %cst_229 = arith.constant dense<0.000000e+00> : vector<32x64xf32>
    %536 = tpu.matmul %534, %535, %cst_229 {dimension_numbers = #tpu.dot_dimension_numbers<[1], [0], [0], [1], [0, 0, 1, 1], [], []>} : vector<32x32xf32>, vector<32x64xf32>, vector<32x64xf32> -> vector<32x64xf32>
    %c0_230 = arith.constant 0 : index
    %c0_231 = arith.constant 0 : index
    %537 = vector.load %arg23[%c0_230, %c0_231] : memref<1x64xf32, #tpu.memory_space<vmem>>, vector<1x64xf32>
    %538 = vector.broadcast %537 : vector<1x64xf32> to vector<32x64xf32>
    %539 = arith.addf %536, %538 : vector<32x64xf32>
    %cst_232 = arith.constant 0.000000e+00 : f32
    %540 = vector.broadcast %cst_232 : f32 to vector<32x64xf32>
    %541 = arith.maximumf %539, %540 : vector<32x64xf32>
    %c0_233 = arith.constant 0 : index
    %c0_234 = arith.constant 0 : index
    %542 = vector.load %arg24[%c0_233, %c0_234] : memref<64x32xf32, #tpu.memory_space<vmem>>, vector<64x32xf32>
    %cst_235 = arith.constant dense<0.000000e+00> : vector<32x32xf32>
    %543 = tpu.matmul %541, %542, %cst_235 {dimension_numbers = #tpu.dot_dimension_numbers<[1], [0], [0], [1], [0, 0, 1, 1], [], []>} : vector<32x64xf32>, vector<64x32xf32>, vector<32x32xf32> -> vector<32x32xf32>
    %544 = arith.addf %534, %543 : vector<32x32xf32>
    %c0_236 = arith.constant 0 : index
    %c0_237 = arith.constant 0 : index
    %545 = vector.load %arg25[%c0_236, %c0_237] : memref<1x32xf32, #tpu.memory_space<vmem>>, vector<1x32xf32>
    %546 = vector.broadcast %545 : vector<1x32xf32> to vector<32x32xf32>
    %547 = arith.addf %544, %546 : vector<32x32xf32>
    %cst_238 = arith.constant dense<0.000000e+00> : vector<32xf32>
    %548 = vector.multi_reduction <add>, %547, %cst_238 [1] : vector<32x32xf32> to vector<32xf32>
    %549 = vector.shape_cast %548 : vector<32xf32> to vector<32x1xf32>
    %cst_239 = arith.constant 3.200000e+01 : f32
    %550 = vector.broadcast %cst_239 : f32 to vector<32x1xf32>
    %551 = arith.divf %549, %550 : vector<32x1xf32>
    %552 = vector.broadcast %551 : vector<32x1xf32> to vector<32x32xf32>
    %553 = arith.subf %547, %552 : vector<32x32xf32>
    %554 = arith.mulf %553, %553 : vector<32x32xf32>
    %cst_240 = arith.constant dense<0.000000e+00> : vector<32xf32>
    %555 = vector.multi_reduction <add>, %554, %cst_240 [1] : vector<32x32xf32> to vector<32xf32>
    %556 = vector.shape_cast %555 : vector<32xf32> to vector<32x1xf32>
    %cst_241 = arith.constant 3.200000e+01 : f32
    %557 = vector.broadcast %cst_241 : f32 to vector<32x1xf32>
    %558 = arith.divf %556, %557 : vector<32x1xf32>
    %cst_242 = arith.constant 9.99999974E-6 : f32
    %559 = vector.broadcast %cst_242 : f32 to vector<32x1xf32>
    %560 = arith.addf %558, %559 : vector<32x1xf32>
    %561 = math.rsqrt %560 : vector<32x1xf32>
    %562 = vector.broadcast %561 : vector<32x1xf32> to vector<32x32xf32>
    %563 = arith.mulf %553, %562 : vector<32x32xf32>
    %c0_243 = arith.constant 0 : index
    %c0_244 = arith.constant 0 : index
    %564 = vector.load %arg26[%c0_243, %c0_244] : memref<1x32xf32, #tpu.memory_space<vmem>>, vector<1x32xf32>
    %565 = vector.broadcast %564 : vector<1x32xf32> to vector<32x32xf32>
    %566 = arith.mulf %563, %565 : vector<32x32xf32>
    %c0_245 = arith.constant 0 : index
    %c0_246 = arith.constant 0 : index
    %567 = vector.load %arg27[%c0_245, %c0_246] : memref<1x32xf32, #tpu.memory_space<vmem>>, vector<1x32xf32>
    %568 = vector.broadcast %567 : vector<1x32xf32> to vector<32x32xf32>
    %569 = arith.addf %566, %568 : vector<32x32xf32>
    %cst_247 = arith.constant dense<0.000000e+00> : vector<46xf32>
    %570 = vector.multi_reduction <add>, %436, %cst_247 [1] : vector<46x64xf32> to vector<46xf32>
    %571 = vector.shape_cast %570 : vector<46xf32> to vector<46x1xf32>
    %cst_248 = arith.constant 6.400000e+01 : f32
    %572 = vector.broadcast %cst_248 : f32 to vector<46x1xf32>
    %573 = arith.divf %571, %572 : vector<46x1xf32>
    %574 = vector.broadcast %573 : vector<46x1xf32> to vector<46x64xf32>
    %575 = arith.subf %436, %574 : vector<46x64xf32>
    %576 = arith.mulf %575, %575 : vector<46x64xf32>
    %cst_249 = arith.constant dense<0.000000e+00> : vector<46xf32>
    %577 = vector.multi_reduction <add>, %576, %cst_249 [1] : vector<46x64xf32> to vector<46xf32>
    %578 = vector.shape_cast %577 : vector<46xf32> to vector<46x1xf32>
    %cst_250 = arith.constant 6.400000e+01 : f32
    %579 = vector.broadcast %cst_250 : f32 to vector<46x1xf32>
    %580 = arith.divf %578, %579 : vector<46x1xf32>
    %cst_251 = arith.constant 9.99999974E-6 : f32
    %581 = vector.broadcast %cst_251 : f32 to vector<46x1xf32>
    %582 = arith.addf %580, %581 : vector<46x1xf32>
    %583 = math.rsqrt %582 : vector<46x1xf32>
    %584 = vector.broadcast %583 : vector<46x1xf32> to vector<46x64xf32>
    %585 = arith.mulf %575, %584 : vector<46x64xf32>
    %c0_252 = arith.constant 0 : index
    %c0_253 = arith.constant 0 : index
    %586 = vector.load %arg28[%c0_252, %c0_253] : memref<1x64xf32, #tpu.memory_space<vmem>>, vector<1x64xf32>
    %587 = vector.broadcast %586 : vector<1x64xf32> to vector<46x64xf32>
    %588 = arith.mulf %585, %587 : vector<46x64xf32>
    %c0_254 = arith.constant 0 : index
    %c0_255 = arith.constant 0 : index
    %589 = vector.load %arg29[%c0_254, %c0_255] : memref<1x64xf32, #tpu.memory_space<vmem>>, vector<1x64xf32>
    %590 = vector.broadcast %589 : vector<1x64xf32> to vector<46x64xf32>
    %591 = arith.addf %588, %590 : vector<46x64xf32>
    %cst_256 = arith.constant dense<0.000000e+00> : vector<32xf32>
    %592 = vector.multi_reduction <add>, %569, %cst_256 [1] : vector<32x32xf32> to vector<32xf32>
    %593 = vector.shape_cast %592 : vector<32xf32> to vector<32x1xf32>
    %cst_257 = arith.constant 3.200000e+01 : f32
    %594 = vector.broadcast %cst_257 : f32 to vector<32x1xf32>
    %595 = arith.divf %593, %594 : vector<32x1xf32>
    %596 = vector.broadcast %595 : vector<32x1xf32> to vector<32x32xf32>
    %597 = arith.subf %569, %596 : vector<32x32xf32>
    %598 = arith.mulf %597, %597 : vector<32x32xf32>
    %cst_258 = arith.constant dense<0.000000e+00> : vector<32xf32>
    %599 = vector.multi_reduction <add>, %598, %cst_258 [1] : vector<32x32xf32> to vector<32xf32>
    %600 = vector.shape_cast %599 : vector<32xf32> to vector<32x1xf32>
    %cst_259 = arith.constant 3.200000e+01 : f32
    %601 = vector.broadcast %cst_259 : f32 to vector<32x1xf32>
    %602 = arith.divf %600, %601 : vector<32x1xf32>
    %cst_260 = arith.constant 9.99999974E-6 : f32
    %603 = vector.broadcast %cst_260 : f32 to vector<32x1xf32>
    %604 = arith.addf %602, %603 : vector<32x1xf32>
    %605 = math.rsqrt %604 : vector<32x1xf32>
    %606 = vector.broadcast %605 : vector<32x1xf32> to vector<32x32xf32>
    %607 = arith.mulf %597, %606 : vector<32x32xf32>
    %c0_261 = arith.constant 0 : index
    %c0_262 = arith.constant 0 : index
    %608 = vector.load %arg30[%c0_261, %c0_262] : memref<1x32xf32, #tpu.memory_space<vmem>>, vector<1x32xf32>
    %609 = vector.broadcast %608 : vector<1x32xf32> to vector<32x32xf32>
    %610 = arith.mulf %607, %609 : vector<32x32xf32>
    %c0_263 = arith.constant 0 : index
    %c0_264 = arith.constant 0 : index
    %611 = vector.load %arg31[%c0_263, %c0_264] : memref<1x32xf32, #tpu.memory_space<vmem>>, vector<1x32xf32>
    %612 = vector.broadcast %611 : vector<1x32xf32> to vector<32x32xf32>
    %613 = arith.addf %610, %612 : vector<32x32xf32>
    %c0_265 = arith.constant 0 : index
    %c0_266 = arith.constant 0 : index
    %614 = vector.load %arg38[%c0_265, %c0_266] : memref<46x64xf32, #tpu.memory_space<vmem>>, vector<46x64xf32>
    tpu.vector_store %arg38[%c0_265, %c0_266], %591 {strides = array<i32>} : memref<46x64xf32, #tpu.memory_space<vmem>>, vector<46x64xf32>,
    %c0_267 = arith.constant 0 : index
    %c0_268 = arith.constant 0 : index
    %615 = vector.load %arg39[%c0_267, %c0_268] : memref<32x32xf32, #tpu.memory_space<vmem>>, vector<32x32xf32>
    tpu.vector_store %arg39[%c0_267, %c0_268], %613 {strides = array<i32>} : memref<32x32xf32, #tpu.memory_space<vmem>>, vector<32x32xf32>,
    return
  }
}

</mosaic_0001>

<bundles_post_ra>
// kernel: mem_transformer_encoder_fwd.1
= control target key start
LH: loop header
LB: loop body
LE: loop exit
PB: predicated region body
PF: predicated region fallthrough
CT: control target
= control target key end

     0   :  { %s12288_s6 = smov 1   ;;  %s12289_s10 = smov 2   ;;  %s15283_s0 = inlined_call_operand.smem [shape: u32[40], index: -1, kind: input, shape index: {}] }
   0x1   :  { %s12361_s5 = sld [smem:[%s15283_s0]]   ;;  %s12290_s14 = smov 3  }
   0x2   :  { %s12366_s9 = sld [smem:[%s15283_s0 + %s12288_s6]]   ;;  %s12291_s18 = smov 4  }
   0x3   :  { %s12371_s13 = sld [smem:[%s15283_s0 + %s12289_s10]]   ;;  %s12292_s22 = smov 5  }
   0x4   :  { %s12376_s17 = sld [smem:[%s15283_s0 + %s12290_s14]]   ;;  %s12293_s26 = smov 6  }
   0x5   :  { %s12381_s21 = sld [smem:[%s15283_s0 + %s12291_s18]]   ;;  %s12294_s30 = smov 7  }
   0x6   :  { %s12386_s25 = sld [smem:[%s15283_s0 + %s12292_s22]]   ;;  %s12295_s4 = smov 8  }
   0x7   :  { %s12391_s29 = sld [smem:[%s15283_s0 + %s12293_s26]]   ;;  %s12296_s10 = smov 9  }
   0x8   :  { %15375 = sst [smem:[#allocation21_spill]] %s12366_s9  ;;  %s12297_s15 = smov 10  }
   0x9   :  { %s12396_s3 = sld [smem:[%s15283_s0 + %s12294_s30]]   ;;  %s12298_s20 = smov 11  }
   0xa   :  { %15376 = sst [smem:[#allocation22_spill]] %s12376_s17  ;;  %s12299_s26 = smov 12  }
   0xb   :  { %s12401_s8 = sld [smem:[%s15283_s0 + %s12295_s4]]   ;;  %s12300_s1 = smov 13  }
   0xc   :  { %s12406_s14 = sld [smem:[%s15283_s0 + %s12296_s10]]   ;;  %s12301_s7 = smov 14  }
   0xd   :  { %s12411_s19 = sld [smem:[%s15283_s0 + %s12297_s15]]   ;;  %s12302_s15 = smov 15  }
   0xe   :  { %s12416_s24 = sld [smem:[%s15283_s0 + %s12298_s20]]   ;;  %s12303_s22 = smov 16  }
   0xf   :  { %s12421_s30 = sld [smem:[%s15283_s0 + %s12299_s26]]   ;;  %s12304_s28 = smov 17  }
  0x10   :  { %s12426_s6 = sld [smem:[%s15283_s0 + %s12300_s1]]  }
  0x11   :  { %s12431_s12 = sld [smem:[%s15283_s0 + %s12301_s7]]   ;;  %s12305_s7 = smov 18  }
  0x12   :  { %s12436_s20 = sld [smem:[%s15283_s0 + %s12302_s15]]   ;;  %s12306_s15 = smov 19  }
  0x13   :  { %15377 = sst [smem:[#allocation23_spill]] %s12411_s19 }
  0x14   :  { %s12441_s27 = sld [smem:[%s15283_s0 + %s12303_s22]]   ;;  %s12307_s22 = smov 20  }
  0x15   :  { %15378 = sst [smem:[#allocation24_spill]] %s12421_s30 }
  0x16   :  { %s12446_s4 = sld [smem:[%s15283_s0 + %s12304_s28]]   ;;  %s12308_s28 = smov 21  }
  0x17   :  { %s12451_s17 = sld [smem:[%s15283_s0 + %s12305_s7]]   ;;  %s12309_s7 = smov 22  }
  0x18   :  { %s12456_s9 = sld [smem:[%s15283_s0 + %s12306_s15]]   ;;  %s12310_s15 = smov 23  }
  0x19   :  { %s12461_s30 = sld [smem:[%s15283_s0 + %s12307_s22]]   ;;  %s12311_s22 = smov 24  }
  0x1a   :  { %15379 = sst [smem:[#allocation25_spill]] %s12441_s27 }
  0x1c   :  { %15380 = sst [smem:[#allocation26_spill]] %s12446_s4 }
  0x1d   :  { %15381 = sst [smem:[#allocation27_spill]] %s12451_s17 }
  0x1e   :  { %15382 = sst [smem:[#allocation28_spill]] %s12456_s9 }
  0x1f   :  { %15383 = sst [smem:[#allocation29_spill]] %s12461_s30 }
  0x20   :  { %s12466_s4 = sld [smem:[%s15283_s0 + %s12308_s28]]   ;;  %s12312_s28 = smov 25  }
  0x21   :  { %s12471_s17 = sld [smem:[%s15283_s0 + %s12309_s7]]   ;;  %s12313_s7 = smov 26  }
  0x22   :  { %s12476_s9 = sld [smem:[%s15283_s0 + %s12310_s15]]   ;;  %s12314_s15 = smov 27  }
  0x23   :  { %s12481_s30 = sld [smem:[%s15283_s0 + %s12311_s22]]   ;;  %s12315_s22 = smov 28  }
  0x24   :  { %s12496_s27 = sld [smem:[%s15283_s0 + %s12314_s15]]   ;;  %s12318_s15 = smov 31  }
  0x26   :  { %15384 = sst [smem:[#allocation30_spill]] %s12466_s4 }
  0x27   :  { %15385 = sst [smem:[#allocation31_spill]] %s12471_s17 }
  0x28   :  { %s12486_s4 = sld [smem:[%s15283_s0 + %s12312_s28]]   ;;  %s12316_s28 = smov 29  }
  0x29   :  { %15386 = sst [smem:[#allocation32_spill]] %s12481_s30 }
  0x2a   :  { %s12491_s17 = sld [smem:[%s15283_s0 + %s12313_s7]]   ;;  %s12317_s7 = smov 30  }
  0x2b   :  { %15388 = sst [smem:[#allocation34_spill]] %s12496_s27 }
  0x2c   :  { %s12501_s30 = sld [smem:[%s15283_s0 + %s12315_s22]]   ;;  %s12319_s22 = smov 32  }
  0x2d   :  { %s12506_s19 = sld [smem:[%s15283_s0 + %s12316_s28]]   ;;  %s12320_s28 = smov 33  }
  0x2e   :  { %s12516_s27 = sld [smem:[%s15283_s0 + %s12318_s15]]   ;;  %s12322_s15 = smov 35  }
  0x30   :  { %15387 = sst [smem:[#allocation33_spill]] %s12491_s17 }
  0x31   :  { %s12511_s17 = sld [smem:[%s15283_s0 + %s12317_s7]]   ;;  %s12321_s7 = smov 34  }
  0x32   :  { %15389 = sst [smem:[#allocation35_spill]] %s12501_s30 }
  0x33   :  { %15390 = sst [smem:[#allocation36_spill]] %s12506_s19 }
  0x34   :  { %15392 = sst [smem:[#allocation38_spill]] %s12516_s27 }
  0x35   :  { %s12521_s30 = sld [smem:[%s15283_s0 + %s12319_s22]]   ;;  %s12323_s22 = smov 36  }
  0x36   :  { %s12526_s19 = sld [smem:[%s15283_s0 + %s12320_s28]]   ;;  %s12324_s28 = smov 37  }
  0x37   :  { %15391 = sst [smem:[#allocation37_spill]] %s12511_s17 }
  0x38   :  { %s12531_s17 = sld [smem:[%s15283_s0 + %s12321_s7]]   ;;  %s12325_s7 = smov 38  }
  0x39   :  { %s12536_s27 = sld [smem:[%s15283_s0 + %s12322_s15]]   ;;  %s12326_s15 = smov 39  }
  0x3b   :  { %15393 = sst [smem:[#allocation39_spill]] %s12521_s30 }
  0x3c   :  { %15394 = sst [smem:[#allocation40_spill]] %s12526_s19 }
  0x3d   :  { %s12541_s30 = sld [smem:[%s15283_s0 + %s12323_s22]]  }
  0x3e   :  { %15395 = sst [smem:[#allocation41_spill]] %s12531_s17 }
  0x3f   :  { %15396 = sst [smem:[#allocation42_spill]] %s12536_s27 }
  0x40   :  { %s12546_s19 = sld [smem:[%s15283_s0 + %s12324_s28]]  }
  0x41   :  { %s12551_s17 = sld [smem:[%s15283_s0 + %s12325_s7]]  }
  0x42   :  { %s12556_s27 = sld [smem:[%s15283_s0 + %s12326_s15]]  }
  0x43   :  { %85 = vsyncpa [#allocation3], 0 }
  0x44   :  { %86 = vsyncpa [#allocation5], 0 }
  0x45   :  { %87 = vsyncpa [#allocation8], 0 }
  0x46   :  { %88 = vsyncpa [#allocation11], 0 }
  0x47   :  { %89 = vsyncpa [#allocation14], 0  ;;  %s12327_s22 = smov [#allocation4]   ;;  %s12328_s26 = smov [#allocation7]  }
  0x48   :  { %s120_s23 = sshll.u32 %s12327_s22, 4  ;;  %s142_s28 = sshll.u32 %s12328_s26, 4  ;;  %s121_s23 = int_to_ptr.vmem [resolvable:$true] %s120_s23  ;;  %s143_s28 = int_to_ptr.vmem [resolvable:$true] %s142_s28 }
  0x49   :  { %s12080_s1 = scalar_lea.hbm %s12401_s8, 16 }
  0x4a   :  { %p12081_p0 = scmp.ne.s32.totalorder %s12401_s8, %s12080_s1  ;;  %p12084_p1 = scmp.lt.u32.totalorder %s12080_s1, %s12401_s8 }
  0x4c   :  { %p12086_p2 = pnand %p12084_p1, %p12081_p0 }
  0x4e   :  { %12089 = shalt.err (!%p12086_p2)
}
  0x4f   :  { %s12090_s0 = scalar_lea.vmem %s121_s23, 16  ;;  %s12094_s2 = scalar_lea.vmem %s121_s23, 32 }
  0x50   :  { %p12091_p3 = scmp.ne.s32.totalorder %s121_s23, %s12090_s0  ;;  %p12095_p4 = scmp.lt.s32.totalorder %s121_s23, %s121_s23 }
  0x51   :  { %p12096_p5 = scmp.lt.s32.totalorder %s12094_s2, %s12090_s0 }
  0x53   :  { %p12097_p6 = por %p12096_p5, %p12095_p4 }
  0x55   :  { %p12098_p7 = pnand %p12097_p6, %p12091_p3 }
  0x57   :  { %12101 = shalt.err (!%p12098_p7)
}
  0x58   :  { %123 = dma.hbm_to_vmem [thread:$0]  %s12401_s8, 16, %s121_s23, [#allocation5]  }
  0x59   :  { %s12102_s7 = scalar_lea.hbm %s12416_s24, 16 }
  0x5a   :  { %p12103_p8 = scmp.ne.s32.totalorder %s12416_s24, %s12102_s7  ;;  %p12106_p9 = scmp.lt.u32.totalorder %s12102_s7, %s12416_s24 }
  0x5c   :  { %p12108_p10 = pnand %p12106_p9, %p12103_p8 }
  0x5e   :  { %12111 = shalt.err (!%p12108_p10)
}
  0x5f   :  { %s12112_s10 = scalar_lea.vmem %s143_s28, 16  ;;  %s12116_s11 = scalar_lea.vmem %s143_s28, 32 }
  0x60   :  { %p12113_p11 = scmp.ne.s32.totalorder %s143_s28, %s12112_s10  ;;  %p12117_p12 = scmp.lt.s32.totalorder %s143_s28, %s143_s28 }
  0x61   :  { %p12118_p13 = scmp.lt.s32.totalorder %s12116_s11, %s12112_s10 }
  0x63   :  { %p12119_p0 = por %p12118_p13, %p12117_p12 }
  0x65   :  { %p12120_p1 = pnand %p12119_p0, %p12113_p11 }
  0x67   :  { %12123 = shalt.err (!%p12120_p1)
}
  0x68   :  { %145 = dma.hbm_to_vmem [thread:$0]  %s12416_s24, 16, %s143_s28, [#allocation8]  }
  0x69   :  { %s12329_s15 = smov [#allocation10]   ;;  %s12330_s16 = smov [#allocation13]  }
  0x6a   :  { %s164_s8 = sshll.u32 %s12329_s15, 4  ;;  %s198_s18 = sshll.u32 %s12330_s16, 4  ;;  %s165_s8 = int_to_ptr.vmem [resolvable:$true] %s164_s8  ;;  %s199_s18 = int_to_ptr.vmem [resolvable:$true] %s198_s18 }
  0x6b   :  { %s12124_s22 = scalar_lea.hbm %s12431_s12, 16 }
  0x6c   :  { %p12125_p2 = scmp.ne.s32.totalorder %s12431_s12, %s12124_s22  ;;  %p12128_p3 = scmp.lt.u32.totalorder %s12124_s22, %s12431_s12 }
  0x6e   :  { %p12130_p4 = pnand %p12128_p3, %p12125_p2 }
  0x70   :  { %12133 = shalt.err (!%p12130_p4)
}
  0x71   :  { %s12134_s23 = scalar_lea.vmem %s165_s8, 16  ;;  %s12138_s26 = scalar_lea.vmem %s165_s8, 32 }
  0x72   :  { %p12135_p5 = scmp.ne.s32.totalorder %s165_s8, %s12134_s23  ;;  %p12139_p6 = scmp.lt.s32.totalorder %s165_s8, %s165_s8 }
  0x73   :  { %p12140_p7 = scmp.lt.s32.totalorder %s12138_s26, %s12134_s23 }
  0x75   :  { %p12141_p8 = por %p12140_p7, %p12139_p6 }
  0x77   :  { %p12142_p9 = pnand %p12141_p8, %p12135_p5 }
  0x79   :  { %12145 = shalt.err (!%p12142_p9)
}
  0x7a   :  { %167 = dma.hbm_to_vmem [thread:$0]  %s12431_s12, 16, %s165_s8, [#allocation11]  }
  0x7b   :  { %s12146_s24 = scalar_lea.hbm %s12476_s9, 16 }
  0x7c   :  { %p12147_p10 = scmp.ne.s32.totalorder %s12476_s9, %s12146_s24  ;;  %p12150_p11 = scmp.lt.u32.totalorder %s12146_s24, %s12476_s9 }
  0x7e   :  { %p12152_p12 = pnand %p12150_p11, %p12147_p10 }
  0x80   :  { %12155 = shalt.err (!%p12152_p12)
}
  0x81   :  { %s12156_s28 = scalar_lea.vmem %s199_s18, 16  ;;  %s12160_s1 = scalar_lea.vmem %s199_s18, 32 }
  0x82   :  { %p12157_p13 = scmp.ne.s32.totalorder %s199_s18, %s12156_s28  ;;  %p12161_p0 = scmp.lt.s32.totalorder %s199_s18, %s199_s18 }
  0x83   :  { %p12162_p1 = scmp.lt.s32.totalorder %s12160_s1, %s12156_s28 }
  0x85   :  { %p12163_p2 = por %p12162_p1, %p12161_p0 }
  0x87   :  { %p12164_p3 = pnand %p12163_p2, %p12157_p13 }
  0x89   :  { %12167 = shalt.err (!%p12164_p3)
}
  0x8a   :  { %201 = dma.hbm_to_vmem [thread:$0]  %s12476_s9, 16, %s199_s18, [#allocation14]  }
  0x8b   :  { %s12331_s0 = smov [#allocation2]   ;;  %s12332_s2 = smov [#allocation6]  }
  0x8c   :  { %s106_s12 = sshll.u32 %s12331_s0, 4  ;;  %s130_s7 = sshll.u32 %s12332_s2, 4  ;;  %s107_s12 = int_to_ptr.vmem [resolvable:$true] %s106_s12  ;;  %s131_s7 = int_to_ptr.vmem [resolvable:$true] %s130_s7 }
  0x8d   :  { %s12168_s10 = scalar_lea.hbm %s12386_s25, 32 }
  0x8e   :  { %p12169_p4 = scmp.ne.s32.totalorder %s12386_s25, %s12168_s10  ;;  %p12172_p5 = scmp.lt.u32.totalorder %s12168_s10, %s12386_s25 }
  0x90   :  { %p12174_p6 = pnand %p12172_p5, %p12169_p4 }
  0x92   :  { %12177 = shalt.err (!%p12174_p6)
}
  0x93   :  { %s12178_s11 = scalar_lea.vmem %s107_s12, 32  ;;  %p12183_p8 = scmp.lt.s32.totalorder %s107_s12, %s107_s12 }
  0x94   :  { %p12179_p7 = scmp.ne.s32.totalorder %s107_s12, %s12178_s11  ;;  %p12184_p9 = scmp.lt.s32.totalorder %s12178_s11, %s12178_s11 }
  0x96   :  { %p12185_p10 = por %p12184_p9, %p12183_p8 }
  0x98   :  { %p12186_p11 = pnand %p12185_p10, %p12179_p7 }
  0x9a   :  { %12189 = shalt.err (!%p12186_p11)
}
  0x9b   :  { %109 = dma.hbm_to_vmem [thread:$0]  %s12386_s25, 32, %s107_s12, [#allocation3]  }
  0x9c   :  { %s12190_s9 = scalar_lea.hbm %s12406_s14, 16 }
  0x9d   :  { %p12191_p12 = scmp.ne.s32.totalorder %s12406_s14, %s12190_s9  ;;  %p12194_p13 = scmp.lt.u32.totalorder %s12190_s9, %s12406_s14 }
  0x9f   :  { %p12196_p0 = pnand %p12194_p13, %p12191_p12 }
  0xa1   :  { %12199 = shalt.err (!%p12196_p0)
}
  0xa2   :  { %s12200_s15 = scalar_lea.vmem %s131_s7, 16  ;;  %s12204_s8 = scalar_lea.vmem %s131_s7, 32 }
  0xa3   :  { %p12201_p1 = scmp.ne.s32.totalorder %s131_s7, %s12200_s15  ;;  %p12205_p2 = scmp.lt.s32.totalorder %s131_s7, %s131_s7 }
  0xa4   :  { %p12206_p3 = scmp.lt.s32.totalorder %s12204_s8, %s12200_s15 }
  0xa6   :  { %p12207_p4 = por %p12206_p3, %p12205_p2 }
  0xa8   :  { %p12208_p5 = pnand %p12207_p4, %p12201_p1 }
  0xaa   :  { %12211 = shalt.err (!%p12208_p5)
}
  0xab   :  { %133 = dma.hbm_to_vmem [thread:$0]  %s12406_s14, 16, %s131_s7, [#allocation5]  }
  0xac   :  { %s12333_s16 = smov [#allocation9]   ;;  %s12334_s18 = smov [#allocation12]  }
  0xad   :  { %s154_s25 = sshll.u32 %s12333_s16, 4  ;;  %s174_s22 = sshll.u32 %s12334_s18, 4  ;;  %s155_s25 = int_to_ptr.vmem [resolvable:$true] %s154_s25  ;;  %s175_s22 = int_to_ptr.vmem [resolvable:$true] %s174_s22 }
  0xae   :  { %s12212_s23 = scalar_lea.hbm %s12426_s6, 16 }
  0xaf   :  { %p12213_p6 = scmp.ne.s32.totalorder %s12426_s6, %s12212_s23  ;;  %p12216_p7 = scmp.lt.u32.totalorder %s12212_s23, %s12426_s6 }
  0xb1   :  { %p12218_p8 = pnand %p12216_p7, %p12213_p6 }
  0xb3   :  { %12221 = shalt.err (!%p12218_p8)
}
  0xb4   :  { %s12222_s26 = scalar_lea.vmem %s155_s25, 16  ;;  %s12226_s24 = scalar_lea.vmem %s155_s25, 32 }
  0xb5   :  { %p12223_p9 = scmp.ne.s32.totalorder %s155_s25, %s12222_s26  ;;  %p12227_p10 = scmp.lt.s32.totalorder %s155_s25, %s155_s25 }
  0xb6   :  { %p12228_p11 = scmp.lt.s32.totalorder %s12226_s24, %s12222_s26 }
  0xb8   :  { %p12229_p12 = por %p12228_p11, %p12227_p10 }
  0xba   :  { %p12230_p13 = pnand %p12229_p12, %p12223_p9 }
  0xbc   :  { %12233 = shalt.err (!%p12230_p13)
}
  0xbd   :  { %157 = dma.hbm_to_vmem [thread:$0]  %s12426_s6, 16, %s155_s25, [#allocation8]  }
  0xbe   :  { %s12234_s14 = scalar_lea.hbm %s12436_s20, 16 }
  0xbf   :  { %p12235_p0 = scmp.ne.s32.totalorder %s12436_s20, %s12234_s14  ;;  %p12238_p1 = scmp.lt.u32.totalorder %s12234_s14, %s12436_s20 }
  0xc1   :  { %p12240_p2 = pnand %p12238_p1, %p12235_p0 }
  0xc3   :  { %12243 = shalt.err (!%p12240_p2)
}
  0xc4   :  { %s12244_s28 = scalar_lea.vmem %s175_s22, 16  ;;  %s12248_s1 = scalar_lea.vmem %s175_s22, 32 }
  0xc5   :  { %p12245_p3 = scmp.ne.s32.totalorder %s175_s22, %s12244_s28  ;;  %p12249_p4 = scmp.lt.s32.totalorder %s175_s22, %s175_s22 }
  0xc6   :  { %p12250_p5 = scmp.lt.s32.totalorder %s12248_s1, %s12244_s28 }
  0xc8   :  { %p12251_p6 = por %p12250_p5, %p12249_p4 }
  0xca   :  { %p12252_p7 = pnand %p12251_p6, %p12245_p3 }
  0xcc   :  { %12255 = shalt.err (!%p12252_p7)
}
  0xcd   :  { %177 = dma.hbm_to_vmem [thread:$0]  %s12436_s20, 16, %s175_s22, [#allocation11]  }
  0xce   :  { %s12335_s0 = smov [#allocation15]   ;;  %s12256_s12 = scalar_lea.hbm %s12486_s4, 16 }
  0xcf   :  { %s210_s6 = sshll.u32 %s12335_s0, 4  ;;  %p12257_p8 = scmp.ne.s32.totalorder %s12486_s4, %s12256_s12  ;;  %s211_s6 = int_to_ptr.vmem [resolvable:$true] %s210_s6 }
  0xd0   :  { %p12260_p9 = scmp.lt.u32.totalorder %s12256_s12, %s12486_s4 }
  0xd2   :  { %p12262_p10 = pnand %p12260_p9, %p12257_p8 }
  0xd4   :  { %12265 = shalt.err (!%p12262_p10)
}
  0xd5   :  { %s12266_s2 = scalar_lea.vmem %s211_s6, 16  ;;  %s12270_s7 = scalar_lea.vmem %s211_s6, 32 }
  0xd6   :  { %p12267_p11 = scmp.ne.s32.totalorder %s211_s6, %s12266_s2  ;;  %p12271_p12 = scmp.lt.s32.totalorder %s211_s6, %s211_s6 }
  0xd7   :  { %p12272_p13 = scmp.lt.s32.totalorder %s12270_s7, %s12266_s2 }
  0xd9   :  { %p12273_p0 = por %p12272_p13, %p12271_p12 }
  0xdb   :  { %p12274_p1 = pnand %p12273_p0, %p12267_p11 }
  0xdd   :  { %12277 = shalt.err (!%p12274_p1)
}
  0xde   :  { %213 = dma.hbm_to_vmem [thread:$0]  %s12486_s4, 16, %s211_s6, [#allocation14]  }
  0xdf   :  { %12278 = dma.done.wait [#allocation3], 32  }
  0xe0   :  { %12279 = vsyncadd [#allocation3], 4294967264 }
  0xe1   :  { %12280 = dma.done.wait [#allocation5], 32  }
  0xe2   :  { %12281 = vsyncadd [#allocation5], 4294967264 }
  0xe3   :  { %12282 = dma.done.wait [#allocation8], 32  }
  0xe4   :  { %12283 = vsyncadd [#allocation8], 4294967264 }
  0xe5   :  { %12284 = dma.done.wait [#allocation11], 32  }
  0xe6   :  { %12285 = vsyncadd [#allocation11], 4294967264 }
  0xe7   :  { %12286 = dma.done.wait [#allocation14], 32  }
  0xe8   :  { %12287 = vsyncadd [#allocation14], 4294967264  ;;  %v15301_v0 = vmov 0.0   ;;  %v286_v1 = vld [vmem:[%s12381_s21 + $0x8] sm:$0xff]  ;;  %v288_v2 = vld [vmem:[%s12381_s21 + $0x18] sm:$0xff]  ;;  %vm313_vm0 = vcmask 523264   ;;  %v303_v31 = vlaneseq }
  0xe9   :  { %396 = vmatprep.mubr.f32.mxu0 %v15301_v0  ;;  %v285_v3 = vld [vmem:[%s12381_s21] sm:$0xff]  ;;  %v12598_v4 = vpack.c.bf16 %v288_v2, %v286_v1  ;;  %v287_v5 = vld [vmem:[%s12381_s21 + $0x10] sm:$0xff]  ;;  %v290_v6 = vld [vmem:[%s12381_s21 + $0x28] sm:$0xff]  ;;  %vm451_vm1 = vcmask 130048   ;;  %s12338_s20 = smov 48   ;;  %s12339_s4 = smov 112  }
  0xea   :  { %v292_v7 = vld [vmem:[%s12381_s21 + $0x38] sm:$0xff]  ;;  %v12603_v8 = vpack.c.bf16 %v287_v5, %v285_v3  ;;  %v289_v10 = vld [vmem:[%s12381_s21 + $0x20] sm:$0xff]  ;;  %v291_v11 = vld [vmem:[%s12381_s21 + $0x30] sm:$0xff]  ;;  %v304_v32 = vshrl.u32 %v303_v31, 7  ;;  %s12340_s10 = smov 32   ;;  %s12341_s11 = smov 96  }
  0xeb   :  { %v12605_v9 = vpack.c.bf16 %v292_v7, %v290_v6  ;;  %v294_v12 = vld [vmem:[%s12381_s21 + $0x48] sm:$0xff]  ;;  %10495 = vmatprep.subr.bf16.mxu0 %v12598_v4  ;;  %v296_v13 = vld [vmem:[%s12381_s21 + $0x58] sm:$0xff]  ;;  %v12613_v14 = vpack.c.bf16 %v291_v11, %v289_v10  ;;  %v293_v16 = vld [vmem:[%s12381_s21 + $0x40] sm:$0xff]  ;;  %vm651_vm3 = vcmask 1045504   ;;  %vm12342_vm4 = vmmov 1   ;;  %s12343_s9 = smov 16  }
  0xec   :  { %10497 = vmatpush1.bf16.msra.mxu0 %v12603_v8  ;;  %v12616_v15 = vpack.c.bf16 %v296_v13, %v294_v12  ;;  %v295_v17 = vld [vmem:[%s12381_s21 + $0x50] sm:$0xff]  ;;  %v298_v18 = vld [vmem:[%s12381_s21 + $0x68] sm:$0xff]  ;;  %v300_v19 = vld [vmem:[%s12381_s21 + $0x78] sm:$0xff]  ;;  %v305_v33 = vsub.s32 0, %v304_v32  ;;  %v309_v36 = vsub.s32 1, %v304_v32  ;;  %vm571_vm6 = vcmask 375808  }
  0xed   :  { %10499 = vmatprep.subr.bf16.mxu0 %v12605_v9  ;;  %v12623_v20 = vpack.c.bf16 %v295_v17, %v293_v16  ;;  %v12626_v21 = vpack.c.bf16 %v300_v19, %v298_v18  ;;  %v297_v22 = vld [vmem:[%s12381_s21 + $0x60] sm:$0xff]  ;;  %v299_v23 = vld [vmem:[%s12381_s21 + $0x70] sm:$0xff]  ;;  %v266_v26 = vld [vmem:[%s12361_s5 + $0x8] sm:$0xff]  ;;  %s12337_s21 = smov 64   ;;  %v15401_v16 = vmov 0  ;;  %vm587_vm7 = vcmask 373760  }
  0xee   :  { %v12631_v24 = vpack.c.bf16 %v299_v23, %v297_v22  ;;  %v265_v25 = vld [vmem:[%s12361_s5] sm:$0xff]  ;;  %v267_v27 = vld [vmem:[%s12361_s5 + $0x10] sm:$0xff]  ;;  %v268_v28 = vld [vmem:[%s12361_s5 + $0x18] sm:$0xff]  ;;  %s12344_s15 = smov 80   ;;  %vm1862_vm8 = vcmask 261120   ;;  %vm1869_vm9 = vcmask 392192  }
  0xef   :  { %15397 = vst [vmem:[#allocation43_spill] sm:$0xff] %v12626_v21  ;;  %v269_v29 = vld [vmem:[%s12361_s5 + $0x20] sm:$0xff]  ;;  %v270_v30 = vld [vmem:[%s12361_s5 + $0x28] sm:$0x3f]  ;;  %vm12762_vm2 = vmpackc.low %vm451_vm1, %vm451_vm1  ;;  %vm2031_vm10 = vcmask 521216   ;;  %s15412_s8 = sld [smem:[#allocation24_spill]] }
  0xf0   :  { %10501 = vmatpush1.bf16.msra.mxu0 %v12613_v14  ;;  %15398 = vst [vmem:[#allocation44_spill] sm:$0xff] %v12631_v24  ;;  %v301_v34 = vld [vmem:[#allocation2] sm:$0x3]  ;;  %v15402_v16 = vsel %vm12762_vm2, 4294967295, %v15401_v16  ;;  %vm12803_vm5 = vmpackc.low %vm651_vm3, %vm12342_vm4  ;;  %s15423_s16 = sld [smem:[#allocation21_spill]]  ;;  %s15425_s25 = sld [smem:[#allocation26_spill]] }
  0xf1   :  { %10503 = vmatprep.subr.bf16.mxu0 %v12616_v15  ;;  %v12652_v35 = vrot.slane %v301_v34, %v305_v33  ;;  %v12657_v40 = vrot.slane %v301_v34, %v309_v36  ;;  %15403 = vst [vmem:[#allocation47_spill] sm:$0xff] %v15402_v16  ;;  %vm2610_vm11 = vcmask 64512   ;;  %s15429_s18 = sld [smem:[#allocation22_spill]]  ;;  %s12345_s22 = smov 88   ;;  %vm3731_vm13 = vcmask 195584  }
  0xf2   :  { %vm13480_vm12 = vmpackc.low %vm2610_vm11, %vm2610_vm11  ;;  %s12346_s23 = smov 120   ;;  %s12347_s26 = smov 56  }
  0xf3   :  { %15399 = vst [vmem:[#allocation45_spill] sm:$0xff] %v12652_v35  ;;  %15400 = vst [vmem:[#allocation46_spill] sm:$0xff] %v12657_v40  ;;  %s12348_s24 = smov 72   ;;  %s12349_s14 = smov 104  }
  0xf4   :  { %10505 = vmatpush1.bf16.msra.mxu0 %v12623_v20  ;;  %s12350_s28 = smov 40   ;;  %s12351_s1 = smov 8  }
  0xf5   :  { %10507 = vmatprep.subr.bf16.mxu0 %v12626_v21  ;;  %s15430_s0 = sld [smem:[#allocation27_spill]]  ;;  %s12352_s6 = smov 24  }
  0xf6   :  { %s15433_s12 = sld [smem:[#allocation28_spill]]  ;;  %s15434_s2 = sld [smem:[#allocation31_spill]] }
  0xf7   :  { %s15435_s7 = sld [smem:[#allocation32_spill]] }
  0xf8   :  { %10509 = vmatpush1.bf16.msra.mxu0 %v12631_v24 }
  0xfb   :  { %8683 = vmatmul.mubr.msk.f32.vlgmr.msra.gmra.mrb[0].mxu0 %vm313_vm0, %v265_v25 }
  0xfc   :  { %402 = vmatprep.mubr.f32.mxu0 %v15301_v0 }
  0xff   :  { %8684 = vmatmul.mubr.msk.f32.gmra.mrb[2].mxu0 %vm313_vm0, %v266_v26 }
 0x100   :  { %408 = vmatprep.mubr.f32.mxu0 %v15301_v0 }
 0x103   :  { %8685 = vmatmul.mubr.msk.f32.gmra.mrb[4].mxu0 %vm313_vm0, %v267_v27 }
 0x104   :  { %414 = vmatprep.mubr.f32.mxu0 %v15301_v0 }
 0x107   :  { %8686 = vmatmul.mubr.msk.f32.gmra.mrb[6].mxu0 %vm313_vm0, %v268_v28 }
 0x108   :  { %420 = vmatprep.mubr.f32.mxu0 %v15301_v0 }
 0x10b   :  { %8687 = vmatmul.mubr.msk.f32.gmra.mrb[8].mxu0 %vm313_vm0, %v269_v29 }
 0x10c   :  { %426 = vmatprep.mubr.f32.mxu0 %v15301_v0 }
 0x10f   :  { %8688 = vmatmul.mubr.msk.f32.gmra.mrb[10].mxu0 %vm313_vm0, %v270_v30 }
 0x1ce   :  { %v398_v37 = vpop.f32.mrb[0].mxu0 }
 0x1cf   :  { %v12655_v38 = vadd.f32 %v398_v37, %v12652_v35  ;;  %v400_v39 = vpop.f32.mrb[1].mxu0 }
 0x1d0   :  { %v401_v44 = vadd.f32 %v400_v39, %v12657_v40 }
 0x1d1   :  { %9577 = vmatprep.mubr.msk.f32.mxu1 %vm451_vm1, %v12655_v38 }
 0x1d2   :  { %v404_v41 = vpop.f32.mrb[2].mxu0 }
 0x1d3   :  { %v12662_v42 = vadd.f32 %v404_v41, %v12652_v35  ;;  %v406_v43 = vpop.f32.mrb[3].mxu0 }
 0x1d4   :  { %v407_v45 = vadd.f32 %v406_v43, %v12657_v40 }
 0x1d5   :  { %v12668_v46 = vpack.i.bf16 %v12662_v42, %v12655_v38 }
 0x1d6   :  { %v410_v47 = vpop.f32.mrb[4].mxu0  ;;  %v12670_v48 = vpack.i.bf16 %v407_v45, %v401_v44  ;;  %v12672_v49 = vpack.c.bf16 %v407_v45, %v401_v44 }
 0x1d7   :  { %v412_v50 = vpop.f32.mrb[5].mxu0  ;;  %11254 = vrot.lane.b32.xlu0 %v12668_v46, %s12337_s21  ;;  %v12677_v52 = vadd.f32 %v410_v47, %v12652_v35 }
 0x1d8   :  { %v413_v55 = vadd.f32 %v412_v50, %v12657_v40 }
 0x1da   :  { %v416_v51 = vpop.f32.mrb[6].mxu0 }
 0x1db   :  { %v12680_v53 = vadd.f32 %v416_v51, %v12652_v35  ;;  %v418_v54 = vpop.f32.mrb[7].mxu0  ;;  %11259 = vrot.lane.b32.xlu0 %v12668_v46, %s12338_s20 }
 0x1dc   :  { %v419_v56 = vadd.f32 %v418_v54, %v12657_v40 }
 0x1dd   :  { %v12688_v57 = vpack.i.bf16 %v12680_v53, %v12677_v52 }
 0x1de   :  { %v422_v58 = vpop.f32.mrb[8].mxu0  ;;  %v12690_v59 = vpack.i.bf16 %v419_v56, %v413_v55  ;;  %v12692_v60 = vpack.c.bf16 %v419_v56, %v413_v55 }
 0x1df   :  { %11264 = vrot.lane.b32.xlu1 %v12688_v57, %s12337_s21  ;;  %v424_v61 = vpop.f32.mrb[9].mxu0  ;;  %v12697_v62 = vadd.f32 %v422_v58, %v12652_v35 }
 0x1e0   :  { %v425_v63 = vadd.f32 %v424_v61, %v12657_v40 }
 0x1e2   :  { %v428_v1 = vpop.f32.mrb[10].mxu0 }
 0x1e3   :  { %v12701_v2 = vadd.f32 %v428_v1, %v12652_v35  ;;  %v430_v3 = vpop.f32.mrb[11].mxu0  ;;  %11269 = vrot.lane.b32.xlu1 %v12688_v57, %s12338_s20 }
 0x1e4   :  { %v431_v5 = vadd.f32 %v430_v3, %v12657_v40 }
 0x1e5   :  { %v12708_v6 = vpack.i.bf16 %v12701_v2, %v12697_v62 }
 0x1e6   :  { %v12710_v7 = vpack.i.bf16 %v431_v5, %v425_v63  ;;  %v12712_v10 = vpack.c.bf16 %v431_v5, %v425_v63 }
 0x1e7   :  { %11279 = vrot.lane.b32.xlu1 %v12708_v6, %s12338_s20  ;;  %11274 = vrot.lane.b32.xlu0 %v12708_v6, %s12337_s21 }
 0x1eb   :  { %756 = vrot.lane.b32.xlu1 %v12655_v38, %s12339_s4  ;;  %11284 = vrot.lane.b32.xlu0 %v12668_v46, %s12340_s10 }
 0x1ef   :  { %11289 = vrot.lane.b32.xlu1 %v12688_v57, %s12340_s10  ;;  %758 = vrot.lane.b32.xlu0 %v12662_v42, %s12339_s4 }
 0x1f3   :  { %760 = vrot.lane.b32.xlu1 %v12677_v52, %s12339_s4  ;;  %11294 = vrot.lane.b32.xlu0 %v12708_v6, %s12340_s10 }
 0x1f7   :  { %764 = vrot.lane.b32.xlu1 %v12697_v62, %s12339_s4  ;;  %762 = vrot.lane.b32.xlu0 %v12680_v53, %s12339_s4 }
 0x1fb   :  { %1102 = vrot.lane.b32.xlu1 %v12655_v38, %s12341_s11  ;;  %766 = vrot.lane.b32.xlu0 %v12701_v2, %s12339_s4 }
 0x1ff   :  { %1106 = vrot.lane.b32.xlu1 %v12677_v52, %s12341_s11  ;;  %1104 = vrot.lane.b32.xlu0 %v12662_v42, %s12341_s11 }
 0x203   :  { %1110 = vrot.lane.b32.xlu1 %v12697_v62, %s12341_s11  ;;  %1108 = vrot.lane.b32.xlu0 %v12680_v53, %s12341_s11 }
 0x207   :  { %11304 = vrot.lane.b32.xlu1 %v12690_v59, %s12339_s4  ;;  %1112 = vrot.lane.b32.xlu0 %v12701_v2, %s12341_s11 }
 0x20b   :  { %11314 = vrot.lane.b32.xlu1 %v12690_v59, %s12341_s11  ;;  %11299 = vrot.lane.b32.xlu0 %v12670_v48, %s12339_s4 }
 0x20f   :  { %11309 = vrot.lane.b32.xlu0 %v12670_v48, %s12341_s11 }
 0x213   :  { %11319 = vrot.lane.b32.xlu0 %v12710_v7, %s12339_s4 }
 0x217   :  { %11324 = vrot.lane.b32.xlu0 %v12710_v7, %s12341_s11 }
 0x249   :  { %v11255_v11 = vpop.permute.xlu0 %11254 }
 0x24a   :  { %v11257_v12 = vunpack.i.h.bf16 %v11255_v11  ;;  %v11256_v13 = vunpack.i.l.bf16 %v11255_v11 }
 0x24c   :  { %v10510_v17 = vpack.c.bf16 %v11257_v12, %v11256_v13 }
 0x24d   :  { %v11260_v18 = vpop.permute.xlu0 %11259 }
 0x24e   :  { %v11262_v19 = vunpack.i.h.bf16 %v11260_v18  ;;  %v11261_v22 = vunpack.i.l.bf16 %v11260_v18  ;;  %10512 = vmatprep.subr.msk.bf16.mxu1 %vm12762_vm2, %v10510_v17 }
 0x24f   :  { %10515 = vmatpush3.bf16.xpose.msk.msra.mxu1 %vm12762_vm2, %v10510_v17 }
 0x250   :  { %v10542_v23 = vpack.c.bf16 %v11262_v19, %v11261_v22 }
 0x251   :  { %v11265_v25 = vpop.permute.xlu1 %11264 }
 0x252   :  { %v11267_v26 = vunpack.i.h.bf16 %v11265_v25  ;;  %v11266_v27 = vunpack.i.l.bf16 %v11265_v25  ;;  %10544 = vmatprep.subr.msk.bf16.mxu0 %vm12762_vm2, %v10542_v23 }
 0x253   :  { %10547 = vmatpush3.bf16.xpose.msk.msra.mxu0 %vm12762_vm2, %v10542_v23 }
 0x254   :  { %v10516_v28 = vpack.c.bf16 %v11267_v26, %v11266_v27 }
 0x255   :  { %v11270_v29 = vpop.permute.xlu1 %11269 }
 0x256   :  { %v11272_v30 = vunpack.i.h.bf16 %v11270_v29  ;;  %v11271_v31 = vunpack.i.l.bf16 %v11270_v29  ;;  %10518 = vmatprep.subr.msk.bf16.mxu1 %vm12762_vm2, %v10516_v28 }
 0x257   :  { %10521 = vmatpush3.bf16.xpose.msk.msra.mxu1 %vm12762_vm2, %v10516_v28 }
 0x258   :  { %v10548_v32 = vpack.c.bf16 %v11272_v30, %v11271_v31  ;;  %v12842_v30 = vld [vmem:[%s12371_s13 + $0x8] sm:$0xff] }
 0x259   :  { %v11280_v33 = vpop.permute.xlu1 %11279  ;;  %v11275_v34 = vpop.permute.xlu0 %11274 }
 0x25a   :  { %v11282_v36 = vunpack.i.h.bf16 %v11280_v33  ;;  %v11281_v37 = vunpack.i.l.bf16 %v11280_v33  ;;  %v11277_v39 = vunpack.i.h.bf16 %v11275_v34  ;;  %v11276_v41 = vunpack.i.l.bf16 %v11275_v34  ;;  %10550 = vmatprep.subr.msk.bf16.mxu0 %vm12762_vm2, %v10548_v32 }
 0x25b   :  { %10553 = vmatpush3.bf16.xpose.msk.msra.mxu0 %vm12762_vm2, %v10548_v32 }
 0x25c   :  { %v10554_v43 = vpack.c.bf16 %v11282_v36, %v11281_v37  ;;  %v10522_v44 = vpack.c.bf16 %v11277_v39, %v11276_v41  ;;  %v12850_v36 = vld [vmem:[%s12371_s13] sm:$0xff] }
 0x25d   :  { %v757_v45 = vpop.permute.xlu1 %756  ;;  %v11285_v47 = vpop.permute.xlu0 %11284 }
 0x25e   :  { %v11287_v50 = vunpack.i.h.bf16 %v11285_v47  ;;  %v11286_v51 = vunpack.i.l.bf16 %v11285_v47  ;;  %10524 = vmatprep.subr.msk.bf16.mxu1 %vm12762_vm2, %v10522_v44  ;;  %10556 = vmatprep.subr.msk.bf16.mxu0 %vm12762_vm2, %v10554_v43 }
 0x25f   :  { %9619 = vmatprep.mubr.msk.f32.mxu0 %vm451_vm1, %v757_v45  ;;  %10527 = vmatpush3.bf16.xpose.msk.msra.mxu1 %vm12762_vm2, %v10522_v44  ;;  %v12856_v44 = vld [vmem:[%s12371_s13 + $0x10] sm:$0xff] }
 0x260   :  { %10529 = vmatprep.subr.bf16.mxu1 %v12672_v49  ;;  %v10574_v56 = vpack.c.bf16 %v11287_v50, %v11286_v51 }
 0x261   :  { %v11290_v54 = vpop.permute.xlu1 %11289  ;;  %v759_v55 = vpop.permute.xlu0 %758 }
 0x262   :  { %v11292_v63 = vunpack.i.h.bf16 %v11290_v54  ;;  %v11291_v1 = vunpack.i.l.bf16 %v11290_v54  ;;  %v12867_v54 = vld [vmem:[%s12371_s13 + $0x18] sm:$0xff] }
 0x263   :  { %10559 = vmatpush3.bf16.xpose.msk.msra.mxu0 %vm12762_vm2, %v10554_v43 }
 0x264   :  { %10576 = vmatprep.subr.msk.bf16.mxu0 %vm12762_vm2, %v10574_v56  ;;  %v10580_v11 = vpack.c.bf16 %v11292_v63, %v11291_v1 }
 0x265   :  { %v11295_v58 = vpop.permute.xlu0 %11294  ;;  %v761_v61 = vpop.permute.xlu1 %760 }
 0x266   :  { %9578 = vmatmul.mubr.msk.f32.vlgmr.msra.gmra.mrb[0].mxu1 %vm451_vm1, %v12662_v42  ;;  %v11296_v13 = vunpack.i.l.bf16 %v11295_v58 }
 0x267   :  { %9580 = vmatprep.mubr.msk.f32.mxu1 %vm451_vm1, %v12677_v52  ;;  %10531 = vmatpush3.bf16.msra.mxu1 %v12672_v49 }
 0x268   :  { %10533 = vmatprep.subr.bf16.mxu1 %v12692_v60 }
 0x269   :  { %v763_v3 = vpop.permute.xlu0 %762  ;;  %v765_v49 = vpop.permute.xlu1 %764 }
 0x26a   :  { %9581 = vmatmul.mubr.msk.f32.gmra.mrb[2].mxu1 %vm451_vm1, %v12680_v53  ;;  %9620 = vmatmul.mubr.msk.f32.vlgmr.msra.gmra.mrb[12].mxu0 %vm451_vm1, %v759_v55 }
 0x26b   :  { %9583 = vmatprep.mubr.msk.f32.mxu1 %vm451_vm1, %v12697_v62  ;;  %10535 = vmatpush3.bf16.msra.mxu1 %v12692_v60  ;;  %v11297_v60 = vunpack.i.h.bf16 %v11295_v58 }
 0x26c   :  { %9622 = vmatprep.mubr.msk.f32.mxu0 %vm451_vm1, %v761_v61  ;;  %10579 = vmatpush3.bf16.xpose.msk.msra.mxu0 %vm12762_vm2, %v10574_v56 }
 0x26d   :  { %10538 = vmatprep.subr.msk.bf16.mxu1 %vm12803_vm5, %v12712_v10  ;;  %10582 = vmatprep.subr.msk.bf16.mxu0 %vm12762_vm2, %v10580_v11  ;;  %v767_v12 = vpop.permute.xlu0 %766  ;;  %v1103_v18 = vpop.permute.xlu1 %1102  ;;  %v10586_v19 = vpack.c.bf16 %v11297_v60, %v11296_v13  ;;  %v12885_v13 = vld [vmem:[%s12371_s13 + $0x20] sm:$0xff] }
 0x26e   :  { %9584 = vmatmul.mubr.msk.f32.gmra.mrb[4].mxu1 %vm451_vm1, %v12701_v2  ;;  %9623 = vmatmul.mubr.msk.f32.gmra.mrb[14].mxu0 %vm451_vm1, %v763_v3 }
 0x26f   :  { %10541 = vmatpush3.bf16.msk.msra.mxu1 %vm12803_vm5, %v12712_v10  ;;  %9625 = vmatprep.mubr.msk.f32.mxu0 %vm451_vm1, %v765_v49 }
 0x271   :  { %v1105_v17 = vpop.permute.xlu0 %1104  ;;  %v1107_v28 = vpop.permute.xlu1 %1106 }
 0x272   :  { %9626 = vmatmul.mubr.msk.f32.gmra.mrb[16].mxu0 %vm451_vm1, %v767_v12 }
 0x273   :  { %9661 = vmatprep.mubr.msk.f32.mxu0 %vm451_vm1, %v1103_v18 }
 0x274   :  { %10585 = vmatpush3.bf16.xpose.msk.msra.mxu0 %vm12762_vm2, %v10580_v11 }
 0x275   :  { %10588 = vmatprep.subr.msk.bf16.mxu0 %vm12762_vm2, %v10586_v19  ;;  %v1109_v22 = vpop.permute.xlu0 %1108  ;;  %v1111_v29 = vpop.permute.xlu1 %1110 }
 0x279   :  { %v1113_v23 = vpop.permute.xlu0 %1112 }
 0x27c   :  { %10591 = vmatpush3.bf16.xpose.msk.msra.mxu0 %vm12762_vm2, %v10586_v19 }
 0x27d   :  { %v11300_v10 = vpop.permute.xlu0 %11299 }
 0x27e   :  { %v11302_v25 = vunpack.i.h.bf16 %v11300_v10  ;;  %v11301_v26 = vunpack.i.l.bf16 %v11300_v10 }
 0x280   :  { %v12833_v27 = vpack.c.bf16 %v11302_v25, %v11301_v26 }
 0x282   :  { %10561 = vmatprep.subr.bf16.mxu1 %v12833_v27 }
 0x283   :  { %9662 = vmatmul.mubr.msk.f32.vlgmr.msra.gmra.mrb[18].mxu0 %vm451_vm1, %v1105_v17 }
 0x284   :  { %9664 = vmatprep.mubr.msk.f32.mxu0 %vm451_vm1, %v1107_v28 }
 0x287   :  { %9665 = vmatmul.mubr.msk.f32.gmra.mrb[20].mxu0 %vm451_vm1, %v1109_v22  ;;  %v12893_v22 = vld [vmem:[%s12371_s13 + $0x28] sm:$0x3f] }
 0x288   :  { %9667 = vmatprep.mubr.msk.f32.mxu0 %vm451_vm1, %v1111_v29 }
 0x28b   :  { %9668 = vmatmul.mubr.msk.f32.gmra.mrb[22].mxu0 %vm451_vm1, %v1113_v23 }
 0x339   :  { %v9579_v31 = vpop.f32.mrb[0].mxu1 }
 0x33a   :  { %v12845_v32 = vadd.f32 %v9579_v31, %v12842_v30  ;;  %v542_v33 = vpop.f32.mrb[1].mxu1 }
 0x33b   :  { %v12862_v50 = vadd.f32 %v542_v33, %v12850_v36 }
 0x33c   :  { %v575_v34 = vsel %vm571_vm6, %v12845_v32, -inf }
 0x33d   :  { %v9621_v37 = vpop.f32.mrb[12].mxu0  ;;  %576 = vmax.xlane.f32.xlu0 %v575_v34  ;;  %v9582_v39 = vpop.f32.mrb[2].mxu1  ;;  %v572_v11 = vsel %vm571_vm6, %v12862_v50, -inf }
 0x33e   :  { %v12853_v41 = vadd.f32 %v9621_v37, %v12842_v30  ;;  %v552_v43 = vpop.f32.mrb[3].mxu1  ;;  %v870_v45 = vpop.f32.mrb[13].mxu0  ;;  %v12875_v3 = vadd.f32 %v9582_v39, %v12867_v54 }
 0x33f   :  { %v12859_v47 = vadd.f32 %v870_v45, %v12850_v36  ;;  %v12870_v55 = vadd.f32 %v552_v43, %v12856_v44 }
 0x340   :  { %v902_v51 = vsel %vm571_vm6, %v12853_v41, -inf  ;;  %v581_v19 = vsel %vm571_vm6, %v12875_v3, -inf }
 0x341   :  { %903 = vmax.xlane.f32.xlu1 %v902_v51  ;;  %v9585_v56 = vpop.f32.mrb[4].mxu1  ;;  %v9624_v58 = vpop.f32.mrb[14].mxu0  ;;  %v899_v61 = vsel %vm571_vm6, %v12859_v47, -inf  ;;  %v578_v60 = vsel %vm571_vm6, %v12870_v55, -inf }
 0x342   :  { %v880_v63 = vpop.f32.mrb[15].mxu0  ;;  %900 = vmax.xlane.f32.xlu0 %v899_v61  ;;  %v562_v1 = vpop.f32.mrb[5].mxu1  ;;  %v12888_v18 = vadd.f32 %v9624_v58, %v12867_v54  ;;  %v12901_v25 = vadd.f32 %v9585_v56, %v12893_v22 }
 0x343   :  { %v12880_v49 = vadd.f32 %v880_v63, %v12856_v44  ;;  %v12896_v23 = vadd.f32 %v562_v1, %v12885_v13 }
 0x344   :  { %v908_v26 = vsel %vm571_vm6, %v12888_v18, -inf  ;;  %v588_v33 = vsel %vm587_vm7, %v12901_v25, -inf }
 0x345   :  { %v9627_v12 = vpop.f32.mrb[16].mxu0  ;;  %573 = vmax.xlane.f32.xlu1 %v572_v11  ;;  %v905_v10 = vsel %vm571_vm6, %v12880_v49, -inf  ;;  %v584_v29 = vsel %vm571_vm6, %v12896_v23, -inf }
 0x346   :  { %v890_v17 = vpop.f32.mrb[17].mxu0  ;;  %579 = vmax.xlane.f32.xlu0 %v578_v60  ;;  %v12911_v31 = vadd.f32 %v9627_v12, %v12893_v22 }
 0x347   :  { %v12906_v28 = vadd.f32 %v890_v17, %v12885_v13 }
 0x348   :  { %v914_v37 = vsel %vm587_vm7, %v12911_v31, -inf }
 0x349   :  { %582 = vmax.xlane.f32.xlu1 %v581_v19  ;;  %v911_v34 = vsel %vm571_vm6, %v12906_v28, -inf }
 0x34a   :  { %906 = vmax.xlane.f32.xlu0 %v905_v10 }
 0x34d   :  { %909 = vmax.xlane.f32.xlu1 %v908_v26 }
 0x34e   :  { %585 = vmax.xlane.f32.xlu0 %v584_v29  ;;  %v11305_v29 = vpop.permute.xlu1 %11304 }
 0x351   :  { %589 = vmax.xlane.f32.xlu1 %v588_v33 }
 0x352   :  { %912 = vmax.xlane.f32.xlu0 %v911_v34  ;;  %v12973_v33 = vpop.permute.xlu1 %11314 }
 0x355   :  { %915 = vmax.xlane.f32.xlu1 %v914_v37 }
 0x356   :  { %v9663_v39 = vpop.f32.mrb[18].mxu0 }
 0x357   :  { %v12920_v43 = vadd.f32 %v9663_v39, %v12842_v30  ;;  %v1216_v45 = vpop.f32.mrb[19].mxu0 }
 0x358   :  { %v12923_v51 = vadd.f32 %v1216_v45, %v12850_v36 }
 0x359   :  { %v1248_v56 = vsel %vm571_vm6, %v12920_v43, -inf }
 0x35a   :  { %v9666_v58 = vpop.f32.mrb[20].mxu0  ;;  %1249 = vmax.xlane.f32.xlu1 %v1248_v56  ;;  %v1245_v63 = vsel %vm571_vm6, %v12923_v51, -inf }
 0x35b   :  { %v1226_v61 = vpop.f32.mrb[21].mxu0  ;;  %v12939_v17 = vadd.f32 %v9666_v58, %v12867_v54 }
 0x35c   :  { %v12934_v12 = vadd.f32 %v1226_v61, %v12856_v44 }
 0x35d   :  { %v1254_v10 = vsel %vm571_vm6, %v12939_v17, -inf }
 0x35e   :  { %v9669_v1 = vpop.f32.mrb[22].mxu0  ;;  %1246 = vmax.xlane.f32.xlu1 %v1245_v63  ;;  %v1251_v60 = vsel %vm571_vm6, %v12934_v12, -inf }
 0x35f   :  { %v1236_v11 = vpop.f32.mrb[23].mxu0  ;;  %v12942_v19 = vadd.f32 %v9669_v1, %v12893_v22 }
 0x368   :  { %11334 = vrot.lane.b32.xlu0 %v12688_v57, %s12343_s9  ;;  %v12947_v57 = vadd.f32 %v1236_v11, %v12885_v13 }
 0x36a   :  { %v1257_v26 = vsel %vm571_vm6, %v12947_v57, -inf }
 0x36f   :  { %11329 = vrot.lane.b32.xlu1 %v12668_v46, %s12343_s9  ;;  %v1260_v46 = vsel %vm587_vm7, %v12942_v19, -inf }
 0x387   :  { %1252 = vmax.xlane.f32.xlu0 %v1251_v60 }
 0x393   :  { %1255 = vmax.xlane.f32.xlu1 %v1254_v10 }
 0x397   :  { %1261 = vmax.xlane.f32.xlu1 %v1260_v46  ;;  %v11307_v46 = vunpack.i.h.bf16 %v11305_v29 }
 0x39b   :  { %1258 = vmax.xlane.f32.xlu1 %v1257_v26  ;;  %v11306_v26 = vunpack.i.l.bf16 %v11305_v29 }
 0x39d   :  { %11339 = vrot.lane.b32.xlu0 %v12708_v6, %s12343_s9  ;;  %v12969_v6 = vpop.permute.xlu0 %11309 }
 0x3a1   :  { %1443 = vrot.lane.b32.xlu0 %v12655_v38, %s12344_s15  ;;  %v11320_v38 = vpop.permute.xlu0 %11319 }
 0x3a5   :  { %1447 = vrot.lane.b32.xlu0 %v12677_v52, %s12344_s15  ;;  %v12971_v52 = vpop.permute.xlu0 %11324 }
 0x3a9   :  { %1451 = vrot.lane.b32.xlu0 %v12697_v62, %s12344_s15 }
 0x3ac   :  { %1445 = vrot.lane.b32.xlu1 %v12662_v42, %s12344_s15 }
 0x3b0   :  { %1449 = vrot.lane.b32.xlu1 %v12680_v53, %s12344_s15 }
 0x3b4   :  { %1453 = vrot.lane.b32.xlu1 %v12701_v2, %s12344_s15 }
 0x3b8   :  { %11344 = vrot.lane.b32.xlu1 %v12670_v48, %s12344_s15 }
 0x3ca   :  { %v577_v62 = vpop.xlane.xlu0 %576 }
 0x3cb   :  { %v592_v42 = vsub.f32 %v12845_v32, %v577_v62 }
 0x3cd   :  { %v599_v53 = vmul.f32 1.442695, %v592_v42 }
 0x3ce   :  { %v904_v34 = vpop.xlane.xlu1 %903 }
 0x3cf   :  { %v901_v37 = vpop.xlane.xlu0 %900  ;;  %11623 = vpow2.f32 %v599_v53  ;;  %v918_v42 = vsub.f32 %v12853_v41, %v904_v34  ;;  %v10564_v41 = vpack.c.bf16 %v11307_v46, %v11306_v26  ;;  %v11321_v34 = vunpack.i.l.bf16 %v11320_v38 }
 0x3d0   :  { %v917_v10 = vsub.f32 %v12859_v47, %v901_v37 }
 0x3d2   :  { %v574_v39 = vpop.xlane.xlu1 %573 }
 0x3d3   :  { %v591_v2 = vsub.f32 %v12862_v50, %v574_v39  ;;  %v580_v45 = vpop.xlane.xlu0 %579 }
 0x3d4   :  { %v593_v48 = vsub.f32 %v12870_v55, %v580_v45 }
 0x3d5   :  { %v597_v56 = vmul.f32 1.442695, %v591_v2 }
 0x3d6   :  { %v601_v58 = vmul.f32 1.442695, %v593_v48  ;;  %v583_v61 = vpop.xlane.xlu1 %582 }
 0x3d7   :  { %11625 = vpow2.f32 %v597_v56  ;;  %v594_v63 = vsub.f32 %v12875_v3, %v583_v61  ;;  %v907_v1 = vpop.xlane.xlu0 %906  ;;  %v923_v3 = vmul.f32 1.442695, %v917_v10 }
 0x3d8   :  { %11627 = vpow2.f32 %v601_v58  ;;  %v919_v2 = vsub.f32 %v12880_v49, %v907_v1 }
 0x3d9   :  { %v603_v11 = vmul.f32 1.442695, %v594_v63  ;;  %v12983_v39 = vpop.eup %11623 }
 0x3da   :  { %v910_v32 = vpop.xlane.xlu1 %909  ;;  %v927_v49 = vmul.f32 1.442695, %v919_v2  ;;  %v11326_v2 = vunpack.i.l.bf16 %v12971_v52 }
 0x3db   :  { %11629 = vpow2.f32 %v603_v11  ;;  %v586_v60 = vpop.xlane.xlu0 %585  ;;  %v920_v56 = vsub.f32 %v12888_v18, %v910_v32  ;;  %v11311_v18 = vunpack.i.l.bf16 %v12969_v6 }
 0x3dc   :  { %v595_v50 = vsub.f32 %v12896_v23, %v586_v60  ;;  %v11322_v23 = vunpack.i.h.bf16 %v11320_v38  ;;  %v11312_v38 = vunpack.i.h.bf16 %v12969_v6 }
 0x3dd   :  { %v929_v1 = vmul.f32 1.442695, %v920_v56 }
 0x3de   :  { %v605_v55 = vmul.f32 1.442695, %v595_v50  ;;  %v590_v62 = vpop.xlane.xlu1 %589  ;;  %v10568_v63 = vpack.c.bf16 %v11322_v23, %v11321_v34 }
 0x3df   :  { %v596_v53 = vsub.f32 %v12901_v25, %v590_v62  ;;  %v913_v47 = vpop.xlane.xlu0 %912  ;;  %v925_v25 = vmul.f32 1.442695, %v918_v42 }
 0x3e0   :  { %11631 = vpow2.f32 %v605_v55  ;;  %v921_v58 = vsub.f32 %v12906_v28, %v913_v47  ;;  %v11317_v55 = vunpack.i.h.bf16 %v12973_v33 }
 0x3e1   :  { %v12986_v45 = vpop.eup %11625  ;;  %v607_v48 = vmul.f32 1.442695, %v596_v53 }
 0x3e2   :  { %v12988_v37 = vpop.eup %11627  ;;  %9598 = vmatprep.mubr.msk.f32.mxu1 %vm571_vm6, %v12986_v45  ;;  %v916_v29 = vpop.xlane.xlu1 %915 }
 0x3e3   :  { %11633 = vpow2.f32 %v607_v48  ;;  %9599 = vmatmul.mubr.msk.f32.vlgmr.msra.gmra.mrb[6].mxu1 %vm571_vm6, %v12983_v39  ;;  %v922_v11 = vsub.f32 %v12911_v31, %v916_v29  ;;  %v10592_v31 = vpack.c.bf16 %v11312_v38, %v11311_v18 }
 0x3e4   :  { %11635 = vpow2.f32 %v923_v3  ;;  %10563 = vmatpush3.bf16.msra.mxu1 %v12833_v27  ;;  %9601 = vmatprep.mubr.msk.f32.mxu1 %vm571_vm6, %v12988_v37  ;;  %v931_v27 = vmul.f32 1.442695, %v921_v58  ;;  %v11327_v3 = vunpack.i.h.bf16 %v12971_v52 }
 0x3e5   :  { %v12999_v61 = vpop.eup %11629  ;;  %10565 = vmatprep.subr.bf16.mxu1 %v10564_v41  ;;  %11637 = vpow2.f32 %v925_v25  ;;  %v933_v60 = vmul.f32 1.442695, %v922_v11 }
 0x3e6   :  { %11639 = vpow2.f32 %v927_v49  ;;  %v10600_v29 = vpack.c.bf16 %v11327_v3, %v11326_v2  ;;  %v11335_v49 = vpop.permute.xlu0 %11334 }
 0x3e7   :  { %v1250_v32 = vpop.xlane.xlu1 %1249  ;;  %9602 = vmatmul.mubr.msk.f32.gmra.mrb[8].mxu1 %vm571_vm6, %v12999_v61  ;;  %11641 = vpow2.f32 %v929_v1  ;;  %v11337_v38 = vunpack.i.h.bf16 %v11335_v49  ;;  %v11336_v18 = vunpack.i.l.bf16 %v11335_v49 }
 0x3e8   :  { %10567 = vmatpush3.bf16.msra.mxu1 %v10564_v41  ;;  %v1264_v6 = vsub.f32 %v12920_v43, %v1250_v32  ;;  %11643 = vpow2.f32 %v931_v27  ;;  %v11316_v43 = vunpack.i.l.bf16 %v12973_v33 }
 0x3e9   :  { %10570 = vmatprep.subr.msk.bf16.mxu1 %vm12803_vm5, %v10568_v63  ;;  %11645 = vpow2.f32 %v933_v60 }
 0x3ea   :  { %v13008_v28 = vpop.eup %11631  ;;  %v1271_v42 = vmul.f32 1.442695, %v1264_v6  ;;  %v10596_v33 = vpack.c.bf16 %v11317_v55, %v11316_v43 }
 0x3eb   :  { %v1247_v10 = vpop.xlane.xlu1 %1246  ;;  %9604 = vmatprep.mubr.msk.f32.mxu1 %vm571_vm6, %v13008_v28 }
 0x3ec   :  { %v1263_v50 = vsub.f32 %v12923_v51, %v1247_v10  ;;  %10573 = vmatpush3.bf16.msk.msra.mxu1 %vm12803_vm5, %v10568_v63  ;;  %v10612_v63 = vpack.c.bf16 %v11337_v38, %v11336_v18 }
 0x3ed   :  { %v13016_v46 = vpop.eup %11633  ;;  %10593 = vmatprep.subr.bf16.mxu1 %v10592_v31 }
 0x3ee   :  { %v13018_v26 = vpop.eup %11635  ;;  %v1269_v62 = vmul.f32 1.442695, %v1263_v50  ;;  %9605 = vmatmul.mubr.msk.f32.gmra.mrb[10].mxu1 %vm571_vm6, %v13016_v46 }
 0x3ef   :  { %9640 = vmatprep.mubr.msk.f32.mxu1 %vm571_vm6, %v13018_v26  ;;  %v13026_v51 = vpop.eup %11637  ;;  %v11330_v48 = vpop.permute.xlu1 %11329 }
 0x3f0   :  { %11647 = vpow2.f32 %v1269_v62  ;;  %v13028_v53 = vpop.eup %11639  ;;  %v11332_v41 = vunpack.i.h.bf16 %v11330_v48  ;;  %v11331_v34 = vunpack.i.l.bf16 %v11330_v48 }
 0x3f1   :  { %11649 = vpow2.f32 %v1271_v42  ;;  %v13036_v47 = vpop.eup %11641 }
 0x3f2   :  { %9641 = vmatmul.mubr.msk.f32.vlgmr.msra.gmra.mrb[12].mxu1 %vm571_vm6, %v13026_v51  ;;  %v13038_v23 = vpop.eup %11643  ;;  %v10606_v56 = vpack.c.bf16 %v11332_v41, %v11331_v34 }
 0x3f3   :  { %10595 = vmatpush3.bf16.msra.mxu1 %v10592_v31  ;;  %9643 = vmatprep.mubr.msk.f32.mxu1 %vm571_vm6, %v13028_v53  ;;  %v13046_v52 = vpop.eup %11645 }
 0x3f4   :  { %10597 = vmatprep.subr.bf16.mxu1 %v10596_v33 }
 0x3f6   :  { %9644 = vmatmul.mubr.msk.f32.gmra.mrb[14].mxu1 %vm571_vm6, %v13036_v47 }
 0x3f7   :  { %10599 = vmatpush3.bf16.msra.mxu1 %v10596_v33  ;;  %9646 = vmatprep.mubr.msk.f32.mxu1 %vm571_vm6, %v13038_v23 }
 0x3f8   :  { %10602 = vmatprep.subr.msk.bf16.mxu1 %vm12803_vm5, %v10600_v29 }
 0x3fa   :  { %v13048_v25 = vpop.eup %11647  ;;  %9647 = vmatmul.mubr.msk.f32.gmra.mrb[16].mxu1 %vm571_vm6, %v13046_v52 }
 0x3fb   :  { %10605 = vmatpush3.bf16.msk.msra.mxu1 %vm12803_vm5, %v10600_v29  ;;  %9682 = vmatprep.mubr.msk.f32.mxu1 %vm571_vm6, %v13048_v25  ;;  %v13058_v58 = vpop.eup %11649 }
 0x3fc   :  { %10608 = vmatprep.subr.msk.bf16.mxu1 %vm12762_vm2, %v10606_v56 }
 0x3fe   :  { %9683 = vmatmul.mubr.msk.f32.vlgmr.msra.gmra.mrb[18].mxu1 %vm571_vm6, %v13058_v58 }
 0x404   :  { %10611 = vmatpush3.bf16.xpose.msk.msra.mxu1 %vm12762_vm2, %v10606_v56 }
 0x405   :  { %10614 = vmatprep.subr.msk.bf16.mxu1 %vm12762_vm2, %v10612_v63 }
 0x40c   :  { %10617 = vmatpush3.bf16.xpose.msk.msra.mxu1 %vm12762_vm2, %v10612_v63 }
 0x414   :  { %v1253_v1 = vpop.xlane.xlu0 %1252 }
 0x415   :  { %v1265_v11 = vsub.f32 %v12934_v12, %v1253_v1 }
 0x417   :  { %v1273_v32 = vmul.f32 1.442695, %v1265_v11 }
 0x418   :  { %v11340_v27 = vpop.permute.xlu0 %11339 }
 0x419   :  { %11651 = vpow2.f32 %v1273_v32  ;;  %v11342_v60 = vunpack.i.h.bf16 %v11340_v27  ;;  %v11341_v6 = vunpack.i.l.bf16 %v11340_v27 }
 0x41b   :  { %v10618_v10 = vpack.c.bf16 %v11342_v60, %v11341_v6 }
 0x41c   :  { %v1444_v34 = vpop.permute.xlu0 %1443 }
 0x41d   :  { %10620 = vmatprep.subr.msk.bf16.mxu1 %vm12762_vm2, %v10618_v10 }
 0x41e   :  { %10623 = vmatpush3.bf16.xpose.msk.msra.mxu1 %vm12762_vm2, %v10618_v10 }
 0x420   :  { %v1256_v31 = vpop.xlane.xlu1 %1255  ;;  %v1448_v18 = vpop.permute.xlu0 %1447 }
 0x421   :  { %v1266_v50 = vsub.f32 %v12939_v17, %v1256_v31 }
 0x423   :  { %v13074_v55 = vpop.eup %11651  ;;  %v1275_v43 = vmul.f32 1.442695, %v1266_v50 }
 0x424   :  { %v1262_v62 = vpop.xlane.xlu1 %1261  ;;  %9685 = vmatprep.mubr.msk.f32.mxu1 %vm571_vm6, %v13074_v55  ;;  %v1452_v1 = vpop.permute.xlu0 %1451 }
 0x425   :  { %11653 = vpow2.f32 %v1275_v43  ;;  %v1268_v12 = vsub.f32 %v12942_v19, %v1262_v62 }
 0x427   :  { %v1279_v2 = vmul.f32 1.442695, %v1268_v12 }
 0x428   :  { %v1259_v42 = vpop.xlane.xlu1 %1258 }
 0x429   :  { %v1267_v3 = vsub.f32 %v12947_v57, %v1259_v42 }
 0x42b   :  { %v1277_v33 = vmul.f32 1.442695, %v1267_v3 }
 0x42c   :  { %v1446_v48 = vpop.permute.xlu1 %1445 }
 0x42d   :  { %11655 = vpow2.f32 %v1277_v33 }
 0x42e   :  { %11657 = vpow2.f32 %v1279_v2 }
 0x42f   :  { %v13080_v29 = vpop.eup %11653 }
 0x430   :  { %9686 = vmatmul.mubr.msk.f32.gmra.mrb[20].mxu1 %vm571_vm6, %v13080_v29  ;;  %v1450_v17 = vpop.permute.xlu1 %1449 }
 0x434   :  { %v1454_v41 = vpop.permute.xlu1 %1453 }
 0x437   :  { %v13084_v56 = vpop.eup %11655 }
 0x438   :  { %v13086_v49 = vpop.eup %11657  ;;  %9688 = vmatprep.mubr.msk.f32.mxu1 %vm571_vm6, %v13084_v56  ;;  %v11345_v19 = vpop.permute.xlu1 %11344 }
 0x439   :  { %v11347_v57 = vunpack.i.h.bf16 %v11345_v19  ;;  %v11346_v38 = vunpack.i.l.bf16 %v11345_v19  ;;  %9689 = vmatmul.mubr.msk.f32.gmra.mrb[22].mxu1 %vm571_vm6, %v13086_v49 }
 0x43a   :  { %9703 = vmatprep.mubr.msk.f32.mxu1 %vm451_vm1, %v1444_v34 }
 0x43b   :  { %v10624_v63 = vpack.c.bf16 %v11347_v57, %v11346_v38 }
 0x43d   :  { %9704 = vmatmul.mubr.msk.f32.vlgmr.msra.gmra.mrb[24].mxu1 %vm451_vm1, %v1446_v48  ;;  %10625 = vmatprep.subr.bf16.mxu0 %v10624_v63 }
 0x43e   :  { %9706 = vmatprep.mubr.msk.f32.mxu1 %vm451_vm1, %v1448_v18  ;;  %10627 = vmatpush3.bf16.msra.mxu0 %v10624_v63 }
 0x441   :  { %9707 = vmatmul.mubr.msk.f32.gmra.mrb[26].mxu1 %vm451_vm1, %v1450_v17 }
 0x442   :  { %9709 = vmatprep.mubr.msk.f32.mxu1 %vm451_vm1, %v1452_v1 }
 0x445   :  { %9710 = vmatmul.mubr.msk.f32.gmra.mrb[28].mxu1 %vm451_vm1, %v1454_v41 }
 0x4b6   :  { %v13098_v11 = vpop.f32.mrb[6].mxu1 }
 0x4b7   :  { %v13100_v32 = vpop.f32.mrb[7].mxu1 }
 0x4ba   :  { %v13102_v27 = vpop.f32.mrb[8].mxu1 }
 0x4bb   :  { %v13104_v60 = vpop.f32.mrb[9].mxu1 }
 0x4c1   :  { %v13106_v6 = vpop.f32.mrb[10].mxu1 }
 0x4c2   :  { %v13108_v10 = vpop.f32.mrb[11].mxu1 }
 0x4c5   :  { %v13110_v31 = vpop.f32.mrb[12].mxu1 }
 0x4c6   :  { %v13112_v50 = vpop.f32.mrb[13].mxu1 }
 0x4c9   :  { %v13114_v43 = vpop.f32.mrb[14].mxu1 }
 0x4ca   :  { %v13116_v62 = vpop.f32.mrb[15].mxu1 }
 0x4cd   :  { %v13118_v12 = vpop.f32.mrb[16].mxu1 }
 0x4ce   :  { %v13120_v42 = vpop.f32.mrb[17].mxu1 }
 0x4d1   :  { %v13122_v3 = vpop.f32.mrb[18].mxu1 }
 0x4d2   :  { %v13124_v2 = vpop.f32.mrb[19].mxu1 }
 0x503   :  { %v13126_v33 = vpop.f32.mrb[20].mxu1 }
 0x504   :  { %v13128_v48 = vpop.f32.mrb[21].mxu1 }
 0x50c   :  { %v13130_v17 = vpop.f32.mrb[22].mxu1 }
 0x50d   :  { %v13132_v41 = vpop.f32.mrb[23].mxu1 }
 0x510   :  { %v9705_v34 = vpop.f32.mrb[24].mxu1 }
 0x511   :  { %v1563_v19 = vadd.f32 %v9705_v34, %v12842_v30  ;;  %v1557_v57 = vpop.f32.mrb[25].mxu1 }
 0x512   :  { %v1558_v38 = vadd.f32 %v1557_v57, %v12850_v36 }
 0x513   :  { %v1589_v18 = vsel %vm571_vm6, %v1563_v19, -inf }
 0x514   :  { %1590 = vmax.xlane.f32.xlu1 %v1589_v18  ;;  %v9708_v63 = vpop.f32.mrb[26].mxu1  ;;  %v1586_v1 = vsel %vm571_vm6, %v1558_v38, -inf }
 0x515   :  { %v1573_v0 = vadd.f32 %v9708_v63, %v12867_v54  ;;  %v1567_v16 = vpop.f32.mrb[27].mxu1  ;;  %1587 = vmax.xlane.f32.xlu0 %v1586_v1 }
 0x516   :  { %v1568_v35 = vadd.f32 %v1567_v16, %v12856_v44  ;;  %v944_v16 = vsel %vm571_vm6, %v13036_v47, 0.0  ;;  %v941_v44 = vsel %vm571_vm6, %v13028_v53, 0.0  ;;  %v1293_v53 = vsel %vm571_vm6, %v13084_v56, 0.0 }
 0x517   :  { %v1595_v40 = vsel %vm571_vm6, %v1573_v0, -inf }
 0x518   :  { %v9711_v24 = vpop.f32.mrb[28].mxu1  ;;  %v1592_v57 = vsel %vm571_vm6, %v1568_v35, -inf }
 0x519   :  { %v1577_v21 = vpop.f32.mrb[29].mxu1  ;;  %1596 = vmax.xlane.f32.xlu0 %v1595_v40  ;;  %v1583_v36 = vadd.f32 %v9711_v24, %v12893_v22  ;;  %v1284_v24 = vsel %vm571_vm6, %v13058_v58, 0.0  ;;  %v938_v40 = vsel %vm571_vm6, %v13026_v51, 0.0  ;;  %v1287_v22 = vsel %vm571_vm6, %v13074_v55, 0.0 }
 0x51a   :  { %v1578_v30 = vadd.f32 %v1577_v21, %v12885_v13  ;;  %v935_v21 = vsel %vm571_vm6, %v13018_v26, 0.0  ;;  %v950_v13 = vsel %vm587_vm7, %v13046_v52, 0.0  ;;  %v1296_v26 = vsel %vm587_vm7, %v13086_v49, 0.0 }
 0x51b   :  { %v1601_v54 = vsel %vm587_vm7, %v1583_v36, -inf  ;;  %v947_v51 = vsel %vm571_vm6, %v13038_v23, 0.0 }
 0x51c   :  { %v1598_v34 = vsel %vm571_vm6, %v1578_v30, -inf }
 0x51d   :  { %1599 = vmax.xlane.f32.xlu1 %v1598_v34  ;;  %1593 = vmax.xlane.f32.xlu0 %v1592_v57 }
 0x521   :  { %1602 = vmax.xlane.f32.xlu0 %v1601_v54 }
 0x52e   :  { %11354 = vrot.lane.b32.xlu1 %v12710_v7, %s12344_s15  ;;  %v1281_v7 = vsel %vm571_vm6, %v13048_v25, 0.0 }
 0x537   :  { %11349 = vrot.lane.b32.xlu0 %v12690_v59, %s12344_s15  ;;  %v1290_v59 = vsel %vm571_vm6, %v13080_v29, 0.0 }
 0x552   :  { %936 = vadd.xlane.f32.xlu1 %v935_v21 }
 0x556   :  { %1285 = vadd.xlane.f32.xlu1 %v1284_v24  ;;  %939 = vadd.xlane.f32.xlu0 %v938_v40 }
 0x55a   :  { %945 = vadd.xlane.f32.xlu1 %v944_v16  ;;  %1282 = vadd.xlane.f32.xlu0 %v1281_v7 }
 0x55e   :  { %1291 = vadd.xlane.f32.xlu1 %v1290_v59  ;;  %942 = vadd.xlane.f32.xlu0 %v941_v44 }
 0x562   :  { %951 = vadd.xlane.f32.xlu1 %v950_v13  ;;  %1288 = vadd.xlane.f32.xlu0 %v1287_v22 }
 0x566   :  { %1297 = vadd.xlane.f32.xlu1 %v1296_v26  ;;  %948 = vadd.xlane.f32.xlu0 %v947_v51 }
 0x56a   :  { %1294 = vadd.xlane.f32.xlu0 %v1293_v53 }
 0x5a1   :  { %v1591_v47 = vpop.xlane.xlu1 %1590 }
 0x5a2   :  { %v1605_v25 = vsub.f32 %v1563_v19, %v1591_v47  ;;  %v1588_v52 = vpop.xlane.xlu0 %1587 }
 0x5a3   :  { %v1604_v58 = vsub.f32 %v1558_v38, %v1588_v52 }
 0x5a4   :  { %v1612_v29 = vmul.f32 1.442695, %v1605_v25 }
 0x5a5   :  { %v1610_v55 = vmul.f32 1.442695, %v1604_v58 }
 0x5a6   :  { %11659 = vpow2.f32 %v1612_v29  ;;  %v1597_v18 = vpop.xlane.xlu0 %1596 }
 0x5a7   :  { %11661 = vpow2.f32 %v1610_v55  ;;  %v1607_v63 = vsub.f32 %v1573_v0, %v1597_v18  ;;  %v612_v55 = vsel %vm571_vm6, %v12983_v39, 0.0  ;;  %v609_v18 = vsel %vm571_vm6, %v12986_v45, 0.0 }
 0x5a8   :  { %v624_v39 = vsel %vm587_vm7, %v13016_v46, 0.0  ;;  %v621_v45 = vsel %vm571_vm6, %v13008_v28, 0.0 }
 0x5a9   :  { %v1616_v49 = vmul.f32 1.442695, %v1607_v63  ;;  %v618_v63 = vsel %vm571_vm6, %v12999_v61, 0.0 }
 0x5aa   :  { %v1600_v1 = vpop.xlane.xlu1 %1599  ;;  %v1594_v34 = vpop.xlane.xlu0 %1593 }
 0x5ab   :  { %11663 = vpow2.f32 %v1616_v49  ;;  %v1608_v23 = vsub.f32 %v1578_v30, %v1600_v1  ;;  %v1606_v57 = vsub.f32 %v1568_v35, %v1594_v34  ;;  %v615_v49 = vsel %vm571_vm6, %v12988_v37, 0.0 }
 0x5ad   :  { %v1614_v54 = vmul.f32 1.442695, %v1606_v57  ;;  %v1618_v21 = vmul.f32 1.442695, %v1608_v23 }
 0x5ae   :  { %v1603_v56 = vpop.xlane.xlu0 %1602  ;;  %v11355_v24 = vpop.permute.xlu1 %11354 }
 0x5af   :  { %v1609_v40 = vsub.f32 %v1583_v36, %v1603_v56  ;;  %11665 = vpow2.f32 %v1614_v54  ;;  %v11357_v59 = vunpack.i.h.bf16 %v11355_v24  ;;  %v11356_v35 = vunpack.i.l.bf16 %v11355_v24 }
 0x5b0   :  { %v11660_v19 = vpop.eup %11659  ;;  %11667 = vpow2.f32 %v1618_v21 }
 0x5b1   :  { %v11662_v38 = vpop.eup %11661  ;;  %v1620_v16 = vmul.f32 1.442695, %v1609_v40  ;;  %v1625_v7 = vsel %vm571_vm6, %v11660_v19, 0.0  ;;  %v10632_v51 = vpack.c.bf16 %v11357_v59, %v11356_v35 }
 0x5b2   :  { %1626 = vadd.xlane.f32.xlu1 %v1625_v7  ;;  %9724 = vmatprep.mubr.msk.f32.mxu0 %vm571_vm6, %v11662_v38  ;;  %v11350_v0 = vpop.permute.xlu0 %11349  ;;  %v1622_v30 = vsel %vm571_vm6, %v11662_v38, 0.0 }
 0x5b3   :  { %11669 = vpow2.f32 %v1620_v16  ;;  %v11352_v44 = vunpack.i.h.bf16 %v11350_v0  ;;  %v11351_v13 = vunpack.i.l.bf16 %v11350_v0  ;;  %1623 = vadd.xlane.f32.xlu0 %v1622_v30 }
 0x5b5   :  { %v11664_v36 = vpop.eup %11663  ;;  %v10628_v22 = vpack.c.bf16 %v11352_v44, %v11351_v13 }
 0x5b6   :  { %v1631_v26 = vsel %vm571_vm6, %v11664_v36, 0.0 }
 0x5b7   :  { %1632 = vadd.xlane.f32.xlu1 %v1631_v26  ;;  %10629 = vmatprep.subr.bf16.mxu0 %v10628_v22 }
 0x5b8   :  { %10631 = vmatpush3.bf16.msra.mxu0 %v10628_v22 }
 0x5b9   :  { %10634 = vmatprep.subr.msk.bf16.mxu0 %vm12803_vm5, %v10632_v51  ;;  %v11666_v53 = vpop.eup %11665 }
 0x5ba   :  { %v1628_v47 = vsel %vm571_vm6, %v11666_v53, 0.0  ;;  %v11668_v25 = vpop.eup %11667 }
 0x5bb   :  { %1629 = vadd.xlane.f32.xlu0 %v1628_v47  ;;  %v1634_v29 = vsel %vm571_vm6, %v11668_v25, 0.0  ;;  %v1877_v47 = vld [vmem:[%s12391_s29 + $0x8] sm:$0xff] }
 0x5bc   :  { %10637 = vmatpush3.bf16.msk.msra.mxu0 %vm12803_vm5, %v10632_v51 }
 0x5bd   :  { %v11670_v52 = vpop.eup %11669 }
 0x5be   :  { %v1637_v58 = vsel %vm587_vm7, %v11670_v52, 0.0 }
 0x5bf   :  { %1638 = vadd.xlane.f32.xlu1 %v1637_v58  ;;  %9725 = vmatmul.mubr.msk.f32.vlgmr.msra.gmra.mrb[24].mxu0 %vm571_vm6, %v11660_v19  ;;  %v1879_v58 = vld [vmem:[%s12391_s29 + $0x18] sm:$0xff] }
 0x5c0   :  { %1635 = vadd.xlane.f32.xlu0 %v1634_v29  ;;  %9727 = vmatprep.mubr.msk.f32.mxu0 %vm571_vm6, %v11666_v53  ;;  %v1881_v29 = vld [vmem:[%s12391_s29 + $0x28] sm:$0xff] }
 0x5c3   :  { %613 = vadd.xlane.f32.xlu1 %v612_v55  ;;  %9728 = vmatmul.mubr.msk.f32.gmra.mrb[26].mxu0 %vm571_vm6, %v11664_v36 }
 0x5c4   :  { %610 = vadd.xlane.f32.xlu0 %v609_v18  ;;  %9730 = vmatprep.mubr.msk.f32.mxu0 %vm571_vm6, %v11668_v25  ;;  %v1878_v25 = vld [vmem:[%s12391_s29 + $0x10] sm:$0xff]  ;;  %v1883_v18 = vld [vmem:[%s12391_s29 + $0x38] sm:$0xff] }
 0x5c7   :  { %619 = vadd.xlane.f32.xlu1 %v618_v63  ;;  %9731 = vmatmul.mubr.msk.f32.gmra.mrb[28].mxu0 %vm571_vm6, %v11670_v52 }
 0x5c8   :  { %616 = vadd.xlane.f32.xlu0 %v615_v49 }
 0x5cb   :  { %625 = vadd.xlane.f32.xlu1 %v624_v39 }
 0x5cc   :  { %622 = vadd.xlane.f32.xlu0 %v621_v45 }
 0x5df   :  { %v937_v1 = vpop.xlane.xlu1 %936 }
 0x5e0   :  { %11671 = vrcp.f32 %v937_v1 }
 0x5e3   :  { %v1286_v34 = vpop.xlane.xlu1 %1285  ;;  %v940_v23 = vpop.xlane.xlu0 %939 }
 0x5e4   :  { %11673 = vrcp.f32 %v1286_v34 }
 0x5e5   :  { %11675 = vrcp.f32 %v940_v23 }
 0x5e7   :  { %v946_v61 = vpop.xlane.xlu1 %945  ;;  %v1283_v37 = vpop.xlane.xlu0 %1282 }
 0x5e8   :  { %11677 = vrcp.f32 %v946_v61 }
 0x5e9   :  { %11679 = vrcp.f32 %v1283_v37 }
 0x5ea   :  { %v11672_v57 = vpop.eup %11671 }
 0x5eb   :  { %v1292_v54 = vpop.xlane.xlu1 %1291  ;;  %v943_v21 = vpop.xlane.xlu0 %942  ;;  %v1096_v46 = vmul.f32 %v11672_v57, %v13112_v50 }
 0x5ec   :  { %11681 = vrcp.f32 %v1292_v54 }
 0x5ed   :  { %11683 = vrcp.f32 %v943_v21  ;;  %1790 = vrot.lane.b32.xlu0 %v1096_v46, %s12343_s9 }
 0x5ee   :  { %v11674_v28 = vpop.eup %11673 }
 0x5ef   :  { %v11676_v56 = vpop.eup %11675  ;;  %v952_v24 = vpop.xlane.xlu1 %951  ;;  %v1438_v19 = vmul.f32 %v11674_v28, %v13122_v3 }
 0x5f0   :  { %v1289_v40 = vpop.xlane.xlu0 %1288  ;;  %11685 = vrcp.f32 %v952_v24  ;;  %v1097_v38 = vmul.f32 %v11676_v56, %v13110_v31 }
 0x5f1   :  { %11687 = vrcp.f32 %v1289_v40  ;;  %1816 = vrot.lane.b32.xlu0 %v1438_v19, %s12340_s10 }
 0x5f2   :  { %v11678_v16 = vpop.eup %11677  ;;  %1792 = vrot.lane.b32.xlu1 %v1097_v38, %s12343_s9 }
 0x5f3   :  { %v11680_v50 = vpop.eup %11679  ;;  %v1298_v7 = vpop.xlane.xlu1 %1297  ;;  %v1099_v0 = vmul.f32 %v11678_v16, %v13114_v43 }
 0x5f4   :  { %v949_v59 = vpop.xlane.xlu0 %948  ;;  %11689 = vrcp.f32 %v1298_v7  ;;  %v1437_v30 = vmul.f32 %v11680_v50, %v13124_v2 }
 0x5f5   :  { %11691 = vrcp.f32 %v949_v59  ;;  %1796 = vrot.lane.b32.xlu0 %v1099_v0, %s12343_s9 }
 0x5f6   :  { %v11682_v3 = vpop.eup %11681  ;;  %1814 = vrot.lane.b32.xlu1 %v1437_v30, %s12340_s10 }
 0x5f7   :  { %v11684_v31 = vpop.eup %11683  ;;  %v1440_v44 = vmul.f32 %v11682_v3, %v13126_v33 }
 0x5f8   :  { %v1295_v35 = vpop.xlane.xlu0 %1294  ;;  %v1098_v13 = vmul.f32 %v11684_v31, %v13116_v62 }
 0x5f9   :  { %11693 = vrcp.f32 %v1295_v35  ;;  %1820 = vrot.lane.b32.xlu0 %v1440_v44, %s12340_s10 }
 0x5fa   :  { %v11686_v36 = vpop.eup %11685  ;;  %1794 = vrot.lane.b32.xlu1 %v1098_v13, %s12343_s9 }
 0x5fb   :  { %v11688_v43 = vpop.eup %11687  ;;  %v1101_v2 = vmul.f32 %v11686_v36, %v13118_v12 }
 0x5fc   :  { %v1439_v22 = vmul.f32 %v11688_v43, %v13128_v48  ;;  %v1876_v48 = vld [vmem:[%s12391_s29] sm:$0xff] }
 0x5fd   :  { %1800 = vrot.lane.b32.xlu0 %v1101_v2, %s12343_s9  ;;  %v13229_v52 = vpack.c.bf16 %v1877_v47, %v1876_v48 }
 0x5fe   :  { %v11690_v33 = vpop.eup %11689  ;;  %1818 = vrot.lane.b32.xlu1 %v1439_v22, %s12340_s10 }
 0x5ff   :  { %v11692_v62 = vpop.eup %11691  ;;  %v1442_v26 = vmul.f32 %v11690_v33, %v13130_v17  ;;  %15406 = vst [vmem:[#allocation48_spill] sm:$0xff] %v13229_v52  ;;  %v13232_v17 = vpack.c.bf16 %v1879_v58, %v1878_v25  ;;  %10639 = vmatprep.subr.bf16.mxu0 %v13229_v52 }
 0x600   :  { %v1100_v51 = vmul.f32 %v11692_v62, %v13120_v42  ;;  %v1880_v42 = vld [vmem:[%s12391_s29 + $0x20] sm:$0xff]  ;;  %10641 = vmatpush3.bf16.msra.mxu0 %v13229_v52 }
 0x601   :  { %1824 = vrot.lane.b32.xlu0 %v1442_v26, %s12340_s10  ;;  %15407 = vst [vmem:[#allocation49_spill] sm:$0xff] %v13232_v17  ;;  %10643 = vmatprep.subr.bf16.mxu0 %v13232_v17  ;;  %v13239_v55 = vpack.c.bf16 %v1881_v29, %v1880_v42 }
 0x602   :  { %1798 = vrot.lane.b32.xlu1 %v1100_v51, %s12343_s9 }
 0x603   :  { %v11694_v53 = vpop.eup %11693  ;;  %15408 = vst [vmem:[#allocation50_spill] sm:$0xff] %v13239_v55 }
 0x604   :  { %v1441_v12 = vmul.f32 %v11694_v53, %v13132_v41  ;;  %v1882_v41 = vld [vmem:[%s12391_s29 + $0x30] sm:$0xff]  ;;  %10645 = vmatpush3.bf16.msra.mxu0 %v13232_v17  ;;  %s15411_s29 = sld [smem:[#allocation25_spill]] }
 0x605   :  { %10647 = vmatprep.subr.bf16.mxu0 %v13239_v55  ;;  %v13245_v63 = vpack.c.bf16 %v1883_v18, %v1882_v41 }
 0x606   :  { %1822 = vrot.lane.b32.xlu1 %v1441_v12, %s12340_s10 }
 0x607   :  { %15409 = vst [vmem:[#allocation51_spill] sm:$0xff] %v13245_v63 }
 0x608   :  { %10649 = vmatpush3.bf16.msra.mxu0 %v13239_v55 }
 0x609   :  { %10651 = vmatprep.subr.bf16.mxu0 %v13245_v63 }
 0x60c   :  { %10653 = vmatpush3.bf16.msra.mxu0 %v13245_v63 }
 0x63f   :  { %v1627_v49 = vpop.xlane.xlu1 %1626 }
 0x640   :  { %v1624_v39 = vpop.xlane.xlu0 %1623  ;;  %11695 = vrcp.f32 %v1627_v49 }
 0x641   :  { %11697 = vrcp.f32 %v1624_v39 }
 0x644   :  { %v1633_v1 = vpop.xlane.xlu1 %1632 }
 0x645   :  { %11699 = vrcp.f32 %v1633_v1 }
 0x648   :  { %v1630_v45 = vpop.xlane.xlu0 %1629 }
 0x649   :  { %11701 = vrcp.f32 %v1630_v45 }
 0x64a   :  { %v11696_v61 = vpop.eup %11695 }
 0x64b   :  { %v11698_v57 = vpop.eup %11697 }
 0x64c   :  { %v1639_v34 = vpop.xlane.xlu1 %1638 }
 0x64d   :  { %v1636_v23 = vpop.xlane.xlu0 %1635  ;;  %11703 = vrcp.f32 %v1639_v34 }
 0x64e   :  { %11705 = vrcp.f32 %v1636_v23 }
 0x64f   :  { %v11700_v28 = vpop.eup %11699 }
 0x650   :  { %v614_v31 = vpop.xlane.xlu1 %613 }
 0x651   :  { %v611_v3 = vpop.xlane.xlu0 %610  ;;  %11707 = vrcp.f32 %v614_v31 }
 0x652   :  { %11709 = vrcp.f32 %v611_v3 }
 0x653   :  { %v11702_v24 = vpop.eup %11701 }
 0x654   :  { %v620_v44 = vpop.xlane.xlu1 %619 }
 0x655   :  { %v617_v35 = vpop.xlane.xlu0 %616 }
 0x656   :  { %11711 = vrcp.f32 %v617_v35  ;;  %v8771_v35 = vld [vmem:[%s12396_s3] ss:$0 sm:$0xff] }
 0x657   :  { %v11704_v16 = vpop.eup %11703  ;;  %11713 = vrcp.f32 %v620_v44  ;;  %v12045_v44 = vld [vmem:[%s12361_s5 + $0x8] sm:$0xff] }
 0x658   :  { %v11706_v7 = vpop.eup %11705  ;;  %v626_v36 = vpop.xlane.xlu1 %625 }
 0x659   :  { %v623_v13 = vpop.xlane.xlu0 %622 }
 0x65a   :  { %11715 = vrcp.f32 %v623_v13 }
 0x65b   :  { %v11708_v47 = vpop.eup %11707  ;;  %11717 = vrcp.f32 %v626_v36 }
 0x65c   :  { %v11710_v25 = vpop.eup %11709  ;;  %v751_v42 = vmul.f32 %v11708_v47, %v13098_v11 }
 0x65d   :  { %v750_v41 = vmul.f32 %v11710_v25, %v13100_v32 }
 0x65f   :  { %v1791_v43 = vpop.permute.xlu0 %1790 }
 0x660   :  { %v11712_v18 = vpop.eup %11711  ;;  %v1856_v45 = vsel %vm451_vm1, %v750_v41, %v1791_v43  ;;  %v12046_v43 = vld [vmem:[%s12361_s5] sm:$0xff]  ;;  %v12049_v41 = vld [vmem:[%s12361_s5 + $0x28] sm:$0x3f] }
 0x661   :  { %v11714_v39 = vpop.eup %11713 }
 0x662   :  { %v753_v32 = vmul.f32 %v11714_v39, %v13102_v27 }
 0x663   :  { %v1817_v22 = vpop.permute.xlu0 %1816 }
 0x664   :  { %v1793_v2 = vpop.permute.xlu1 %1792 }
 0x665   :  { %v1857_v49 = vsel %vm451_vm1, %v751_v42, %v1793_v2 }
 0x667   :  { %v1797_v62 = vpop.permute.xlu0 %1796 }
 0x668   :  { %v1815_v33 = vpop.permute.xlu1 %1814 }
 0x669   :  { %v1863_v34 = vsel %vm1862_vm8, %v1856_v45, %v1815_v33  ;;  %v12050_v45 = vld [vmem:[%s12361_s5 + $0x20] sm:$0xff] }
 0x66b   :  { %v1821_v51 = vpop.permute.xlu0 %1820 }
 0x66c   :  { %v1795_v26 = vpop.permute.xlu1 %1794 }
 0x66f   :  { %v1801_v12 = vpop.permute.xlu0 %1800 }
 0x670   :  { %v1819_v53 = vpop.permute.xlu1 %1818 }
 0x673   :  { %v1825_v58 = vpop.permute.xlu0 %1824 }
 0x674   :  { %v1799_v48 = vpop.permute.xlu1 %1798 }
 0x678   :  { %v1823_v29 = vpop.permute.xlu1 %1822 }
 0x692   :  { %v9726_v37 = vpop.f32.mrb[24].mxu0 }
 0x693   :  { %v1779_v54 = vmul.f32 %v11696_v61, %v9726_v37  ;;  %v1749_v21 = vpop.f32.mrb[25].mxu0  ;;  %v1864_v61 = vsel %vm1862_vm8, %v1857_v49, %v1817_v22  ;;  %v752_v37 = vmul.f32 %v11712_v18, %v13104_v60 }
 0x694   :  { %v1778_v46 = vmul.f32 %v11698_v57, %v1749_v21  ;;  %v11716_v57 = vpop.eup %11715 }
 0x695   :  { %1840 = vrot.lane.b32.xlu0 %v1779_v54, %s12338_s20  ;;  %v11718_v21 = vpop.eup %11717 }
 0x696   :  { %1838 = vrot.lane.b32.xlu1 %v1778_v46, %s12338_s20  ;;  %v9729_v56 = vpop.f32.mrb[26].mxu0  ;;  %v1858_v46 = vsel %vm451_vm1, %v752_v37, %v1795_v26  ;;  %v12047_v26 = vld [vmem:[%s12361_s5 + $0x18] sm:$0xff] }
 0x697   :  { %v1781_v40 = vmul.f32 %v11700_v28, %v9729_v56  ;;  %v1759_v19 = vpop.f32.mrb[27].mxu0  ;;  %v1859_v56 = vsel %vm451_vm1, %v753_v32, %v1797_v62 }
 0x698   :  { %v1780_v38 = vmul.f32 %v11702_v24, %v1759_v19  ;;  %v1865_v24 = vsel %vm1862_vm8, %v1858_v46, %v1819_v53  ;;  %v754_v19 = vmul.f32 %v11716_v57, %v13108_v10 }
 0x699   :  { %1844 = vrot.lane.b32.xlu0 %v1781_v40, %s12338_s20  ;;  %v1866_v40 = vsel %vm1862_vm8, %v1859_v56, %v1821_v51 }
 0x69a   :  { %1842 = vrot.lane.b32.xlu1 %v1780_v38, %s12338_s20  ;;  %v9732_v50 = vpop.f32.mrb[28].mxu0  ;;  %v755_v38 = vmul.f32 %v11718_v21, %v13106_v6 }
 0x69b   :  { %v1783_v59 = vmul.f32 %v11704_v16, %v9732_v50  ;;  %v1769_v0 = vpop.f32.mrb[29].mxu0  ;;  %v1860_v50 = vsel %vm451_vm1, %v754_v19, %v1799_v48  ;;  %v12048_v48 = vld [vmem:[%s12361_s5 + $0x10] sm:$0xff]  ;;  %s15410_s5 = sld [smem:[#allocation23_spill]] }
 0x69c   :  { %v1782_v30 = vmul.f32 %v11706_v7, %v1769_v0  ;;  %v1867_v10 = vsel %vm1862_vm8, %v1860_v50, %v1823_v29 }
 0x69d   :  { %1848 = vrot.lane.b32.xlu0 %v1783_v59, %s12338_s20  ;;  %v1861_v59 = vsel %vm451_vm1, %v755_v38, %v1801_v12 }
 0x69e   :  { %1846 = vrot.lane.b32.xlu1 %v1782_v30, %s12338_s20  ;;  %v1868_v30 = vsel %vm1862_vm8, %v1861_v59, %v1825_v58 }
 0x707   :  { %v1841_v1 = vpop.permute.xlu0 %1840 }
 0x708   :  { %v1839_v23 = vpop.permute.xlu1 %1838  ;;  %v1871_v54 = vsel %vm1869_vm9, %v1864_v61, %v1841_v1 }
 0x709   :  { %v1870_v11 = vsel %vm1869_vm9, %v1863_v34, %v1839_v23 }
 0x70a   :  { %9749 = vmatprep.mubr.msk.f32.mxu0 %vm313_vm0, %v1870_v11 }
 0x70b   :  { %9750 = vmatmul.mubr.msk.f32.vlgmr.msra.gmra.mrb[30].mxu0 %vm313_vm0, %v1871_v54  ;;  %v1845_v28 = vpop.permute.xlu0 %1844 }
 0x70c   :  { %v1843_v60 = vpop.permute.xlu1 %1842  ;;  %v1873_v16 = vsel %vm1869_vm9, %v1866_v40, %v1845_v28 }
 0x70d   :  { %v1872_v27 = vsel %vm1869_vm9, %v1865_v24, %v1843_v60 }
 0x70e   :  { %9752 = vmatprep.mubr.msk.f32.mxu0 %vm313_vm0, %v1872_v27 }
 0x70f   :  { %9753 = vmatmul.mubr.msk.f32.gmra.mrb[32].mxu0 %vm313_vm0, %v1873_v16  ;;  %v1849_v7 = vpop.permute.xlu0 %1848 }
 0x710   :  { %v1847_v0 = vpop.permute.xlu1 %1846  ;;  %v1875_v3 = vsel %vm1869_vm9, %v1868_v30, %v1849_v7 }
 0x711   :  { %v1874_v6 = vsel %vm1869_vm9, %v1867_v10, %v1847_v0 }
 0x712   :  { %9755 = vmatprep.mubr.msk.f32.mxu0 %vm313_vm0, %v1874_v6 }
 0x713   :  { %9756 = vmatmul.mubr.msk.f32.gmra.mrb[34].mxu0 %vm313_vm0, %v1875_v3 }
 0x7de   :  { %v9751_v31 = vpop.f32.mrb[30].mxu0 }
 0x7df   :  { %v1998_v13 = vadd.f32 %v12045_v44, %v9751_v31  ;;  %v1968_v36 = vpop.f32.mrb[31].mxu0 }
 0x7e0   :  { %v1997_v2 = vadd.f32 %v12046_v43, %v1968_v36 }
 0x7e1   :  { %v2011_v22 = vadd.f32 %v8771_v35, %v1998_v13 }
 0x7e2   :  { %v2010_v33 = vadd.f32 %v8771_v35, %v1997_v2  ;;  %v9754_v62 = vpop.f32.mrb[32].mxu0 }
 0x7e3   :  { %v2000_v51 = vadd.f32 %v12047_v26, %v9754_v62  ;;  %v1978_v53 = vpop.f32.mrb[33].mxu0  ;;  %v2019_v12 = vsel %vm313_vm0, %v2011_v22, 0.0  ;;  %v2123_v62 = vld [vmem:[%s15410_s5 + $0x8] sm:$0xff] }
 0x7e4   :  { %v1999_v47 = vadd.f32 %v12048_v48, %v1978_v53  ;;  %2020 = vadd.xlane.f32.xlu0 %v2019_v12  ;;  %v2016_v25 = vsel %vm313_vm0, %v2010_v33, 0.0  ;;  %v2125_v53 = vld [vmem:[%s15410_s5 + $0x18] sm:$0xff]  ;;  %v2126_v48 = vld [vmem:[%s15410_s5 + $0x20] sm:$0xff] }
 0x7e5   :  { %v2013_v58 = vadd.f32 %v8771_v35, %v2000_v51  ;;  %2017 = vadd.xlane.f32.xlu1 %v2016_v25  ;;  %v2124_v51 = vld [vmem:[%s15410_s5 + $0x10] sm:$0xff] }
 0x7e6   :  { %v2012_v42 = vadd.f32 %v8771_v35, %v1999_v47  ;;  %v9757_v29 = vpop.f32.mrb[34].mxu0  ;;  %v13337_v12 = vpack.c.bf16 %v2125_v53, %v2124_v51  ;;  %v2127_v47 = vld [vmem:[%s15410_s5 + $0x28] sm:$0xff] }
 0x7e7   :  { %v2002_v18 = vadd.f32 %v12049_v41, %v9757_v29  ;;  %v1988_v49 = vpop.f32.mrb[35].mxu0  ;;  %v2025_v39 = vsel %vm313_vm0, %v2013_v58, 0.0  ;;  %v13343_v25 = vpack.c.bf16 %v2127_v47, %v2126_v48  ;;  %v2490_v41 = vld [vmem:[%s15411_s29] sm:$0xff] }
 0x7e8   :  { %v2001_v1 = vadd.f32 %v12050_v45, %v1988_v49  ;;  %v2022_v34 = vsel %vm313_vm0, %v2012_v42, 0.0  ;;  %v2257_v45 = vld [vmem:[%s15412_s8 + $0x8] sm:$0xff] }
 0x7e9   :  { %v2015_v23 = vadd.f32 %v8771_v35, %v2002_v18  ;;  %2023 = vadd.xlane.f32.xlu0 %v2022_v34  ;;  %2026 = vadd.xlane.f32.xlu1 %v2025_v39  ;;  %v2491_v18 = vld [vmem:[%s15411_s29 + $0x8] sm:$0xff]  ;;  %v2256_v39 = vld [vmem:[%s15412_s8] sm:$0xff] }
 0x7ea   :  { %v2014_v61 = vadd.f32 %v8771_v35, %v2001_v1  ;;  %v13355_v49 = vpack.c.bf16 %v2491_v18, %v2490_v41  ;;  %v2258_v1 = vld [vmem:[%s15412_s8 + $0x10] sm:$0xff]  ;;  %v13361_v34 = vpack.c.bf16 %v2257_v45, %v2256_v39  ;;  %v8772_v41 = vld [vmem:[#allocation4] ss:$0 sm:$0xff] }
 0x7eb   :  { %v2032_v37 = vsel %vm2031_vm10, %v2015_v23, 0.0 }
 0x7ec   :  { %v2028_v11 = vsel %vm313_vm0, %v2014_v61, 0.0  ;;  %15414 = vst [vmem:[#allocation53_spill] sm:$0xff] %v13355_v49  ;;  %15415 = vst [vmem:[#allocation54_spill] sm:$0xff] %v13361_v34  ;;  %10671 = vmatprep.subr.bf16.mxu0 %v13361_v34 }
 0x7ed   :  { %2033 = vadd.xlane.f32.xlu1 %v2032_v37  ;;  %2029 = vadd.xlane.f32.xlu0 %v2028_v11  ;;  %v2260_v37 = vld [vmem:[%s15412_s8 + $0x20] sm:$0xff]  ;;  %v2261_v11 = vld [vmem:[%s15412_s8 + $0x28] sm:$0xff] }
 0x7ee   :  { %10673 = vmatpush3.bf16.msra.mxu0 %v13361_v34 }
 0x871   :  { %v2021_v57 = vpop.xlane.xlu0 %2020 }
 0x872   :  { %v2037_v32 = vmul.f32 0.015625, %v2021_v57  ;;  %v2018_v54 = vpop.xlane.xlu1 %2017  ;;  %v13371_v57 = vpack.c.bf16 %v2261_v11, %v2260_v37  ;;  %v2492_v11 = vld [vmem:[%s15411_s29 + $0x10] sm:$0xff] }
 0x873   :  { %v2036_v21 = vmul.f32 0.015625, %v2018_v54  ;;  %v2263_v54 = vld [vmem:[%s15412_s8 + $0x38] sm:$0xff] }
 0x874   :  { %v13299_v46 = vsub.f32 %v2011_v22, %v2037_v32  ;;  %15417 = vst [vmem:[#allocation56_spill] sm:$0xff] %v13371_v57  ;;  %v2262_v32 = vld [vmem:[%s15412_s8 + $0x30] sm:$0xff] }
 0x875   :  { %v13301_v28 = vsub.f32 %v2010_v33, %v2036_v21  ;;  %v2122_v33 = vld [vmem:[%s15410_s5] sm:$0xff]  ;;  %v13377_v21 = vpack.c.bf16 %v2263_v54, %v2262_v32  ;;  %v2493_v32 = vld [vmem:[%s15411_s29 + $0x18] sm:$0xff]  ;;  %s15442_s29 = sld [smem:[#allocation30_spill]] }
 0x876   :  { %v2024_v56 = vpop.xlane.xlu0 %2023  ;;  %v2027_v24 = vpop.xlane.xlu1 %2026  ;;  %v2049_v60 = vmul.f32 %v13299_v46, %v13299_v46  ;;  %v13331_v26 = vpack.c.bf16 %v2123_v62, %v2122_v33 }
 0x877   :  { %v2038_v40 = vmul.f32 0.015625, %v2024_v56  ;;  %v2039_v19 = vmul.f32 0.015625, %v2027_v24  ;;  %v2048_v27 = vmul.f32 %v13301_v28, %v13301_v28  ;;  %15418 = vst [vmem:[#allocation57_spill] sm:$0xff] %v13377_v21  ;;  %v2264_v56 = vld [vmem:[%s15412_s8 + $0x40] sm:$0xff]  ;;  %v2265_v24 = vld [vmem:[%s15412_s8 + $0x48] sm:$0xff] }
 0x878   :  { %v2057_v38 = vsel %vm313_vm0, %v2049_v60, 0.0  ;;  %10655 = vmatprep.subr.bf16.mxu1 %v13331_v26  ;;  %v13383_v60 = vpack.c.bf16 %v2265_v24, %v2264_v56 }
 0x879   :  { %v13308_v16 = vsub.f32 %v2012_v42, %v2038_v40  ;;  %v13310_v50 = vsub.f32 %v2013_v58, %v2039_v19  ;;  %2058 = vadd.xlane.f32.xlu1 %v2057_v38  ;;  %v2054_v7 = vsel %vm313_vm0, %v2048_v27, 0.0  ;;  %10657 = vmatpush3.bf16.msra.mxu1 %v13331_v26  ;;  %v2128_v58 = vld [vmem:[%s15410_s5 + $0x30] sm:$0xff]  ;;  %v2129_v42 = vld [vmem:[%s15410_s5 + $0x38] sm:$0xff]  ;;  %v2268_v38 = vld [vmem:[%s15412_s8 + $0x60] sm:$0xff]  ;;  %s15441_s5 = sld [smem:[#allocation29_spill]] }
 0x87a   :  { %v2030_v59 = vpop.xlane.xlu0 %2029  ;;  %2055 = vadd.xlane.f32.xlu0 %v2054_v7  ;;  %v2034_v10 = vpop.xlane.xlu1 %2033  ;;  %10659 = vmatprep.subr.bf16.mxu1 %v13337_v12  ;;  %v13349_v29 = vpack.c.bf16 %v2129_v42, %v2128_v58  ;;  %15419 = vst [vmem:[#allocation58_spill] sm:$0xff] %v13383_v60  ;;  %v2266_v40 = vld [vmem:[%s15412_s8 + $0x50] sm:$0xff]  ;;  %v2267_v19 = vld [vmem:[%s15412_s8 + $0x58] sm:$0xff]  ;;  %v2269_v7 = vld [vmem:[%s15412_s8 + $0x68] sm:$0xff] }
 0x87b   :  { %v2040_v0 = vmul.f32 0.015625, %v2030_v59  ;;  %v2041_v30 = vmul.f32 0.015625, %v2034_v10  ;;  %v2050_v6 = vmul.f32 %v13308_v16, %v13308_v16  ;;  %v2051_v3 = vmul.f32 %v13310_v50, %v13310_v50 }
 0x87c   :  { %15413 = vst [vmem:[#allocation52_spill] sm:$0xff] %v13349_v29  ;;  %v13389_v27 = vpack.c.bf16 %v2267_v19, %v2266_v40  ;;  %v13395_v59 = vpack.c.bf16 %v2269_v7, %v2268_v38  ;;  %v13410_v7 = vpack.c.bf16 %v2493_v32, %v2492_v11 }
 0x87d   :  { %v13317_v31 = vsub.f32 %v2014_v61, %v2040_v0  ;;  %v13319_v35 = vsub.f32 %v2015_v23, %v2041_v30  ;;  %v2060_v44 = vsel %vm313_vm0, %v2050_v6, 0.0  ;;  %v2063_v13 = vsel %vm313_vm0, %v2051_v3, 0.0  ;;  %10661 = vmatpush3.bf16.msra.mxu1 %v13337_v12  ;;  %v2259_v23 = vld [vmem:[%s15412_s8 + $0x18] sm:$0xff] }
 0x87e   :  { %2061 = vadd.xlane.f32.xlu0 %v2060_v44  ;;  %2064 = vadd.xlane.f32.xlu1 %v2063_v13  ;;  %v13364_v61 = vpack.c.bf16 %v2259_v23, %v2258_v1  ;;  %15420 = vst [vmem:[#allocation59_spill] sm:$0xff] %v13389_v27  ;;  %15421 = vst [vmem:[#allocation60_spill] sm:$0xff] %v13395_v59  ;;  %v8773_v23 = vld [vmem:[#allocation6] ss:$0 sm:$0xff] }
 0x87f   :  { %v2052_v36 = vmul.f32 %v13317_v31, %v13317_v31  ;;  %v2053_v43 = vmul.f32 %v13319_v35, %v13319_v35  ;;  %10663 = vmatprep.subr.bf16.mxu1 %v13343_v25  ;;  %15422 = vst [vmem:[#allocation61_spill] sm:$0xff] %v13410_v7 }
 0x880   :  { %15416 = vst [vmem:[#allocation55_spill] sm:$0xff] %v13364_v61  ;;  %10675 = vmatprep.subr.bf16.mxu0 %v13364_v61 }
 0x881   :  { %v2066_v2 = vsel %vm313_vm0, %v2052_v36, 0.0  ;;  %v2069_v22 = vsel %vm2031_vm10, %v2053_v43, 0.0  ;;  %10665 = vmatpush3.bf16.msra.mxu1 %v13343_v25  ;;  %10677 = vmatpush3.bf16.msra.mxu0 %v13364_v61 }
 0x882   :  { %2067 = vadd.xlane.f32.xlu0 %v2066_v2  ;;  %2070 = vadd.xlane.f32.xlu1 %v2069_v22 }
 0x883   :  { %10667 = vmatprep.subr.bf16.mxu1 %v13349_v29  ;;  %10679 = vmatprep.subr.bf16.mxu0 %v13371_v57 }
 0x885   :  { %10669 = vmatpush3.bf16.msra.mxu1 %v13349_v29  ;;  %10681 = vmatpush3.bf16.msra.mxu0 %v13371_v57 }
 0x886   :  { %10703 = vmatprep.subr.bf16.mxu1 %v13355_v49  ;;  %10683 = vmatprep.subr.bf16.mxu0 %v13377_v21 }
 0x889   :  { %10685 = vmatpush3.bf16.msra.mxu0 %v13377_v21 }
 0x88a   :  { %10687 = vmatprep.subr.bf16.mxu0 %v13383_v60 }
 0x88d   :  { %10689 = vmatpush3.bf16.msra.mxu0 %v13383_v60 }
 0x88e   :  { %10691 = vmatprep.subr.bf16.mxu0 %v13389_v27 }
 0x891   :  { %10693 = vmatpush3.bf16.msra.mxu0 %v13389_v27 }
 0x892   :  { %10695 = vmatprep.subr.bf16.mxu0 %v13395_v59 }
 0x895   :  { %10697 = vmatpush3.bf16.msra.mxu0 %v13395_v59 }
 0x906   :  { %v2059_v10 = vpop.xlane.xlu1 %2058 }
 0x907   :  { %v2073_v0 = vmul.f32 0.015625, %v2059_v10  ;;  %v2056_v30 = vpop.xlane.xlu0 %2055 }
 0x908   :  { %v2072_v6 = vmul.f32 0.015625, %v2056_v30 }
 0x909   :  { %v2079_v3 = vadd.f32 1e-05, %v2073_v0 }
 0x90a   :  { %v2078_v44 = vadd.f32 1e-05, %v2072_v6 }
 0x90b   :  { %11719 = vrsqrt.f32 %v2079_v3  ;;  %v2062_v13 = vpop.xlane.xlu0 %2061  ;;  %v2065_v36 = vpop.xlane.xlu1 %2064 }
 0x90c   :  { %11721 = vrsqrt.f32 %v2078_v44  ;;  %v2074_v43 = vmul.f32 0.015625, %v2062_v13  ;;  %v2075_v2 = vmul.f32 0.015625, %v2065_v36  ;;  %v271_v36 = vld [vmem:[%s15423_s16] sm:$0xff] }
 0x90e   :  { %v2080_v22 = vadd.f32 1e-05, %v2074_v43  ;;  %v2081_v33 = vadd.f32 1e-05, %v2075_v2  ;;  %v273_v43 = vld [vmem:[%s15423_s16 + $0x10] sm:$0xff]  ;;  %v274_v2 = vld [vmem:[%s15423_s16 + $0x18] sm:$0xff] }
 0x90f   :  { %v2068_v62 = vpop.xlane.xlu0 %2067  ;;  %v2071_v51 = vpop.xlane.xlu1 %2070 }
 0x910   :  { %11723 = vrsqrt.f32 %v2080_v22  ;;  %v2076_v53 = vmul.f32 0.015625, %v2068_v62  ;;  %v2077_v48 = vmul.f32 0.015625, %v2071_v51  ;;  %v2270_v22 = vld [vmem:[%s15412_s8 + $0x70] sm:$0xff]  ;;  %v8774_v51 = vld [vmem:[#allocation7] ss:$0 sm:$0xff] }
 0x911   :  { %11725 = vrsqrt.f32 %v2081_v33  ;;  %v2271_v33 = vld [vmem:[%s15412_s8 + $0x78] sm:$0xff]  ;;  %s15447_s8 = sld [smem:[#allocation39_spill]] }
 0x912   :  { %v2082_v47 = vadd.f32 1e-05, %v2076_v53  ;;  %v2083_v58 = vadd.f32 1e-05, %v2077_v48  ;;  %v13447_v62 = vpack.c.bf16 %v2271_v33, %v2270_v22 }
 0x914   :  { %11727 = vrsqrt.f32 %v2082_v47  ;;  %15424 = vst [vmem:[#allocation62_spill] sm:$0xff] %v13447_v62  ;;  %10699 = vmatprep.subr.bf16.mxu0 %v13447_v62 }
 0x915   :  { %v11720_v42 = vpop.eup %11719  ;;  %11729 = vrsqrt.f32 %v2083_v58  ;;  %10701 = vmatpush3.bf16.msra.mxu0 %v13447_v62 }
 0x916   :  { %v11722_v18 = vpop.eup %11721  ;;  %v2091_v39 = vmul.f32 %v11720_v42, %v13299_v46 }
 0x917   :  { %v2090_v45 = vmul.f32 %v11722_v18, %v13301_v28 }
 0x918   :  { %v2104_v1 = vmul.f32 %v8772_v41, %v2091_v39 }
 0x919   :  { %v2103_v37 = vmul.f32 %v8772_v41, %v2090_v45 }
 0x91a   :  { %v11724_v54 = vpop.eup %11723  ;;  %v13407_v19 = vadd.f32 %v8773_v23, %v2104_v1 }
 0x91b   :  { %v11726_v56 = vpop.eup %11725  ;;  %v13404_v24 = vadd.f32 %v8773_v23, %v2103_v37  ;;  %v2092_v40 = vmul.f32 %v11724_v54, %v13308_v16 }
 0x91c   :  { %v2093_v38 = vmul.f32 %v11726_v56, %v13310_v50 }
 0x91d   :  { %9774 = vmatprep.mubr.msk.f32.mxu1 %vm313_vm0, %v13404_v24  ;;  %v2105_v46 = vmul.f32 %v8772_v41, %v2092_v40  ;;  %v8784_v40 = vld [vmem:[%s15425_s25] ss:$0 sm:$0xff] }
 0x91e   :  { %v11728_v28 = vpop.eup %11727  ;;  %9775 = vmatmul.mubr.msk.f32.vlgmr.msra.gmra.mrb[30].mxu1 %vm313_vm0, %v13407_v19  ;;  %v2106_v10 = vmul.f32 %v8772_v41, %v2093_v38 }
 0x91f   :  { %v11730_v0 = vpop.eup %11729  ;;  %10705 = vmatpush3.bf16.msra.mxu1 %v13355_v49  ;;  %v13417_v16 = vadd.f32 %v8773_v23, %v2105_v46  ;;  %v2094_v50 = vmul.f32 %v11728_v28, %v13317_v31 }
 0x920   :  { %v13420_v30 = vadd.f32 %v8773_v23, %v2106_v10  ;;  %10707 = vmatprep.subr.bf16.mxu1 %v13410_v7  ;;  %v2095_v6 = vmul.f32 %v11730_v0, %v13319_v35  ;;  %v272_v35 = vld [vmem:[%s15423_s16 + $0x8] sm:$0xff] }
 0x921   :  { %9777 = vmatprep.mubr.msk.f32.mxu1 %vm313_vm0, %v13417_v16  ;;  %v2107_v3 = vmul.f32 %v8772_v41, %v2094_v50 }
 0x922   :  { %9778 = vmatmul.mubr.msk.f32.gmra.mrb[32].mxu1 %vm313_vm0, %v13420_v30  ;;  %v2108_v44 = vmul.f32 %v8772_v41, %v2095_v6 }
 0x923   :  { %v13428_v13 = vadd.f32 %v8773_v23, %v2107_v3  ;;  %10709 = vmatpush3.bf16.msra.mxu1 %v13410_v7 }
 0x924   :  { %v13431_v31 = vadd.f32 %v8773_v23, %v2108_v44 }
 0x925   :  { %9780 = vmatprep.mubr.msk.f32.mxu1 %vm313_vm0, %v13428_v13 }
 0x926   :  { %9781 = vmatmul.mubr.msk.f32.gmra.mrb[34].mxu1 %vm313_vm0, %v13431_v31 }
 0x927   :  { %9832 = vmatprep.mubr.msk.f32.mxu1 %vm1862_vm8, %v271_v36 }
 0x92a   :  { %9833 = vmatmul.mubr.msk.f32.vlgmr.msra.gmra.mrb[36].mxu1 %vm1862_vm8, %v272_v35 }
 0x92b   :  { %9835 = vmatprep.mubr.msk.f32.mxu1 %vm1862_vm8, %v273_v43 }
 0x92e   :  { %9836 = vmatmul.mubr.msk.f32.gmra.mrb[38].mxu1 %vm1862_vm8, %v274_v2 }
 0x9f1   :  { %v9776_v53 = vpop.f32.mrb[30].mxu1 }
 0x9f2   :  { %v2227_v48 = vadd.f32 %v9776_v53, %v8774_v51  ;;  %v2221_v47 = vpop.f32.mrb[31].mxu1 }
 0x9f3   :  { %v2222_v58 = vadd.f32 %v8774_v51, %v2221_v47 }
 0x9f4   :  { %v2251_v18 = vmax.f32 %v2227_v48, 0.0 }
 0x9f5   :  { %v2250_v42 = vmax.f32 %v2222_v58, 0.0  ;;  %v9779_v41 = vpop.f32.mrb[32].mxu1 }
 0x9f6   :  { %v2237_v39 = vadd.f32 %v9779_v41, %v8774_v51  ;;  %v2231_v45 = vpop.f32.mrb[33].mxu1 }
 0x9f7   :  { %v2232_v1 = vadd.f32 %v8774_v51, %v2231_v45  ;;  %9815 = vmatprep.mubr.f32.mxu0 %v2250_v42 }
 0x9f8   :  { %9816 = vmatmul.mubr.f32.vlgmr.msra.gmra.mrb[36].mxu0 %v2251_v18  ;;  %v2253_v11 = vmax.f32 %v2237_v39, 0.0 }
 0x9f9   :  { %v2252_v23 = vmax.f32 %v2232_v1, 0.0  ;;  %v9782_v37 = vpop.f32.mrb[34].mxu1 }
 0x9fa   :  { %v2247_v32 = vadd.f32 %v9782_v37, %v8774_v51  ;;  %v2241_v54 = vpop.f32.mrb[35].mxu1 }
 0x9fb   :  { %v2242_v56 = vadd.f32 %v8774_v51, %v2241_v54  ;;  %9818 = vmatprep.mubr.f32.mxu0 %v2252_v23  ;;  %v15426_v51 = vmov 0 }
 0x9fc   :  { %9819 = vmatmul.mubr.f32.gmra.mrb[38].mxu0 %v2253_v11  ;;  %v2255_v28 = vmax.f32 %v2247_v32, 0.0  ;;  %v15427_v51 = vsel %vm13480_vm12, 4294967295, %v15426_v51 }
 0x9fd   :  { %v2254_v38 = vmax.f32 %v2242_v56, 0.0  ;;  %v9834_v46 = vpop.f32.mrb[36].mxu1  ;;  %15428 = vst [vmem:[#allocation63_spill] sm:$0xff] %v15427_v51 }
 0x9fe   :  { %v13452_v10 = vadd.f32 %v9834_v46, %v8784_v40  ;;  %v2579_v0 = vpop.f32.mrb[37].mxu1 }
 0x9ff   :  { %v13454_v50 = vadd.f32 %v8784_v40, %v2579_v0  ;;  %9821 = vmatprep.mubr.f32.mxu0 %v2254_v38  ;;  %v13514_v0 = vld [vmem:[%s15429_s18] sm:$0xff] }
 0xa00   :  { %9822 = vmatmul.mubr.f32.gmra.mrb[40].mxu0 %v2255_v28  ;;  %v13511_v28 = vld [vmem:[%s15429_s18 + $0x8] sm:$0xff] }
 0xa01   :  { %v9837_v6 = vpop.f32.mrb[38].mxu1  ;;  %9846 = vmatprep.mubr.msk.f32.mxu1 %vm2610_vm11, %v13454_v50  ;;  %v13460_v3 = vpack.i.bf16 %v13452_v10, %v13454_v50 }
 0xa02   :  { %v13462_v44 = vadd.f32 %v9837_v6, %v8784_v40  ;;  %v2589_v36 = vpop.f32.mrb[39].mxu1 }
 0xa03   :  { %v13464_v35 = vadd.f32 %v8784_v40, %v2589_v36  ;;  %11359 = vrot.lane.b32.xlu0 %v13460_v3, %s12341_s11 }
 0xa05   :  { %v13470_v43 = vpack.i.bf16 %v13462_v44, %v13464_v35 }
 0xa07   :  { %11364 = vrot.lane.b32.xlu1 %v13470_v43, %s12341_s11  ;;  %11369 = vrot.lane.b32.xlu0 %v13460_v3, %s12337_s21 }
 0xa0b   :  { %11374 = vrot.lane.b32.xlu1 %v13470_v43, %s12337_s21 }
 0xa75   :  { %v11360_v2 = vpop.permute.xlu0 %11359 }
 0xa76   :  { %v11362_v22 = vunpack.i.h.bf16 %v11360_v2  ;;  %v11361_v33 = vunpack.i.l.bf16 %v11360_v2 }
 0xa78   :  { %v10710_v53 = vpack.c.bf16 %v11362_v22, %v11361_v33 }
 0xa79   :  { %v11365_v48 = vpop.permute.xlu1 %11364  ;;  %v11370_v42 = vpop.permute.xlu0 %11369 }
 0xa7a   :  { %v11367_v47 = vunpack.i.h.bf16 %v11365_v48  ;;  %v11366_v58 = vunpack.i.l.bf16 %v11365_v48  ;;  %10712 = vmatprep.subr.msk.bf16.mxu1 %vm13480_vm12, %v10710_v53  ;;  %v11372_v18 = vunpack.i.h.bf16 %v11370_v42  ;;  %v11371_v39 = vunpack.i.l.bf16 %v11370_v42 }
 0xa7b   :  { %10715 = vmatpush3.bf16.xpose.msk.msra.mxu1 %vm13480_vm12, %v10710_v53  ;;  %v13520_v53 = vld [vmem:[%s15429_s18 + $0x10] sm:$0xff] }
 0xa7c   :  { %v10716_v41 = vpack.c.bf16 %v11367_v47, %v11366_v58  ;;  %v10722_v45 = vpack.c.bf16 %v11372_v18, %v11371_v39  ;;  %v13536_v18 = vld [vmem:[%s15429_s18 + $0x18] sm:$0xff] }
 0xa7d   :  { %v11375_v1 = vpop.permute.xlu1 %11374 }
 0xa7e   :  { %10718 = vmatprep.subr.msk.bf16.mxu1 %vm13480_vm12, %v10716_v41  ;;  %v11377_v23 = vunpack.i.h.bf16 %v11375_v1  ;;  %v11376_v37 = vunpack.i.l.bf16 %v11375_v1 }
 0xa80   :  { %v10726_v11 = vpack.c.bf16 %v11377_v23, %v11376_v37 }
 0xa83   :  { %10721 = vmatpush3.bf16.xpose.msk.msra.mxu1 %vm13480_vm12, %v10716_v41 }
 0xa84   :  { %10723 = vmatprep.subr.bf16.mxu1 %v10722_v45 }
 0xa8a   :  { %9847 = vmatmul.mubr.msk.f32.vlgmr.msra.gmra.mrb[40].mxu1 %vm2610_vm11, %v13452_v10 }
 0xa8b   :  { %9849 = vmatprep.mubr.msk.f32.mxu1 %vm2610_vm11, %v13464_v35  ;;  %10725 = vmatpush3.bf16.msra.mxu1 %v10722_v45 }
 0xa8c   :  { %10727 = vmatprep.subr.bf16.mxu1 %v10726_v11 }
 0xa8e   :  { %9850 = vmatmul.mubr.msk.f32.gmra.mrb[42].mxu1 %vm2610_vm11, %v13462_v44 }
 0xa8f   :  { %10729 = vmatpush3.bf16.msra.mxu1 %v10726_v11 }
 0xacb   :  { %v13498_v32 = vpop.f32.mrb[36].mxu0 }
 0xacc   :  { %v13500_v54 = vpop.f32.mrb[37].mxu0 }
 0xacf   :  { %v13502_v56 = vpop.f32.mrb[38].mxu0 }
 0xad0   :  { %v13504_v40 = vpop.f32.mrb[39].mxu0 }
 0xad3   :  { %v13506_v38 = vpop.f32.mrb[40].mxu0 }
 0xad4   :  { %v13508_v46 = vpop.f32.mrb[41].mxu0 }
 0xb5d   :  { %v9848_v6 = vpop.f32.mrb[40].mxu1 }
 0xb5e   :  { %v2699_v36 = vadd.f32 %v9848_v6, %v13511_v28  ;;  %v2693_v2 = vpop.f32.mrb[41].mxu1 }
 0xb5f   :  { %v2694_v22 = vadd.f32 %v2693_v2, %v13514_v0 }
 0xb60   :  { %v2715_v33 = vsel %vm1862_vm8, %v2699_v36, -inf }
 0xb61   :  { %2716 = vmax.xlane.f32.xlu0 %v2715_v33  ;;  %v9851_v48 = vpop.f32.mrb[42].mxu1  ;;  %v2712_v47 = vsel %vm1862_vm8, %v2694_v22, -inf }
 0xb62   :  { %v2703_v58 = vpop.f32.mrb[43].mxu1  ;;  %2713 = vmax.xlane.f32.xlu1 %v2712_v47  ;;  %v2709_v39 = vadd.f32 %v9851_v48, %v13536_v18 }
 0xb63   :  { %v2704_v42 = vadd.f32 %v2703_v58, %v13520_v53 }
 0xb64   :  { %v2721_v45 = vsel %vm1862_vm8, %v2709_v39, -inf }
 0xb65   :  { %v2718_v41 = vsel %vm1862_vm8, %v2704_v42, -inf }
 0xb66   :  { %2719 = vmax.xlane.f32.xlu0 %v2718_v41 }
 0xb73   :  { %11379 = vrot.lane.b32.xlu1 %v13460_v3, %s12345_s22 }
 0xb7c   :  { %11384 = vrot.lane.b32.xlu0 %v13470_v43, %s12345_s22 }
 0xb80   :  { %2867 = vrot.lane.b32.xlu0 %v13452_v10, %s12346_s23 }
 0xb84   :  { %2871 = vrot.lane.b32.xlu0 %v13462_v44, %s12346_s23 }
 0xb88   :  { %11389 = vrot.lane.b32.xlu0 %v13460_v3, %s12347_s26 }
 0xb97   :  { %2722 = vmax.xlane.f32.xlu1 %v2721_v45 }
 0xba8   :  { %2865 = vrot.lane.b32.xlu1 %v13454_v50, %s12346_s23 }
 0xbac   :  { %2869 = vrot.lane.b32.xlu1 %v13464_v35, %s12346_s23 }
 0xbb0   :  { %11394 = vrot.lane.b32.xlu1 %v13470_v43, %s12347_s26 }
 0xbee   :  { %v2717_v1 = vpop.xlane.xlu0 %2716 }
 0xbef   :  { %v2725_v23 = vsub.f32 %v2699_v36, %v2717_v1  ;;  %v2714_v37 = vpop.xlane.xlu1 %2713 }
 0xbf0   :  { %v2724_v11 = vsub.f32 %v2694_v22, %v2714_v37 }
 0xbf1   :  { %v2730_v6 = vmul.f32 1.442695, %v2725_v23 }
 0xbf2   :  { %v2728_v2 = vmul.f32 1.442695, %v2724_v11 }
 0xbf3   :  { %v2720_v33 = vpop.xlane.xlu0 %2719  ;;  %v11380_v48 = vpop.permute.xlu1 %11379 }
 0xbf4   :  { %11731 = vpow2.f32 %v2728_v2  ;;  %v2726_v47 = vsub.f32 %v2704_v42, %v2720_v33  ;;  %v11382_v58 = vunpack.i.h.bf16 %v11380_v48  ;;  %v11381_v41 = vunpack.i.l.bf16 %v11380_v48 }
 0xbf5   :  { %11733 = vpow2.f32 %v2730_v6 }
 0xbf6   :  { %v2732_v45 = vmul.f32 1.442695, %v2726_v47  ;;  %v10730_v7 = vpack.c.bf16 %v11382_v58, %v11381_v41 }
 0xbf7   :  { %v11385_v62 = vpop.permute.xlu0 %11384 }
 0xbf8   :  { %11735 = vpow2.f32 %v2732_v45  ;;  %10732 = vmatprep.subr.msk.bf16.mxu1 %vm13480_vm12, %v10730_v7  ;;  %v11387_v36 = vunpack.i.h.bf16 %v11385_v62  ;;  %v11386_v1 = vunpack.i.l.bf16 %v11385_v62 }
 0xbfa   :  { %v10736_v42 = vpack.c.bf16 %v11387_v36, %v11386_v1 }
 0xbfb   :  { %v2868_v59 = vpop.permute.xlu0 %2867 }
 0xbfe   :  { %v13548_v22 = vpop.eup %11731 }
 0xbff   :  { %v13550_v23 = vpop.eup %11733  ;;  %v2872_v37 = vpop.permute.xlu0 %2871  ;;  %9860 = vmatprep.mubr.msk.f32.mxu1 %vm1862_vm8, %v13548_v22 }
 0xc00   :  { %9861 = vmatmul.mubr.msk.f32.vlgmr.msra.gmra.mrb[44].mxu1 %vm1862_vm8, %v13550_v23 }
 0xc01   :  { %10735 = vmatpush3.bf16.xpose.msk.msra.mxu1 %vm13480_vm12, %v10730_v7 }
 0xc02   :  { %v13558_v11 = vpop.eup %11735  ;;  %10738 = vmatprep.subr.msk.bf16.mxu1 %vm13480_vm12, %v10736_v42 }
 0xc03   :  { %v11390_v62 = vpop.permute.xlu0 %11389  ;;  %9863 = vmatprep.mubr.msk.f32.mxu1 %vm1862_vm8, %v13558_v11 }
 0xc04   :  { %v11392_v6 = vunpack.i.h.bf16 %v11390_v62  ;;  %v11391_v2 = vunpack.i.l.bf16 %v11390_v62 }
 0xc06   :  { %v10742_v33 = vpack.c.bf16 %v11392_v6, %v11391_v2 }
 0xc08   :  { %10743 = vmatprep.subr.bf16.mxu0 %v10742_v33 }
 0xc09   :  { %10741 = vmatpush3.bf16.xpose.msk.msra.mxu1 %vm13480_vm12, %v10736_v42  ;;  %10745 = vmatpush3.bf16.msra.mxu0 %v10742_v33 }
 0xc24   :  { %v2723_v48 = vpop.xlane.xlu1 %2722 }
 0xc25   :  { %v2727_v47 = vsub.f32 %v2709_v39, %v2723_v48 }
 0xc27   :  { %v2734_v7 = vmul.f32 1.442695, %v2727_v47 }
 0xc28   :  { %v2866_v58 = vpop.permute.xlu1 %2865 }
 0xc29   :  { %11737 = vpow2.f32 %v2734_v7 }
 0xc2c   :  { %v2870_v41 = vpop.permute.xlu1 %2869 }
 0xc30   :  { %v11395_v45 = vpop.permute.xlu1 %11394 }
 0xc31   :  { %v11397_v36 = vunpack.i.h.bf16 %v11395_v45  ;;  %v11396_v1 = vunpack.i.l.bf16 %v11395_v45 }
 0xc33   :  { %v13566_v27 = vpop.eup %11737  ;;  %v10746_v60 = vpack.c.bf16 %v11397_v36, %v11396_v1 }
 0xc34   :  { %9864 = vmatmul.mubr.msk.f32.gmra.mrb[46].mxu1 %vm1862_vm8, %v13566_v27 }
 0xc35   :  { %9874 = vmatprep.mubr.msk.f32.mxu1 %vm2610_vm11, %v2866_v58  ;;  %10747 = vmatprep.subr.bf16.mxu0 %v10746_v60 }
 0xc36   :  { %10749 = vmatpush3.bf16.msra.mxu0 %v10746_v60 }
 0xc38   :  { %9875 = vmatmul.mubr.msk.f32.vlgmr.msra.gmra.mrb[48].mxu1 %vm2610_vm11, %v2868_v59 }
 0xc39   :  { %9877 = vmatprep.mubr.msk.f32.mxu1 %vm2610_vm11, %v2870_v41 }
 0xc3c   :  { %9878 = vmatmul.mubr.msk.f32.gmra.mrb[50].mxu1 %vm2610_vm11, %v2872_v37 }
 0xcd3   :  { %v13574_v39 = vpop.f32.mrb[44].mxu1 }
 0xcd4   :  { %v13576_v42 = vpop.f32.mrb[45].mxu1 }
 0xd07   :  { %v13578_v62 = vpop.f32.mrb[46].mxu1 }
 0xd08   :  { %v13580_v6 = vpop.f32.mrb[47].mxu1 }
 0xd0b   :  { %v9876_v2 = vpop.f32.mrb[48].mxu1 }
 0xd0c   :  { %v2969_v33 = vadd.f32 %v9876_v2, %v13511_v28  ;;  %v2963_v48 = vpop.f32.mrb[49].mxu1 }
 0xd0d   :  { %v2964_v60 = vadd.f32 %v2963_v48, %v13514_v0 }
 0xd0e   :  { %v2985_v59 = vsel %vm1862_vm8, %v2969_v33, -inf }
 0xd0f   :  { %2986 = vmax.xlane.f32.xlu0 %v2985_v59  ;;  %v9879_v47 = vpop.f32.mrb[50].mxu1  ;;  %v2982_v37 = vsel %vm1862_vm8, %v2964_v60, -inf }
 0xd10   :  { %v2973_v7 = vpop.f32.mrb[51].mxu1  ;;  %2983 = vmax.xlane.f32.xlu1 %v2982_v37  ;;  %v2979_v45 = vadd.f32 %v9879_v47, %v13536_v18 }
 0xd11   :  { %v2974_v58 = vadd.f32 %v2973_v7, %v13520_v53 }
 0xd12   :  { %v2991_v36 = vsel %vm1862_vm8, %v2979_v45, -inf }
 0xd13   :  { %v2988_v41 = vsel %vm1862_vm8, %v2974_v58, -inf }
 0xd14   :  { %2989 = vmax.xlane.f32.xlu0 %v2988_v41 }
 0xd21   :  { %11399 = vrot.lane.b32.xlu1 %v13460_v3, %s12344_s15 }
 0xd2a   :  { %11404 = vrot.lane.b32.xlu0 %v13470_v43, %s12344_s15 }
 0xd2e   :  { %3137 = vrot.lane.b32.xlu0 %v13452_v10, %s12339_s4 }
 0xd32   :  { %3141 = vrot.lane.b32.xlu0 %v13462_v44, %s12339_s4 }
 0xd36   :  { %11409 = vrot.lane.b32.xlu0 %v13460_v3, %s12338_s20 }
 0xd45   :  { %2992 = vmax.xlane.f32.xlu1 %v2991_v36 }
 0xd56   :  { %3135 = vrot.lane.b32.xlu1 %v13454_v50, %s12339_s4 }
 0xd5a   :  { %3139 = vrot.lane.b32.xlu1 %v13464_v35, %s12339_s4 }
 0xd5e   :  { %11414 = vrot.lane.b32.xlu1 %v13470_v43, %s12338_s20 }
 0xd9c   :  { %v2987_v1 = vpop.xlane.xlu0 %2986 }
 0xd9d   :  { %v2995_v2 = vsub.f32 %v2969_v33, %v2987_v1  ;;  %v2984_v48 = vpop.xlane.xlu1 %2983 }
 0xd9e   :  { %v2994_v59 = vsub.f32 %v2964_v60, %v2984_v48 }
 0xd9f   :  { %v3000_v37 = vmul.f32 1.442695, %v2995_v2 }
 0xda0   :  { %v2998_v7 = vmul.f32 1.442695, %v2994_v59 }
 0xda1   :  { %v2990_v41 = vpop.xlane.xlu0 %2989  ;;  %v11400_v47 = vpop.permute.xlu1 %11399 }
 0xda2   :  { %11739 = vpow2.f32 %v2998_v7  ;;  %v2996_v21 = vsub.f32 %v2974_v58, %v2990_v41  ;;  %v11402_v36 = vunpack.i.h.bf16 %v11400_v47  ;;  %v11401_v57 = vunpack.i.l.bf16 %v11400_v47 }
 0xda3   :  { %11741 = vpow2.f32 %v3000_v37 }
 0xda4   :  { %v3002_v61 = vmul.f32 1.442695, %v2996_v21  ;;  %v10750_v34 = vpack.c.bf16 %v11402_v36, %v11401_v57 }
 0xda5   :  { %v11405_v63 = vpop.permute.xlu0 %11404 }
 0xda6   :  { %11743 = vpow2.f32 %v3002_v61  ;;  %10752 = vmatprep.subr.msk.bf16.mxu0 %vm13480_vm12, %v10750_v34  ;;  %v11407_v33 = vunpack.i.h.bf16 %v11405_v63  ;;  %v11406_v1 = vunpack.i.l.bf16 %v11405_v63 }
 0xda8   :  { %v10756_v58 = vpack.c.bf16 %v11407_v33, %v11406_v1 }
 0xda9   :  { %v3138_v55 = vpop.permute.xlu0 %3137 }
 0xdac   :  { %v13608_v60 = vpop.eup %11739 }
 0xdad   :  { %v13610_v2 = vpop.eup %11741  ;;  %v3142_v48 = vpop.permute.xlu0 %3141  ;;  %9888 = vmatprep.mubr.msk.f32.mxu0 %vm1862_vm8, %v13608_v60 }
 0xdae   :  { %9889 = vmatmul.mubr.msk.f32.vlgmr.msra.gmra.mrb[42].mxu0 %vm1862_vm8, %v13610_v2 }
 0xdaf   :  { %10755 = vmatpush3.bf16.xpose.msk.msra.mxu0 %vm13480_vm12, %v10750_v34 }
 0xdb0   :  { %v13618_v61 = vpop.eup %11743  ;;  %10758 = vmatprep.subr.msk.bf16.mxu0 %vm13480_vm12, %v10756_v58 }
 0xdb1   :  { %v11410_v63 = vpop.permute.xlu0 %11409  ;;  %9891 = vmatprep.mubr.msk.f32.mxu0 %vm1862_vm8, %v13618_v61 }
 0xdb2   :  { %v11412_v57 = vunpack.i.h.bf16 %v11410_v63  ;;  %v11411_v21 = vunpack.i.l.bf16 %v11410_v63 }
 0xdb4   :  { %v10762_v59 = vpack.c.bf16 %v11412_v57, %v11411_v21 }
 0xdb6   :  { %10763 = vmatprep.subr.bf16.mxu1 %v10762_v59 }
 0xdb7   :  { %10761 = vmatpush3.bf16.xpose.msk.msra.mxu0 %vm13480_vm12, %v10756_v58  ;;  %10765 = vmatpush3.bf16.msra.mxu1 %v10762_v59 }
 0xdd2   :  { %v2993_v37 = vpop.xlane.xlu1 %2992 }
 0xdd3   :  { %v2997_v7 = vsub.f32 %v2979_v45, %v2993_v37 }
 0xdd5   :  { %v3004_v34 = vmul.f32 1.442695, %v2997_v7 }
 0xdd6   :  { %v3136_v41 = vpop.permute.xlu1 %3135 }
 0xdd7   :  { %11745 = vpow2.f32 %v3004_v34 }
 0xdda   :  { %v3140_v47 = vpop.permute.xlu1 %3139 }
 0xdde   :  { %v11415_v36 = vpop.permute.xlu1 %11414 }
 0xddf   :  { %v11417_v33 = vunpack.i.h.bf16 %v11415_v36  ;;  %v11416_v1 = vunpack.i.l.bf16 %v11415_v36 }
 0xde1   :  { %v13626_v17 = vpop.eup %11745  ;;  %v10766_v52 = vpack.c.bf16 %v11417_v33, %v11416_v1 }
 0xde2   :  { %9892 = vmatmul.mubr.msk.f32.gmra.mrb[44].mxu0 %vm1862_vm8, %v13626_v17 }
 0xde3   :  { %9902 = vmatprep.mubr.msk.f32.mxu0 %vm2610_vm11, %v3136_v41  ;;  %10767 = vmatprep.subr.bf16.mxu1 %v10766_v52 }
 0xde4   :  { %10769 = vmatpush3.bf16.msra.mxu1 %v10766_v52 }
 0xde6   :  { %9903 = vmatmul.mubr.msk.f32.vlgmr.msra.gmra.mrb[46].mxu0 %vm2610_vm11, %v3138_v55 }
 0xde7   :  { %9905 = vmatprep.mubr.msk.f32.mxu0 %vm2610_vm11, %v3140_v47 }
 0xdea   :  { %9906 = vmatmul.mubr.msk.f32.gmra.mrb[48].mxu0 %vm2610_vm11, %v3142_v48 }
 0xe81   :  { %v13634_v45 = vpop.f32.mrb[42].mxu0 }
 0xe82   :  { %v13636_v58 = vpop.f32.mrb[43].mxu0 }
 0xeb5   :  { %v13638_v63 = vpop.f32.mrb[44].mxu0 }
 0xeb6   :  { %v13640_v57 = vpop.f32.mrb[45].mxu0 }
 0xeb9   :  { %v9904_v21 = vpop.f32.mrb[46].mxu0 }
 0xeba   :  { %v3239_v59 = vadd.f32 %v9904_v21, %v13511_v28  ;;  %v3233_v37 = vpop.f32.mrb[47].mxu0 }
 0xebb   :  { %v3234_v52 = vadd.f32 %v3233_v37, %v13514_v0 }
 0xebc   :  { %v3255_v55 = vsel %vm1862_vm8, %v3239_v59, -inf }
 0xebd   :  { %3256 = vmax.xlane.f32.xlu0 %v3255_v55  ;;  %v9907_v7 = vpop.f32.mrb[48].mxu0  ;;  %v3252_v48 = vsel %vm1862_vm8, %v3234_v52, -inf }
 0xebe   :  { %v3243_v34 = vpop.f32.mrb[49].mxu0  ;;  %3253 = vmax.xlane.f32.xlu1 %v3252_v48  ;;  %v3249_v36 = vadd.f32 %v9907_v7, %v13536_v18 }
 0xebf   :  { %v3244_v41 = vadd.f32 %v3243_v34, %v13520_v53 }
 0xec0   :  { %v3261_v33 = vsel %vm1862_vm8, %v3249_v36, -inf }
 0xec1   :  { %v3258_v47 = vsel %vm1862_vm8, %v3244_v41, -inf }
 0xec2   :  { %3259 = vmax.xlane.f32.xlu0 %v3258_v47 }
 0xecf   :  { %11419 = vrot.lane.b32.xlu1 %v13460_v3, %s12348_s24 }
 0xed8   :  { %11424 = vrot.lane.b32.xlu0 %v13470_v43, %s12348_s24 }
 0xedc   :  { %3407 = vrot.lane.b32.xlu0 %v13452_v10, %s12349_s14 }
 0xee0   :  { %3411 = vrot.lane.b32.xlu0 %v13462_v44, %s12349_s14 }
 0xef3   :  { %3262 = vmax.xlane.f32.xlu1 %v3261_v33 }
 0xf04   :  { %3405 = vrot.lane.b32.xlu1 %v13454_v50, %s12349_s14 }
 0xf08   :  { %3409 = vrot.lane.b32.xlu1 %v13464_v35, %s12349_s14 }
 0xf4a   :  { %v3257_v1 = vpop.xlane.xlu0 %3256 }
 0xf4b   :  { %v3265_v21 = vsub.f32 %v3239_v59, %v3257_v1  ;;  %v3254_v37 = vpop.xlane.xlu1 %3253 }
 0xf4c   :  { %v3264_v55 = vsub.f32 %v3234_v52, %v3254_v37 }
 0xf4d   :  { %v3270_v48 = vmul.f32 1.442695, %v3265_v21 }
 0xf4e   :  { %v3268_v10 = vmul.f32 1.442695, %v3264_v55 }
 0xf4f   :  { %v3260_v34 = vpop.xlane.xlu0 %3259  ;;  %v11420_v47 = vpop.permute.xlu1 %11419 }
 0xf50   :  { %11747 = vpow2.f32 %v3268_v10  ;;  %v3266_v44 = vsub.f32 %v3244_v41, %v3260_v34  ;;  %v11422_v7 = vunpack.i.h.bf16 %v11420_v47  ;;  %v11421_v49 = vunpack.i.l.bf16 %v11420_v47 }
 0xf51   :  { %11749 = vpow2.f32 %v3270_v48 }
 0xf52   :  { %v3272_v33 = vmul.f32 1.442695, %v3266_v44  ;;  %v10770_v29 = vpack.c.bf16 %v11422_v7, %v11421_v49 }
 0xf53   :  { %v11425_v50 = vpop.permute.xlu0 %11424 }
 0xf54   :  { %11751 = vpow2.f32 %v3272_v33  ;;  %10772 = vmatprep.subr.msk.bf16.mxu1 %vm13480_vm12, %v10770_v29  ;;  %v11427_v35 = vunpack.i.h.bf16 %v11425_v50  ;;  %v11426_v59 = vunpack.i.l.bf16 %v11425_v50 }
 0xf56   :  { %v10776_v21 = vpack.c.bf16 %v11427_v35, %v11426_v59 }
 0xf57   :  { %v3408_v34 = vpop.permute.xlu0 %3407 }
 0xf5a   :  { %v11748_v1 = vpop.eup %11747 }
 0xf5b   :  { %v11750_v52 = vpop.eup %11749  ;;  %9916 = vmatprep.mubr.msk.f32.mxu1 %vm1862_vm8, %v11748_v1  ;;  %v3412_v47 = vpop.permute.xlu0 %3411 }
 0xf5c   :  { %9917 = vmatmul.mubr.msk.f32.vlgmr.msra.gmra.mrb[52].mxu1 %vm1862_vm8, %v11750_v52 }
 0xf5d   :  { %10775 = vmatpush3.bf16.xpose.msk.msra.mxu1 %vm13480_vm12, %v10770_v29 }
 0xf5e   :  { %v11752_v41 = vpop.eup %11751  ;;  %10778 = vmatprep.subr.msk.bf16.mxu1 %vm13480_vm12, %v10776_v21 }
 0xf5f   :  { %9919 = vmatprep.mubr.msk.f32.mxu1 %vm1862_vm8, %v11752_v41 }
 0xf65   :  { %10781 = vmatpush3.bf16.xpose.msk.msra.mxu1 %vm13480_vm12, %v10776_v21 }
 0xf80   :  { %v3263_v49 = vpop.xlane.xlu1 %3262 }
 0xf81   :  { %v3267_v37 = vsub.f32 %v3249_v36, %v3263_v49 }
 0xf83   :  { %v3274_v55 = vmul.f32 1.442695, %v3267_v37 }
 0xf84   :  { %v3406_v48 = vpop.permute.xlu1 %3405 }
 0xf85   :  { %11753 = vpow2.f32 %v3274_v55 }
 0xf88   :  { %v3410_v29 = vpop.permute.xlu1 %3409 }
 0xf8f   :  { %v11754_v10 = vpop.eup %11753 }
 0xf90   :  { %9920 = vmatmul.mubr.msk.f32.gmra.mrb[54].mxu1 %vm1862_vm8, %v11754_v10 }
 0xf91   :  { %9930 = vmatprep.mubr.msk.f32.mxu1 %vm2610_vm11, %v3406_v48 }
 0xf94   :  { %9931 = vmatmul.mubr.msk.f32.vlgmr.msra.gmra.mrb[56].mxu1 %vm2610_vm11, %v3408_v34 }
 0xf95   :  { %9933 = vmatprep.mubr.msk.f32.mxu1 %vm2610_vm11, %v3410_v29 }
 0xf98   :  { %9934 = vmatmul.mubr.msk.f32.gmra.mrb[58].mxu1 %vm2610_vm11, %v3412_v47 }
0x102f   :  { %v13678_v44 = vpop.f32.mrb[52].mxu1 }
0x1030   :  { %v13680_v36 = vpop.f32.mrb[53].mxu1 }
0x1063   :  { %v13682_v7 = vpop.f32.mrb[54].mxu1 }
0x1064   :  { %v13684_v33 = vpop.f32.mrb[55].mxu1 }
0x1067   :  { %v9932_v50 = vpop.f32.mrb[56].mxu1 }
0x1068   :  { %v3509_v35 = vadd.f32 %v9932_v50, %v13511_v28  ;;  %v3503_v59 = vpop.f32.mrb[57].mxu1  ;;  %v3009_v28 = vsel %vm1862_vm8, %v13610_v2, 0.0 }
0x1069   :  { %v3504_v21 = vadd.f32 %v3503_v59, %v13514_v0  ;;  %v3006_v0 = vsel %vm1862_vm8, %v13608_v60, 0.0  ;;  %v3285_v60 = vsel %vm1862_vm8, %v11754_v10, 0.0 }
0x106a   :  { %v3525_v49 = vsel %vm1862_vm8, %v3509_v35, -inf }
0x106b   :  { %3526 = vmax.xlane.f32.xlu0 %v3525_v49  ;;  %v9935_v37 = vpop.f32.mrb[58].mxu1  ;;  %v3522_v55 = vsel %vm1862_vm8, %v3504_v21, -inf }
0x106c   :  { %v3519_v48 = vadd.f32 %v9935_v37, %v13536_v18  ;;  %v3513_v34 = vpop.f32.mrb[59].mxu1  ;;  %3523 = vmax.xlane.f32.xlu1 %v3522_v55  ;;  %v3282_v18 = vsel %vm1862_vm8, %v11752_v41, 0.0 }
0x106d   :  { %v3514_v29 = vadd.f32 %v3513_v34, %v13520_v53  ;;  %v3276_v53 = vsel %vm1862_vm8, %v11748_v1, 0.0 }
0x106e   :  { %v3531_v47 = vsel %vm1862_vm8, %v3519_v48, -inf }
0x106f   :  { %v3528_v51 = vsel %vm1862_vm8, %v3514_v29, -inf }
0x1070   :  { %3529 = vmax.xlane.f32.xlu0 %v3528_v51  ;;  %3532 = vmax.xlane.f32.xlu1 %v3531_v47  ;;  %v3279_v51 = vsel %vm1862_vm8, %v11750_v52, 0.0 }
0x1081   :  { %11434 = vrot.lane.b32.xlu1 %v13470_v43, %s12350_s28  ;;  %v3012_v43 = vsel %vm1862_vm8, %v13618_v61, 0.0 }
0x1086   :  { %11429 = vrot.lane.b32.xlu0 %v13460_v3, %s12350_s28  ;;  %v3015_v3 = vsel %vm1862_vm8, %v13626_v17, 0.0 }
0x10a5   :  { %3010 = vadd.xlane.f32.xlu0 %v3009_v28  ;;  %3007 = vadd.xlane.f32.xlu1 %v3006_v0 }
0x10a9   :  { %3277 = vadd.xlane.f32.xlu0 %v3276_v53  ;;  %3280 = vadd.xlane.f32.xlu1 %v3279_v51 }
0x10ad   :  { %3013 = vadd.xlane.f32.xlu0 %v3012_v43  ;;  %3016 = vadd.xlane.f32.xlu1 %v3015_v3 }
0x10b1   :  { %3283 = vadd.xlane.f32.xlu0 %v3282_v18  ;;  %3286 = vadd.xlane.f32.xlu1 %v3285_v60 }
0x10f8   :  { %v3527_v2 = vpop.xlane.xlu0 %3526 }
0x10f9   :  { %v3535_v1 = vsub.f32 %v3509_v35, %v3527_v2  ;;  %v3524_v50 = vpop.xlane.xlu1 %3523 }
0x10fa   :  { %v3534_v52 = vsub.f32 %v3504_v21, %v3524_v50  ;;  %v2736_v50 = vsel %vm1862_vm8, %v13548_v22, 0.0 }
0x10fb   :  { %v3540_v59 = vmul.f32 1.442695, %v3535_v1 }
0x10fc   :  { %v3538_v49 = vmul.f32 1.442695, %v3534_v52  ;;  %v2739_v52 = vsel %vm1862_vm8, %v13550_v23, 0.0 }
0x10fd   :  { %11755 = vpow2.f32 %v3540_v59  ;;  %v3530_v37 = vpop.xlane.xlu0 %3529  ;;  %v3533_v61 = vpop.xlane.xlu1 %3532  ;;  %v2742_v59 = vsel %vm1862_vm8, %v13558_v11, 0.0 }
0x10fe   :  { %11757 = vpow2.f32 %v3538_v49  ;;  %v3536_v55 = vsub.f32 %v3514_v29, %v3530_v37  ;;  %v3537_v17 = vsub.f32 %v3519_v48, %v3533_v61  ;;  %v2745_v49 = vsel %vm1862_vm8, %v13566_v27, 0.0 }
0x1100   :  { %v3542_v34 = vmul.f32 1.442695, %v3536_v55  ;;  %v3544_v47 = vmul.f32 1.442695, %v3537_v17 }
0x1101   :  { %v11430_v28 = vpop.permute.xlu0 %11429  ;;  %v11435_v41 = vpop.permute.xlu1 %11434 }
0x1102   :  { %11759 = vpow2.f32 %v3542_v34  ;;  %v11432_v10 = vunpack.i.h.bf16 %v11430_v28  ;;  %v11431_v0 = vunpack.i.l.bf16 %v11430_v28  ;;  %v11437_v53 = vunpack.i.h.bf16 %v11435_v41 }
0x1103   :  { %11761 = vpow2.f32 %v3544_v47  ;;  %v11436_v35 = vunpack.i.l.bf16 %v11435_v41 }
0x1104   :  { %v10782_v51 = vpack.c.bf16 %v11432_v10, %v11431_v0 }
0x1105   :  { %v10786_v21 = vpack.c.bf16 %v11437_v53, %v11436_v35 }
0x1106   :  { %10783 = vmatprep.subr.bf16.mxu0 %v10782_v51 }
0x1107   :  { %v11756_v43 = vpop.eup %11755  ;;  %10785 = vmatpush3.bf16.msra.mxu0 %v10782_v51 }
0x1108   :  { %v11758_v3 = vpop.eup %11757  ;;  %10787 = vmatprep.subr.bf16.mxu0 %v10786_v21  ;;  %v3549_v29 = vsel %vm1862_vm8, %v11756_v43, 0.0 }
0x1109   :  { %3550 = vadd.xlane.f32.xlu1 %v3549_v29  ;;  %9944 = vmatprep.mubr.msk.f32.mxu0 %vm1862_vm8, %v11758_v3  ;;  %v3546_v48 = vsel %vm1862_vm8, %v11758_v3, 0.0  ;;  %v3736_v29 = vld [vmem:[%s15430_s0] sm:$0xff] }
0x110a   :  { %3547 = vadd.xlane.f32.xlu0 %v3546_v48  ;;  %v3737_v48 = vld [vmem:[%s15430_s0 + $0x8] sm:$0xff] }
0x110b   :  { %10789 = vmatpush3.bf16.msra.mxu0 %v10786_v21 }
0x110c   :  { %v11760_v18 = vpop.eup %11759 }
0x110d   :  { %v11762_v60 = vpop.eup %11761  ;;  %v3552_v2 = vsel %vm1862_vm8, %v11760_v18, 0.0 }
0x110e   :  { %3553 = vadd.xlane.f32.xlu0 %v3552_v2  ;;  %v3555_v1 = vsel %vm1862_vm8, %v11762_v60, 0.0  ;;  %9945 = vmatmul.mubr.msk.f32.vlgmr.msra.gmra.mrb[50].mxu0 %vm1862_vm8, %v11756_v43 }
0x110f   :  { %3556 = vadd.xlane.f32.xlu1 %v3555_v1  ;;  %9947 = vmatprep.mubr.msk.f32.mxu0 %vm1862_vm8, %v11760_v18  ;;  %v3738_v18 = vld [vmem:[%s15430_s0 + $0x10] sm:$0xff] }
0x1112   :  { %2737 = vadd.xlane.f32.xlu0 %v2736_v50  ;;  %9948 = vmatmul.mubr.msk.f32.gmra.mrb[52].mxu0 %vm1862_vm8, %v11762_v60 }
0x1113   :  { %2740 = vadd.xlane.f32.xlu1 %v2739_v52 }
0x1116   :  { %2743 = vadd.xlane.f32.xlu0 %v2742_v59 }
0x1117   :  { %2746 = vadd.xlane.f32.xlu1 %v2745_v49 }
0x1132   :  { %v3011_v37 = vpop.xlane.xlu0 %3010  ;;  %v3008_v61 = vpop.xlane.xlu1 %3007 }
0x1133   :  { %11763 = vrcp.f32 %v3011_v37 }
0x1134   :  { %11765 = vrcp.f32 %v3008_v61 }
0x1136   :  { %v3278_v22 = vpop.xlane.xlu0 %3277  ;;  %v3281_v55 = vpop.xlane.xlu1 %3280 }
0x1137   :  { %11767 = vrcp.f32 %v3278_v22 }
0x1138   :  { %11769 = vrcp.f32 %v3281_v55 }
0x113a   :  { %v3014_v23 = vpop.xlane.xlu0 %3013  ;;  %v3017_v17 = vpop.xlane.xlu1 %3016 }
0x113b   :  { %11771 = vrcp.f32 %v3014_v23 }
0x113c   :  { %11773 = vrcp.f32 %v3017_v17 }
0x113d   :  { %v11764_v34 = vpop.eup %11763 }
0x113e   :  { %v11766_v47 = vpop.eup %11765  ;;  %v3284_v11 = vpop.xlane.xlu0 %3283  ;;  %v3132_v41 = vmul.f32 %v11764_v34, %v13634_v45 }
0x113f   :  { %v3287_v28 = vpop.xlane.xlu1 %3286  ;;  %11775 = vrcp.f32 %v3284_v11  ;;  %v3131_v27 = vmul.f32 %v11766_v47, %v13636_v58 }
0x1140   :  { %11777 = vrcp.f32 %v3287_v28  ;;  %3681 = vrot.lane.b32.xlu1 %v3132_v41, %s12351_s1 }
0x1141   :  { %v11768_v10 = vpop.eup %11767  ;;  %3679 = vrot.lane.b32.xlu0 %v3131_v27, %s12351_s1 }
0x1142   :  { %v11770_v0 = vpop.eup %11769  ;;  %v3401_v53 = vmul.f32 %v11768_v10, %v13680_v36 }
0x1143   :  { %v3402_v35 = vmul.f32 %v11770_v0, %v13678_v44 }
0x1144   :  { %3695 = vrot.lane.b32.xlu1 %v3401_v53, %s12343_s9 }
0x1145   :  { %v11772_v45 = vpop.eup %11771  ;;  %3697 = vrot.lane.b32.xlu0 %v3402_v35, %s12343_s9 }
0x1146   :  { %v11774_v58 = vpop.eup %11773  ;;  %v3133_v51 = vmul.f32 %v11772_v45, %v13640_v57  ;;  %v13745_v57 = vpack.c.bf16 %v3737_v48, %v3736_v29 }
0x1147   :  { %v3134_v21 = vmul.f32 %v11774_v58, %v13638_v63  ;;  %v3739_v63 = vld [vmem:[%s15430_s0 + $0x18] sm:$0xff]  ;;  %s15449_s0 = sld [smem:[#allocation34_spill]] }
0x1148   :  { %3683 = vrot.lane.b32.xlu1 %v3133_v51, %s12351_s1  ;;  %15431 = vst [vmem:[#allocation64_spill] sm:$0xff] %v13745_v57  ;;  %v13748_v60 = vpack.c.bf16 %v3739_v63, %v3738_v18  ;;  %10791 = vmatprep.subr.bf16.mxu0 %v13745_v57 }
0x1149   :  { %v11776_v43 = vpop.eup %11775  ;;  %3685 = vrot.lane.b32.xlu0 %v3134_v21, %s12351_s1  ;;  %10793 = vmatpush3.bf16.msra.mxu0 %v13745_v57 }
0x114a   :  { %v11778_v36 = vpop.eup %11777  ;;  %v3403_v44 = vmul.f32 %v11776_v43, %v13684_v33  ;;  %15432 = vst [vmem:[#allocation65_spill] sm:$0xff] %v13748_v60  ;;  %10795 = vmatprep.subr.bf16.mxu0 %v13748_v60 }
0x114b   :  { %v3404_v3 = vmul.f32 %v11778_v36, %v13682_v7 }
0x114c   :  { %3699 = vrot.lane.b32.xlu1 %v3403_v44, %s12343_s9 }
0x114d   :  { %3701 = vrot.lane.b32.xlu0 %v3404_v3, %s12343_s9  ;;  %10797 = vmatpush3.bf16.msra.mxu0 %v13748_v60 }
0x1196   :  { %v3551_v7 = vpop.xlane.xlu1 %3550 }
0x1197   :  { %v3548_v33 = vpop.xlane.xlu0 %3547  ;;  %11779 = vrcp.f32 %v3551_v7 }
0x1198   :  { %11781 = vrcp.f32 %v3548_v33 }
0x119b   :  { %v3554_v1 = vpop.xlane.xlu0 %3553 }
0x119c   :  { %v3557_v2 = vpop.xlane.xlu1 %3556 }
0x119d   :  { %11783 = vrcp.f32 %v3557_v2 }
0x119e   :  { %11785 = vrcp.f32 %v3554_v1 }
0x119f   :  { %v2738_v11 = vpop.xlane.xlu0 %2737 }
0x11a0   :  { %v2741_v28 = vpop.xlane.xlu1 %2740  ;;  %11787 = vrcp.f32 %v2738_v11 }
0x11a1   :  { %v11780_v50 = vpop.eup %11779  ;;  %11789 = vrcp.f32 %v2741_v28  ;;  %v12052_v28 = vld [vmem:[%s15423_s16] sm:$0xff] }
0x11a2   :  { %v11782_v59 = vpop.eup %11781 }
0x11a3   :  { %v2744_v41 = vpop.xlane.xlu0 %2743 }
0x11a4   :  { %v2747_v27 = vpop.xlane.xlu1 %2746  ;;  %11791 = vrcp.f32 %v2744_v41 }
0x11a5   :  { %11793 = vrcp.f32 %v2747_v27 }
0x11a7   :  { %v11784_v22 = vpop.eup %11783 }
0x11a8   :  { %v11786_v23 = vpop.eup %11785 }
0x11aa   :  { %v11788_v51 = vpop.eup %11787 }
0x11ab   :  { %v11790_v21 = vpop.eup %11789  ;;  %v2861_v44 = vmul.f32 %v11788_v51, %v13576_v42  ;;  %v12054_v51 = vld [vmem:[%s15423_s16 + $0x10] sm:$0xff] }
0x11ac   :  { %v2862_v29 = vmul.f32 %v11790_v21, %v13574_v39 }
0x11ae   :  { %v11792_v3 = vpop.eup %11791 }
0x11af   :  { %v11794_v48 = vpop.eup %11793 }
0x11b0   :  { %v2864_v42 = vmul.f32 %v11794_v48, %v13578_v62 }
0x11b2   :  { %v3682_v0 = vpop.permute.xlu1 %3681 }
0x11b3   :  { %v3680_v10 = vpop.permute.xlu0 %3679  ;;  %v3724_v7 = vsel %vm2610_vm11, %v2862_v29, %v3682_v0 }
0x11b4   :  { %v3723_v18 = vsel %vm2610_vm11, %v2861_v44, %v3680_v10 }
0x11b6   :  { %v3696_v35 = vpop.permute.xlu1 %3695 }
0x11b7   :  { %v3698_v53 = vpop.permute.xlu0 %3697  ;;  %v3727_v33 = vsel %vm451_vm1, %v3723_v18, %v3696_v35 }
0x11b8   :  { %v3728_v1 = vsel %vm451_vm1, %v3724_v7, %v3698_v53  ;;  %v12053_v53 = vld [vmem:[%s15423_s16 + $0x18] sm:$0xff] }
0x11ba   :  { %v3684_v58 = vpop.permute.xlu1 %3683 }
0x11bb   :  { %v3686_v45 = vpop.permute.xlu0 %3685 }
0x11be   :  { %v3700_v36 = vpop.permute.xlu1 %3699 }
0x11bf   :  { %v3702_v43 = vpop.permute.xlu0 %3701 }
0x11e1   :  { %v9946_v52 = vpop.f32.mrb[50].mxu0 }
0x11e2   :  { %v3672_v49 = vmul.f32 %v11780_v50, %v9946_v52  ;;  %v3652_v37 = vpop.f32.mrb[51].mxu0  ;;  %v2863_v50 = vmul.f32 %v11792_v3, %v13580_v6 }
0x11e3   :  { %v3671_v61 = vmul.f32 %v11782_v59, %v3652_v37  ;;  %v3726_v37 = vsel %vm2610_vm11, %v2864_v42, %v3686_v45 }
0x11e4   :  { %3713 = vrot.lane.b32.xlu0 %v3672_v49, %s12352_s6  ;;  %v3725_v59 = vsel %vm2610_vm11, %v2863_v50, %v3684_v58 }
0x11e5   :  { %3711 = vrot.lane.b32.xlu1 %v3671_v61, %s12352_s6  ;;  %v9949_v55 = vpop.f32.mrb[52].mxu0  ;;  %v3729_v6 = vsel %vm451_vm1, %v3725_v59, %v3700_v36 }
0x11e6   :  { %v3674_v17 = vmul.f32 %v11784_v22, %v9949_v55  ;;  %v3662_v34 = vpop.f32.mrb[53].mxu0  ;;  %v3730_v22 = vsel %vm451_vm1, %v3726_v37, %v3702_v43 }
0x11e7   :  { %v3673_v47 = vmul.f32 %v11786_v23, %v3662_v34  ;;  %v12051_v34 = vld [vmem:[%s15423_s16 + $0x8] sm:$0xff]  ;;  %s15448_s16 = sld [smem:[#allocation33_spill]] }
0x11e8   :  { %3717 = vrot.lane.b32.xlu0 %v3674_v17, %s12352_s6  ;;  %v8841_v17 = vld [vmem:[%s15433_s12] ss:$0 sm:$0xff] }
0x11e9   :  { %3715 = vrot.lane.b32.xlu1 %v3673_v47, %s12352_s6 }
0x1256   :  { %v3714_v63 = vpop.permute.xlu0 %3713 }
0x1257   :  { %v3712_v2 = vpop.permute.xlu1 %3711  ;;  %v3733_v39 = vsel %vm3731_vm13, %v3728_v1, %v3714_v63 }
0x1258   :  { %v3732_v52 = vsel %vm3731_vm13, %v3727_v33, %v3712_v2 }
0x1259   :  { %9958 = vmatprep.mubr.msk.f32.mxu0 %vm1862_vm8, %v3732_v52 }
0x125a   :  { %9959 = vmatmul.mubr.msk.f32.vlgmr.msra.gmra.mrb[54].mxu0 %vm1862_vm8, %v3733_v39  ;;  %v3718_v49 = vpop.permute.xlu0 %3717 }
0x125b   :  { %v3716_v61 = vpop.permute.xlu1 %3715  ;;  %v3735_v55 = vsel %vm3731_vm13, %v3730_v22, %v3718_v49 }
0x125c   :  { %v3734_v62 = vsel %vm3731_vm13, %v3729_v6, %v3716_v61 }
0x125d   :  { %9961 = vmatprep.mubr.msk.f32.mxu0 %vm1862_vm8, %v3734_v62 }
0x125e   :  { %9962 = vmatmul.mubr.msk.f32.gmra.mrb[56].mxu0 %vm1862_vm8, %v3735_v55 }
0x132d   :  { %v9960_v23 = vpop.f32.mrb[54].mxu0 }
0x132e   :  { %v3838_v47 = vadd.f32 %v12051_v34, %v9960_v23  ;;  %v3818_v11 = vpop.f32.mrb[55].mxu0  ;;  %v3928_v34 = vld [vmem:[%s15434_s2 + $0x8] sm:$0xff] }
0x132f   :  { %v3837_v41 = vadd.f32 %v12052_v28, %v3818_v11  ;;  %v3929_v11 = vld [vmem:[%s15434_s2 + $0x10] sm:$0xff]  ;;  %v3930_v28 = vld [vmem:[%s15434_s2 + $0x18] sm:$0xff] }
0x1330   :  { %v3849_v27 = vadd.f32 %v8841_v17, %v3838_v47 }
0x1331   :  { %v3848_v10 = vadd.f32 %v8841_v17, %v3837_v41  ;;  %v9963_v0 = vpop.f32.mrb[56].mxu0  ;;  %v13815_v41 = vpack.c.bf16 %v3930_v28, %v3929_v11 }
0x1332   :  { %v3840_v35 = vadd.f32 %v12053_v53, %v9963_v0  ;;  %v3828_v45 = vpop.f32.mrb[57].mxu0  ;;  %v3855_v58 = vsel %vm1862_vm8, %v3849_v27, 0.0  ;;  %v4041_v0 = vld [vmem:[%s15435_s7 + $0x10] sm:$0xff] }
0x1333   :  { %v3839_v21 = vadd.f32 %v12054_v51, %v3828_v45  ;;  %3856 = vadd.xlane.f32.xlu0 %v3855_v58  ;;  %v3852_v43 = vsel %vm1862_vm8, %v3848_v10, 0.0  ;;  %15437 = vst [vmem:[#allocation67_spill] sm:$0xff] %v13815_v41  ;;  %v4043_v58 = vld [vmem:[%s15435_s7 + $0x20] sm:$0xff]  ;;  %v4044_v51 = vld [vmem:[%s15435_s7 + $0x28] sm:$0xff] }
0x1334   :  { %v3851_v36 = vadd.f32 %v8841_v17, %v3840_v35  ;;  %3853 = vadd.xlane.f32.xlu1 %v3852_v43  ;;  %v4042_v35 = vld [vmem:[%s15435_s7 + $0x18] sm:$0xff] }
0x1335   :  { %v3850_v44 = vadd.f32 %v8841_v17, %v3839_v21  ;;  %v3927_v17 = vld [vmem:[%s15434_s2] sm:$0xff]  ;;  %v13825_v45 = vpack.c.bf16 %v4042_v35, %v4041_v0  ;;  %v13832_v21 = vpack.c.bf16 %v4044_v51, %v4043_v58  ;;  %v4045_v35 = vld [vmem:[%s15435_s7 + $0x30] sm:$0xff]  ;;  %v4046_v58 = vld [vmem:[%s15435_s7 + $0x38] sm:$0xff]  ;;  %s15453_s2 = sld [smem:[#allocation41_spill]] }
0x1336   :  { %v3861_v3 = vsel %vm1862_vm8, %v3851_v36, 0.0  ;;  %v13809_v47 = vpack.c.bf16 %v3928_v34, %v3927_v17  ;;  %v13849_v51 = vpack.c.bf16 %v4046_v58, %v4045_v35 }
0x1337   :  { %v3858_v29 = vsel %vm1862_vm8, %v3850_v44, 0.0  ;;  %15439 = vst [vmem:[#allocation69_spill] sm:$0xff] %v13825_v45  ;;  %15440 = vst [vmem:[#allocation70_spill] sm:$0xff] %v13832_v21 }
0x1338   :  { %3862 = vadd.xlane.f32.xlu1 %v3861_v3  ;;  %3859 = vadd.xlane.f32.xlu0 %v3858_v29  ;;  %15436 = vst [vmem:[#allocation66_spill] sm:$0xff] %v13809_v47  ;;  %15443 = vst [vmem:[#allocation71_spill] sm:$0xff] %v13849_v51 }
0x1339   :  { %10799 = vmatprep.subr.bf16.mxu1 %v13809_v47 }
0x133a   :  { %10801 = vmatpush3.bf16.msra.mxu1 %v13809_v47 }
0x133b   :  { %10803 = vmatprep.subr.bf16.mxu1 %v13815_v41 }
0x133e   :  { %10805 = vmatpush3.bf16.msra.mxu1 %v13815_v41 }
0x13c0   :  { %v3857_v48 = vpop.xlane.xlu0 %3856 }
0x13c1   :  { %v3866_v18 = vmul.f32 0.03125, %v3857_v48  ;;  %v3854_v63 = vpop.xlane.xlu1 %3853 }
0x13c2   :  { %v3865_v7 = vmul.f32 0.03125, %v3854_v63 }
0x13c3   :  { %v13787_v33 = vsub.f32 %v3849_v27, %v3866_v18  ;;  %v4039_v27 = vld [vmem:[%s15435_s7] sm:$0xff] }
0x13c4   :  { %v13789_v2 = vsub.f32 %v3848_v10, %v3865_v7  ;;  %v4040_v10 = vld [vmem:[%s15435_s7 + $0x8] sm:$0xff]  ;;  %s15455_s7 = sld [smem:[#allocation40_spill]] }
0x13c5   :  { %v3860_v1 = vpop.xlane.xlu0 %3859  ;;  %v3863_v50 = vpop.xlane.xlu1 %3862  ;;  %v3874_v52 = vmul.f32 %v13787_v33, %v13787_v33  ;;  %v13822_v53 = vpack.c.bf16 %v4040_v10, %v4039_v27 }
0x13c6   :  { %v3867_v42 = vmul.f32 0.03125, %v3860_v1  ;;  %v3868_v39 = vmul.f32 0.03125, %v3863_v50  ;;  %v3873_v59 = vmul.f32 %v13789_v2, %v13789_v2 }
0x13c7   :  { %v3880_v49 = vsel %vm1862_vm8, %v3874_v52, 0.0  ;;  %15438 = vst [vmem:[#allocation68_spill] sm:$0xff] %v13822_v53  ;;  %10807 = vmatprep.subr.bf16.mxu0 %v13822_v53 }
0x13c8   :  { %v13796_v37 = vsub.f32 %v3850_v44, %v3867_v42  ;;  %v13798_v6 = vsub.f32 %v3851_v36, %v3868_v39  ;;  %3881 = vadd.xlane.f32.xlu1 %v3880_v49  ;;  %v3877_v61 = vsel %vm1862_vm8, %v3873_v59, 0.0  ;;  %10809 = vmatpush3.bf16.msra.mxu0 %v13822_v53  ;;  %v8842_v39 = vld [vmem:[%s15441_s5] ss:$0 sm:$0xff] }
0x13c9   :  { %3878 = vadd.xlane.f32.xlu0 %v3877_v61  ;;  %10811 = vmatprep.subr.bf16.mxu0 %v13825_v45 }
0x13ca   :  { %v3875_v22 = vmul.f32 %v13796_v37, %v13796_v37  ;;  %v3876_v62 = vmul.f32 %v13798_v6, %v13798_v6 }
0x13cc   :  { %v3883_v55 = vsel %vm1862_vm8, %v3875_v22, 0.0  ;;  %v3886_v23 = vsel %vm1862_vm8, %v3876_v62, 0.0  ;;  %10813 = vmatpush3.bf16.msra.mxu0 %v13825_v45  ;;  %v8843_v62 = vld [vmem:[%s15442_s29] ss:$0 sm:$0xff] }
0x13cd   :  { %3884 = vadd.xlane.f32.xlu0 %v3883_v55  ;;  %3887 = vadd.xlane.f32.xlu1 %v3886_v23 }
0x13ce   :  { %10815 = vmatprep.subr.bf16.mxu0 %v13832_v21 }
0x13d0   :  { %10817 = vmatpush3.bf16.msra.mxu0 %v13832_v21 }
0x13d1   :  { %10819 = vmatprep.subr.bf16.mxu0 %v13849_v51 }
0x13d4   :  { %10821 = vmatpush3.bf16.msra.mxu0 %v13849_v51 }
0x13d5   :  { %10855 = vmatprep.subr.bf16.mxu0 %v12598_v4  ;;  %v15444_v4 = vmov 0.0  }
0x1455   :  { %v3882_v43 = vpop.xlane.xlu1 %3881 }
0x1456   :  { %v3890_v36 = vmul.f32 0.03125, %v3882_v43  ;;  %v3879_v44 = vpop.xlane.xlu0 %3878 }
0x1457   :  { %v3889_v3 = vmul.f32 0.03125, %v3879_v44 }
0x1458   :  { %v3894_v29 = vadd.f32 1e-05, %v3890_v36 }
0x1459   :  { %v3893_v48 = vadd.f32 1e-05, %v3889_v3 }
0x145a   :  { %11795 = vrsqrt.f32 %v3894_v29  ;;  %v3885_v18 = vpop.xlane.xlu0 %3884  ;;  %v3888_v63 = vpop.xlane.xlu1 %3887 }
0x145b   :  { %11797 = vrsqrt.f32 %v3893_v48  ;;  %v3891_v7 = vmul.f32 0.03125, %v3885_v18  ;;  %v3892_v1 = vmul.f32 0.03125, %v3888_v63 }
0x145d   :  { %v3895_v50 = vadd.f32 1e-05, %v3891_v7  ;;  %v3896_v52 = vadd.f32 1e-05, %v3892_v1 }
0x145f   :  { %11799 = vrsqrt.f32 %v3895_v50 }
0x1460   :  { %11801 = vrsqrt.f32 %v3896_v52  ;;  %v15445_v52 = vld [vmem:[#allocation43_spill] sm:$0xff] }
0x1464   :  { %v11796_v42 = vpop.eup %11795 }
0x1465   :  { %v11798_v59 = vpop.eup %11797  ;;  %v3902_v49 = vmul.f32 %v11796_v42, %v13787_v33  ;;  %v15446_v42 = vld [vmem:[#allocation44_spill] sm:$0xff] }
0x1466   :  { %v3901_v61 = vmul.f32 %v11798_v59, %v13789_v2 }
0x1467   :  { %v3913_v22 = vmul.f32 %v8842_v39, %v3902_v49 }
0x1468   :  { %v3912_v55 = vmul.f32 %v8842_v39, %v3901_v61 }
0x1469   :  { %v11800_v23 = vpop.eup %11799  ;;  %v3924_v28 = vadd.f32 %v8843_v62, %v3913_v22 }
0x146a   :  { %v11802_v17 = vpop.eup %11801  ;;  %v3923_v34 = vadd.f32 %v8843_v62, %v3912_v55  ;;  %v3903_v11 = vmul.f32 %v11800_v23, %v13796_v37  ;;  %v8844_v37 = vld [vmem:[#allocation13] ss:$0 sm:$0xff] }
0x146b   :  { %v3904_v27 = vmul.f32 %v11802_v17, %v13798_v6 }
0x146c   :  { %9972 = vmatprep.mubr.msk.f32.mxu1 %vm1862_vm8, %v3923_v34  ;;  %v3914_v10 = vmul.f32 %v8842_v39, %v3903_v11 }
0x146d   :  { %9973 = vmatmul.mubr.msk.f32.vlgmr.msra.gmra.mrb[60].mxu1 %vm1862_vm8, %v3924_v28  ;;  %v3915_v33 = vmul.f32 %v8842_v39, %v3904_v27  ;;  %v8853_v39 = vld [vmem:[#allocation15] ss:$0 sm:$0xff] }
0x146e   :  { %v3925_v2 = vadd.f32 %v8843_v62, %v3914_v10 }
0x146f   :  { %v3926_v0 = vadd.f32 %v8843_v62, %v3915_v33 }
0x1470   :  { %9975 = vmatprep.mubr.msk.f32.mxu1 %vm1862_vm8, %v3925_v2 }
0x1471   :  { %9976 = vmatmul.mubr.msk.f32.gmra.mrb[62].mxu1 %vm1862_vm8, %v3926_v0 }
0x1540   :  { %v9974_v6 = vpop.f32.mrb[60].mxu1 }
0x1541   :  { %v4022_v43 = vadd.f32 %v9974_v6, %v8844_v37  ;;  %v4016_v36 = vpop.f32.mrb[61].mxu1 }
0x1542   :  { %v4017_v44 = vadd.f32 %v8844_v37, %v4016_v36 }
0x1543   :  { %v4036_v48 = vmax.f32 %v4022_v43, 0.0 }
0x1544   :  { %v4035_v3 = vmax.f32 %v4017_v44, 0.0  ;;  %v9977_v29 = vpop.f32.mrb[62].mxu1 }
0x1545   :  { %v4032_v18 = vadd.f32 %v9977_v29, %v8844_v37  ;;  %v4026_v63 = vpop.f32.mrb[63].mxu1 }
0x1546   :  { %v4027_v7 = vadd.f32 %v8844_v37, %v4026_v63  ;;  %9994 = vmatprep.mubr.msk.f32.mxu0 %vm313_vm0, %v4035_v3  ;;  %v2368_v3 = vadd.f32 %v13498_v32, %v13407_v19  ;;  %v2367_v63 = vadd.f32 %v13500_v54, %v13404_v24  ;;  %v2369_v24 = vadd.f32 %v13504_v40, %v13417_v16 }
0x1547   :  { %9995 = vmatmul.mubr.msk.f32.vlgmr.msra.gmra.mrb[58].mxu0 %vm313_vm0, %v4036_v48  ;;  %v4038_v50 = vmax.f32 %v4032_v18, 0.0  ;;  %v8781_v18 = vld [vmem:[#allocation9] ss:$0 sm:$0xff] }
0x1548   :  { %v4037_v1 = vmax.f32 %v4027_v7, 0.0  ;;  %10857 = vmatpush1.bf16.msra.mxu0 %v12603_v8  ;;  %v2381_v32 = vadd.f32 %v8781_v18, %v2368_v3 }
0x1549   :  { %10859 = vmatprep.subr.bf16.mxu0 %v12605_v9 }
0x154a   :  { %9997 = vmatprep.mubr.msk.f32.mxu0 %vm313_vm0, %v4037_v1 }
0x154b   :  { %9998 = vmatmul.mubr.msk.f32.gmra.mrb[60].mxu0 %vm313_vm0, %v4038_v50 }
0x154c   :  { %10861 = vmatpush1.bf16.msra.mxu0 %v12613_v14  ;;  %4774 = vmatprep.mubr.f32.mxu0 %v15444_v4 }
0x154d   :  { %10863 = vmatprep.subr.bf16.mxu0 %v12616_v15 }
0x1550   :  { %10865 = vmatpush1.bf16.msra.mxu0 %v12623_v20 }
0x1551   :  { %10867 = vmatprep.subr.bf16.mxu0 %v15445_v52  ;;  %v2370_v52 = vadd.f32 %v13502_v56, %v13420_v30  ;;  %v2371_v30 = vadd.f32 %v13508_v46, %v13428_v13 }
0x1554   :  { %10869 = vmatpush1.bf16.msra.mxu0 %v15446_v42 }
0x161a   :  { %v9996_v8 = vpop.f32.mrb[58].mxu0 }
0x161b   :  { %v4145_v59 = vadd.f32 %v9996_v8, %v3924_v28  ;;  %v4125_v9 = vpop.f32.mrb[59].mxu0  ;;  %v2380_v8 = vadd.f32 %v8781_v18, %v2367_v63 }
0x161c   :  { %v4144_v49 = vadd.f32 %v4125_v9, %v3923_v34  ;;  %v2389_v9 = vsel %vm313_vm0, %v2381_v32, 0.0 }
0x161d   :  { %v4156_v61 = vadd.f32 %v8853_v39, %v4145_v59  ;;  %v2372_v59 = vadd.f32 %v13506_v38, %v13431_v31  ;;  %v2386_v56 = vsel %vm313_vm0, %v2380_v8, 0.0 }
0x161e   :  { %v4155_v22 = vadd.f32 %v8853_v39, %v4144_v49  ;;  %v9999_v62 = vpop.f32.mrb[60].mxu0  ;;  %v2382_v49 = vadd.f32 %v8781_v18, %v2369_v24 }
0x161f   :  { %v4147_v55 = vadd.f32 %v9999_v62, %v3926_v0  ;;  %v4135_v14 = vpop.f32.mrb[61].mxu0  ;;  %v4162_v23 = vsel %vm1862_vm8, %v4156_v61, 0.0  ;;  %v2385_v16 = vadd.f32 %v8781_v18, %v2372_v59  ;;  %v4233_v62 = vld [vmem:[%s15447_s8] sm:$0xff] }
0x1620   :  { %v4146_v17 = vadd.f32 %v4135_v14, %v3925_v2  ;;  %4163 = vadd.xlane.f32.xlu1 %v4162_v23  ;;  %v4159_v15 = vsel %vm1862_vm8, %v4155_v22, 0.0  ;;  %10008 = vmatprep.mubr.msk.f32.mxu1 %vm1862_vm8, %v4233_v62 }
0x1621   :  { %v4158_v20 = vadd.f32 %v8853_v39, %v4147_v55  ;;  %4160 = vadd.xlane.f32.xlu0 %v4159_v15  ;;  %v2401_v31 = vsel %vm2031_vm10, %v2385_v16, 0.0 }
0x1622   :  { %v4157_v11 = vadd.f32 %v8853_v39, %v4146_v17  ;;  %v2383_v39 = vadd.f32 %v8781_v18, %v2370_v52 }
0x1623   :  { %v4168_v27 = vsel %vm1862_vm8, %v4158_v20, 0.0 }
0x1624   :  { %4169 = vadd.xlane.f32.xlu1 %v4168_v27  ;;  %v4165_v28 = vsel %vm1862_vm8, %v4157_v11, 0.0  ;;  %v2395_v40 = vsel %vm313_vm0, %v2383_v39, 0.0 }
0x1625   :  { %4166 = vadd.xlane.f32.xlu0 %v4165_v28 }
0x16ad   :  { %v4164_v34 = vpop.xlane.xlu1 %4163 }
0x16ae   :  { %v4172_v10 = vmul.f32 0.03125, %v4164_v34  ;;  %v4161_v33 = vpop.xlane.xlu0 %4160 }
0x16af   :  { %v4171_v0 = vmul.f32 0.03125, %v4161_v33 }
0x16b0   :  { %v13870_v35 = vsub.f32 %v4156_v61, %v4172_v10  ;;  %v2384_v61 = vadd.f32 %v8781_v18, %v2371_v30  ;;  %v8855_v30 = vld [vmem:[%s15449_s0] ss:$0 sm:$0xff] }
0x16b1   :  { %v13872_v58 = vsub.f32 %v4155_v22, %v4171_v0  ;;  %v4170_v2 = vpop.xlane.xlu1 %4169  ;;  %v2392_v22 = vsel %vm313_vm0, %v2382_v49, 0.0 }
0x16b2   :  { %v4174_v37 = vmul.f32 0.03125, %v4170_v2  ;;  %v4167_v6 = vpop.xlane.xlu0 %4166  ;;  %v4180_v43 = vmul.f32 %v13870_v35, %v13870_v35  ;;  %v2398_v38 = vsel %vm313_vm0, %v2384_v61, 0.0 }
0x16b3   :  { %v4173_v36 = vmul.f32 0.03125, %v4167_v6  ;;  %v4179_v44 = vmul.f32 %v13872_v58, %v13872_v58 }
0x16b4   :  { %v13880_v29 = vsub.f32 %v4158_v20, %v4174_v37  ;;  %v4186_v48 = vsel %vm1862_vm8, %v4180_v43, 0.0 }
0x16b5   :  { %v13885_v7 = vsub.f32 %v4157_v11, %v4173_v36  ;;  %4187 = vadd.xlane.f32.xlu1 %v4186_v48  ;;  %v4183_v1 = vsel %vm1862_vm8, %v4179_v44, 0.0 }
0x16b6   :  { %4184 = vadd.xlane.f32.xlu0 %v4183_v1  ;;  %v4182_v50 = vmul.f32 %v13880_v29, %v13880_v29 }
0x16b7   :  { %v4181_v19 = vmul.f32 %v13885_v7, %v13885_v7 }
0x16b8   :  { %v4192_v42 = vsel %vm1862_vm8, %v4182_v50, 0.0 }
0x16b9   :  { %4193 = vadd.xlane.f32.xlu1 %v4192_v42  ;;  %v4189_v54 = vsel %vm1862_vm8, %v4181_v19, 0.0  ;;  %v8854_v19 = vld [vmem:[%s15448_s16] ss:$0 sm:$0xff] }
0x16ba   :  { %4190 = vadd.xlane.f32.xlu0 %v4189_v54 }
0x16bd   :  { %2390 = vadd.xlane.f32.xlu1 %v2389_v9 }
0x16be   :  { %2387 = vadd.xlane.f32.xlu0 %v2386_v56 }
0x16c1   :  { %2396 = vadd.xlane.f32.xlu1 %v2395_v40 }
0x16c2   :  { %2393 = vadd.xlane.f32.xlu0 %v2392_v22 }
0x16c5   :  { %2402 = vadd.xlane.f32.xlu1 %v2401_v31 }
0x16c6   :  { %2399 = vadd.xlane.f32.xlu0 %v2398_v38 }
0x1742   :  { %v4188_v13 = vpop.xlane.xlu1 %4187 }
0x1743   :  { %v4196_v46 = vmul.f32 0.03125, %v4188_v13  ;;  %v4185_v55 = vpop.xlane.xlu0 %4184 }
0x1744   :  { %v4195_v14 = vmul.f32 0.03125, %v4185_v55 }
0x1745   :  { %v4200_v23 = vadd.f32 1e-05, %v4196_v46 }
0x1746   :  { %v4199_v17 = vadd.f32 1e-05, %v4195_v14  ;;  %v4194_v15 = vpop.xlane.xlu1 %4193 }
0x1747   :  { %11803 = vrsqrt.f32 %v4200_v23  ;;  %v4198_v20 = vmul.f32 0.03125, %v4194_v15  ;;  %v4191_v11 = vpop.xlane.xlu0 %4190 }
0x1748   :  { %11805 = vrsqrt.f32 %v4199_v17  ;;  %v4197_v27 = vmul.f32 0.03125, %v4191_v11 }
0x1749   :  { %v4202_v28 = vadd.f32 1e-05, %v4198_v20 }
0x174a   :  { %v4201_v34 = vadd.f32 1e-05, %v4197_v27  ;;  %v2391_v10 = vpop.xlane.xlu1 %2390 }
0x174b   :  { %11807 = vrsqrt.f32 %v4202_v28  ;;  %v2405_v33 = vmul.f32 0.015625, %v2391_v10  ;;  %v2388_v0 = vpop.xlane.xlu0 %2387  ;;  %v4235_v10 = vld [vmem:[%s15447_s8 + $0x10] sm:$0xff] }
0x174c   :  { %11809 = vrsqrt.f32 %v4201_v34  ;;  %v2404_v2 = vmul.f32 0.015625, %v2388_v0  ;;  %v4234_v34 = vld [vmem:[%s15447_s8 + $0x8] sm:$0xff]  ;;  %v4237_v0 = vld [vmem:[%s15447_s8 + $0x20] sm:$0xff] }
0x174d   :  { %v13910_v37 = vsub.f32 %v2381_v32, %v2405_v33  ;;  %v4236_v33 = vld [vmem:[%s15447_s8 + $0x18] sm:$0xff] }
0x174e   :  { %v13912_v6 = vsub.f32 %v2380_v8, %v2404_v2  ;;  %v2397_v43 = vpop.xlane.xlu1 %2396  ;;  %v4238_v2 = vld [vmem:[%s15447_s8 + $0x28] sm:$0x3f]  ;;  %s15456_s8 = sld [smem:[#allocation42_spill]] }
0x174f   :  { %v2407_v36 = vmul.f32 0.015625, %v2397_v43  ;;  %v2394_v44 = vpop.xlane.xlu0 %2393  ;;  %v2417_v3 = vmul.f32 %v13910_v37, %v13910_v37  ;;  %v4360_v43 = vld [vmem:[%s15453_s2] sm:$0xff] }
0x1750   :  { %v2406_v48 = vmul.f32 0.015625, %v2394_v44  ;;  %v2416_v18 = vmul.f32 %v13912_v6, %v13912_v6  ;;  %v4362_v44 = vld [vmem:[%s15453_s2 + $0x10] sm:$0xff] }
0x1751   :  { %v11804_v63 = vpop.eup %11803  ;;  %v13918_v1 = vsub.f32 %v2383_v39, %v2407_v36  ;;  %v2425_v50 = vsel %vm313_vm0, %v2417_v3, 0.0  ;;  %v4361_v36 = vld [vmem:[%s15453_s2 + $0x8] sm:$0xff] }
0x1752   :  { %v11806_v32 = vpop.eup %11805  ;;  %v13922_v52 = vsub.f32 %v2382_v49, %v2406_v48  ;;  %2426 = vadd.xlane.f32.xlu1 %v2425_v50  ;;  %v2403_v42 = vpop.xlane.xlu1 %2402  ;;  %v2422_v8 = vsel %vm313_vm0, %v2416_v18, 0.0  ;;  %v4208_v24 = vmul.f32 %v11804_v63, %v13870_v35  ;;  %v10830_v3 = vpack.c.bf16 %v4361_v36, %v4360_v43  ;;  %v4363_v48 = vld [vmem:[%s15453_s2 + $0x18] sm:$0xff]  ;;  %v4352_v63 = vld [vmem:[%s15455_s7] sm:$0xff]  ;;  %v4353_v50 = vld [vmem:[%s15455_s7 + $0x8] sm:$0xff] }
0x1753   :  { %v2409_v54 = vmul.f32 0.015625, %v2403_v42  ;;  %2423 = vadd.xlane.f32.xlu0 %v2422_v8  ;;  %v2400_v59 = vpop.xlane.xlu0 %2399  ;;  %v2419_v9 = vmul.f32 %v13918_v1, %v13918_v1  ;;  %v4207_v39 = vmul.f32 %v11806_v32, %v13872_v58  ;;  %v10834_v18 = vpack.c.bf16 %v4363_v48, %v4362_v44  ;;  %v4358_v36 = vld [vmem:[%s15455_s7 + $0x30] sm:$0xff]  ;;  %v4359_v44 = vld [vmem:[%s15455_s7 + $0x38] sm:$0xff]  ;;  %v8783_v48 = vld [vmem:[#allocation12] ss:$0 sm:$0xff] }
0x1754   :  { %v2408_v56 = vmul.f32 0.015625, %v2400_v59  ;;  %v2418_v49 = vmul.f32 %v13922_v52, %v13922_v52  ;;  %v4219_v40 = vmul.f32 %v8854_v19, %v4208_v24 }
0x1755   :  { %v11808_v22 = vpop.eup %11807  ;;  %v13932_v31 = vsub.f32 %v2385_v16, %v2409_v54  ;;  %v2431_v38 = vsel %vm313_vm0, %v2419_v9, 0.0  ;;  %v4218_v35 = vmul.f32 %v8854_v19, %v4207_v39 }
0x1756   :  { %v11810_v62 = vpop.eup %11809  ;;  %v13935_v13 = vsub.f32 %v2384_v61, %v2408_v56  ;;  %2432 = vadd.xlane.f32.xlu1 %v2431_v38  ;;  %v2428_v46 = vsel %vm313_vm0, %v2418_v49, 0.0  ;;  %v13938_v55 = vadd.f32 %v8855_v30, %v4219_v40  ;;  %v4210_v58 = vmul.f32 %v11808_v22, %v13880_v29 }
0x1757   :  { %2429 = vadd.xlane.f32.xlu0 %v2428_v46  ;;  %v2421_v14 = vmul.f32 %v13932_v31, %v13932_v31  ;;  %v13943_v23 = vadd.f32 %v8855_v30, %v4218_v35  ;;  %v4209_v16 = vmul.f32 %v11810_v62, %v13885_v7 }
0x1758   :  { %15450 = vst [vmem:[#allocation43_spill] sm:$0xff] %v13938_v55  ;;  %v2420_v61 = vmul.f32 %v13935_v13, %v13935_v13  ;;  %v4221_v17 = vmul.f32 %v8854_v19, %v4210_v58  ;;  %v4354_v58 = vld [vmem:[%s15455_s7 + $0x10] sm:$0xff] }
0x1759   :  { %15451 = vst [vmem:[#allocation44_spill] sm:$0xff] %v13943_v23  ;;  %v2437_v15 = vsel %vm2031_vm10, %v2421_v14, 0.0  ;;  %v10822_v20 = vpack.c.bf16 %v13938_v55, %v13943_v23  ;;  %v4220_v29 = vmul.f32 %v8854_v19, %v4209_v16  ;;  %v10838_v19 = vpack.c.bf16 %v4353_v50, %v4352_v63  ;;  %v4355_v14 = vld [vmem:[%s15455_s7 + $0x18] sm:$0xff] }
0x175a   :  { %2438 = vadd.xlane.f32.xlu1 %v2437_v15  ;;  %v2434_v11 = vsel %vm313_vm0, %v2420_v61, 0.0  ;;  %v13952_v27 = vadd.f32 %v8855_v30, %v4221_v17  ;;  %v10850_v50 = vpack.c.bf16 %v4359_v44, %v4358_v36 }
0x175b   :  { %10823 = vmatprep.subr.bf16.mxu1 %v10822_v20  ;;  %2435 = vadd.xlane.f32.xlu0 %v2434_v11  ;;  %v13954_v7 = vadd.f32 %v8855_v30, %v4220_v29  ;;  %v4356_v29 = vld [vmem:[%s15455_s7 + $0x20] sm:$0xff]  ;;  %v4357_v11 = vld [vmem:[%s15455_s7 + $0x28] sm:$0xff] }
0x175c   :  { %15452 = vst [vmem:[#allocation72_spill] sm:$0xff] %v13952_v27  ;;  %10825 = vmatpush3.bf16.msra.mxu1 %v10822_v20  ;;  %v10842_v20 = vpack.c.bf16 %v4355_v14, %v4354_v58 }
0x175d   :  { %15454 = vst [vmem:[#allocation73_spill] sm:$0xff] %v13954_v7  ;;  %v10826_v28 = vpack.c.bf16 %v13952_v27, %v13954_v7 }
0x175f   :  { %10827 = vmatprep.subr.bf16.mxu1 %v10826_v28 }
0x1760   :  { %10829 = vmatpush3.bf16.msra.mxu1 %v10826_v28 }
0x1761   :  { %10831 = vmatprep.subr.bf16.mxu1 %v10830_v3 }
0x1763   :  { %10009 = vmatmul.mubr.msk.f32.vlgmr.msra.gmra.mrb[64].mxu1 %vm1862_vm8, %v4234_v34  ;;  %v8782_v34 = vld [vmem:[#allocation10] ss:$0 sm:$0xff] }
0x1764   :  { %10011 = vmatprep.mubr.msk.f32.mxu1 %vm1862_vm8, %v4235_v10  ;;  %10833 = vmatpush3.bf16.msra.mxu1 %v10830_v3 }
0x1765   :  { %10835 = vmatprep.subr.bf16.mxu1 %v10834_v18 }
0x1767   :  { %10012 = vmatmul.mubr.msk.f32.gmra.mrb[66].mxu1 %vm1862_vm8, %v4236_v33 }
0x1768   :  { %10014 = vmatprep.mubr.msk.f32.mxu1 %vm1862_vm8, %v4237_v0  ;;  %10837 = vmatpush3.bf16.msra.mxu1 %v10834_v18  ;;  %v10846_v0 = vpack.c.bf16 %v4357_v11, %v4356_v29 }
0x1769   :  { %10839 = vmatprep.subr.bf16.mxu1 %v10838_v19 }
0x176b   :  { %10015 = vmatmul.mubr.msk.f32.gmra.mrb[68].mxu1 %vm1862_vm8, %v4238_v2 }
0x17df   :  { %v2427_v42 = vpop.xlane.xlu1 %2426 }
0x17e0   :  { %v2424_v32 = vpop.xlane.xlu0 %2423  ;;  %v2441_v9 = vmul.f32 0.015625, %v2427_v42 }
0x17e1   :  { %v2440_v8 = vmul.f32 0.015625, %v2424_v32 }
0x17e2   :  { %v2447_v56 = vadd.f32 1e-05, %v2441_v9 }
0x17e3   :  { %v2446_v54 = vadd.f32 1e-05, %v2440_v8  ;;  %v2433_v59 = vpop.xlane.xlu1 %2432 }
0x17e4   :  { %v2430_v24 = vpop.xlane.xlu0 %2429  ;;  %v2443_v49 = vmul.f32 0.015625, %v2433_v59 }
0x17e5   :  { %11811 = vrsqrt.f32 %v2446_v54  ;;  %v2442_v39 = vmul.f32 0.015625, %v2430_v24 }
0x17e6   :  { %11813 = vrsqrt.f32 %v2447_v56  ;;  %v2449_v35 = vadd.f32 1e-05, %v2443_v49 }
0x17e7   :  { %v2448_v40 = vadd.f32 1e-05, %v2442_v39  ;;  %v2439_v22 = vpop.xlane.xlu1 %2438 }
0x17e8   :  { %v2436_v30 = vpop.xlane.xlu0 %2435  ;;  %v2445_v62 = vmul.f32 0.015625, %v2439_v22 }
0x17e9   :  { %v2444_v38 = vmul.f32 0.015625, %v2436_v30  ;;  %11815 = vrsqrt.f32 %v2448_v40 }
0x17ea   :  { %11817 = vrsqrt.f32 %v2449_v35  ;;  %v2451_v61 = vadd.f32 1e-05, %v2445_v62 }
0x17eb   :  { %v2450_v46 = vadd.f32 1e-05, %v2444_v38 }
0x17ed   :  { %11819 = vrsqrt.f32 %v2450_v46 }
0x17ee   :  { %11821 = vrsqrt.f32 %v2451_v61 }
0x17ef   :  { %v11812_v16 = vpop.eup %11811 }
0x17f0   :  { %v2458_v28 = vmul.f32 %v11812_v16, %v13912_v6  ;;  %v11814_v2 = vpop.eup %11813 }
0x17f1   :  { %v2459_v18 = vmul.f32 %v11814_v2, %v13910_v37 }
0x17f2   :  { %v2471_v43 = vmul.f32 %v8782_v34, %v2458_v28 }
0x17f3   :  { %v11816_v3 = vpop.eup %11815  ;;  %v2472_v24 = vmul.f32 %v8782_v34, %v2459_v18 }
0x17f4   :  { %v2484_v32 = vadd.f32 %v8783_v48, %v2471_v43  ;;  %v2460_v42 = vmul.f32 %v11816_v3, %v13922_v52 }
0x17f5   :  { %v2485_v39 = vadd.f32 %v8783_v48, %v2472_v24 }
0x17f6   :  { %v2473_v59 = vmul.f32 %v8782_v34, %v2460_v42 }
0x17f8   :  { %v2486_v56 = vadd.f32 %v8783_v48, %v2473_v59 }
0x1836   :  { %v10010_v17 = vpop.f32.mrb[64].mxu1 }
0x1837   :  { %v4323_v15 = vpop.f32.mrb[65].mxu1 }
0x1838   :  { %10025 = vmatprep.mubr.msk.f32.mxu1 %vm1862_vm8, %v4323_v15 }
0x1839   :  { %10026 = vmatmul.mubr.msk.f32.vlgmr.msra.gmra.mrb[70].mxu1 %vm1862_vm8, %v10010_v17 }
0x183a   :  { %10841 = vmatpush3.bf16.msra.mxu1 %v10838_v19  ;;  %v10013_v10 = vpop.f32.mrb[66].mxu1  ;;  %v11818_v19 = vpop.eup %11817 }
0x183b   :  { %v4333_v33 = vpop.f32.mrb[67].mxu1  ;;  %10843 = vmatprep.subr.bf16.mxu1 %v10842_v20  ;;  %v11820_v8 = vpop.eup %11819  ;;  %v2461_v54 = vmul.f32 %v11818_v19, %v13918_v1 }
0x183c   :  { %10028 = vmatprep.mubr.msk.f32.mxu1 %vm1862_vm8, %v4333_v33  ;;  %v11822_v37 = vpop.eup %11821  ;;  %v2462_v9 = vmul.f32 %v11820_v8, %v13935_v13  ;;  %v8874_v13 = vld [vmem:[%s15456_s8] ss:$0 sm:$0xff] }
0x183d   :  { %10029 = vmatmul.mubr.msk.f32.gmra.mrb[72].mxu1 %vm1862_vm8, %v10013_v10  ;;  %v2474_v30 = vmul.f32 %v8782_v34, %v2461_v54  ;;  %v2463_v52 = vmul.f32 %v11822_v37, %v13932_v31 }
0x183e   :  { %10845 = vmatpush3.bf16.msra.mxu1 %v10842_v20  ;;  %v10016_v6 = vpop.f32.mrb[68].mxu1  ;;  %v2475_v49 = vmul.f32 %v8782_v34, %v2462_v9 }
0x183f   :  { %v4343_v63 = vpop.f32.mrb[69].mxu1  ;;  %10847 = vmatprep.subr.bf16.mxu1 %v10846_v0  ;;  %v2487_v40 = vadd.f32 %v8783_v48, %v2474_v30  ;;  %v2476_v22 = vmul.f32 %v8782_v34, %v2463_v52 }
0x1840   :  { %10031 = vmatprep.mubr.msk.f32.mxu1 %vm1862_vm8, %v4343_v63  ;;  %v2488_v38 = vadd.f32 %v8783_v48, %v2475_v49 }
0x1841   :  { %10032 = vmatmul.mubr.msk.f32.gmra.mrb[74].mxu1 %vm1862_vm8, %v10016_v6  ;;  %v2489_v1 = vadd.f32 %v8783_v48, %v2476_v22 }
0x1842   :  { %10849 = vmatpush3.bf16.msra.mxu1 %v10846_v0  ;;  %10050 = vmatprep.mubr.msk.f32.mxu1 %vm313_vm0, %v2484_v32 }
0x1843   :  { %10851 = vmatprep.subr.bf16.mxu1 %v10850_v50 }
0x1846   :  { %10853 = vmatpush3.bf16.msra.mxu1 %v10850_v50 }
0x1849   :  { %10051 = vmatmul.mubr.msk.f32.vlgmr.msra.gmra.mrb[70].mxu1 %vm313_vm0, %v2485_v39 }
0x184a   :  { %10053 = vmatprep.mubr.msk.f32.mxu1 %vm313_vm0, %v2486_v56 }
0x184d   :  { %10054 = vmatmul.mubr.msk.f32.gmra.mrb[72].mxu1 %vm313_vm0, %v2487_v40 }
0x184e   :  { %10056 = vmatprep.mubr.msk.f32.mxu1 %vm313_vm0, %v2488_v38 }
0x1851   :  { %10057 = vmatmul.mubr.msk.f32.gmra.mrb[74].mxu1 %vm313_vm0, %v2489_v1 }
0x191c   :  { %v10052_v35 = vpop.f32.mrb[70].mxu1 }
0x191d   :  { %v4598_v62 = vadd.f32 %v10052_v35, %v8874_v13  ;;  %v4561_v31 = vpop.f32.mrb[71].mxu1 }
0x191e   :  { %v4597_v46 = vadd.f32 %v8874_v13, %v4561_v31 }
0x191f   :  { %v4604_v58 = vsel %vm313_vm0, %v4598_v62, 0.0 }
0x1920   :  { %v4603_v14 = vsel %vm313_vm0, %v4597_v46, 0.0  ;;  %v10055_v16 = vpop.f32.mrb[72].mxu1 }
0x1921   :  { %v4605_v61 = vadd.f32 %v4604_v58, %v4603_v14  ;;  %v4571_v17 = vpop.f32.mrb[73].mxu1  ;;  %v4600_v15 = vadd.f32 %v10055_v16, %v8874_v13 }
0x1922   :  { %v4599_v20 = vadd.f32 %v8874_v13, %v4571_v17 }
0x1923   :  { %v4608_v10 = vsel %vm313_vm0, %v4600_v15, 0.0 }
0x1924   :  { %v4606_v29 = vsel %vm313_vm0, %v4599_v20, 0.0  ;;  %v10058_v11 = vpop.f32.mrb[74].mxu1 }
0x1925   :  { %v4607_v28 = vadd.f32 %v4606_v29, %v4605_v61  ;;  %v4581_v34 = vpop.f32.mrb[75].mxu1  ;;  %v4602_v33 = vadd.f32 %v10058_v11, %v8874_v13 }
0x1926   :  { %v4601_v0 = vadd.f32 %v8874_v13, %v4581_v34 }
0x1927   :  { %v4609_v2 = vadd.f32 %v4608_v10, %v4607_v28  ;;  %v4612_v44 = vsel %vm2031_vm10, %v4602_v33, 0.0  ;;  %v8875_v10 = vld [vmem:[%s12541_s30] ss:$0 sm:$0xff]  ;;  %s15501_s30 = sld [smem:[#allocation38_spill]] }
0x1928   :  { %v4610_v43 = vsel %vm313_vm0, %v4601_v0, 0.0 }
0x1929   :  { %v4611_v36 = vadd.f32 %v4610_v43, %v4609_v2 }
0x192b   :  { %v4613_v3 = vadd.f32 %v4612_v44, %v4611_v36  ;;  %v8876_v36 = vld [vmem:[%s12546_s19] ss:$0 sm:$0xff]  ;;  %s15500_s19 = sld [smem:[#allocation37_spill]] }
0x192d   :  { %v4614_v48 = vrot.slane %v4613_v3, 4 }
0x192f   :  { %v4615_v6 = vadd.f32 %v4614_v48, %v4613_v3 }
0x1931   :  { %v4616_v18 = vrot.slane %v4615_v6, 2 }
0x1933   :  { %v4617_v63 = vadd.f32 %v4616_v18, %v4615_v6 }
0x1935   :  { %v4618_v50 = vrot.slane %v4617_v63, 1 }
0x1937   :  { %v4619_v19 = vadd.f32 %v4618_v50, %v4617_v63 }
0x1939   :  { %v4621_v32 = vmul.f32 0.02173913, %v4619_v19 }
0x193b   :  { %v4622_v42 = vsub.f32 %v4597_v46, %v4621_v32  ;;  %v4623_v8 = vsub.f32 %v4598_v62, %v4621_v32  ;;  %v4624_v24 = vsub.f32 %v4599_v20, %v4621_v32  ;;  %v4625_v54 = vsub.f32 %v4600_v15, %v4621_v32 }
0x193c   :  { %v4626_v37 = vsub.f32 %v4601_v0, %v4621_v32  ;;  %v4627_v59 = vsub.f32 %v4602_v33, %v4621_v32 }
0x193d   :  { %v4628_v9 = vmul.f32 %v4622_v42, %v4622_v42  ;;  %v4629_v39 = vmul.f32 %v4623_v8, %v4623_v8  ;;  %v4630_v30 = vmul.f32 %v4624_v24, %v4624_v24  ;;  %v4631_v52 = vmul.f32 %v4625_v54, %v4625_v54 }
0x193e   :  { %v4632_v22 = vmul.f32 %v4626_v37, %v4626_v37  ;;  %v4633_v13 = vmul.f32 %v4627_v59, %v4627_v59 }
0x193f   :  { %v4634_v56 = vsel %vm313_vm0, %v4628_v9, 0.0  ;;  %v4635_v49 = vsel %vm313_vm0, %v4629_v39, 0.0  ;;  %v4637_v38 = vsel %vm313_vm0, %v4630_v30, 0.0  ;;  %v4639_v35 = vsel %vm313_vm0, %v4631_v52, 0.0 }
0x1940   :  { %v4636_v40 = vadd.f32 %v4635_v49, %v4634_v56  ;;  %v4641_v31 = vsel %vm313_vm0, %v4632_v22, 0.0  ;;  %v4643_v58 = vsel %vm2031_vm10, %v4633_v13, 0.0 }
0x1942   :  { %v4638_v1 = vadd.f32 %v4637_v38, %v4636_v40  ;;  %v15459_v40 = vld [vmem:[#allocation45_spill] sm:$0xff] }
0x1944   :  { %v4640_v62 = vadd.f32 %v4639_v35, %v4638_v1 }
0x1946   :  { %v4642_v46 = vadd.f32 %v4641_v31, %v4640_v62 }
0x1948   :  { %v4644_v14 = vadd.f32 %v4643_v58, %v4642_v46 }
0x194a   :  { %v4645_v16 = vrot.slane %v4644_v14, 4 }
0x194c   :  { %v4646_v61 = vadd.f32 %v4645_v16, %v4644_v14 }
0x194e   :  { %v4647_v17 = vrot.slane %v4646_v61, 2 }
0x1950   :  { %v4648_v15 = vadd.f32 %v4647_v17, %v4646_v61 }
0x1952   :  { %v4649_v20 = vrot.slane %v4648_v15, 1 }
0x1954   :  { %v4650_v29 = vadd.f32 %v4649_v20, %v4648_v15 }
0x1956   :  { %v4651_v11 = vmul.f32 0.02173913, %v4650_v29 }
0x1958   :  { %v4652_v28 = vadd.f32 1e-05, %v4651_v11 }
0x195a   :  { %11823 = vrsqrt.f32 %v4652_v28 }
0x1964   :  { %v11824_v34 = vpop.eup %11823 }
0x1965   :  { %v4654_v33 = vmul.f32 %v11824_v34, %v4622_v42  ;;  %v4658_v0 = vmul.f32 %v11824_v34, %v4626_v37  ;;  %v4655_v2 = vmul.f32 %v11824_v34, %v4623_v8  ;;  %v4656_v43 = vmul.f32 %v11824_v34, %v4624_v24 }
0x1966   :  { %v4657_v44 = vmul.f32 %v11824_v34, %v4625_v54  ;;  %v4659_v3 = vmul.f32 %v11824_v34, %v4627_v59 }
0x1967   :  { %v4667_v48 = vmul.f32 %v8875_v10, %v4654_v33  ;;  %v4668_v6 = vmul.f32 %v8875_v10, %v4655_v2  ;;  %v4669_v19 = vmul.f32 %v8875_v10, %v4656_v43  ;;  %v4671_v24 = vmul.f32 %v8875_v10, %v4658_v0 }
0x1968   :  { %v4670_v8 = vmul.f32 %v8875_v10, %v4657_v44  ;;  %v4672_v39 = vmul.f32 %v8875_v10, %v4659_v3 }
0x1969   :  { %v14013_v18 = vadd.f32 %v8876_v36, %v4667_v48  ;;  %v14016_v50 = vadd.f32 %v8876_v36, %v4668_v6  ;;  %v14023_v42 = vadd.f32 %v8876_v36, %v4669_v19  ;;  %v14037_v9 = vadd.f32 %v8876_v36, %v4671_v24 }
0x196a   :  { %v14030_v37 = vadd.f32 %v8876_v36, %v4670_v8  ;;  %v14044_v52 = vadd.f32 %v8876_v36, %v4672_v39 }
0x196b   :  { %v15347_v63 = vmax.f32 %v14013_v18, 0.0  ;;  %v15348_v32 = vmax.f32 %v14016_v50, 0.0  ;;  %v15345_v54 = vmax.f32 %v14023_v42, 0.0  ;;  %15457 = vst [vmem:[#allocation74_spill] sm:$0xff] %v14037_v9  ;;  %v15343_v30 = vmax.f32 %v14037_v9, 0.0 }
0x196c   :  { %v15346_v59 = vmax.f32 %v14030_v37, 0.0  ;;  %15458 = vst [vmem:[#allocation75_spill] sm:$0xff] %v14044_v52  ;;  %v15344_v56 = vmax.f32 %v14044_v52, 0.0 }
0x196d   :  { %8877 = vmatmul.mubr.msk.f32.vlgmr.msra.gmra.mrb[62].mxu0 %vm313_vm0, %v15347_v63 }
0x196e   :  { %4780 = vmatprep.mubr.f32.mxu0 %v15444_v4 }
0x1971   :  { %8878 = vmatmul.mubr.msk.f32.gmra.mrb[64].mxu0 %vm313_vm0, %v15348_v32 }
0x1972   :  { %4786 = vmatprep.mubr.f32.mxu0 %v15444_v4 }
0x1975   :  { %8879 = vmatmul.mubr.msk.f32.gmra.mrb[66].mxu0 %vm313_vm0, %v15345_v54 }
0x1976   :  { %4792 = vmatprep.mubr.f32.mxu0 %v15444_v4 }
0x1979   :  { %8880 = vmatmul.mubr.msk.f32.gmra.mrb[68].mxu0 %vm313_vm0, %v15346_v59 }
0x197a   :  { %4798 = vmatprep.mubr.f32.mxu0 %v15444_v4 }
0x197d   :  { %8881 = vmatmul.mubr.msk.f32.gmra.mrb[70].mxu0 %vm313_vm0, %v15343_v30 }
0x197e   :  { %4804 = vmatprep.mubr.f32.mxu0 %v15444_v4  ;;  %v15460_v4 = vld [vmem:[#allocation46_spill] sm:$0xff] }
0x1981   :  { %8882 = vmatmul.mubr.msk.f32.gmra.mrb[72].mxu0 %vm313_vm0, %v15344_v56 }
0x1a40   :  { %v4776_v49 = vpop.f32.mrb[62].mxu0 }
0x1a41   :  { %v14055_v22 = vadd.f32 %v4776_v49, %v15459_v40  ;;  %v4778_v38 = vpop.f32.mrb[63].mxu0 }
0x1a42   :  { %v4779_v62 = vadd.f32 %v4778_v38, %v15460_v4 }
0x1a43   :  { %10071 = vmatprep.mubr.msk.f32.mxu0 %vm451_vm1, %v14055_v22 }
0x1a44   :  { %v4782_v1 = vpop.f32.mrb[64].mxu0 }
0x1a45   :  { %v14060_v13 = vadd.f32 %v4782_v1, %v15459_v40  ;;  %v4784_v35 = vpop.f32.mrb[65].mxu0 }
0x1a46   :  { %v4785_v31 = vadd.f32 %v4784_v35, %v15460_v4 }
0x1a47   :  { %v14066_v46 = vpack.i.bf16 %v14060_v13, %v14055_v22 }
0x1a48   :  { %v4788_v58 = vpop.f32.mrb[66].mxu0  ;;  %v10888_v14 = vpack.c.bf16 %v4785_v31, %v4779_v62  ;;  %v14068_v16 = vpack.i.bf16 %v4785_v31, %v4779_v62 }
0x1a49   :  { %v4790_v61 = vpop.f32.mrb[67].mxu0  ;;  %11439 = vrot.lane.b32.xlu0 %v14066_v46, %s12337_s21  ;;  %v14073_v15 = vadd.f32 %v4788_v58, %v15459_v40 }
0x1a4a   :  { %10889 = vmatprep.subr.bf16.mxu1 %v10888_v14  ;;  %v4791_v11 = vadd.f32 %v4790_v61, %v15460_v4 }
0x1a4b   :  { %10891 = vmatpush3.bf16.msra.mxu1 %v10888_v14 }
0x1a4c   :  { %v4794_v17 = vpop.f32.mrb[68].mxu0 }
0x1a4d   :  { %v14076_v20 = vadd.f32 %v4794_v17, %v15459_v40  ;;  %v4796_v29 = vpop.f32.mrb[69].mxu0 }
0x1a4e   :  { %v4797_v28 = vadd.f32 %v4796_v29, %v15460_v4 }
0x1a4f   :  { %v14082_v34 = vpack.i.bf16 %v14076_v20, %v14073_v15 }
0x1a50   :  { %v4800_v10 = vpop.f32.mrb[70].mxu0  ;;  %v10892_v33 = vpack.c.bf16 %v4797_v28, %v4791_v11  ;;  %v14084_v0 = vpack.i.bf16 %v4797_v28, %v4791_v11 }
0x1a51   :  { %v4802_v2 = vpop.f32.mrb[71].mxu0  ;;  %11444 = vrot.lane.b32.xlu1 %v14082_v34, %s12337_s21  ;;  %v14089_v36 = vadd.f32 %v4800_v10, %v15459_v40 }
0x1a52   :  { %10893 = vmatprep.subr.bf16.mxu1 %v10892_v33  ;;  %v4803_v48 = vadd.f32 %v4802_v2, %v15460_v4  ;;  %v14138_v2 = vld [vmem:[%s12371_s13 + $0x8] sm:$0xff] }
0x1a53   :  { %10895 = vmatpush3.bf16.msra.mxu1 %v10892_v33 }
0x1a54   :  { %v4806_v43 = vpop.f32.mrb[72].mxu0 }
0x1a55   :  { %v14092_v44 = vadd.f32 %v4806_v43, %v15459_v40  ;;  %v4808_v3 = vpop.f32.mrb[73].mxu0 }
0x1a56   :  { %v4809_v6 = vadd.f32 %v4808_v3, %v15460_v4 }
0x1a57   :  { %v14098_v19 = vpack.i.bf16 %v14092_v44, %v14089_v36 }
0x1a58   :  { %v10896_v8 = vpack.c.bf16 %v4809_v6, %v4803_v48  ;;  %v14100_v24 = vpack.i.bf16 %v4809_v6, %v4803_v48  ;;  %v14142_v48 = vld [vmem:[%s12371_s13] sm:$0xff] }
0x1a59   :  { %11449 = vrot.lane.b32.xlu1 %v14098_v19, %s12337_s21 }
0x1a5a   :  { %10898 = vmatprep.subr.msk.bf16.mxu1 %vm12803_vm5, %v10896_v8 }
0x1a5b   :  { %10901 = vmatpush3.bf16.msk.msra.mxu1 %vm12803_vm5, %v10896_v8 }
0x1a5d   :  { %11454 = vrot.lane.b32.xlu1 %v14066_v46, %s12338_s20 }
0x1abb   :  { %v11440_v39 = vpop.permute.xlu0 %11439 }
0x1abc   :  { %v11442_v49 = vunpack.i.h.bf16 %v11440_v39  ;;  %v11441_v40 = vunpack.i.l.bf16 %v11440_v39 }
0x1abe   :  { %v10870_v38 = vpack.c.bf16 %v11442_v49, %v11441_v40  ;;  %v14148_v40 = vld [vmem:[%s12371_s13 + $0x18] sm:$0xff] }
0x1ac0   :  { %10872 = vmatprep.subr.msk.bf16.mxu0 %vm12762_vm2, %v10870_v38 }
0x1ac1   :  { %10875 = vmatpush3.bf16.xpose.msk.msra.mxu0 %vm12762_vm2, %v10870_v38 }
0x1ac3   :  { %v11445_v35 = vpop.permute.xlu1 %11444 }
0x1ac4   :  { %v11447_v4 = vunpack.i.h.bf16 %v11445_v35  ;;  %v11446_v62 = vunpack.i.l.bf16 %v11445_v35 }
0x1ac6   :  { %v10876_v31 = vpack.c.bf16 %v11447_v4, %v11446_v62  ;;  %v14153_v62 = vld [vmem:[%s12371_s13 + $0x10] sm:$0xff] }
0x1ac8   :  { %10878 = vmatprep.subr.msk.bf16.mxu0 %vm12762_vm2, %v10876_v31 }
0x1ac9   :  { %10881 = vmatpush3.bf16.xpose.msk.msra.mxu0 %vm12762_vm2, %v10876_v31 }
0x1acb   :  { %v11450_v58 = vpop.permute.xlu1 %11449 }
0x1acc   :  { %v11452_v14 = vunpack.i.h.bf16 %v11450_v58  ;;  %v11451_v61 = vunpack.i.l.bf16 %v11450_v58 }
0x1ace   :  { %v10882_v17 = vpack.c.bf16 %v11452_v14, %v11451_v61  ;;  %v14157_v61 = vld [vmem:[%s12371_s13 + $0x28] sm:$0x3f] }
0x1acf   :  { %v11455_v29 = vpop.permute.xlu1 %11454 }
0x1ad0   :  { %v11457_v11 = vunpack.i.h.bf16 %v11455_v29  ;;  %v11456_v28 = vunpack.i.l.bf16 %v11455_v29  ;;  %10884 = vmatprep.subr.msk.bf16.mxu0 %vm12762_vm2, %v10882_v17 }
0x1ad1   :  { %10887 = vmatpush3.bf16.xpose.msk.msra.mxu0 %vm12762_vm2, %v10882_v17 }
0x1ad2   :  { %v14122_v10 = vpack.c.bf16 %v11457_v11, %v11456_v28  ;;  %v14176_v28 = vld [vmem:[%s12371_s13 + $0x20] sm:$0xff]  ;;  %s15498_s13 = sld [smem:[#allocation35_spill]] }
0x1ad4   :  { %10904 = vmatprep.subr.msk.bf16.mxu1 %vm12762_vm2, %v14122_v10 }
0x1ad8   :  { %10072 = vmatmul.mubr.msk.f32.vlgmr.msra.gmra.mrb[74].mxu0 %vm451_vm1, %v14060_v13 }
0x1ad9   :  { %10074 = vmatprep.mubr.msk.f32.mxu0 %vm451_vm1, %v14073_v15 }
0x1adc   :  { %10075 = vmatmul.mubr.msk.f32.gmra.mrb[76].mxu0 %vm451_vm1, %v14076_v20 }
0x1add   :  { %10077 = vmatprep.mubr.msk.f32.mxu0 %vm451_vm1, %v14089_v36 }
0x1ae0   :  { %10078 = vmatmul.mubr.msk.f32.gmra.mrb[78].mxu0 %vm451_vm1, %v14092_v44 }
0x1bab   :  { %v10073_v33 = vpop.f32.mrb[74].mxu0 }
0x1bac   :  { %v4925_v43 = vadd.f32 %v14138_v2, %v10073_v33  ;;  %v4919_v3 = vpop.f32.mrb[75].mxu0 }
0x1bad   :  { %v4920_v6 = vadd.f32 %v14142_v48, %v4919_v3 }
0x1bae   :  { %v4951_v8 = vsel %vm571_vm6, %v4925_v43, -inf }
0x1baf   :  { %4952 = vmax.xlane.f32.xlu1 %v4951_v8  ;;  %v10076_v39 = vpop.f32.mrb[76].mxu0  ;;  %v4948_v49 = vsel %vm571_vm6, %v4920_v6, -inf }
0x1bb0   :  { %v4935_v38 = vadd.f32 %v14148_v40, %v10076_v39  ;;  %v4929_v35 = vpop.f32.mrb[77].mxu0  ;;  %4949 = vmax.xlane.f32.xlu0 %v4948_v49 }
0x1bb1   :  { %v4930_v31 = vadd.f32 %v14153_v62, %v4929_v35 }
0x1bb2   :  { %v4957_v4 = vsel %vm571_vm6, %v4935_v38, -inf }
0x1bb3   :  { %v10079_v58 = vpop.f32.mrb[78].mxu0  ;;  %v4954_v29 = vsel %vm571_vm6, %v4930_v31, -inf }
0x1bb4   :  { %v4939_v14 = vpop.f32.mrb[79].mxu0  ;;  %4958 = vmax.xlane.f32.xlu0 %v4957_v4  ;;  %v14160_v17 = vadd.f32 %v14157_v61, %v10079_v58 }
0x1bb5   :  { %v4940_v33 = vadd.f32 %v14176_v28, %v4939_v14 }
0x1bb6   :  { %v4963_v11 = vsel %vm587_vm7, %v14160_v17, -inf }
0x1bb7   :  { %v4960_v3 = vsel %vm571_vm6, %v4940_v33, -inf }
0x1bb8   :  { %4955 = vmax.xlane.f32.xlu0 %v4954_v29 }
0x1bbc   :  { %4964 = vmax.xlane.f32.xlu0 %v4963_v11 }
0x1bc0   :  { %11464 = vrot.lane.b32.xlu1 %v14098_v19, %s12338_s20 }
0x1bd2   :  { %11459 = vrot.lane.b32.xlu0 %v14082_v34, %s12338_s20 }
0x1bd6   :  { %5132 = vrot.lane.b32.xlu0 %v14060_v13, %s12339_s4 }
0x1bda   :  { %5136 = vrot.lane.b32.xlu0 %v14076_v20, %s12339_s4 }
0x1bde   :  { %5140 = vrot.lane.b32.xlu0 %v14092_v44, %s12339_s4 }
0x1be2   :  { %11469 = vrot.lane.b32.xlu0 %v14068_v16, %s12339_s4 }
0x1be4   :  { %4961 = vmax.xlane.f32.xlu1 %v4960_v3 }
0x1be6   :  { %11479 = vrot.lane.b32.xlu0 %v14100_v24, %s12339_s4 }
0x1bf5   :  { %5130 = vrot.lane.b32.xlu1 %v14055_v22, %s12339_s4 }
0x1bf9   :  { %5134 = vrot.lane.b32.xlu1 %v14073_v15, %s12339_s4 }
0x1bfd   :  { %5138 = vrot.lane.b32.xlu1 %v14089_v36, %s12339_s4 }
0x1c01   :  { %11474 = vrot.lane.b32.xlu1 %v14084_v0, %s12339_s4 }
0x1c3c   :  { %v4953_v8 = vpop.xlane.xlu1 %4952 }
0x1c3d   :  { %v4967_v39 = vsub.f32 %v4925_v43, %v4953_v8  ;;  %v4950_v49 = vpop.xlane.xlu0 %4949 }
0x1c3e   :  { %v4966_v35 = vsub.f32 %v4920_v6, %v4950_v49 }
0x1c3f   :  { %v4974_v4 = vmul.f32 1.442695, %v4967_v39 }
0x1c40   :  { %v4972_v58 = vmul.f32 1.442695, %v4966_v35 }
0x1c41   :  { %v4959_v14 = vpop.xlane.xlu0 %4958 }
0x1c42   :  { %11825 = vpow2.f32 %v4972_v58  ;;  %v4969_v29 = vsub.f32 %v4935_v38, %v4959_v14  ;;  %v11465_v38 = vpop.permute.xlu1 %11464 }
0x1c43   :  { %11827 = vpow2.f32 %v4974_v4  ;;  %v11466_v39 = vunpack.i.l.bf16 %v11465_v38 }
0x1c44   :  { %v4978_v30 = vmul.f32 1.442695, %v4969_v29 }
0x1c45   :  { %v4956_v11 = vpop.xlane.xlu0 %4955 }
0x1c46   :  { %v4968_v3 = vsub.f32 %v4930_v31, %v4956_v11  ;;  %v11467_v31 = vunpack.i.h.bf16 %v11465_v38 }
0x1c48   :  { %v4976_v56 = vmul.f32 1.442695, %v4968_v3  ;;  %v10914_v58 = vpack.c.bf16 %v11467_v31, %v11466_v39 }
0x1c49   :  { %v4965_v54 = vpop.xlane.xlu0 %4964 }
0x1c4a   :  { %11829 = vpow2.f32 %v4976_v56 }
0x1c4b   :  { %11831 = vpow2.f32 %v4978_v30 }
0x1c4c   :  { %v14192_v59 = vpop.eup %11825 }
0x1c4d   :  { %v14194_v63 = vpop.eup %11827  ;;  %10092 = vmatprep.mubr.msk.f32.mxu1 %vm571_vm6, %v14192_v59  ;;  %v11460_v43 = vpop.permute.xlu0 %11459 }
0x1c4e   :  { %v11462_v6 = vunpack.i.h.bf16 %v11460_v43  ;;  %v11461_v8 = vunpack.i.l.bf16 %v11460_v43  ;;  %10093 = vmatmul.mubr.msk.f32.vlgmr.msra.gmra.mrb[76].mxu1 %vm571_vm6, %v14194_v63  ;;  %v4971_v43 = vsub.f32 %v14160_v17, %v4965_v54 }
0x1c4f   :  { %10907 = vmatpush3.bf16.xpose.msk.msra.mxu1 %vm12762_vm2, %v14122_v10 }
0x1c50   :  { %v10908_v56 = vpack.c.bf16 %v11462_v6, %v11461_v8  ;;  %v4982_v38 = vmul.f32 1.442695, %v4971_v43 }
0x1c51   :  { %v5133_v30 = vpop.permute.xlu0 %5132 }
0x1c52   :  { %10910 = vmatprep.subr.msk.bf16.mxu1 %vm12762_vm2, %v10908_v56 }
0x1c54   :  { %v14205_v49 = vpop.eup %11829 }
0x1c55   :  { %v14207_v35 = vpop.eup %11831  ;;  %10095 = vmatprep.mubr.msk.f32.mxu1 %vm571_vm6, %v14205_v49  ;;  %v5137_v4 = vpop.permute.xlu0 %5136  ;;  %v4990_v5 = vsel %vm571_vm6, %v14205_v49, 0.0 }
0x1c56   :  { %10096 = vmatmul.mubr.msk.f32.gmra.mrb[78].mxu1 %vm571_vm6, %v14207_v35 }
0x1c57   :  { %10913 = vmatpush3.bf16.xpose.msk.msra.mxu1 %vm12762_vm2, %v10908_v56 }
0x1c58   :  { %10916 = vmatprep.subr.msk.bf16.mxu1 %vm12762_vm2, %v10914_v58 }
0x1c59   :  { %v5141_v10 = vpop.permute.xlu0 %5140 }
0x1c5d   :  { %v11470_v14 = vpop.permute.xlu0 %11469 }
0x1c5e   :  { %v11472_v29 = vunpack.i.h.bf16 %v11470_v14  ;;  %v11471_v11 = vunpack.i.l.bf16 %v11470_v14 }
0x1c5f   :  { %10919 = vmatpush3.bf16.xpose.msk.msra.mxu1 %vm12762_vm2, %v10914_v58 }
0x1c60   :  { %v10920_v3 = vpack.c.bf16 %v11472_v29, %v11471_v11 }
0x1c61   :  { %v11480_v51 = vpop.permute.xlu0 %11479 }
0x1c62   :  { %10921 = vmatprep.subr.bf16.mxu0 %v10920_v3  ;;  %v11482_v29 = vunpack.i.h.bf16 %v11480_v51  ;;  %v11481_v54 = vunpack.i.l.bf16 %v11480_v51 }
0x1c63   :  { %10923 = vmatpush3.bf16.msra.mxu0 %v10920_v3 }
0x1c64   :  { %v10928_v3 = vpack.c.bf16 %v11482_v29, %v11481_v54 }
0x1c71   :  { %v4962_v6 = vpop.xlane.xlu1 %4961 }
0x1c72   :  { %v4970_v8 = vsub.f32 %v4940_v33, %v4962_v6 }
0x1c74   :  { %v4980_v31 = vmul.f32 1.442695, %v4970_v8 }
0x1c75   :  { %v5131_v56 = vpop.permute.xlu1 %5130 }
0x1c76   :  { %11833 = vpow2.f32 %v4980_v31 }
0x1c77   :  { %11835 = vpow2.f32 %v4982_v38 }
0x1c79   :  { %v5135_v39 = vpop.permute.xlu1 %5134 }
0x1c7d   :  { %v5139_v32 = vpop.permute.xlu1 %5138 }
0x1c80   :  { %v14220_v21 = vpop.eup %11833 }
0x1c81   :  { %v14222_v14 = vpop.eup %11835  ;;  %v11475_v58 = vpop.permute.xlu1 %11474  ;;  %10098 = vmatprep.mubr.msk.f32.mxu1 %vm571_vm6, %v14220_v21 }
0x1c82   :  { %v11477_v17 = vunpack.i.h.bf16 %v11475_v58  ;;  %v11476_v33 = vunpack.i.l.bf16 %v11475_v58  ;;  %10099 = vmatmul.mubr.msk.f32.gmra.mrb[80].mxu1 %vm571_vm6, %v14222_v14  ;;  %v4999_v49 = vsel %vm587_vm7, %v14222_v14, 0.0 }
0x1c83   :  { %10113 = vmatprep.mubr.msk.f32.mxu1 %vm451_vm1, %v5131_v56 }
0x1c84   :  { %v10924_v11 = vpack.c.bf16 %v11477_v17, %v11476_v33 }
0x1c86   :  { %10114 = vmatmul.mubr.msk.f32.vlgmr.msra.gmra.mrb[82].mxu1 %vm451_vm1, %v5133_v30  ;;  %10925 = vmatprep.subr.bf16.mxu0 %v10924_v11 }
0x1c87   :  { %10116 = vmatprep.mubr.msk.f32.mxu1 %vm451_vm1, %v5135_v39  ;;  %10927 = vmatpush3.bf16.msra.mxu0 %v10924_v11 }
0x1c88   :  { %10930 = vmatprep.subr.msk.bf16.mxu0 %vm12803_vm5, %v10928_v3 }
0x1c8a   :  { %10117 = vmatmul.mubr.msk.f32.gmra.mrb[84].mxu1 %vm451_vm1, %v5137_v4 }
0x1c8b   :  { %10119 = vmatprep.mubr.msk.f32.mxu1 %vm451_vm1, %v5139_v32  ;;  %10933 = vmatpush3.bf16.msk.msra.mxu0 %vm12803_vm5, %v10928_v3 }
0x1c8e   :  { %10120 = vmatmul.mubr.msk.f32.gmra.mrb[86].mxu1 %vm451_vm1, %v5141_v10 }
0x1d21   :  { %v14238_v51 = vpop.f32.mrb[76].mxu1 }
0x1d22   :  { %v14240_v43 = vpop.f32.mrb[77].mxu1 }
0x1d29   :  { %v14242_v30 = vpop.f32.mrb[78].mxu1 }
0x1d2a   :  { %v14244_v6 = vpop.f32.mrb[79].mxu1 }
0x1d55   :  { %v14246_v8 = vpop.f32.mrb[80].mxu1 }
0x1d56   :  { %v14248_v38 = vpop.f32.mrb[81].mxu1 }
0x1d59   :  { %v10115_v4 = vpop.f32.mrb[82].mxu1 }
0x1d5a   :  { %v5250_v32 = vadd.f32 %v14138_v2, %v10115_v4  ;;  %v5244_v31 = vpop.f32.mrb[83].mxu1 }
0x1d5b   :  { %v5245_v56 = vadd.f32 %v14142_v48, %v5244_v31 }
0x1d5c   :  { %v5276_v10 = vsel %vm571_vm6, %v5250_v32, -inf }
0x1d5d   :  { %5277 = vmax.xlane.f32.xlu0 %v5276_v10  ;;  %v10118_v39 = vpop.f32.mrb[84].mxu1  ;;  %v5273_v58 = vsel %vm571_vm6, %v5245_v56, -inf }
0x1d5e   :  { %v5254_v29 = vpop.f32.mrb[85].mxu1  ;;  %5274 = vmax.xlane.f32.xlu1 %v5273_v58  ;;  %v5260_v33 = vadd.f32 %v14148_v40, %v10118_v39 }
0x1d5f   :  { %v5255_v11 = vadd.f32 %v14153_v62, %v5254_v29 }
0x1d60   :  { %v5282_v3 = vsel %vm571_vm6, %v5260_v33, -inf }
0x1d61   :  { %v10121_v54 = vpop.f32.mrb[86].mxu1  ;;  %v5279_v31 = vsel %vm571_vm6, %v5255_v11, -inf }
0x1d62   :  { %v5264_v17 = vpop.f32.mrb[87].mxu1  ;;  %v5270_v4 = vadd.f32 %v14157_v61, %v10121_v54 }
0x1d63   :  { %v5265_v10 = vadd.f32 %v14176_v28, %v5264_v17 }
0x1d64   :  { %v5288_v58 = vsel %vm587_vm7, %v5270_v4, -inf }
0x1d65   :  { %v5285_v45 = vsel %vm571_vm6, %v5265_v10, -inf }
0x1d6f   :  { %11484 = vrot.lane.b32.xlu1 %v14066_v46, %s12340_s10 }
0x1d73   :  { %11489 = vrot.lane.b32.xlu0 %v14082_v34, %s12340_s10 }
0x1d92   :  { %5283 = vmax.xlane.f32.xlu0 %v5282_v3 }
0x1d93   :  { %5280 = vmax.xlane.f32.xlu1 %v5279_v31 }
0x1d97   :  { %5289 = vmax.xlane.f32.xlu1 %v5288_v58 }
0x1d9b   :  { %5286 = vmax.xlane.f32.xlu1 %v5285_v45 }
0x1da8   :  { %11494 = vrot.lane.b32.xlu0 %v14098_v19, %s12340_s10 }
0x1dac   :  { %5478 = vrot.lane.b32.xlu0 %v14060_v13, %s12341_s11  ;;  %5476 = vrot.lane.b32.xlu1 %v14055_v22, %s12341_s11 }
0x1db0   :  { %5482 = vrot.lane.b32.xlu0 %v14076_v20, %s12341_s11  ;;  %5480 = vrot.lane.b32.xlu1 %v14073_v15, %s12341_s11 }
0x1db4   :  { %5486 = vrot.lane.b32.xlu0 %v14092_v44, %s12341_s11  ;;  %5484 = vrot.lane.b32.xlu1 %v14089_v36, %s12341_s11 }
0x1db8   :  { %11499 = vrot.lane.b32.xlu0 %v14068_v16, %s12341_s11  ;;  %11504 = vrot.lane.b32.xlu1 %v14084_v0, %s12341_s11 }
0x1dbc   :  { %11509 = vrot.lane.b32.xlu0 %v14100_v24, %s12341_s11 }
0x1dea   :  { %v5278_v45 = vpop.xlane.xlu0 %5277 }
0x1deb   :  { %v5292_v39 = vsub.f32 %v5250_v32, %v5278_v45  ;;  %v5275_v29 = vpop.xlane.xlu1 %5274 }
0x1dec   :  { %v5291_v54 = vsub.f32 %v5245_v56, %v5275_v29 }
0x1ded   :  { %v5299_v17 = vmul.f32 1.442695, %v5292_v39 }
0x1dee   :  { %v5297_v3 = vmul.f32 1.442695, %v5291_v54  ;;  %v11490_v57 = vpop.permute.xlu0 %11489 }
0x1def   :  { %v11485_v31 = vpop.permute.xlu1 %11484  ;;  %v11492_v41 = vunpack.i.h.bf16 %v11490_v57  ;;  %v11491_v47 = vunpack.i.l.bf16 %v11490_v57 }
0x1df0   :  { %11837 = vpow2.f32 %v5297_v3  ;;  %v11487_v58 = vunpack.i.h.bf16 %v11485_v31  ;;  %v11486_v53 = vunpack.i.l.bf16 %v11485_v31 }
0x1df1   :  { %11839 = vpow2.f32 %v5299_v17  ;;  %v10940_v32 = vpack.c.bf16 %v11492_v41, %v11491_v47 }
0x1df2   :  { %v10934_v60 = vpack.c.bf16 %v11487_v58, %v11486_v53 }
0x1df4   :  { %10936 = vmatprep.subr.msk.bf16.mxu0 %vm12762_vm2, %v10934_v60 }
0x1dfa   :  { %v14288_v27 = vpop.eup %11837 }
0x1dfb   :  { %v14290_v7 = vpop.eup %11839  ;;  %10134 = vmatprep.mubr.msk.f32.mxu0 %vm571_vm6, %v14288_v27 }
0x1dfc   :  { %10135 = vmatmul.mubr.msk.f32.vlgmr.msra.gmra.mrb[80].mxu0 %vm571_vm6, %v14290_v7 }
0x1dfd   :  { %10939 = vmatpush3.bf16.xpose.msk.msra.mxu0 %vm12762_vm2, %v10934_v60 }
0x1dfe   :  { %10942 = vmatprep.subr.msk.bf16.mxu0 %vm12762_vm2, %v10940_v32 }
0x1e05   :  { %10945 = vmatpush3.bf16.xpose.msk.msra.mxu0 %vm12762_vm2, %v10940_v32 }
0x1e1f   :  { %v5284_v57 = vpop.xlane.xlu0 %5283 }
0x1e20   :  { %v5294_v53 = vsub.f32 %v5260_v33, %v5284_v57  ;;  %v5281_v56 = vpop.xlane.xlu1 %5280 }
0x1e21   :  { %v5293_v45 = vsub.f32 %v5255_v11, %v5281_v56 }
0x1e22   :  { %v5303_v39 = vmul.f32 1.442695, %v5294_v53 }
0x1e23   :  { %v5301_v29 = vmul.f32 1.442695, %v5293_v45  ;;  %v11495_v54 = vpop.permute.xlu0 %11494 }
0x1e24   :  { %v11497_v47 = vunpack.i.h.bf16 %v11495_v54  ;;  %v11496_v41 = vunpack.i.l.bf16 %v11495_v54  ;;  %v5290_v17 = vpop.xlane.xlu1 %5289 }
0x1e25   :  { %11841 = vpow2.f32 %v5301_v29  ;;  %v5296_v60 = vsub.f32 %v5270_v4, %v5290_v17 }
0x1e26   :  { %11843 = vpow2.f32 %v5303_v39  ;;  %v10946_v3 = vpack.c.bf16 %v11497_v47, %v11496_v41 }
0x1e27   :  { %v5479_v31 = vpop.permute.xlu0 %5478  ;;  %v5307_v33 = vmul.f32 1.442695, %v5296_v60 }
0x1e28   :  { %v5287_v58 = vpop.xlane.xlu1 %5286  ;;  %10948 = vmatprep.subr.msk.bf16.mxu0 %vm12762_vm2, %v10946_v3 }
0x1e29   :  { %v5295_v32 = vsub.f32 %v5265_v10, %v5287_v58  ;;  %10951 = vmatpush3.bf16.xpose.msk.msra.mxu0 %vm12762_vm2, %v10946_v3 }
0x1e2b   :  { %v5305_v11 = vmul.f32 1.442695, %v5295_v32  ;;  %v5483_v57 = vpop.permute.xlu0 %5482 }
0x1e2c   :  { %v5477_v53 = vpop.permute.xlu1 %5476 }
0x1e2d   :  { %11845 = vpow2.f32 %v5305_v11 }
0x1e2e   :  { %11847 = vpow2.f32 %v5307_v33 }
0x1e2f   :  { %v14306_v56 = vpop.eup %11841  ;;  %v5487_v45 = vpop.permute.xlu0 %5486 }
0x1e30   :  { %v14308_v39 = vpop.eup %11843  ;;  %10137 = vmatprep.mubr.msk.f32.mxu0 %vm571_vm6, %v14306_v56  ;;  %v5481_v4 = vpop.permute.xlu1 %5480 }
0x1e31   :  { %10138 = vmatmul.mubr.msk.f32.gmra.mrb[82].mxu0 %vm571_vm6, %v14308_v39 }
0x1e33   :  { %v11500_v10 = vpop.permute.xlu0 %11499 }
0x1e34   :  { %v11502_v29 = vunpack.i.h.bf16 %v11500_v10  ;;  %v11501_v54 = vunpack.i.l.bf16 %v11500_v10  ;;  %v5485_v47 = vpop.permute.xlu1 %5484 }
0x1e36   :  { %v10952_v41 = vpack.c.bf16 %v11502_v29, %v11501_v54 }
0x1e37   :  { %v14314_v17 = vpop.eup %11845  ;;  %v11510_v3 = vpop.permute.xlu0 %11509 }
0x1e38   :  { %v14316_v60 = vpop.eup %11847  ;;  %10140 = vmatprep.mubr.msk.f32.mxu0 %vm571_vm6, %v14314_v17  ;;  %10953 = vmatprep.subr.bf16.mxu1 %v10952_v41  ;;  %v11505_v58 = vpop.permute.xlu1 %11504  ;;  %v11512_v32 = vunpack.i.h.bf16 %v11510_v3  ;;  %v11511_v33 = vunpack.i.l.bf16 %v11510_v3 }
0x1e39   :  { %v11507_v11 = vunpack.i.h.bf16 %v11505_v58  ;;  %v11506_v55 = vunpack.i.l.bf16 %v11505_v58  ;;  %10141 = vmatmul.mubr.msk.f32.gmra.mrb[84].mxu0 %vm571_vm6, %v14316_v60  ;;  %10955 = vmatpush3.bf16.msra.mxu1 %v10952_v41 }
0x1e3a   :  { %10155 = vmatprep.mubr.msk.f32.mxu0 %vm451_vm1, %v5477_v53  ;;  %v10960_v29 = vpack.c.bf16 %v11512_v32, %v11511_v33 }
0x1e3b   :  { %v10956_v10 = vpack.c.bf16 %v11507_v11, %v11506_v55 }
0x1e3d   :  { %10156 = vmatmul.mubr.msk.f32.vlgmr.msra.gmra.mrb[86].mxu0 %vm451_vm1, %v5479_v31  ;;  %10957 = vmatprep.subr.bf16.mxu1 %v10956_v10 }
0x1e3e   :  { %10158 = vmatprep.mubr.msk.f32.mxu0 %vm451_vm1, %v5481_v4  ;;  %10959 = vmatpush3.bf16.msra.mxu1 %v10956_v10 }
0x1e3f   :  { %10962 = vmatprep.subr.msk.bf16.mxu1 %vm12803_vm5, %v10960_v29 }
0x1e41   :  { %10159 = vmatmul.mubr.msk.f32.gmra.mrb[88].mxu0 %vm451_vm1, %v5483_v57 }
0x1e42   :  { %10161 = vmatprep.mubr.msk.f32.mxu0 %vm451_vm1, %v5485_v47  ;;  %10965 = vmatpush3.bf16.msk.msra.mxu1 %vm12803_vm5, %v10960_v29 }
0x1e45   :  { %10162 = vmatmul.mubr.msk.f32.gmra.mrb[90].mxu0 %vm451_vm1, %v5487_v45 }
0x1ecf   :  { %v14332_v55 = vpop.f32.mrb[80].mxu0 }
0x1ed0   :  { %v14334_v53 = vpop.f32.mrb[81].mxu0 }
0x1f04   :  { %v14336_v31 = vpop.f32.mrb[82].mxu0 }
0x1f05   :  { %v14338_v4 = vpop.f32.mrb[83].mxu0 }
0x1f0c   :  { %v14340_v54 = vpop.f32.mrb[84].mxu0 }
0x1f0d   :  { %v14342_v41 = vpop.f32.mrb[85].mxu0 }
0x1f10   :  { %v10157_v57 = vpop.f32.mrb[86].mxu0 }
0x1f11   :  { %v5596_v47 = vadd.f32 %v14138_v2, %v10157_v57  ;;  %v5590_v3 = vpop.f32.mrb[87].mxu0 }
0x1f12   :  { %v5591_v58 = vadd.f32 %v14142_v48, %v5590_v3 }
0x1f13   :  { %v5622_v45 = vsel %vm571_vm6, %v5596_v47, -inf }
0x1f14   :  { %5623 = vmax.xlane.f32.xlu0 %v5622_v45  ;;  %v10160_v32 = vpop.f32.mrb[88].mxu0  ;;  %v5619_v33 = vsel %vm571_vm6, %v5591_v58, -inf }
0x1f15   :  { %v5600_v11 = vpop.f32.mrb[89].mxu0  ;;  %5620 = vmax.xlane.f32.xlu1 %v5619_v33  ;;  %v5606_v57 = vadd.f32 %v14148_v40, %v10160_v32 }
0x1f16   :  { %v5601_v3 = vadd.f32 %v14153_v62, %v5600_v11 }
0x1f17   :  { %v5628_v23 = vsel %vm571_vm6, %v5606_v57, -inf }
0x1f18   :  { %v10163_v10 = vpop.f32.mrb[90].mxu0  ;;  %v5625_v9 = vsel %vm571_vm6, %v5601_v3, -inf }
0x1f19   :  { %v5610_v29 = vpop.f32.mrb[91].mxu0  ;;  %v5616_v45 = vadd.f32 %v14157_v61, %v10163_v10 }
0x1f1a   :  { %v5611_v33 = vadd.f32 %v14176_v28, %v5610_v29 }
0x1f1b   :  { %v5634_v52 = vsel %vm587_vm7, %v5616_v45, -inf }
0x1f26   :  { %11514 = vrot.lane.b32.xlu1 %v14066_v46, %s12343_s9  ;;  %v5631_v46 = vsel %vm571_vm6, %v5611_v33, -inf }
0x1f2a   :  { %11519 = vrot.lane.b32.xlu0 %v14082_v34, %s12343_s9 }
0x1f49   :  { %5629 = vmax.xlane.f32.xlu0 %v5628_v23 }
0x1f4a   :  { %5626 = vmax.xlane.f32.xlu1 %v5625_v9 }
0x1f4e   :  { %5635 = vmax.xlane.f32.xlu1 %v5634_v52 }
0x1f52   :  { %5632 = vmax.xlane.f32.xlu1 %v5631_v46 }
0x1f5f   :  { %11524 = vrot.lane.b32.xlu0 %v14098_v19, %s12343_s9 }
0x1f63   :  { %5819 = vrot.lane.b32.xlu0 %v14060_v13, %s12344_s15  ;;  %5817 = vrot.lane.b32.xlu1 %v14055_v22, %s12344_s15 }
0x1f67   :  { %5823 = vrot.lane.b32.xlu0 %v14076_v20, %s12344_s15  ;;  %5821 = vrot.lane.b32.xlu1 %v14073_v15, %s12344_s15 }
0x1f6b   :  { %5827 = vrot.lane.b32.xlu0 %v14092_v44, %s12344_s15  ;;  %5825 = vrot.lane.b32.xlu1 %v14089_v36, %s12344_s15 }
0x1fa1   :  { %v5624_v23 = vpop.xlane.xlu0 %5623 }
0x1fa2   :  { %v5638_v9 = vsub.f32 %v5596_v47, %v5624_v23  ;;  %v5621_v52 = vpop.xlane.xlu1 %5620 }
0x1fa3   :  { %v5637_v34 = vsub.f32 %v5591_v58, %v5621_v52 }
0x1fa4   :  { %v5645_v13 = vmul.f32 1.442695, %v5638_v9 }
0x1fa5   :  { %v5643_v19 = vmul.f32 1.442695, %v5637_v34  ;;  %v11520_v15 = vpop.permute.xlu0 %11519 }
0x1fa6   :  { %v11515_v32 = vpop.permute.xlu1 %11514  ;;  %v11522_v44 = vunpack.i.h.bf16 %v11520_v15  ;;  %v11521_v10 = vunpack.i.l.bf16 %v11520_v15 }
0x1fa7   :  { %11849 = vpow2.f32 %v5643_v19  ;;  %v11517_v22 = vunpack.i.h.bf16 %v11515_v32  ;;  %v11516_v11 = vunpack.i.l.bf16 %v11515_v32 }
0x1fa8   :  { %11851 = vpow2.f32 %v5645_v13  ;;  %v10972_v47 = vpack.c.bf16 %v11522_v44, %v11521_v10 }
0x1fa9   :  { %v10966_v20 = vpack.c.bf16 %v11517_v22, %v11516_v11 }
0x1fab   :  { %10968 = vmatprep.subr.msk.bf16.mxu1 %vm12762_vm2, %v10966_v20 }
0x1fb1   :  { %v14376_v29 = vpop.eup %11849 }
0x1fb2   :  { %v14378_v36 = vpop.eup %11851  ;;  %10176 = vmatprep.mubr.msk.f32.mxu1 %vm571_vm6, %v14376_v29 }
0x1fb3   :  { %10177 = vmatmul.mubr.msk.f32.vlgmr.msra.gmra.mrb[88].mxu1 %vm571_vm6, %v14378_v36 }
0x1fb4   :  { %10971 = vmatpush3.bf16.xpose.msk.msra.mxu1 %vm12762_vm2, %v10966_v20 }
0x1fb5   :  { %10974 = vmatprep.subr.msk.bf16.mxu1 %vm12762_vm2, %v10972_v47 }
0x1fbc   :  { %10977 = vmatpush3.bf16.xpose.msk.msra.mxu1 %vm12762_vm2, %v10972_v47 }
0x1fd6   :  { %v5630_v58 = vpop.xlane.xlu0 %5629 }
0x1fd7   :  { %v5640_v46 = vsub.f32 %v5606_v57, %v5630_v58  ;;  %v5627_v23 = vpop.xlane.xlu1 %5626 }
0x1fd8   :  { %v5639_v9 = vsub.f32 %v5601_v3, %v5627_v23 }
0x1fd9   :  { %v5649_v52 = vmul.f32 1.442695, %v5640_v46 }
0x1fda   :  { %v5647_v34 = vmul.f32 1.442695, %v5639_v9  ;;  %v11525_v13 = vpop.permute.xlu0 %11524 }
0x1fdb   :  { %v11527_v19 = vunpack.i.h.bf16 %v11525_v13  ;;  %v11526_v32 = vunpack.i.l.bf16 %v11525_v13  ;;  %v5636_v22 = vpop.xlane.xlu1 %5635 }
0x1fdc   :  { %11853 = vpow2.f32 %v5647_v34  ;;  %v5642_v20 = vsub.f32 %v5616_v45, %v5636_v22  ;;  %v15462_v34 = vld [vmem:[#allocation52_spill] sm:$0xff] }
0x1fdd   :  { %11855 = vpow2.f32 %v5649_v52  ;;  %v10978_v11 = vpack.c.bf16 %v11527_v19, %v11526_v32 }
0x1fde   :  { %v5653_v57 = vmul.f32 1.442695, %v5642_v20  ;;  %v5820_v58 = vpop.permute.xlu0 %5819 }
0x1fdf   :  { %v5633_v15 = vpop.xlane.xlu1 %5632  ;;  %10980 = vmatprep.subr.msk.bf16.mxu1 %vm12762_vm2, %v10978_v11 }
0x1fe0   :  { %v5641_v44 = vsub.f32 %v5611_v33, %v5633_v15  ;;  %10983 = vmatpush3.bf16.xpose.msk.msra.mxu1 %vm12762_vm2, %v10978_v11 }
0x1fe1   :  { %11015 = vmatprep.subr.bf16.mxu1 %v13331_v26 }
0x1fe2   :  { %v5651_v3 = vmul.f32 1.442695, %v5641_v44  ;;  %v5824_v23 = vpop.permute.xlu0 %5823 }
0x1fe3   :  { %v5818_v45 = vpop.permute.xlu1 %5817 }
0x1fe4   :  { %11857 = vpow2.f32 %v5651_v3 }
0x1fe5   :  { %11859 = vpow2.f32 %v5653_v57 }
0x1fe6   :  { %v14395_v10 = vpop.eup %11853  ;;  %v5828_v52 = vpop.permute.xlu0 %5827 }
0x1fe7   :  { %v14397_v47 = vpop.eup %11855  ;;  %10179 = vmatprep.mubr.msk.f32.mxu1 %vm571_vm6, %v14395_v10  ;;  %v5822_v46 = vpop.permute.xlu1 %5821 }
0x1fe8   :  { %10180 = vmatmul.mubr.msk.f32.gmra.mrb[90].mxu1 %vm571_vm6, %v14397_v47 }
0x1feb   :  { %v5826_v9 = vpop.permute.xlu1 %5825 }
0x1fee   :  { %v14403_v33 = vpop.eup %11857 }
0x1fef   :  { %v14405_v1 = vpop.eup %11859  ;;  %10182 = vmatprep.mubr.msk.f32.mxu1 %vm571_vm6, %v14403_v33 }
0x1ff0   :  { %10183 = vmatmul.mubr.msk.f32.gmra.mrb[92].mxu1 %vm571_vm6, %v14405_v1 }
0x1ff1   :  { %10197 = vmatprep.mubr.msk.f32.mxu1 %vm451_vm1, %v5818_v45 }
0x1ff4   :  { %10198 = vmatmul.mubr.msk.f32.vlgmr.msra.gmra.mrb[94].mxu1 %vm451_vm1, %v5820_v58 }
0x1ff5   :  { %10200 = vmatprep.mubr.msk.f32.mxu1 %vm451_vm1, %v5822_v46  ;;  %11017 = vmatpush3.bf16.msra.mxu1 %v13331_v26  ;;  %v15463_v26 = vld [vmem:[#allocation53_spill] sm:$0xff] }
0x1ff6   :  { %11019 = vmatprep.subr.bf16.mxu1 %v13337_v12 }
0x1ff8   :  { %10201 = vmatmul.mubr.msk.f32.gmra.mrb[96].mxu1 %vm451_vm1, %v5824_v23 }
0x1ff9   :  { %10203 = vmatprep.mubr.msk.f32.mxu1 %vm451_vm1, %v5826_v9  ;;  %11021 = vmatpush3.bf16.msra.mxu1 %v13337_v12 }
0x1ffa   :  { %11023 = vmatprep.subr.bf16.mxu1 %v13343_v25 }
0x1ffc   :  { %10204 = vmatmul.mubr.msk.f32.gmra.mrb[98].mxu1 %vm451_vm1, %v5828_v52 }
0x1ffd   :  { %11025 = vmatpush3.bf16.msra.mxu1 %v13343_v25 }
0x1ffe   :  { %11027 = vmatprep.subr.bf16.mxu1 %v15462_v34 }
0x2001   :  { %11029 = vmatpush3.bf16.msra.mxu1 %v15462_v34 }
0x2002   :  { %11063 = vmatprep.subr.bf16.mxu1 %v15463_v26 }
0x2086   :  { %v14425_v13 = vpop.f32.mrb[88].mxu1 }
0x2087   :  { %v14427_v19 = vpop.f32.mrb[89].mxu1 }
0x20bb   :  { %v14429_v32 = vpop.f32.mrb[90].mxu1 }
0x20bc   :  { %v14431_v12 = vpop.f32.mrb[91].mxu1 }
0x20c3   :  { %v14433_v22 = vpop.f32.mrb[92].mxu1 }
0x20c4   :  { %v14435_v11 = vpop.f32.mrb[93].mxu1 }
0x20c7   :  { %v10199_v20 = vpop.f32.mrb[94].mxu1 }
0x20c8   :  { %v5937_v25 = vadd.f32 %v14138_v2, %v10199_v20  ;;  %v5931_v15 = vpop.f32.mrb[95].mxu1 }
0x20c9   :  { %v5932_v44 = vadd.f32 %v14142_v48, %v5931_v15 }
0x20ca   :  { %v5963_v57 = vsel %vm571_vm6, %v5937_v25, -inf }
0x20cb   :  { %5964 = vmax.xlane.f32.xlu0 %v5963_v57  ;;  %v10202_v3 = vpop.f32.mrb[96].mxu1  ;;  %v5960_v45 = vsel %vm571_vm6, %v5932_v44, -inf }
0x20cc   :  { %v5947_v58 = vadd.f32 %v14148_v40, %v10202_v3  ;;  %v5941_v46 = vpop.f32.mrb[97].mxu1  ;;  %5961 = vmax.xlane.f32.xlu1 %v5960_v45 }
0x20cd   :  { %v5942_v23 = vadd.f32 %v14153_v62, %v5941_v46  ;;  %v5309_v62 = vsel %vm571_vm6, %v14288_v27, 0.0  ;;  %v5318_v27 = vsel %vm571_vm6, %v14308_v39, 0.0  ;;  %v5670_v39 = vsel %vm587_vm7, %v14405_v1, 0.0 }
0x20ce   :  { %v5969_v9 = vsel %vm571_vm6, %v5947_v58, -inf }
0x20cf   :  { %v10205_v52 = vpop.f32.mrb[98].mxu1  ;;  %v5966_v2 = vsel %vm571_vm6, %v5942_v23, -inf }
0x20d0   :  { %v5957_v34 = vadd.f32 %v14157_v61, %v10205_v52  ;;  %v5951_v48 = vpop.f32.mrb[99].mxu1  ;;  %5967 = vmax.xlane.f32.xlu0 %v5966_v2  ;;  %5970 = vmax.xlane.f32.xlu1 %v5969_v9  ;;  %v5655_v61 = vsel %vm571_vm6, %v14376_v29, 0.0  ;;  %v5321_v29 = vsel %vm571_vm6, %v14314_v17, 0.0 }
0x20d1   :  { %v5952_v20 = vadd.f32 %v14176_v28, %v5951_v48  ;;  %v5312_v28 = vsel %vm571_vm6, %v14290_v7, 0.0  ;;  %v5664_v7 = vsel %vm571_vm6, %v14397_v47, 0.0 }
0x20d2   :  { %v5975_v15 = vsel %vm587_vm7, %v5957_v34, -inf }
0x20d3   :  { %v5972_v40 = vsel %vm571_vm6, %v5952_v20, -inf }
0x20d4   :  { %5973 = vmax.xlane.f32.xlu0 %v5972_v40  ;;  %5976 = vmax.xlane.f32.xlu1 %v5975_v15 }
0x20e5   :  { %11534 = vrot.lane.b32.xlu1 %v14084_v0, %s12344_s15  ;;  %v5658_v0 = vsel %vm571_vm6, %v14378_v36, 0.0  ;;  %v5667_v36 = vsel %vm571_vm6, %v14403_v33, 0.0 }
0x20e9   :  { %11539 = vrot.lane.b32.xlu1 %v14100_v24, %s12344_s15  ;;  %v5315_v24 = vsel %vm571_vm6, %v14306_v56, 0.0  ;;  %v5324_v56 = vsel %vm587_vm7, %v14316_v60, 0.0 }
0x20ea   :  { %11529 = vrot.lane.b32.xlu0 %v14068_v16, %s12344_s15  ;;  %v5661_v16 = vsel %vm571_vm6, %v14395_v10, 0.0 }
0x2109   :  { %5310 = vadd.xlane.f32.xlu0 %v5309_v62 }
0x210d   :  { %5656 = vadd.xlane.f32.xlu0 %v5655_v61  ;;  %5313 = vadd.xlane.f32.xlu1 %v5312_v28 }
0x2111   :  { %5659 = vadd.xlane.f32.xlu0 %v5658_v0  ;;  %5316 = vadd.xlane.f32.xlu1 %v5315_v24 }
0x2115   :  { %5319 = vadd.xlane.f32.xlu0 %v5318_v27  ;;  %5662 = vadd.xlane.f32.xlu1 %v5661_v16 }
0x2119   :  { %5665 = vadd.xlane.f32.xlu0 %v5664_v7  ;;  %5322 = vadd.xlane.f32.xlu1 %v5321_v29 }
0x211d   :  { %5325 = vadd.xlane.f32.xlu0 %v5324_v56  ;;  %5668 = vadd.xlane.f32.xlu1 %v5667_v36 }
0x2121   :  { %5671 = vadd.xlane.f32.xlu0 %v5670_v39 }
0x2158   :  { %v5965_v10 = vpop.xlane.xlu0 %5964 }
0x2159   :  { %v5979_v57 = vsub.f32 %v5937_v25, %v5965_v10  ;;  %v5962_v47 = vpop.xlane.xlu1 %5961 }
0x215a   :  { %v5978_v3 = vsub.f32 %v5932_v44, %v5962_v47 }
0x215b   :  { %v5986_v45 = vmul.f32 1.442695, %v5979_v57 }
0x215c   :  { %v5984_v17 = vmul.f32 1.442695, %v5978_v3 }
0x215d   :  { %11861 = vpow2.f32 %v5986_v45  ;;  %v5968_v46 = vpop.xlane.xlu0 %5967  ;;  %v5971_v9 = vpop.xlane.xlu1 %5970 }
0x215e   :  { %11863 = vpow2.f32 %v5984_v17  ;;  %v5980_v60 = vsub.f32 %v5942_v23, %v5968_v46  ;;  %v5981_v52 = vsub.f32 %v5947_v58, %v5971_v9 }
0x2160   :  { %v5988_v2 = vmul.f32 1.442695, %v5980_v60  ;;  %v5990_v33 = vmul.f32 1.442695, %v5981_v52  ;;  %v15464_v60 = vld [vmem:[#allocation48_spill] sm:$0xff]  ;;  %v4984_v52 = vsel %vm571_vm6, %v14192_v59, 0.0 }
0x2161   :  { %v5974_v48 = vpop.xlane.xlu0 %5973  ;;  %v5977_v15 = vpop.xlane.xlu1 %5976  ;;  %v4993_v59 = vsel %vm571_vm6, %v14207_v35, 0.0  ;;  %v15467_v35 = vld [vmem:[#allocation51_spill] sm:$0xff] }
0x2162   :  { %11865 = vpow2.f32 %v5988_v2  ;;  %v5982_v40 = vsub.f32 %v5952_v20, %v5974_v48  ;;  %v5983_v1 = vsub.f32 %v5957_v34, %v5977_v15  ;;  %v4987_v2 = vsel %vm571_vm6, %v14194_v63, 0.0  ;;  %v15466_v48 = vld [vmem:[#allocation50_spill] sm:$0xff] }
0x2163   :  { %11867 = vpow2.f32 %v5990_v33  ;;  %v15465_v33 = vld [vmem:[#allocation49_spill] sm:$0xff]  ;;  %v4996_v63 = vsel %vm571_vm6, %v14220_v21, 0.0  ;;  %v15468_v15 = vld [vmem:[#allocation54_spill] sm:$0xff] }
0x2164   :  { %v5992_v62 = vmul.f32 1.442695, %v5982_v40  ;;  %v5994_v25 = vmul.f32 1.442695, %v5983_v1 }
0x2165   :  { %v11530_v61 = vpop.permute.xlu0 %11529  ;;  %v11535_v44 = vpop.permute.xlu1 %11534 }
0x2166   :  { %11869 = vpow2.f32 %v5992_v62  ;;  %v11532_v28 = vunpack.i.h.bf16 %v11530_v61  ;;  %v11531_v0 = vunpack.i.l.bf16 %v11530_v61  ;;  %v11537_v24 = vunpack.i.h.bf16 %v11535_v44 }
0x2167   :  { %v11862_v27 = vpop.eup %11861  ;;  %11871 = vpow2.f32 %v5994_v25  ;;  %v11536_v23 = vunpack.i.l.bf16 %v11535_v44 }
0x2168   :  { %v11864_v58 = vpop.eup %11863  ;;  %v5999_v16 = vsel %vm571_vm6, %v11862_v27, 0.0  ;;  %v10984_v7 = vpack.c.bf16 %v11532_v28, %v11531_v0 }
0x2169   :  { %6000 = vadd.xlane.f32.xlu0 %v5999_v16  ;;  %10218 = vmatprep.mubr.msk.f32.mxu0 %vm571_vm6, %v11864_v58  ;;  %v11540_v34 = vpop.permute.xlu1 %11539  ;;  %v5996_v20 = vsel %vm571_vm6, %v11864_v58, 0.0  ;;  %v10988_v36 = vpack.c.bf16 %v11537_v24, %v11536_v23 }
0x216a   :  { %v11542_v29 = vunpack.i.h.bf16 %v11540_v34  ;;  %v11541_v56 = vunpack.i.l.bf16 %v11540_v34  ;;  %10985 = vmatprep.subr.bf16.mxu0 %v10984_v7  ;;  %5997 = vadd.xlane.f32.xlu1 %v5996_v20 }
0x216b   :  { %10987 = vmatpush3.bf16.msra.mxu0 %v10984_v7 }
0x216c   :  { %v11866_v39 = vpop.eup %11865  ;;  %10989 = vmatprep.subr.bf16.mxu0 %v10988_v36  ;;  %v10992_v47 = vpack.c.bf16 %v11542_v29, %v11541_v56 }
0x216d   :  { %v11868_v10 = vpop.eup %11867  ;;  %v6002_v57 = vsel %vm571_vm6, %v11866_v39, 0.0 }
0x216e   :  { %6003 = vadd.xlane.f32.xlu1 %v6002_v57  ;;  %v6005_v3 = vsel %vm571_vm6, %v11868_v10, 0.0 }
0x216f   :  { %6006 = vadd.xlane.f32.xlu0 %v6005_v3  ;;  %10991 = vmatpush3.bf16.msra.mxu0 %v10988_v36 }
0x2170   :  { %v11870_v45 = vpop.eup %11869  ;;  %10994 = vmatprep.subr.msk.bf16.mxu0 %vm12803_vm5, %v10992_v47 }
0x2171   :  { %v11872_v17 = vpop.eup %11871  ;;  %v6008_v46 = vsel %vm571_vm6, %v11870_v45, 0.0 }
0x2172   :  { %6009 = vadd.xlane.f32.xlu1 %v6008_v46  ;;  %v6011_v9 = vsel %vm587_vm7, %v11872_v17, 0.0 }
0x2173   :  { %6012 = vadd.xlane.f32.xlu0 %v6011_v9  ;;  %10997 = vmatpush3.bf16.msk.msra.mxu0 %vm12803_vm5, %v10992_v47 }
0x2174   :  { %10999 = vmatprep.subr.bf16.mxu0 %v15464_v60 }
0x2176   :  { %4985 = vadd.xlane.f32.xlu1 %v4984_v52  ;;  %10219 = vmatmul.mubr.msk.f32.vlgmr.msra.gmra.mrb[92].mxu0 %vm571_vm6, %v11862_v27 }
0x2177   :  { %4988 = vadd.xlane.f32.xlu0 %v4987_v2  ;;  %10221 = vmatprep.mubr.msk.f32.mxu0 %vm571_vm6, %v11866_v39 }
0x2178   :  { %11001 = vmatpush3.bf16.msra.mxu0 %v15464_v60 }
0x2179   :  { %11003 = vmatprep.subr.bf16.mxu0 %v15465_v33 }
0x217a   :  { %4991 = vadd.xlane.f32.xlu1 %v4990_v5  ;;  %10222 = vmatmul.mubr.msk.f32.gmra.mrb[94].mxu0 %vm571_vm6, %v11868_v10 }
0x217b   :  { %4994 = vadd.xlane.f32.xlu0 %v4993_v59  ;;  %10224 = vmatprep.mubr.msk.f32.mxu0 %vm571_vm6, %v11870_v45 }
0x217c   :  { %11005 = vmatpush3.bf16.msra.mxu0 %v15465_v33 }
0x217d   :  { %11007 = vmatprep.subr.bf16.mxu0 %v15466_v48 }
0x217e   :  { %4997 = vadd.xlane.f32.xlu1 %v4996_v63  ;;  %10225 = vmatmul.mubr.msk.f32.gmra.mrb[96].mxu0 %vm571_vm6, %v11872_v17 }
0x217f   :  { %5000 = vadd.xlane.f32.xlu0 %v4999_v49 }
0x2180   :  { %11009 = vmatpush3.bf16.msra.mxu0 %v15466_v48 }
0x2181   :  { %11011 = vmatprep.subr.bf16.mxu0 %v15467_v35 }
0x2184   :  { %11013 = vmatpush3.bf16.msra.mxu0 %v15467_v35 }
0x2185   :  { %11031 = vmatprep.subr.bf16.mxu0 %v15468_v15 }
0x2196   :  { %v5311_v40 = vpop.xlane.xlu0 %5310 }
0x2197   :  { %11873 = vrcp.f32 %v5311_v40 }
0x219a   :  { %v5657_v21 = vpop.xlane.xlu0 %5656  ;;  %v5314_v1 = vpop.xlane.xlu1 %5313 }
0x219b   :  { %11875 = vrcp.f32 %v5657_v21 }
0x219c   :  { %11877 = vrcp.f32 %v5314_v1 }
0x219e   :  { %v5660_v62 = vpop.xlane.xlu0 %5659  ;;  %v5317_v25 = vpop.xlane.xlu1 %5316 }
0x219f   :  { %11879 = vrcp.f32 %v5660_v62 }
0x21a0   :  { %11881 = vrcp.f32 %v5317_v25 }
0x21a1   :  { %v11874_v14 = vpop.eup %11873 }
0x21a2   :  { %v5320_v61 = vpop.xlane.xlu0 %5319  ;;  %v5663_v44 = vpop.xlane.xlu1 %5662  ;;  %v5470_v28 = vmul.f32 %v11874_v14, %v14334_v53 }
0x21a3   :  { %11883 = vrcp.f32 %v5320_v61 }
0x21a4   :  { %11885 = vrcp.f32 %v5663_v44  ;;  %6164 = vrot.lane.b32.xlu1 %v5470_v28, %s12343_s9 }
0x21a5   :  { %v11876_v0 = vpop.eup %11875 }
0x21a6   :  { %v11878_v24 = vpop.eup %11877  ;;  %v5666_v27 = vpop.xlane.xlu0 %5665  ;;  %v5811_v58 = vmul.f32 %v11876_v0, %v14427_v19 }
0x21a7   :  { %v5323_v23 = vpop.xlane.xlu1 %5322  ;;  %11887 = vrcp.f32 %v5666_v27  ;;  %v5471_v16 = vmul.f32 %v11878_v24, %v14332_v55 }
0x21a8   :  { %11889 = vrcp.f32 %v5323_v23  ;;  %6188 = vrot.lane.b32.xlu1 %v5811_v58, %s12340_s10 }
0x21a9   :  { %v11880_v7 = vpop.eup %11879  ;;  %6166 = vrot.lane.b32.xlu0 %v5471_v16, %s12343_s9 }
0x21aa   :  { %v11882_v53 = vpop.eup %11881  ;;  %v5326_v34 = vpop.xlane.xlu0 %5325  ;;  %v5812_v29 = vmul.f32 %v11880_v7, %v14425_v13 }
0x21ab   :  { %v5669_v20 = vpop.xlane.xlu1 %5668  ;;  %11891 = vrcp.f32 %v5326_v34  ;;  %v5472_v56 = vmul.f32 %v11882_v53, %v14338_v4 }
0x21ac   :  { %11893 = vrcp.f32 %v5669_v20  ;;  %6190 = vrot.lane.b32.xlu1 %v5812_v29, %s12340_s10 }
0x21ad   :  { %v11884_v19 = vpop.eup %11883  ;;  %6168 = vrot.lane.b32.xlu0 %v5472_v56, %s12343_s9 }
0x21ae   :  { %v11886_v55 = vpop.eup %11885  ;;  %v5672_v36 = vpop.xlane.xlu0 %5671  ;;  %v5473_v39 = vmul.f32 %v11884_v19, %v14336_v31 }
0x21af   :  { %11895 = vrcp.f32 %v5672_v36  ;;  %v5813_v10 = vmul.f32 %v11886_v55, %v14431_v12 }
0x21b0   :  { %6170 = vrot.lane.b32.xlu1 %v5473_v39, %s12343_s9 }
0x21b1   :  { %v11888_v57 = vpop.eup %11887  ;;  %6192 = vrot.lane.b32.xlu0 %v5813_v10, %s12340_s10 }
0x21b2   :  { %v11890_v13 = vpop.eup %11889  ;;  %v5814_v4 = vmul.f32 %v11888_v57, %v14429_v32 }
0x21b3   :  { %v5474_v47 = vmul.f32 %v11890_v13, %v14342_v41 }
0x21b4   :  { %6194 = vrot.lane.b32.xlu1 %v5814_v4, %s12340_s10 }
0x21b5   :  { %v11892_v3 = vpop.eup %11891  ;;  %6172 = vrot.lane.b32.xlu0 %v5474_v47, %s12343_s9 }
0x21b6   :  { %v11894_v45 = vpop.eup %11893  ;;  %v5475_v31 = vmul.f32 %v11892_v3, %v14340_v54 }
0x21b7   :  { %v5815_v12 = vmul.f32 %v11894_v45, %v14435_v11 }
0x21b8   :  { %6174 = vrot.lane.b32.xlu1 %v5475_v31, %s12343_s9 }
0x21b9   :  { %v11896_v17 = vpop.eup %11895  ;;  %6196 = vrot.lane.b32.xlu0 %v5815_v12, %s12340_s10 }
0x21ba   :  { %v5816_v46 = vmul.f32 %v11896_v17, %v14433_v22 }
0x21bc   :  { %6198 = vrot.lane.b32.xlu1 %v5816_v46, %s12340_s10 }
0x21f6   :  { %v6001_v41 = vpop.xlane.xlu0 %6000 }
0x21f7   :  { %v5998_v32 = vpop.xlane.xlu1 %5997  ;;  %11897 = vrcp.f32 %v6001_v41 }
0x21f8   :  { %11899 = vrcp.f32 %v5998_v32 }
0x21fb   :  { %v6004_v60 = vpop.xlane.xlu1 %6003 }
0x21fc   :  { %v6007_v9 = vpop.xlane.xlu0 %6006 }
0x21fd   :  { %11901 = vrcp.f32 %v6007_v9 }
0x21fe   :  { %11903 = vrcp.f32 %v6004_v60 }
0x21ff   :  { %v6010_v52 = vpop.xlane.xlu1 %6009 }
0x2200   :  { %v6013_v54 = vpop.xlane.xlu0 %6012 }
0x2201   :  { %11905 = vrcp.f32 %v6013_v54  ;;  %v11898_v11 = vpop.eup %11897 }
0x2202   :  { %11907 = vrcp.f32 %v6010_v52  ;;  %v11900_v5 = vpop.eup %11899 }
0x2203   :  { %v4986_v28 = vpop.xlane.xlu1 %4985 }
0x2204   :  { %v4989_v27 = vpop.xlane.xlu0 %4988  ;;  %11909 = vrcp.f32 %v4986_v28  ;;  %v15474_v28 = vld [vmem:[#allocation60_spill] sm:$0xff] }
0x2205   :  { %11911 = vrcp.f32 %v4989_v27  ;;  %v15476_v27 = vmax.f32 %v14016_v50, 0.0 }
0x2207   :  { %v11902_v63 = vpop.eup %11901  ;;  %v4992_v0 = vpop.xlane.xlu1 %4991 }
0x2208   :  { %v11904_v49 = vpop.eup %11903  ;;  %v4995_v58 = vpop.xlane.xlu0 %4994  ;;  %11913 = vrcp.f32 %v4992_v0  ;;  %v15475_v0 = vld [vmem:[#allocation62_spill] sm:$0xff] }
0x2209   :  { %11915 = vrcp.f32 %v4995_v58 }
0x220b   :  { %v11906_v1 = vpop.eup %11905  ;;  %v4998_v24 = vpop.xlane.xlu1 %4997 }
0x220c   :  { %v11908_v25 = vpop.eup %11907  ;;  %v5001_v7 = vpop.xlane.xlu0 %5000  ;;  %11917 = vrcp.f32 %v4998_v24 }
0x220d   :  { %11919 = vrcp.f32 %v5001_v7 }
0x220e   :  { %v11910_v39 = vpop.eup %11909 }
0x220f   :  { %v11912_v10 = vpop.eup %11911  ;;  %v5124_v4 = vmul.f32 %v11910_v39, %v14240_v43  ;;  %v15479_v39 = vmax.f32 %v14023_v42, 0.0 }
0x2210   :  { %v5125_v3 = vmul.f32 %v11912_v10, %v14238_v51 }
0x2212   :  { %v11914_v47 = vpop.eup %11913 }
0x2213   :  { %v11916_v45 = vpop.eup %11915  ;;  %v5126_v32 = vmul.f32 %v11914_v47, %v14244_v6  ;;  %v15480_v47 = vld [vmem:[#allocation75_spill] sm:$0xff] }
0x2214   :  { %v5127_v43 = vmul.f32 %v11916_v45, %v14242_v30 }
0x2216   :  { %v6165_v23 = vpop.permute.xlu1 %6164  ;;  %v11918_v54 = vpop.eup %11917 }
0x2217   :  { %v6230_v31 = vsel %vm451_vm1, %v5124_v4, %v6165_v23  ;;  %v11920_v52 = vpop.eup %11919 }
0x221a   :  { %v6189_v16 = vpop.permute.xlu1 %6188 }
0x221b   :  { %v6167_v34 = vpop.permute.xlu0 %6166  ;;  %v6236_v46 = vsel %vm1862_vm8, %v6230_v31, %v6189_v16  ;;  %v15477_v16 = vmax.f32 %v14013_v18, 0.0  ;;  %v15482_v31 = vld [vmem:[#allocation74_spill] sm:$0xff] }
0x221c   :  { %v6231_v17 = vsel %vm451_vm1, %v5125_v3, %v6167_v34  ;;  %v15481_v3 = vmax.f32 %v15480_v47, 0.0 }
0x221e   :  { %v6191_v53 = vpop.permute.xlu1 %6190 }
0x221f   :  { %v6169_v29 = vpop.permute.xlu0 %6168  ;;  %v6237_v9 = vsel %vm1862_vm8, %v6231_v17, %v6191_v53  ;;  %v12061_v53 = vld [vmem:[%s12396_s3] ss:$0 sm:$0xff]  ;;  %s15499_s3 = sld [smem:[#allocation36_spill]] }
0x2222   :  { %v6171_v20 = vpop.permute.xlu1 %6170 }
0x2223   :  { %v6193_v19 = vpop.permute.xlu0 %6192  ;;  %v6233_v6 = vsel %vm451_vm1, %v5127_v43, %v6171_v20 }
0x2226   :  { %v6195_v56 = vpop.permute.xlu1 %6194 }
0x2227   :  { %v6173_v36 = vpop.permute.xlu0 %6172  ;;  %v6239_v30 = vsel %vm1862_vm8, %v6233_v6, %v6195_v56 }
0x222a   :  { %v6175_v55 = vpop.permute.xlu1 %6174 }
0x222b   :  { %v6197_v13 = vpop.permute.xlu0 %6196 }
0x222e   :  { %v6199_v57 = vpop.permute.xlu1 %6198 }
0x2249   :  { %v10220_v2 = vpop.f32.mrb[92].mxu0 }
0x224a   :  { %v6153_v33 = vmul.f32 %v11898_v11, %v10220_v2  ;;  %v6123_v59 = vpop.f32.mrb[93].mxu0  ;;  %v6232_v11 = vsel %vm451_vm1, %v5126_v32, %v6169_v29 }
0x224b   :  { %v6152_v22 = vmul.f32 %v11900_v5, %v6123_v59  ;;  %v6238_v5 = vsel %vm1862_vm8, %v6232_v11, %v6193_v19  ;;  %v5128_v59 = vmul.f32 %v11918_v54, %v14248_v38 }
0x224c   :  { %6214 = vrot.lane.b32.xlu1 %v6153_v33, %s12338_s20 }
0x224d   :  { %6212 = vrot.lane.b32.xlu0 %v6152_v22, %s12338_s20  ;;  %v10223_v48 = vpop.f32.mrb[94].mxu0 }
0x224e   :  { %v6155_v35 = vmul.f32 %v11902_v63, %v10223_v48  ;;  %v6133_v40 = vpop.f32.mrb[95].mxu0  ;;  %v15469_v63 = vld [vmem:[#allocation55_spill] sm:$0xff]  ;;  %v5129_v48 = vmul.f32 %v11920_v52, %v14246_v8 }
0x224f   :  { %v6154_v21 = vmul.f32 %v11904_v49, %v6133_v40 }
0x2250   :  { %6218 = vrot.lane.b32.xlu1 %v6155_v35, %s12338_s20  ;;  %v6234_v35 = vsel %vm451_vm1, %v5128_v59, %v6173_v36  ;;  %v6235_v38 = vsel %vm451_vm1, %v5129_v48, %v6175_v55  ;;  %v15478_v55 = vmax.f32 %v14030_v37, 0.0 }
0x2251   :  { %6216 = vrot.lane.b32.xlu0 %v6154_v21, %s12338_s20  ;;  %v10226_v62 = vpop.f32.mrb[96].mxu0 }
0x2252   :  { %v6157_v14 = vmul.f32 %v11906_v1, %v10226_v62  ;;  %v6143_v61 = vpop.f32.mrb[97].mxu0  ;;  %v6241_v1 = vsel %vm1862_vm8, %v6235_v38, %v6199_v57  ;;  %v15470_v62 = vld [vmem:[#allocation56_spill] sm:$0xff] }
0x2253   :  { %v6156_v44 = vmul.f32 %v11908_v25, %v6143_v61  ;;  %v15472_v61 = vld [vmem:[#allocation58_spill] sm:$0xff] }
0x2254   :  { %6222 = vrot.lane.b32.xlu1 %v6157_v14, %s12338_s20  ;;  %v15471_v14 = vld [vmem:[#allocation57_spill] sm:$0xff] }
0x2255   :  { %6220 = vrot.lane.b32.xlu0 %v6156_v44, %s12338_s20  ;;  %v15473_v44 = vld [vmem:[#allocation59_spill] sm:$0xff] }
0x22be   :  { %v6215_v12 = vpop.permute.xlu1 %6214 }
0x22bf   :  { %v6213_v41 = vpop.permute.xlu0 %6212  ;;  %v6243_v51 = vsel %vm1869_vm9, %v6237_v9, %v6215_v12  ;;  %v15483_v12 = vmax.f32 %v15482_v31, 0.0 }
0x22c0   :  { %v6242_v60 = vsel %vm1869_vm9, %v6236_v46, %v6213_v41 }
0x22c1   :  { %10243 = vmatprep.mubr.msk.f32.mxu0 %vm313_vm0, %v6242_v60 }
0x22c2   :  { %10244 = vmatmul.mubr.msk.f32.vlgmr.msra.gmra.mrb[98].mxu0 %vm313_vm0, %v6243_v51  ;;  %v6219_v2 = vpop.permute.xlu1 %6218 }
0x22c3   :  { %v6217_v33 = vpop.permute.xlu0 %6216  ;;  %11033 = vmatpush3.bf16.msra.mxu0 %v15468_v15  ;;  %v6245_v49 = vsel %vm1869_vm9, %v6239_v30, %v6219_v2  ;;  %v6240_v15 = vsel %vm1862_vm8, %v6234_v35, %v6197_v13 }
0x22c4   :  { %v6244_v22 = vsel %vm1869_vm9, %v6238_v5, %v6217_v33  ;;  %11035 = vmatprep.subr.bf16.mxu0 %v15469_v63 }
0x22c5   :  { %10246 = vmatprep.mubr.msk.f32.mxu0 %vm313_vm0, %v6244_v22 }
0x22c6   :  { %10247 = vmatmul.mubr.msk.f32.gmra.mrb[100].mxu0 %vm313_vm0, %v6245_v49  ;;  %v6223_v40 = vpop.permute.xlu1 %6222 }
0x22c7   :  { %v6221_v21 = vpop.permute.xlu0 %6220  ;;  %11037 = vmatpush3.bf16.msra.mxu0 %v15469_v63  ;;  %v6247_v25 = vsel %vm1869_vm9, %v6241_v1, %v6223_v40 }
0x22c8   :  { %v6246_v8 = vsel %vm1869_vm9, %v6240_v15, %v6221_v21  ;;  %11039 = vmatprep.subr.bf16.mxu0 %v15470_v62 }
0x22c9   :  { %10249 = vmatprep.mubr.msk.f32.mxu0 %vm313_vm0, %v6246_v8 }
0x22ca   :  { %10250 = vmatmul.mubr.msk.f32.gmra.mrb[102].mxu0 %vm313_vm0, %v6247_v25 }
0x22cb   :  { %11041 = vmatpush3.bf16.msra.mxu0 %v15470_v62 }
0x22cc   :  { %11043 = vmatprep.subr.bf16.mxu0 %v15471_v14 }
0x22cf   :  { %11045 = vmatpush3.bf16.msra.mxu0 %v15471_v14 }
0x22d0   :  { %11047 = vmatprep.subr.bf16.mxu0 %v15472_v61 }
0x22d3   :  { %11049 = vmatpush3.bf16.msra.mxu0 %v15472_v61 }
0x22d4   :  { %11051 = vmatprep.subr.bf16.mxu0 %v15473_v44 }
0x22d7   :  { %11053 = vmatpush3.bf16.msra.mxu0 %v15473_v44 }
0x22d8   :  { %11055 = vmatprep.subr.bf16.mxu0 %v15474_v28 }
0x22db   :  { %11057 = vmatpush3.bf16.msra.mxu0 %v15474_v28 }
0x22dc   :  { %11059 = vmatprep.subr.bf16.mxu0 %v15475_v0 }
0x22df   :  { %11061 = vmatpush3.bf16.msra.mxu0 %v15475_v0 }
0x2395   :  { %v10245_v24 = vpop.f32.mrb[98].mxu0 }
0x2396   :  { %v6362_v23 = vadd.f32 %v10245_v24, %v15476_v27  ;;  %v6332_v58 = vpop.f32.mrb[99].mxu0 }
0x2397   :  { %v6361_v7 = vadd.f32 %v6332_v58, %v15477_v16 }
0x2398   :  { %v6368_v34 = vadd.f32 %v12061_v53, %v6362_v23 }
0x2399   :  { %v6367_v20 = vadd.f32 %v12061_v53, %v6361_v7  ;;  %v10248_v29 = vpop.f32.mrb[100].mxu0 }
0x239a   :  { %v6342_v56 = vpop.f32.mrb[101].mxu0  ;;  %v6376_v19 = vsel %vm313_vm0, %v6368_v34, 0.0  ;;  %v6364_v36 = vadd.f32 %v10248_v29, %v15478_v55 }
0x239b   :  { %v6363_v10 = vadd.f32 %v6342_v56, %v15479_v39  ;;  %6377 = vadd.xlane.f32.xlu1 %v6376_v19  ;;  %v6373_v50 = vsel %vm313_vm0, %v6367_v20, 0.0 }
0x239c   :  { %6374 = vadd.xlane.f32.xlu0 %v6373_v50  ;;  %v6370_v4 = vadd.f32 %v12061_v53, %v6364_v36 }
0x239d   :  { %v6369_v57 = vadd.f32 %v12061_v53, %v6363_v10  ;;  %v10251_v18 = vpop.f32.mrb[102].mxu0 }
0x239e   :  { %v6352_v13 = vpop.f32.mrb[103].mxu0  ;;  %v6366_v45 = vadd.f32 %v10251_v18, %v15481_v3  ;;  %v6382_v41 = vsel %vm313_vm0, %v6370_v4, 0.0  ;;  %v12062_v3 = vld [vmem:[#allocation4] ss:$0 sm:$0xff] }
0x239f   :  { %v6365_v17 = vadd.f32 %v6352_v13, %v15483_v12  ;;  %v6379_v37 = vsel %vm313_vm0, %v6369_v57, 0.0 }
0x23a0   :  { %6380 = vadd.xlane.f32.xlu0 %v6379_v37  ;;  %v6372_v42 = vadd.f32 %v12061_v53, %v6366_v45 }
0x23a1   :  { %v6371_v46 = vadd.f32 %v12061_v53, %v6365_v17  ;;  %v12063_v17 = vld [vmem:[#allocation6] ss:$0 sm:$0xff] }
0x23a2   :  { %v6388_v9 = vsel %vm2031_vm10, %v6372_v42, 0.0 }
0x23a3   :  { %v6385_v32 = vsel %vm313_vm0, %v6371_v46, 0.0 }
0x23a4   :  { %6383 = vadd.xlane.f32.xlu0 %v6382_v41  ;;  %6386 = vadd.xlane.f32.xlu1 %v6385_v32 }
0x23a8   :  { %6389 = vadd.xlane.f32.xlu0 %v6388_v9 }
0x2428   :  { %v6378_v60 = vpop.xlane.xlu1 %6377 }
0x2429   :  { %v6392_v54 = vmul.f32 0.015625, %v6378_v60  ;;  %v6375_v43 = vpop.xlane.xlu0 %6374 }
0x242a   :  { %v6391_v51 = vmul.f32 0.015625, %v6375_v43 }
0x242b   :  { %v6398_v52 = vsub.f32 %v6368_v34, %v6392_v54 }
0x242c   :  { %v6397_v11 = vsub.f32 %v6367_v20, %v6391_v51  ;;  %v15484_v51 = vld [vmem:[#allocation61_spill] sm:$0xff] }
0x242d   :  { %v6381_v2 = vpop.xlane.xlu0 %6380  ;;  %v6404_v5 = vmul.f32 %v6398_v52, %v6398_v52 }
0x242e   :  { %v6393_v6 = vmul.f32 0.015625, %v6381_v2  ;;  %v6403_v33 = vmul.f32 %v6397_v11, %v6397_v11 }
0x242f   :  { %v6412_v59 = vsel %vm313_vm0, %v6404_v5, 0.0 }
0x2430   :  { %v6399_v30 = vsub.f32 %v6369_v57, %v6393_v6  ;;  %6413 = vadd.xlane.f32.xlu0 %v6412_v59  ;;  %v6409_v22 = vsel %vm313_vm0, %v6403_v33, 0.0 }
0x2431   :  { %v6387_v63 = vpop.xlane.xlu1 %6386  ;;  %6410 = vadd.xlane.f32.xlu1 %v6409_v22  ;;  %v6384_v48 = vpop.xlane.xlu0 %6383  ;;  %v15486_v22 = vld [vmem:[#allocation43_spill] sm:$0xff] }
0x2432   :  { %v6395_v49 = vmul.f32 0.015625, %v6387_v63  ;;  %v6394_v35 = vmul.f32 0.015625, %v6384_v48  ;;  %v6405_v40 = vmul.f32 %v6399_v30, %v6399_v30  ;;  %v15487_v63 = vld [vmem:[#allocation73_spill] sm:$0xff]  ;;  %v15488_v48 = vld [vmem:[#allocation72_spill] sm:$0xff] }
0x2434   :  { %v6401_v15 = vsub.f32 %v6371_v46, %v6395_v49  ;;  %v6400_v38 = vsub.f32 %v6370_v4, %v6394_v35  ;;  %v6415_v21 = vsel %vm313_vm0, %v6405_v40, 0.0  ;;  %v12064_v35 = vld [vmem:[#allocation7] ss:$0 sm:$0xff] }
0x2435   :  { %6416 = vadd.xlane.f32.xlu1 %v6415_v21  ;;  %v6390_v1 = vpop.xlane.xlu0 %6389 }
0x2436   :  { %v6396_v8 = vmul.f32 0.015625, %v6390_v1  ;;  %v6407_v62 = vmul.f32 %v6401_v15, %v6401_v15  ;;  %v6406_v25 = vmul.f32 %v6400_v38, %v6400_v38 }
0x2438   :  { %v6402_v14 = vsub.f32 %v6372_v42, %v6396_v8  ;;  %v6421_v61 = vsel %vm313_vm0, %v6407_v62, 0.0  ;;  %v6418_v44 = vsel %vm313_vm0, %v6406_v25, 0.0 }
0x2439   :  { %6422 = vadd.xlane.f32.xlu1 %v6421_v61  ;;  %6419 = vadd.xlane.f32.xlu0 %v6418_v44 }
0x243a   :  { %v6408_v28 = vmul.f32 %v6402_v14, %v6402_v14 }
0x243c   :  { %v6424_v0 = vsel %vm2031_vm10, %v6408_v28, 0.0 }
0x243d   :  { %6425 = vadd.xlane.f32.xlu0 %v6424_v0 }
0x24bd   :  { %v6414_v24 = vpop.xlane.xlu0 %6413 }
0x24be   :  { %v6428_v27 = vmul.f32 0.015625, %v6414_v24  ;;  %v6411_v23 = vpop.xlane.xlu1 %6410 }
0x24bf   :  { %v6427_v58 = vmul.f32 0.015625, %v6411_v23 }
0x24c0   :  { %v6434_v16 = vadd.f32 1e-05, %v6428_v27 }
0x24c1   :  { %v6433_v7 = vadd.f32 1e-05, %v6427_v58 }
0x24c2   :  { %11921 = vrsqrt.f32 %v6434_v16  ;;  %v6417_v53 = vpop.xlane.xlu1 %6416 }
0x24c3   :  { %11923 = vrsqrt.f32 %v6433_v7  ;;  %v6429_v34 = vmul.f32 0.015625, %v6417_v53  ;;  %v12065_v7 = vld [vmem:[%s15425_s25] ss:$0 sm:$0xff] }
0x24c5   :  { %v6435_v20 = vadd.f32 1e-05, %v6429_v34 }
0x24c6   :  { %v6423_v29 = vpop.xlane.xlu1 %6422  ;;  %v6420_v56 = vpop.xlane.xlu0 %6419 }
0x24c7   :  { %11925 = vrsqrt.f32 %v6435_v20  ;;  %v6431_v19 = vmul.f32 0.015625, %v6423_v29  ;;  %v6430_v55 = vmul.f32 0.015625, %v6420_v56 }
0x24c9   :  { %v6437_v36 = vadd.f32 1e-05, %v6431_v19  ;;  %v6436_v39 = vadd.f32 1e-05, %v6430_v55 }
0x24ca   :  { %v6426_v10 = vpop.xlane.xlu0 %6425 }
0x24cb   :  { %11927 = vrsqrt.f32 %v6437_v36  ;;  %v6432_v50 = vmul.f32 0.015625, %v6426_v10 }
0x24cc   :  { %v11922_v57 = vpop.eup %11921  ;;  %11929 = vrsqrt.f32 %v6436_v39 }
0x24cd   :  { %v11924_v18 = vpop.eup %11923  ;;  %v6446_v13 = vmul.f32 %v11922_v57, %v6398_v52  ;;  %v6438_v4 = vadd.f32 1e-05, %v6432_v50 }
0x24ce   :  { %v6445_v47 = vmul.f32 %v11924_v18, %v6397_v11 }
0x24cf   :  { %v6452_v45 = vmul.f32 %v12062_v3, %v6446_v13  ;;  %11931 = vrsqrt.f32 %v6438_v4 }
0x24d0   :  { %v6451_v31 = vmul.f32 %v12062_v3, %v6445_v47 }
0x24d1   :  { %v11926_v12 = vpop.eup %11925  ;;  %v14618_v42 = vadd.f32 %v12063_v17, %v6452_v45 }
0x24d2   :  { %v14616_v37 = vadd.f32 %v12063_v17, %v6451_v31  ;;  %v6447_v46 = vmul.f32 %v11926_v12, %v6399_v30  ;;  %v15485_v30 = vld [vmem:[#allocation44_spill] sm:$0xff] }
0x24d4   :  { %10268 = vmatprep.mubr.msk.f32.mxu1 %vm313_vm0, %v14616_v37  ;;  %v6453_v41 = vmul.f32 %v12062_v3, %v6447_v46 }
0x24d5   :  { %v11928_v32 = vpop.eup %11927  ;;  %10269 = vmatmul.mubr.msk.f32.vlgmr.msra.gmra.mrb[100].mxu1 %vm313_vm0, %v14618_v42 }
0x24d6   :  { %v11930_v9 = vpop.eup %11929  ;;  %v14624_v60 = vadd.f32 %v12063_v17, %v6453_v41  ;;  %11065 = vmatpush3.bf16.msra.mxu1 %v15463_v26  ;;  %v6449_v54 = vmul.f32 %v11928_v32, %v6401_v15 }
0x24d7   :  { %v6448_v43 = vmul.f32 %v11930_v9, %v6400_v38  ;;  %11067 = vmatprep.subr.bf16.mxu1 %v15484_v51 }
0x24d8   :  { %10271 = vmatprep.mubr.msk.f32.mxu1 %vm313_vm0, %v14624_v60  ;;  %v6455_v52 = vmul.f32 %v12062_v3, %v6449_v54 }
0x24d9   :  { %v11932_v11 = vpop.eup %11931  ;;  %v6454_v2 = vmul.f32 %v12062_v3, %v6448_v43 }
0x24da   :  { %v14630_v5 = vadd.f32 %v12063_v17, %v6455_v52  ;;  %11069 = vmatpush3.bf16.msra.mxu1 %v15484_v51  ;;  %v6450_v6 = vmul.f32 %v11932_v11, %v6402_v14 }
0x24db   :  { %v14633_v33 = vadd.f32 %v12063_v17, %v6454_v2 }
0x24dc   :  { %v6456_v59 = vmul.f32 %v12062_v3, %v6450_v6 }
0x24dd   :  { %10272 = vmatmul.mubr.msk.f32.gmra.mrb[102].mxu1 %vm313_vm0, %v14633_v33 }
0x24de   :  { %10274 = vmatprep.mubr.msk.f32.mxu1 %vm313_vm0, %v14630_v5  ;;  %v14639_v26 = vadd.f32 %v12063_v17, %v6456_v59 }
0x24e1   :  { %10275 = vmatmul.mubr.msk.f32.gmra.mrb[104].mxu1 %vm313_vm0, %v14639_v26 }
0x24e2   :  { %10326 = vmatprep.mubr.msk.f32.mxu1 %vm1862_vm8, %v15485_v30 }
0x24e5   :  { %10327 = vmatmul.mubr.msk.f32.vlgmr.msra.gmra.mrb[106].mxu1 %vm1862_vm8, %v15486_v22 }
0x24e6   :  { %10329 = vmatprep.mubr.msk.f32.mxu1 %vm1862_vm8, %v15487_v63 }
0x24e9   :  { %10330 = vmatmul.mubr.msk.f32.gmra.mrb[108].mxu1 %vm1862_vm8, %v15488_v48 }
0x25a8   :  { %v10270_v49 = vpop.f32.mrb[100].mxu1 }
0x25a9   :  { %v6553_v40 = vadd.f32 %v12064_v35, %v10270_v49  ;;  %v6547_v15 = vpop.f32.mrb[101].mxu1 }
0x25aa   :  { %v6548_v38 = vadd.f32 %v12064_v35, %v6547_v15 }
0x25ab   :  { %v6577_v1 = vmax.f32 %v6553_v40, 0.0 }
0x25ac   :  { %v6576_v21 = vmax.f32 %v6548_v38, 0.0 }
0x25ae   :  { %10309 = vmatprep.mubr.f32.mxu0 %v6576_v21 }
0x25af   :  { %10310 = vmatmul.mubr.f32.vlgmr.msra.gmra.mrb[104].mxu0 %v6577_v1 }
0x25b0   :  { %v10273_v8 = vpop.f32.mrb[102].mxu1 }
0x25b1   :  { %v6563_v62 = vadd.f32 %v12064_v35, %v10273_v8  ;;  %v6557_v25 = vpop.f32.mrb[103].mxu1 }
0x25b2   :  { %v6558_v14 = vadd.f32 %v12064_v35, %v6557_v25 }
0x25b3   :  { %v6579_v28 = vmax.f32 %v6563_v62, 0.0 }
0x25b4   :  { %v6578_v61 = vmax.f32 %v6558_v14, 0.0  ;;  %v10276_v44 = vpop.f32.mrb[104].mxu1 }
0x25b5   :  { %v6573_v0 = vadd.f32 %v12064_v35, %v10276_v44  ;;  %v6567_v24 = vpop.f32.mrb[105].mxu1 }
0x25b6   :  { %v6568_v27 = vadd.f32 %v12064_v35, %v6567_v24  ;;  %10312 = vmatprep.mubr.f32.mxu0 %v6578_v61 }
0x25b7   :  { %10313 = vmatmul.mubr.f32.gmra.mrb[106].mxu0 %v6579_v28  ;;  %v6581_v16 = vmax.f32 %v6573_v0, 0.0 }
0x25b8   :  { %v6580_v23 = vmax.f32 %v6568_v27, 0.0  ;;  %v10328_v58 = vpop.f32.mrb[106].mxu1 }
0x25b9   :  { %v14652_v53 = vadd.f32 %v12065_v7, %v10328_v58  ;;  %v6857_v34 = vpop.f32.mrb[107].mxu1 }
0x25ba   :  { %v14654_v20 = vadd.f32 %v12065_v7, %v6857_v34  ;;  %10315 = vmatprep.mubr.f32.mxu0 %v6580_v23 }
0x25bb   :  { %10316 = vmatmul.mubr.f32.gmra.mrb[108].mxu0 %v6581_v16 }
0x25bc   :  { %v10331_v29 = vpop.f32.mrb[108].mxu1  ;;  %10340 = vmatprep.mubr.msk.f32.mxu1 %vm2610_vm11, %v14654_v20  ;;  %v14660_v56 = vpack.i.bf16 %v14652_v53, %v14654_v20 }
0x25bd   :  { %v14662_v19 = vadd.f32 %v12065_v7, %v10331_v29  ;;  %v6867_v55 = vpop.f32.mrb[109].mxu1 }
0x25be   :  { %v14664_v36 = vadd.f32 %v12065_v7, %v6867_v55  ;;  %11549 = vrot.lane.b32.xlu0 %v14660_v56, %s12345_s22  ;;  %11544 = vrot.lane.b32.xlu1 %v14660_v56, %s12341_s11 }
0x25c0   :  { %v14672_v39 = vpack.i.bf16 %v14662_v19, %v14664_v36 }
0x25c2   :  { %11564 = vrot.lane.b32.xlu0 %v14660_v56, %s12344_s15  ;;  %11554 = vrot.lane.b32.xlu1 %v14672_v39, %s12341_s11 }
0x25c6   :  { %7144 = vrot.lane.b32.xlu0 %v14652_v53, %s12346_s23  ;;  %11559 = vrot.lane.b32.xlu1 %v14672_v39, %s12345_s22 }
0x25ca   :  { %7146 = vrot.lane.b32.xlu0 %v14664_v36, %s12346_s23  ;;  %7142 = vrot.lane.b32.xlu1 %v14654_v20, %s12346_s23 }
0x25ce   :  { %7412 = vrot.lane.b32.xlu0 %v14654_v20, %s12339_s4  ;;  %11569 = vrot.lane.b32.xlu1 %v14672_v39, %s12344_s15 }
0x25d2   :  { %7416 = vrot.lane.b32.xlu0 %v14664_v36, %s12339_s4  ;;  %7148 = vrot.lane.b32.xlu1 %v14662_v19, %s12346_s23 }
0x25d6   :  { %11589 = vrot.lane.b32.xlu0 %v14672_v39, %s12337_s21  ;;  %7414 = vrot.lane.b32.xlu1 %v14652_v53, %s12339_s4 }
0x25da   :  { %7418 = vrot.lane.b32.xlu1 %v14662_v19, %s12339_s4 }
0x25de   :  { %11574 = vrot.lane.b32.xlu1 %v14660_v56, %s12337_s21 }
0x25e2   :  { %11579 = vrot.lane.b32.xlu1 %v14660_v56, %s12347_s26 }
0x25e6   :  { %11584 = vrot.lane.b32.xlu1 %v14660_v56, %s12338_s20 }
0x25ea   :  { %11594 = vrot.lane.b32.xlu1 %v14672_v39, %s12347_s26 }
0x2630   :  { %v11550_v10 = vpop.permute.xlu0 %11549  ;;  %v11545_v50 = vpop.permute.xlu1 %11544 }
0x2631   :  { %v11552_v57 = vunpack.i.h.bf16 %v11550_v10  ;;  %v11551_v18 = vunpack.i.l.bf16 %v11550_v10  ;;  %v11547_v13 = vunpack.i.h.bf16 %v11545_v50  ;;  %v11546_v4 = vunpack.i.l.bf16 %v11545_v50 }
0x2633   :  { %v11090_v47 = vpack.c.bf16 %v11552_v57, %v11551_v18  ;;  %v11070_v3 = vpack.c.bf16 %v11547_v13, %v11546_v4  ;;  %v14762_v4 = vld [vmem:[%s15429_s18 + $0x8] sm:$0xff] }
0x2634   :  { %v11565_v45 = vpop.permute.xlu0 %11564  ;;  %v11555_v31 = vpop.permute.xlu1 %11554 }
0x2635   :  { %v11557_v12 = vunpack.i.h.bf16 %v11555_v31  ;;  %v11556_v17 = vunpack.i.l.bf16 %v11555_v31  ;;  %11072 = vmatprep.subr.msk.bf16.mxu1 %vm13480_vm12, %v11070_v3  ;;  %11092 = vmatprep.subr.msk.bf16.mxu0 %vm13480_vm12, %v11090_v47  ;;  %v11567_v54 = vunpack.i.h.bf16 %v11565_v45  ;;  %v11566_v43 = vunpack.i.l.bf16 %v11565_v45 }
0x2636   :  { %11075 = vmatpush3.bf16.xpose.msk.msra.mxu1 %vm13480_vm12, %v11070_v3  ;;  %11095 = vmatpush3.bf16.xpose.msk.msra.mxu0 %vm13480_vm12, %v11090_v47 }
0x2637   :  { %v11076_v41 = vpack.c.bf16 %v11557_v12, %v11556_v17  ;;  %v11110_v59 = vpack.c.bf16 %v11567_v54, %v11566_v43  ;;  %v14771_v12 = vld [vmem:[%s15429_s18] sm:$0xff] }
0x2638   :  { %v7145_v32 = vpop.permute.xlu0 %7144  ;;  %v11560_v9 = vpop.permute.xlu1 %11559 }
0x2639   :  { %v11562_v51 = vunpack.i.h.bf16 %v11560_v9  ;;  %v11561_v52 = vunpack.i.l.bf16 %v11560_v9  ;;  %11078 = vmatprep.subr.msk.bf16.mxu1 %vm13480_vm12, %v11076_v41 }
0x263b   :  { %v11096_v11 = vpack.c.bf16 %v11562_v51, %v11561_v52 }
0x263c   :  { %v7147_v2 = vpop.permute.xlu0 %7146  ;;  %v7143_v6 = vpop.permute.xlu1 %7142 }
0x263d   :  { %11098 = vmatprep.subr.msk.bf16.mxu0 %vm13480_vm12, %v11096_v11  ;;  %10368 = vmatprep.mubr.msk.f32.mxu0 %vm2610_vm11, %v7143_v6  ;;  %v14786_v6 = vld [vmem:[%s15429_s18 + $0x10] sm:$0xff] }
0x263e   :  { %11081 = vmatpush3.bf16.xpose.msk.msra.mxu1 %vm13480_vm12, %v11076_v41  ;;  %11101 = vmatpush3.bf16.xpose.msk.msra.mxu0 %vm13480_vm12, %v11096_v11  ;;  %v14782_v11 = vld [vmem:[%s15429_s18 + $0x18] sm:$0xff] }
0x263f   :  { %11112 = vmatprep.subr.msk.bf16.mxu0 %vm13480_vm12, %v11110_v59 }
0x2640   :  { %v11570_v49 = vpop.permute.xlu1 %11569  ;;  %v7413_v35 = vpop.permute.xlu0 %7412 }
0x2641   :  { %v11572_v40 = vunpack.i.h.bf16 %v11570_v49  ;;  %v11571_v15 = vunpack.i.l.bf16 %v11570_v49 }
0x2643   :  { %v11116_v21 = vpack.c.bf16 %v11572_v40, %v11571_v15 }
0x2644   :  { %v7149_v38 = vpop.permute.xlu1 %7148  ;;  %v7417_v1 = vpop.permute.xlu0 %7416 }
0x2645   :  { %10341 = vmatmul.mubr.msk.f32.vlgmr.msra.gmra.mrb[110].mxu1 %vm2610_vm11, %v14652_v53  ;;  %10369 = vmatmul.mubr.msk.f32.vlgmr.msra.gmra.mrb[110].mxu0 %vm2610_vm11, %v7145_v32 }
0x2646   :  { %10343 = vmatprep.mubr.msk.f32.mxu1 %vm2610_vm11, %v14664_v36  ;;  %10371 = vmatprep.mubr.msk.f32.mxu0 %vm2610_vm11, %v7147_v2 }
0x2647   :  { %11115 = vmatpush3.bf16.xpose.msk.msra.mxu0 %vm13480_vm12, %v11110_v59 }
0x2648   :  { %11118 = vmatprep.subr.msk.bf16.mxu0 %vm13480_vm12, %v11116_v21  ;;  %v7415_v8 = vpop.permute.xlu1 %7414  ;;  %v11590_v25 = vpop.permute.xlu0 %11589 }
0x2649   :  { %10344 = vmatmul.mubr.msk.f32.gmra.mrb[112].mxu1 %vm2610_vm11, %v14662_v19  ;;  %10372 = vmatmul.mubr.msk.f32.gmra.mrb[112].mxu0 %vm2610_vm11, %v7149_v38  ;;  %v11592_v61 = vunpack.i.h.bf16 %v11590_v25  ;;  %v11591_v44 = vunpack.i.l.bf16 %v11590_v25 }
0x264a   :  { %10396 = vmatprep.mubr.msk.f32.mxu0 %vm2610_vm11, %v7413_v35 }
0x264b   :  { %v11086_v16 = vpack.c.bf16 %v11592_v61, %v11591_v44 }
0x264c   :  { %v7419_v62 = vpop.permute.xlu1 %7418 }
0x264f   :  { %11121 = vmatpush3.bf16.xpose.msk.msra.mxu0 %vm13480_vm12, %v11116_v21 }
0x2650   :  { %v11575_v14 = vpop.permute.xlu1 %11574 }
0x2651   :  { %v11577_v28 = vunpack.i.h.bf16 %v11575_v14  ;;  %v11576_v0 = vunpack.i.l.bf16 %v11575_v14 }
0x2653   :  { %v11082_v24 = vpack.c.bf16 %v11577_v28, %v11576_v0 }
0x2654   :  { %v11580_v27 = vpop.permute.xlu1 %11579 }
0x2655   :  { %v11582_v23 = vunpack.i.h.bf16 %v11580_v27  ;;  %v11581_v58 = vunpack.i.l.bf16 %v11580_v27  ;;  %11083 = vmatprep.subr.bf16.mxu1 %v11082_v24 }
0x2656   :  { %10397 = vmatmul.mubr.msk.f32.vlgmr.msra.gmra.mrb[114].mxu0 %vm2610_vm11, %v7415_v8  ;;  %11085 = vmatpush3.bf16.msra.mxu1 %v11082_v24 }
0x2657   :  { %10399 = vmatprep.mubr.msk.f32.mxu0 %vm2610_vm11, %v7417_v1  ;;  %11087 = vmatprep.subr.bf16.mxu1 %v11086_v16  ;;  %v14745_v7 = vpack.c.bf16 %v11582_v23, %v11581_v58 }
0x265a   :  { %10400 = vmatmul.mubr.msk.f32.gmra.mrb[116].mxu0 %vm2610_vm11, %v7419_v62  ;;  %11089 = vmatpush3.bf16.msra.mxu1 %v11086_v16 }
0x265b   :  { %11103 = vmatprep.subr.bf16.mxu1 %v14745_v7 }
0x2682   :  { %v14749_v34 = vpop.f32.mrb[104].mxu0 }
0x2683   :  { %v14751_v29 = vpop.f32.mrb[105].mxu0 }
0x268a   :  { %v14753_v55 = vpop.f32.mrb[106].mxu0 }
0x268b   :  { %v14755_v10 = vpop.f32.mrb[107].mxu0 }
0x268e   :  { %v14757_v50 = vpop.f32.mrb[108].mxu0 }
0x268f   :  { %v14759_v57 = vpop.f32.mrb[109].mxu0 }
0x2718   :  { %v10342_v18 = vpop.f32.mrb[110].mxu1  ;;  %v10370_v13 = vpop.f32.mrb[110].mxu0 }
0x2719   :  { %v14765_v47 = vadd.f32 %v14762_v4, %v10342_v18  ;;  %v14768_v3 = vadd.f32 %v14762_v4, %v10370_v13  ;;  %v6970_v45 = vpop.f32.mrb[111].mxu1  ;;  %v7240_v31 = vpop.f32.mrb[111].mxu0 }
0x271a   :  { %v6971_v17 = vadd.f32 %v14771_v12, %v6970_v45  ;;  %v14775_v41 = vadd.f32 %v14771_v12, %v7240_v31  ;;  %v11585_v18 = vpop.permute.xlu1 %11584 }
0x271b   :  { %v6992_v32 = vsel %vm1862_vm8, %v14765_v47, -inf  ;;  %v7262_v9 = vsel %vm1862_vm8, %v14768_v3, -inf }
0x271c   :  { %6993 = vmax.xlane.f32.xlu1 %v6992_v32  ;;  %v10345_v54 = vpop.f32.mrb[112].mxu1  ;;  %7263 = vmax.xlane.f32.xlu0 %v7262_v9  ;;  %v10373_v43 = vpop.f32.mrb[112].mxu0  ;;  %v6989_v49 = vsel %vm1862_vm8, %v6971_v17, -inf  ;;  %v7259_v35 = vsel %vm1862_vm8, %v14775_v41, -inf }
0x271d   :  { %v6980_v51 = vpop.f32.mrb[113].mxu1  ;;  %v7250_v52 = vpop.f32.mrb[113].mxu0  ;;  %v6986_v2 = vadd.f32 %v14782_v11, %v10345_v54  ;;  %v14795_v40 = vadd.f32 %v14782_v11, %v10373_v43 }
0x271e   :  { %v14789_v59 = vadd.f32 %v14786_v6, %v7250_v52  ;;  %v6981_v21 = vadd.f32 %v14786_v6, %v6980_v51  ;;  %v11595_v13 = vpop.permute.xlu1 %11594 }
0x271f   :  { %v6998_v15 = vsel %vm1862_vm8, %v6986_v2, -inf  ;;  %v7268_v1 = vsel %vm1862_vm8, %v14795_v40, -inf }
0x2720   :  { %6990 = vmax.xlane.f32.xlu0 %v6989_v49  ;;  %7260 = vmax.xlane.f32.xlu1 %v7259_v35  ;;  %v7265_v38 = vsel %vm1862_vm8, %v14789_v59, -inf  ;;  %v6995_v14 = vsel %vm1862_vm8, %v6981_v21, -inf }
0x2724   :  { %6999 = vmax.xlane.f32.xlu0 %v6998_v15  ;;  %7266 = vmax.xlane.f32.xlu1 %v7265_v38  ;;  %v11597_v15 = vunpack.i.h.bf16 %v11595_v13  ;;  %v11596_v38 = vunpack.i.l.bf16 %v11595_v13 }
0x2728   :  { %7269 = vmax.xlane.f32.xlu0 %v7268_v1 }
0x2729   :  { %v10398_v8 = vpop.f32.mrb[114].mxu0 }
0x272a   :  { %v7510_v62 = vpop.f32.mrb[115].mxu0  ;;  %v14804_v25 = vadd.f32 %v14762_v4, %v10398_v8 }
0x272b   :  { %v14808_v28 = vadd.f32 %v14771_v12, %v7510_v62 }
0x272c   :  { %6996 = vmax.xlane.f32.xlu0 %v6995_v14  ;;  %v7532_v0 = vsel %vm1862_vm8, %v14804_v25, -inf }
0x272d   :  { %v10401_v61 = vpop.f32.mrb[116].mxu0  ;;  %v7529_v27 = vsel %vm1862_vm8, %v14808_v28, -inf }
0x272e   :  { %v7520_v44 = vpop.f32.mrb[117].mxu0  ;;  %v14813_v24 = vadd.f32 %v14782_v11, %v10401_v61 }
0x272f   :  { %v14830_v58 = vadd.f32 %v14786_v6, %v7520_v44 }
0x2730   :  { %7533 = vmax.xlane.f32.xlu0 %v7532_v0  ;;  %v7538_v23 = vsel %vm1862_vm8, %v14813_v24, -inf  ;;  %v11586_v0 = vunpack.i.l.bf16 %v11585_v18 }
0x2731   :  { %v7535_v16 = vsel %vm1862_vm8, %v14830_v58, -inf }
0x2734   :  { %7530 = vmax.xlane.f32.xlu0 %v7529_v27  ;;  %v11106_v27 = vpack.c.bf16 %v11597_v15, %v11596_v38 }
0x2735   :  { %11604 = vrot.lane.b32.xlu1 %v14660_v56, %s12348_s24 }
0x2738   :  { %7539 = vmax.xlane.f32.xlu0 %v7538_v23 }
0x2739   :  { %11609 = vrot.lane.b32.xlu1 %v14672_v39, %s12348_s24 }
0x274e   :  { %11599 = vrot.lane.b32.xlu0 %v14672_v39, %s12338_s20 }
0x2752   :  { %7682 = vrot.lane.b32.xlu0 %v14654_v20, %s12349_s14 }
0x2756   :  { %7686 = vrot.lane.b32.xlu0 %v14664_v36, %s12349_s14 }
0x275d   :  { %7536 = vmax.xlane.f32.xlu1 %v7535_v16 }
0x276e   :  { %7684 = vrot.lane.b32.xlu1 %v14652_v53, %s12349_s14 }
0x2772   :  { %7688 = vrot.lane.b32.xlu1 %v14662_v19, %s12349_s14 }
0x27a9   :  { %v6994_v45 = vpop.xlane.xlu1 %6993  ;;  %v7264_v20 = vpop.xlane.xlu0 %7263 }
0x27aa   :  { %v7002_v31 = vsub.f32 %v14765_v47, %v6994_v45  ;;  %v7272_v8 = vsub.f32 %v14768_v3, %v7264_v20 }
0x27ac   :  { %v7007_v9 = vmul.f32 1.442695, %v7002_v31  ;;  %v7277_v3 = vmul.f32 1.442695, %v7272_v8 }
0x27ad   :  { %v6991_v36 = vpop.xlane.xlu0 %6990  ;;  %v7261_v51 = vpop.xlane.xlu1 %7260 }
0x27ae   :  { %v7001_v32 = vsub.f32 %v6971_v17, %v6991_v36  ;;  %v7271_v53 = vsub.f32 %v14775_v41, %v7261_v51 }
0x27b0   :  { %v7005_v54 = vmul.f32 1.442695, %v7001_v32  ;;  %v7275_v17 = vmul.f32 1.442695, %v7271_v53 }
0x27b1   :  { %v7000_v43 = vpop.xlane.xlu0 %6999  ;;  %v7267_v35 = vpop.xlane.xlu1 %7266 }
0x27b2   :  { %11933 = vpow2.f32 %v7005_v54  ;;  %v7004_v49 = vsub.f32 %v6986_v2, %v7000_v43  ;;  %v7273_v14 = vsub.f32 %v14789_v59, %v7267_v35  ;;  %v11587_v2 = vunpack.i.h.bf16 %v11585_v18 }
0x27b3   :  { %11935 = vpow2.f32 %v7007_v9 }
0x27b4   :  { %v7011_v47 = vmul.f32 1.442695, %v7004_v49  ;;  %v7279_v59 = vmul.f32 1.442695, %v7273_v14  ;;  %v11122_v13 = vpack.c.bf16 %v11587_v2, %v11586_v0  ;;  %v15490_v14 = vld [vmem:[#allocation66_spill] sm:$0xff] }
0x27b5   :  { %v7270_v52 = vpop.xlane.xlu0 %7269  ;;  %v11605_v54 = vpop.permute.xlu1 %11604 }
0x27b6   :  { %v11607_v49 = vunpack.i.h.bf16 %v11605_v54  ;;  %v11606_v53 = vunpack.i.l.bf16 %v11605_v54 }
0x27b8   :  { %v11130_v15 = vpack.c.bf16 %v11607_v49, %v11606_v53 }
0x27b9   :  { %v6997_v19 = vpop.xlane.xlu0 %6996  ;;  %v11610_v38 = vpop.permute.xlu1 %11609 }
0x27ba   :  { %v7003_v1 = vsub.f32 %v6981_v21, %v6997_v19  ;;  %v7274_v21 = vsub.f32 %v14795_v40, %v7270_v52  ;;  %v11612_v8 = vunpack.i.h.bf16 %v11610_v38 }
0x27bc   :  { %v14841_v62 = vpop.eup %11933  ;;  %v7009_v61 = vmul.f32 1.442695, %v7003_v1  ;;  %v7281_v18 = vmul.f32 1.442695, %v7274_v21 }
0x27bd   :  { %v14844_v44 = vpop.eup %11935  ;;  %10354 = vmatprep.mubr.msk.f32.mxu1 %vm1862_vm8, %v14841_v62  ;;  %v7534_v41 = vpop.xlane.xlu0 %7533 }
0x27be   :  { %11937 = vpow2.f32 %v7009_v61  ;;  %10355 = vmatmul.mubr.msk.f32.vlgmr.msra.gmra.mrb[114].mxu1 %vm1862_vm8, %v14844_v44  ;;  %v7542_v45 = vsub.f32 %v14804_v25, %v7534_v41 }
0x27bf   :  { %11939 = vpow2.f32 %v7011_v47  ;;  %11105 = vmatpush3.bf16.msra.mxu1 %v14745_v7  ;;  %v11611_v47 = vunpack.i.l.bf16 %v11610_v38 }
0x27c0   :  { %11941 = vpow2.f32 %v7275_v17  ;;  %11107 = vmatprep.subr.bf16.mxu1 %v11106_v27  ;;  %v7547_v40 = vmul.f32 1.442695, %v7542_v45 }
0x27c1   :  { %v7531_v23 = vpop.xlane.xlu0 %7530  ;;  %11943 = vpow2.f32 %v7277_v3  ;;  %v11136_v17 = vpack.c.bf16 %v11612_v8, %v11611_v47 }
0x27c2   :  { %v7541_v16 = vsub.f32 %v14808_v28, %v7531_v23  ;;  %11945 = vpow2.f32 %v7279_v59 }
0x27c3   :  { %11109 = vmatpush3.bf16.msra.mxu1 %v11106_v27  ;;  %11947 = vpow2.f32 %v7281_v18 }
0x27c4   :  { %v7545_v20 = vmul.f32 1.442695, %v7541_v16  ;;  %11123 = vmatprep.subr.bf16.mxu1 %v11122_v13 }
0x27c5   :  { %v7540_v31 = vpop.xlane.xlu0 %7539 }
0x27c6   :  { %11949 = vpow2.f32 %v7545_v20  ;;  %v7544_v61 = vsub.f32 %v14813_v24, %v7540_v31  ;;  %v15491_v24 = vld [vmem:[#allocation67_spill] sm:$0xff] }
0x27c7   :  { %11951 = vpow2.f32 %v7547_v40 }
0x27c8   :  { %v14854_v36 = vpop.eup %11937  ;;  %v7551_v0 = vmul.f32 1.442695, %v7544_v61 }
0x27c9   :  { %v14856_v7 = vpop.eup %11939  ;;  %10357 = vmatprep.mubr.msk.f32.mxu1 %vm1862_vm8, %v14854_v36  ;;  %v11600_v28 = vpop.permute.xlu0 %11599 }
0x27ca   :  { %v14860_v32 = vpop.eup %11941  ;;  %v11602_v9 = vunpack.i.h.bf16 %v11600_v28  ;;  %v11601_v25 = vunpack.i.l.bf16 %v11600_v28  ;;  %10358 = vmatmul.mubr.msk.f32.gmra.mrb[116].mxu1 %vm1862_vm8, %v14856_v7 }
0x27cb   :  { %10382 = vmatprep.mubr.msk.f32.mxu1 %vm1862_vm8, %v14860_v32  ;;  %v14866_v51 = vpop.eup %11943 }
0x27cc   :  { %v11126_v43 = vpack.c.bf16 %v11602_v9, %v11601_v25  ;;  %v14868_v52 = vpop.eup %11945 }
0x27cd   :  { %v14874_v35 = vpop.eup %11947  ;;  %v7683_v21 = vpop.permute.xlu0 %7682 }
0x27ce   :  { %10383 = vmatmul.mubr.msk.f32.vlgmr.msra.gmra.mrb[118].mxu1 %vm1862_vm8, %v14866_v51 }
0x27cf   :  { %11125 = vmatpush3.bf16.msra.mxu1 %v11122_v13  ;;  %10385 = vmatprep.mubr.msk.f32.mxu1 %vm1862_vm8, %v14868_v52 }
0x27d0   :  { %11127 = vmatprep.subr.bf16.mxu1 %v11126_v43  ;;  %v14876_v19 = vpop.eup %11949 }
0x27d1   :  { %v14884_v1 = vpop.eup %11951  ;;  %v7687_v23 = vpop.permute.xlu0 %7686 }
0x27d2   :  { %10386 = vmatmul.mubr.msk.f32.gmra.mrb[120].mxu1 %vm1862_vm8, %v14874_v35 }
0x27d3   :  { %11129 = vmatpush3.bf16.msra.mxu1 %v11126_v43  ;;  %10410 = vmatprep.mubr.msk.f32.mxu1 %vm1862_vm8, %v14876_v19 }
0x27d4   :  { %11132 = vmatprep.subr.msk.bf16.mxu1 %vm13480_vm12, %v11130_v15 }
0x27d6   :  { %10411 = vmatmul.mubr.msk.f32.vlgmr.msra.gmra.mrb[122].mxu1 %vm1862_vm8, %v14884_v1 }
0x27dc   :  { %11135 = vmatpush3.bf16.xpose.msk.msra.mxu1 %vm13480_vm12, %v11130_v15 }
0x27dd   :  { %11138 = vmatprep.subr.msk.bf16.mxu1 %vm13480_vm12, %v11136_v17 }
0x27e4   :  { %11141 = vmatpush3.bf16.xpose.msk.msra.mxu1 %vm13480_vm12, %v11136_v17 }
0x27e5   :  { %11159 = vmatprep.subr.bf16.mxu1 %v15490_v14 }
0x27ea   :  { %v7537_v41 = vpop.xlane.xlu1 %7536 }
0x27eb   :  { %v7543_v2 = vsub.f32 %v14830_v58, %v7537_v41 }
0x27ed   :  { %v7549_v27 = vmul.f32 1.442695, %v7543_v2 }
0x27ee   :  { %v7685_v46 = vpop.permute.xlu1 %7684 }
0x27ef   :  { %11953 = vpow2.f32 %v7549_v27 }
0x27f0   :  { %11955 = vpow2.f32 %v7551_v0  ;;  %v7286_v0 = vsel %vm1862_vm8, %v14866_v51, 0.0 }
0x27f2   :  { %v7689_v58 = vpop.permute.xlu1 %7688 }
0x27f9   :  { %v11954_v3 = vpop.eup %11953 }
0x27fa   :  { %v11956_v59 = vpop.eup %11955  ;;  %10413 = vmatprep.mubr.msk.f32.mxu1 %vm1862_vm8, %v11954_v3 }
0x27fb   :  { %10414 = vmatmul.mubr.msk.f32.gmra.mrb[124].mxu1 %vm1862_vm8, %v11956_v59 }
0x27fc   :  { %10424 = vmatprep.mubr.msk.f32.mxu1 %vm2610_vm11, %v7683_v21 }
0x27ff   :  { %10425 = vmatmul.mubr.msk.f32.vlgmr.msra.gmra.mrb[126].mxu1 %vm2610_vm11, %v7685_v46 }
0x2800   :  { %10427 = vmatprep.mubr.msk.f32.mxu1 %vm2610_vm11, %v7687_v23  ;;  %11161 = vmatpush3.bf16.msra.mxu1 %v15490_v14 }
0x2801   :  { %11163 = vmatprep.subr.bf16.mxu1 %v15491_v24 }
0x2803   :  { %10428 = vmatmul.mubr.msk.f32.gmra.mrb[128].mxu1 %vm2610_vm11, %v7689_v58 }
0x2804   :  { %11165 = vmatpush3.bf16.msra.mxu1 %v15491_v24 }
0x2891   :  { %v14906_v16 = vpop.f32.mrb[114].mxu1 }
0x2892   :  { %v14908_v13 = vpop.f32.mrb[115].mxu1 }
0x289d   :  { %v14910_v18 = vpop.f32.mrb[116].mxu1 }
0x289e   :  { %v14912_v45 = vpop.f32.mrb[117].mxu1 }
0x28a1   :  { %v14914_v20 = vpop.f32.mrb[118].mxu1 }
0x28a2   :  { %v14916_v31 = vpop.f32.mrb[119].mxu1 }
0x28a5   :  { %v14918_v40 = vpop.f32.mrb[120].mxu1 }
0x28a6   :  { %v14920_v28 = vpop.f32.mrb[121].mxu1 }
0x28a9   :  { %v14922_v9 = vpop.f32.mrb[122].mxu1 }
0x28aa   :  { %v14924_v25 = vpop.f32.mrb[123].mxu1 }
0x28ce   :  { %v14926_v54 = vpop.f32.mrb[124].mxu1 }
0x28cf   :  { %v14928_v43 = vpop.f32.mrb[125].mxu1 }
0x28d2   :  { %v10426_v49 = vpop.f32.mrb[126].mxu1 }
0x28d3   :  { %v7786_v53 = vadd.f32 %v14762_v4, %v10426_v49  ;;  %v7780_v15 = vpop.f32.mrb[127].mxu1 }
0x28d4   :  { %v7781_v38 = vadd.f32 %v14771_v12, %v7780_v15  ;;  %v7283_v12 = vsel %vm1862_vm8, %v14860_v32, 0.0  ;;  %v7292_v32 = vsel %vm1862_vm8, %v14874_v35, 0.0 }
0x28d5   :  { %v7802_v8 = vsel %vm1862_vm8, %v7786_v53, -inf }
0x28d6   :  { %7803 = vmax.xlane.f32.xlu1 %v7802_v8  ;;  %v10429_v47 = vpop.f32.mrb[128].mxu1  ;;  %v7799_v17 = vsel %vm1862_vm8, %v7781_v38, -inf }
0x28d7   :  { %v7796_v14 = vadd.f32 %v14782_v11, %v10429_v47  ;;  %v7790_v61 = vpop.f32.mrb[129].mxu1  ;;  %7800 = vmax.xlane.f32.xlu0 %v7799_v17  ;;  %v7553_v11 = vsel %vm1862_vm8, %v14876_v19, 0.0  ;;  %v7562_v19 = vsel %vm1862_vm8, %v11956_v59, 0.0 }
0x28d8   :  { %v7791_v2 = vadd.f32 %v14786_v6, %v7790_v61  ;;  %v7289_v6 = vsel %vm1862_vm8, %v14868_v52, 0.0 }
0x28d9   :  { %v7808_v41 = vsel %vm1862_vm8, %v7796_v14, -inf }
0x28da   :  { %v7805_v4 = vsel %vm1862_vm8, %v7791_v2, -inf }
0x28db   :  { %7809 = vmax.xlane.f32.xlu0 %v7808_v41 }
0x28df   :  { %7806 = vmax.xlane.f32.xlu0 %v7805_v4 }
0x28e7   :  { %11614 = vrot.lane.b32.xlu1 %v14660_v56, %s12350_s28  ;;  %v7559_v56 = vsel %vm1862_vm8, %v11954_v3, 0.0 }
0x28f5   :  { %11619 = vrot.lane.b32.xlu0 %v14672_v39, %s12350_s28  ;;  %v7556_v39 = vsel %vm1862_vm8, %v14884_v1, 0.0 }
0x290b   :  { %7284 = vadd.xlane.f32.xlu1 %v7283_v12 }
0x290f   :  { %7554 = vadd.xlane.f32.xlu1 %v7553_v11  ;;  %v15492_v11 = vld [vmem:[#allocation64_spill] sm:$0xff] }
0x2913   :  { %7290 = vadd.xlane.f32.xlu1 %v7289_v6 }
0x2914   :  { %7287 = vadd.xlane.f32.xlu0 %v7286_v0 }
0x2917   :  { %7560 = vadd.xlane.f32.xlu1 %v7559_v56  ;;  %v15493_v56 = vld [vmem:[#allocation65_spill] sm:$0xff] }
0x2918   :  { %7557 = vadd.xlane.f32.xlu0 %v7556_v39  ;;  %v7016_v39 = vsel %vm1862_vm8, %v14844_v44, 0.0  ;;  %v7019_v44 = vsel %vm1862_vm8, %v14854_v36, 0.0 }
0x291c   :  { %7293 = vadd.xlane.f32.xlu0 %v7292_v32 }
0x2920   :  { %7563 = vadd.xlane.f32.xlu0 %v7562_v19  ;;  %v7022_v19 = vsel %vm1862_vm8, %v14856_v7, 0.0 }
0x2963   :  { %v7804_v52 = vpop.xlane.xlu1 %7803 }
0x2964   :  { %v7812_v27 = vsub.f32 %v7786_v53, %v7804_v52  ;;  %v7801_v21 = vpop.xlane.xlu0 %7800  ;;  %v7013_v52 = vsel %vm1862_vm8, %v14841_v62, 0.0 }
0x2965   :  { %v7811_v46 = vsub.f32 %v7781_v38, %v7801_v21 }
0x2966   :  { %v7817_v51 = vmul.f32 1.442695, %v7812_v27  ;;  %v15494_v27 = vld [vmem:[#allocation68_spill] sm:$0xff] }
0x2967   :  { %v7815_v23 = vmul.f32 1.442695, %v7811_v46  ;;  %v11615_v24 = vpop.permute.xlu1 %11614 }
0x2968   :  { %11957 = vpow2.f32 %v7817_v51  ;;  %v11617_v3 = vunpack.i.h.bf16 %v11615_v24  ;;  %v11616_v58 = vunpack.i.l.bf16 %v11615_v24  ;;  %v7810_v49 = vpop.xlane.xlu0 %7809 }
0x2969   :  { %11959 = vpow2.f32 %v7815_v23  ;;  %v7814_v1 = vsub.f32 %v7796_v14, %v7810_v49 }
0x296a   :  { %v11142_v15 = vpack.c.bf16 %v11617_v3, %v11616_v58 }
0x296b   :  { %v7821_v8 = vmul.f32 1.442695, %v7814_v1 }
0x296c   :  { %11143 = vmatprep.subr.bf16.mxu0 %v11142_v15  ;;  %v7807_v35 = vpop.xlane.xlu0 %7806 }
0x296d   :  { %11961 = vpow2.f32 %v7821_v8  ;;  %v7813_v59 = vsub.f32 %v7791_v2, %v7807_v35  ;;  %11145 = vmatpush3.bf16.msra.mxu0 %v11142_v15 }
0x296f   :  { %v7819_v47 = vmul.f32 1.442695, %v7813_v59 }
0x2970   :  { %v11620_v53 = vpop.permute.xlu0 %11619 }
0x2971   :  { %11963 = vpow2.f32 %v7819_v47  ;;  %v11622_v38 = vunpack.i.h.bf16 %v11620_v53  ;;  %v11621_v17 = vunpack.i.l.bf16 %v11620_v53 }
0x2972   :  { %v11958_v61 = vpop.eup %11957 }
0x2973   :  { %v11960_v41 = vpop.eup %11959  ;;  %v11146_v4 = vpack.c.bf16 %v11622_v38, %v11621_v17  ;;  %v7826_v12 = vsel %vm1862_vm8, %v11958_v61, 0.0 }
0x2974   :  { %7827 = vadd.xlane.f32.xlu0 %v7826_v12  ;;  %10438 = vmatprep.mubr.msk.f32.mxu0 %vm1862_vm8, %v11960_v41  ;;  %v7823_v14 = vsel %vm1862_vm8, %v11960_v41, 0.0 }
0x2975   :  { %7824 = vadd.xlane.f32.xlu1 %v7823_v14  ;;  %11147 = vmatprep.subr.bf16.mxu0 %v11146_v4 }
0x2976   :  { %11149 = vmatpush3.bf16.msra.mxu0 %v11146_v4 }
0x2977   :  { %v11962_v2 = vpop.eup %11961  ;;  %11151 = vmatprep.subr.bf16.mxu0 %v15492_v11 }
0x2978   :  { %v7832_v6 = vsel %vm1862_vm8, %v11962_v2, 0.0 }
0x2979   :  { %7833 = vadd.xlane.f32.xlu0 %v7832_v6  ;;  %10439 = vmatmul.mubr.msk.f32.vlgmr.msra.gmra.mrb[118].mxu0 %vm1862_vm8, %v11958_v61 }
0x297a   :  { %11153 = vmatpush3.bf16.msra.mxu0 %v15492_v11 }
0x297b   :  { %v11964_v0 = vpop.eup %11963  ;;  %11155 = vmatprep.subr.bf16.mxu0 %v15493_v56 }
0x297c   :  { %10441 = vmatprep.mubr.msk.f32.mxu0 %vm1862_vm8, %v11964_v0  ;;  %v7829_v32 = vsel %vm1862_vm8, %v11964_v0, 0.0 }
0x297d   :  { %7017 = vadd.xlane.f32.xlu0 %v7016_v39  ;;  %7830 = vadd.xlane.f32.xlu1 %v7829_v32 }
0x297e   :  { %10442 = vmatmul.mubr.msk.f32.gmra.mrb[120].mxu0 %vm1862_vm8, %v11962_v2 }
0x297f   :  { %11157 = vmatpush3.bf16.msra.mxu0 %v15493_v56 }
0x2980   :  { %11167 = vmatprep.subr.bf16.mxu0 %v15494_v27 }
0x2981   :  { %7023 = vadd.xlane.f32.xlu0 %v7022_v19  ;;  %7014 = vadd.xlane.f32.xlu1 %v7013_v52 }
0x2985   :  { %7020 = vadd.xlane.f32.xlu1 %v7019_v44 }
0x2998   :  { %v7285_v21 = vpop.xlane.xlu1 %7284 }
0x2999   :  { %11965 = vrcp.f32 %v7285_v21 }
0x299c   :  { %v7555_v46 = vpop.xlane.xlu1 %7554 }
0x299d   :  { %11967 = vrcp.f32 %v7555_v46 }
0x29a0   :  { %v7291_v51 = vpop.xlane.xlu1 %7290 }
0x29a1   :  { %v7288_v23 = vpop.xlane.xlu0 %7287 }
0x29a2   :  { %11969 = vrcp.f32 %v7288_v23 }
0x29a3   :  { %v11966_v24 = vpop.eup %11965  ;;  %11971 = vrcp.f32 %v7291_v51 }
0x29a4   :  { %v7408_v7 = vmul.f32 %v11966_v24, %v14916_v31  ;;  %v7561_v62 = vpop.xlane.xlu1 %7560 }
0x29a5   :  { %v7558_v3 = vpop.xlane.xlu0 %7557 }
0x29a6   :  { %11973 = vrcp.f32 %v7558_v3  ;;  %7956 = vrot.lane.b32.xlu1 %v7408_v7, %s12351_s1 }
0x29a7   :  { %v11968_v58 = vpop.eup %11967  ;;  %11975 = vrcp.f32 %v7561_v62 }
0x29a8   :  { %v7678_v36 = vmul.f32 %v11968_v58, %v14924_v25 }
0x29a9   :  { %v7294_v49 = vpop.xlane.xlu0 %7293 }
0x29aa   :  { %11977 = vrcp.f32 %v7294_v49  ;;  %7972 = vrot.lane.b32.xlu1 %v7678_v36, %s12343_s9 }
0x29ac   :  { %v11970_v1 = vpop.eup %11969 }
0x29ad   :  { %v7564_v15 = vpop.xlane.xlu0 %7563  ;;  %v7409_v8 = vmul.f32 %v11970_v1, %v14914_v20  ;;  %v11972_v35 = vpop.eup %11971 }
0x29ae   :  { %11979 = vrcp.f32 %v7564_v15  ;;  %v7410_v59 = vmul.f32 %v11972_v35, %v14920_v28 }
0x29af   :  { %7958 = vrot.lane.b32.xlu0 %v7409_v8, %s12351_s1 }
0x29b0   :  { %v11974_v31 = vpop.eup %11973 }
0x29b1   :  { %v7679_v47 = vmul.f32 %v11974_v31, %v14922_v9  ;;  %v11976_v53 = vpop.eup %11975 }
0x29b2   :  { %v7680_v38 = vmul.f32 %v11976_v53, %v14928_v43 }
0x29b3   :  { %7960 = vrot.lane.b32.xlu0 %v7410_v59, %s12351_s1  ;;  %7974 = vrot.lane.b32.xlu1 %v7679_v47, %s12343_s9 }
0x29b4   :  { %v11978_v25 = vpop.eup %11977 }
0x29b5   :  { %v7411_v17 = vmul.f32 %v11978_v25, %v14918_v40 }
0x29b7   :  { %7976 = vrot.lane.b32.xlu0 %v7680_v38, %s12343_s9  ;;  %7962 = vrot.lane.b32.xlu1 %v7411_v17, %s12351_s1 }
0x29b8   :  { %v11980_v20 = vpop.eup %11979 }
0x29b9   :  { %v7681_v61 = vmul.f32 %v11980_v20, %v14926_v54 }
0x29bb   :  { %7978 = vrot.lane.b32.xlu1 %v7681_v61, %s12343_s9 }
0x2a01   :  { %v7828_v28 = vpop.xlane.xlu0 %7827 }
0x2a02   :  { %v7825_v9 = vpop.xlane.xlu1 %7824  ;;  %11981 = vrcp.f32 %v7828_v28 }
0x2a03   :  { %11983 = vrcp.f32 %v7825_v9 }
0x2a06   :  { %v7834_v41 = vpop.xlane.xlu0 %7833 }
0x2a07   :  { %11985 = vrcp.f32 %v7834_v41 }
0x2a0a   :  { %v7831_v4 = vpop.xlane.xlu1 %7830  ;;  %v7018_v21 = vpop.xlane.xlu0 %7017 }
0x2a0b   :  { %11987 = vrcp.f32 %v7831_v4 }
0x2a0c   :  { %v11982_v43 = vpop.eup %11981 }
0x2a0d   :  { %v11984_v40 = vpop.eup %11983 }
0x2a0e   :  { %v7015_v19 = vpop.xlane.xlu1 %7014  ;;  %v7024_v51 = vpop.xlane.xlu0 %7023 }
0x2a0f   :  { %11989 = vrcp.f32 %v7015_v19 }
0x2a10   :  { %11991 = vrcp.f32 %v7018_v21 }
0x2a11   :  { %v11986_v54 = vpop.eup %11985 }
0x2a12   :  { %v7021_v52 = vpop.xlane.xlu1 %7020 }
0x2a13   :  { %11993 = vrcp.f32 %v7021_v52 }
0x2a14   :  { %11995 = vrcp.f32 %v7024_v51 }
0x2a15   :  { %v11988_v0 = vpop.eup %11987 }
0x2a18   :  { %v7957_v44 = vpop.permute.xlu1 %7956 }
0x2a19   :  { %v11990_v62 = vpop.eup %11989 }
0x2a1a   :  { %v7138_v58 = vmul.f32 %v11990_v62, %v14908_v13  ;;  %v11992_v36 = vpop.eup %11991 }
0x2a1b   :  { %v7139_v8 = vmul.f32 %v11992_v36, %v14906_v16 }
0x2a1c   :  { %v7973_v46 = vpop.permute.xlu1 %7972  ;;  %v8000_v15 = vsel %vm2610_vm11, %v7138_v58, %v7957_v44 }
0x2a1d   :  { %v11994_v35 = vpop.eup %11993  ;;  %v8004_v47 = vsel %vm451_vm1, %v8000_v15, %v7973_v46  ;;  %v6677_v15 = vadd.f32 %v14751_v29, %v14616_v37 }
0x2a1e   :  { %v11996_v59 = vpop.eup %11995  ;;  %v7140_v13 = vmul.f32 %v11994_v35, %v14912_v45 }
0x2a1f   :  { %v7141_v16 = vmul.f32 %v11996_v59, %v14910_v18 }
0x2a21   :  { %v7959_v24 = vpop.permute.xlu0 %7958 }
0x2a22   :  { %v8001_v53 = vsel %vm2610_vm11, %v7139_v8, %v7959_v24 }
0x2a25   :  { %v7975_v23 = vpop.permute.xlu1 %7974  ;;  %v7961_v3 = vpop.permute.xlu0 %7960 }
0x2a26   :  { %v8005_v38 = vsel %vm451_vm1, %v8001_v53, %v7975_v23  ;;  %v8002_v61 = vsel %vm2610_vm11, %v7140_v13, %v7961_v3  ;;  %v6678_v53 = vadd.f32 %v14749_v34, %v14618_v42  ;;  %v6681_v34 = vadd.f32 %v14759_v57, %v14630_v5 }
0x2a29   :  { %v7963_v7 = vpop.permute.xlu1 %7962  ;;  %v7977_v1 = vpop.permute.xlu0 %7976 }
0x2a2a   :  { %v8003_v9 = vsel %vm2610_vm11, %v7141_v16, %v7963_v7  ;;  %v8006_v41 = vsel %vm451_vm1, %v8002_v61, %v7977_v1  ;;  %v6680_v61 = vadd.f32 %v14753_v55, %v14633_v33 }
0x2a2d   :  { %v7979_v49 = vpop.permute.xlu1 %7978 }
0x2a2e   :  { %v8007_v45 = vsel %vm451_vm1, %v8003_v9, %v7979_v49  ;;  %v6682_v9 = vadd.f32 %v14757_v50, %v14639_v26 }
0x2a4c   :  { %v10440_v12 = vpop.f32.mrb[118].mxu0 }
0x2a4d   :  { %v7949_v14 = vmul.f32 %v11982_v43, %v10440_v12  ;;  %v7929_v2 = vpop.f32.mrb[119].mxu0  ;;  %v15495_v43 = vld [vmem:[#allocation69_spill] sm:$0xff] }
0x2a4e   :  { %v7948_v11 = vmul.f32 %v11984_v40, %v7929_v2  ;;  %v15497_v40 = vld [vmem:[#allocation71_spill] sm:$0xff] }
0x2a4f   :  { %7990 = vrot.lane.b32.xlu1 %v7949_v14, %s12352_s6 }
0x2a50   :  { %7988 = vrot.lane.b32.xlu0 %v7948_v11, %s12352_s6 }
0x2a51   :  { %v10443_v6 = vpop.f32.mrb[120].mxu0 }
0x2a52   :  { %v7951_v56 = vmul.f32 %v11986_v54, %v10443_v6  ;;  %v7939_v39 = vpop.f32.mrb[121].mxu0  ;;  %v12070_v6 = vld [vmem:[%s15433_s12] ss:$0 sm:$0xff] }
0x2a53   :  { %v7950_v32 = vmul.f32 %v11988_v0, %v7939_v39 }
0x2a54   :  { %7994 = vrot.lane.b32.xlu1 %v7951_v56, %s12352_s6 }
0x2a55   :  { %7992 = vrot.lane.b32.xlu0 %v7950_v32, %s12352_s6 }
0x2ac1   :  { %v7991_v31 = vpop.permute.xlu1 %7990 }
0x2ac2   :  { %v7989_v25 = vpop.permute.xlu0 %7988  ;;  %v8009_v20 = vsel %vm3731_vm13, %v8005_v38, %v7991_v31 }
0x2ac3   :  { %v8008_v17 = vsel %vm3731_vm13, %v8004_v47, %v7989_v25  ;;  %v12071_v25 = vld [vmem:[#allocation9] ss:$0 sm:$0xff] }
0x2ac4   :  { %10452 = vmatprep.mubr.msk.f32.mxu0 %vm1862_vm8, %v8008_v17  ;;  %v15047_v38 = vadd.f32 %v12071_v25, %v6677_v15  ;;  %v6679_v17 = vadd.f32 %v14755_v10, %v14624_v60  ;;  %v15073_v5 = vadd.f32 %v12071_v25, %v6682_v9 }
0x2ac5   :  { %10453 = vmatmul.mubr.msk.f32.vlgmr.msra.gmra.mrb[122].mxu0 %vm1862_vm8, %v8009_v20  ;;  %v15052_v20 = vadd.f32 %v12071_v25, %v6678_v53 }
0x2ac6   :  { %v7995_v28 = vpop.permute.xlu1 %7994  ;;  %11169 = vmatpush3.bf16.msra.mxu0 %v15494_v27  ;;  %v15496_v27 = vld [vmem:[#allocation70_spill] sm:$0xff]  ;;  %v6689_v16 = vsel %vm313_vm0, %v15047_v38, 0.0  ;;  %v15058_v42 = vadd.f32 %v12071_v25, %v6679_v17  ;;  %v6704_v26 = vsel %vm2031_vm10, %v15073_v5, 0.0 }
0x2ac7   :  { %v7993_v4 = vpop.permute.xlu0 %7992  ;;  %11171 = vmatprep.subr.bf16.mxu0 %v15495_v43  ;;  %v8011_v18 = vsel %vm3731_vm13, %v8007_v45, %v7995_v28  ;;  %v6692_v10 = vsel %vm313_vm0, %v15052_v20, 0.0  ;;  %v15065_v28 = vadd.f32 %v12071_v25, %v6680_v61  ;;  %v12075_v61 = vld [vmem:[#allocation15] ss:$0 sm:$0xff] }
0x2ac8   :  { %v8010_v12 = vsel %vm3731_vm13, %v8006_v41, %v7993_v4  ;;  %v15069_v41 = vadd.f32 %v12071_v25, %v6681_v34  ;;  %v6695_v33 = vsel %vm313_vm0, %v15058_v42, 0.0 }
0x2ac9   :  { %10455 = vmatprep.mubr.msk.f32.mxu0 %vm1862_vm8, %v8010_v12  ;;  %v6698_v55 = vsel %vm313_vm0, %v15065_v28, 0.0 }
0x2aca   :  { %10456 = vmatmul.mubr.msk.f32.gmra.mrb[124].mxu0 %vm1862_vm8, %v8011_v18  ;;  %v6701_v57 = vsel %vm313_vm0, %v15069_v41, 0.0 }
0x2acb   :  { %11173 = vmatpush3.bf16.msra.mxu0 %v15495_v43 }
0x2acc   :  { %11175 = vmatprep.subr.bf16.mxu0 %v15496_v27 }
0x2acf   :  { %11177 = vmatpush3.bf16.msra.mxu0 %v15496_v27 }
0x2ad0   :  { %11179 = vmatprep.subr.bf16.mxu0 %v15497_v40 }
0x2ad3   :  { %11181 = vmatpush3.bf16.msra.mxu0 %v15497_v40 }
0x2b98   :  { %v10454_v14 = vpop.f32.mrb[122].mxu0 }
0x2b99   :  { %v8110_v2 = vadd.f32 %v10454_v14, %v15486_v22  ;;  %v8090_v11 = vpop.f32.mrb[123].mxu0 }
0x2b9a   :  { %v8109_v54 = vadd.f32 %v8090_v11, %v15485_v30 }
0x2b9b   :  { %v8114_v0 = vadd.f32 %v12070_v6, %v8110_v2 }
0x2b9c   :  { %v8113_v56 = vadd.f32 %v12070_v6, %v8109_v54 }
0x2b9d   :  { %v10457_v39 = vpop.f32.mrb[124].mxu0  ;;  %v8120_v32 = vsel %vm1862_vm8, %v8114_v0, 0.0 }
0x2b9e   :  { %v8100_v19 = vpop.f32.mrb[125].mxu0  ;;  %8121 = vadd.xlane.f32.xlu1 %v8120_v32  ;;  %v8117_v52 = vsel %vm1862_vm8, %v8113_v56, 0.0  ;;  %v8112_v44 = vadd.f32 %v10457_v39, %v15488_v48  ;;  %v12072_v32 = vld [vmem:[%s15441_s5] ss:$0 sm:$0xff] }
0x2b9f   :  { %v8111_v21 = vadd.f32 %v8100_v19, %v15487_v63  ;;  %8118 = vadd.xlane.f32.xlu0 %v8117_v52 }
0x2ba0   :  { %v8116_v22 = vadd.f32 %v12070_v6, %v8112_v44 }
0x2ba1   :  { %v8115_v46 = vadd.f32 %v12070_v6, %v8111_v21  ;;  %v12073_v21 = vld [vmem:[%s15442_s29] ss:$0 sm:$0xff] }
0x2ba2   :  { %v8126_v30 = vsel %vm1862_vm8, %v8116_v22, 0.0 }
0x2ba3   :  { %v8123_v51 = vsel %vm1862_vm8, %v8115_v46, 0.0 }
0x2ba4   :  { %8124 = vadd.xlane.f32.xlu0 %v8123_v51 }
0x2ba8   :  { %8127 = vadd.xlane.f32.xlu0 %v8126_v30 }
0x2c2b   :  { %v8122_v23 = vpop.xlane.xlu1 %8121 }
0x2c2c   :  { %v8130_v24 = vmul.f32 0.03125, %v8122_v23  ;;  %v8119_v7 = vpop.xlane.xlu0 %8118 }
0x2c2d   :  { %v8129_v62 = vmul.f32 0.03125, %v8119_v7 }
0x2c2e   :  { %v15033_v3 = vsub.f32 %v8114_v0, %v8130_v24 }
0x2c2f   :  { %v15035_v58 = vsub.f32 %v8113_v56, %v8129_v62 }
0x2c30   :  { %v8138_v63 = vmul.f32 %v15033_v3, %v15033_v3 }
0x2c31   :  { %v8125_v48 = vpop.xlane.xlu0 %8124  ;;  %v8137_v36 = vmul.f32 %v15035_v58, %v15035_v58 }
0x2c32   :  { %v8131_v49 = vmul.f32 0.03125, %v8125_v48  ;;  %v8144_v1 = vsel %vm1862_vm8, %v8138_v63, 0.0  ;;  %v12074_v63 = vld [vmem:[#allocation13] ss:$0 sm:$0xff] }
0x2c33   :  { %8145 = vadd.xlane.f32.xlu0 %v8144_v1  ;;  %v8141_v8 = vsel %vm1862_vm8, %v8137_v36, 0.0 }
0x2c34   :  { %v8135_v35 = vsub.f32 %v8115_v46, %v8131_v49  ;;  %8142 = vadd.xlane.f32.xlu1 %v8141_v8 }
0x2c35   :  { %v8128_v31 = vpop.xlane.xlu0 %8127 }
0x2c36   :  { %v8132_v59 = vmul.f32 0.03125, %v8128_v31  ;;  %v8139_v47 = vmul.f32 %v8135_v35, %v8135_v35 }
0x2c38   :  { %v8136_v13 = vsub.f32 %v8116_v22, %v8132_v59  ;;  %v8147_v37 = vsel %vm1862_vm8, %v8139_v47, 0.0 }
0x2c39   :  { %8148 = vadd.xlane.f32.xlu1 %v8147_v37 }
0x2c3a   :  { %v8140_v29 = vmul.f32 %v8136_v13, %v8136_v13 }
0x2c3c   :  { %v8150_v60 = vsel %vm1862_vm8, %v8140_v29, 0.0 }
0x2c3d   :  { %6690 = vadd.xlane.f32.xlu1 %v6689_v16  ;;  %8151 = vadd.xlane.f32.xlu0 %v8150_v60 }
0x2c41   :  { %6696 = vadd.xlane.f32.xlu1 %v6695_v33  ;;  %6693 = vadd.xlane.f32.xlu0 %v6692_v10 }
0x2c45   :  { %6699 = vadd.xlane.f32.xlu0 %v6698_v55  ;;  %6702 = vadd.xlane.f32.xlu1 %v6701_v57 }
0x2c49   :  { %6705 = vadd.xlane.f32.xlu0 %v6704_v26 }
0x2cc0   :  { %v8146_v50 = vpop.xlane.xlu0 %8145 }
0x2cc1   :  { %v8154_v4 = vmul.f32 0.03125, %v8146_v50  ;;  %v8143_v43 = vpop.xlane.xlu1 %8142 }
0x2cc2   :  { %v8153_v45 = vmul.f32 0.03125, %v8143_v43 }
0x2cc3   :  { %v8158_v12 = vadd.f32 1e-05, %v8154_v4 }
0x2cc4   :  { %v8157_v18 = vadd.f32 1e-05, %v8153_v45 }
0x2cc5   :  { %11997 = vrsqrt.f32 %v8158_v12 }
0x2cc6   :  { %11999 = vrsqrt.f32 %v8157_v18  ;;  %v8149_v27 = vpop.xlane.xlu1 %8148 }
0x2cc7   :  { %v8155_v40 = vmul.f32 0.03125, %v8149_v27 }
0x2cc9   :  { %v8159_v14 = vadd.f32 1e-05, %v8155_v40 }
0x2cca   :  { %v8152_v2 = vpop.xlane.xlu0 %8151  ;;  %v6691_v17 = vpop.xlane.xlu1 %6690 }
0x2ccb   :  { %12001 = vrsqrt.f32 %v8159_v14  ;;  %v8156_v11 = vmul.f32 0.03125, %v8152_v2  ;;  %v6707_v57 = vmul.f32 0.015625, %v6691_v17 }
0x2ccd   :  { %v8160_v54 = vadd.f32 1e-05, %v8156_v11  ;;  %v15099_v18 = vsub.f32 %v15047_v38, %v6707_v57 }
0x2cce   :  { %v6694_v25 = vpop.xlane.xlu0 %6693  ;;  %v6697_v9 = vpop.xlane.xlu1 %6696 }
0x2ccf   :  { %v11998_v6 = vpop.eup %11997  ;;  %12003 = vrsqrt.f32 %v8160_v54  ;;  %v6708_v33 = vmul.f32 0.015625, %v6694_v25  ;;  %v6709_v27 = vmul.f32 0.015625, %v6697_v9 }
0x2cd0   :  { %v12000_v0 = vpop.eup %11999  ;;  %v8166_v56 = vmul.f32 %v11998_v6, %v15033_v3 }
0x2cd1   :  { %v8165_v39 = vmul.f32 %v12000_v0, %v15035_v58  ;;  %v15096_v4 = vsub.f32 %v15052_v20, %v6708_v33 }
0x2cd2   :  { %v8170_v19 = vmul.f32 %v12072_v32, %v8166_v56  ;;  %v6700_v60 = vpop.xlane.xlu0 %6699  ;;  %v6703_v2 = vpop.xlane.xlu1 %6702 }
0x2cd3   :  { %v8169_v52 = vmul.f32 %v12072_v32, %v8165_v39  ;;  %v6710_v43 = vmul.f32 0.015625, %v6700_v60  ;;  %v6720_v20 = vmul.f32 %v15096_v4, %v15096_v4  ;;  %v15108_v39 = vsub.f32 %v15058_v42, %v6709_v27 }
0x2cd4   :  { %v8174_v22 = vadd.f32 %v12073_v21, %v8170_v19  ;;  %v6711_v38 = vmul.f32 0.015625, %v6703_v2  ;;  %v6719_v19 = vmul.f32 %v15099_v18, %v15099_v18 }
0x2cd5   :  { %v12002_v44 = vpop.eup %12001  ;;  %v8173_v46 = vadd.f32 %v12073_v21, %v8169_v52  ;;  %v15102_v6 = vsub.f32 %v15065_v28, %v6710_v43  ;;  %v6728_v52 = vsel %vm313_vm0, %v6720_v20, 0.0 }
0x2cd6   :  { %v8167_v51 = vmul.f32 %v12002_v44, %v8135_v35  ;;  %v6706_v40 = vpop.xlane.xlu0 %6705  ;;  %v6725_v42 = vsel %vm313_vm0, %v6719_v19, 0.0  ;;  %v12077_v19 = vld [vmem:[#allocation12] ss:$0 sm:$0xff] }
0x2cd7   :  { %10466 = vmatprep.mubr.msk.f32.mxu1 %vm1862_vm8, %v8173_v46  ;;  %v6712_v0 = vmul.f32 0.015625, %v6706_v40  ;;  %v6722_v44 = vmul.f32 %v15102_v6, %v15102_v6 }
0x2cd8   :  { %10467 = vmatmul.mubr.msk.f32.vlgmr.msra.gmra.mrb[130].mxu1 %vm1862_vm8, %v8174_v22  ;;  %v8171_v30 = vmul.f32 %v12072_v32, %v8167_v51 }
0x2cd9   :  { %v12004_v23 = vpop.eup %12003  ;;  %v15114_v28 = vsub.f32 %v15073_v5, %v6712_v0  ;;  %v12076_v0 = vld [vmem:[#allocation10] ss:$0 sm:$0xff] }
0x2cda   :  { %v8175_v24 = vadd.f32 %v12073_v21, %v8171_v30  ;;  %v8168_v7 = vmul.f32 %v12004_v23, %v8136_v13 }
0x2cdb   :  { %v6724_v5 = vmul.f32 %v15114_v28, %v15114_v28 }
0x2cdc   :  { %10469 = vmatprep.mubr.msk.f32.mxu1 %vm1862_vm8, %v8175_v24  ;;  %v8172_v62 = vmul.f32 %v12072_v32, %v8168_v7 }
0x2cde   :  { %v8176_v3 = vadd.f32 %v12073_v21, %v8172_v62  ;;  %v15120_v21 = vsub.f32 %v15069_v41, %v6711_v38  ;;  %v6740_v41 = vsel %vm2031_vm10, %v6724_v5, 0.0 }
0x2ce0   :  { %10470 = vmatmul.mubr.msk.f32.gmra.mrb[132].mxu1 %vm1862_vm8, %v8176_v3  ;;  %v6723_v30 = vmul.f32 %v15120_v21, %v15120_v21 }
0x2ce2   :  { %v6737_v23 = vsel %vm313_vm0, %v6723_v30, 0.0 }
0x2dab   :  { %v10468_v58 = vpop.f32.mrb[130].mxu1 }
0x2dac   :  { %v8261_v48 = vadd.f32 %v12074_v63, %v10468_v58  ;;  %v8255_v36 = vpop.f32.mrb[131].mxu1 }
0x2dad   :  { %v8256_v49 = vadd.f32 %v12074_v63, %v8255_v36 }
0x2dae   :  { %v8275_v15 = vmax.f32 %v8261_v48, 0.0 }
0x2daf   :  { %v8274_v1 = vmax.f32 %v8256_v49, 0.0 }
0x2db1   :  { %10488 = vmatprep.mubr.msk.f32.mxu0 %vm313_vm0, %v8274_v1 }
0x2db2   :  { %10489 = vmatmul.mubr.msk.f32.vlgmr.msra.gmra.mrb[126].mxu0 %vm313_vm0, %v8275_v15 }
0x2db3   :  { %v10471_v8 = vpop.f32.mrb[132].mxu1 }
0x2db4   :  { %v8271_v35 = vadd.f32 %v12074_v63, %v10471_v8  ;;  %v8265_v31 = vpop.f32.mrb[133].mxu1 }
0x2db5   :  { %v8266_v59 = vadd.f32 %v12074_v63, %v8265_v31 }
0x2db6   :  { %v8277_v53 = vmax.f32 %v8271_v35, 0.0 }
0x2db7   :  { %v8276_v47 = vmax.f32 %v8266_v59, 0.0 }
0x2db9   :  { %10491 = vmatprep.mubr.msk.f32.mxu0 %vm313_vm0, %v8276_v47 }
0x2dba   :  { %10492 = vmatmul.mubr.msk.f32.gmra.mrb[128].mxu0 %vm313_vm0, %v8277_v53 }
0x2e85   :  { %v10490_v13 = vpop.f32.mrb[126].mxu0 }
0x2e86   :  { %v8376_v37 = vadd.f32 %v10490_v13, %v8174_v22  ;;  %v8356_v29 = vpop.f32.mrb[127].mxu0  ;;  %v6734_v22 = vsel %vm313_vm0, %v6722_v44, 0.0 }
0x2e87   :  { %v8375_v16 = vadd.f32 %v8356_v29, %v8173_v46  ;;  %v6721_v46 = vmul.f32 %v15108_v39, %v15108_v39 }
0x2e88   :  { %v8380_v34 = vadd.f32 %v12075_v61, %v8376_v37 }
0x2e89   :  { %v8379_v10 = vadd.f32 %v12075_v61, %v8375_v16  ;;  %v6731_v51 = vsel %vm313_vm0, %v6721_v46, 0.0 }
0x2e8a   :  { %v8386_v55 = vsel %vm1862_vm8, %v8380_v34, 0.0 }
0x2e8b   :  { %8387 = vadd.xlane.f32.xlu0 %v8386_v55  ;;  %v8383_v26 = vsel %vm1862_vm8, %v8379_v10, 0.0 }
0x2e8c   :  { %8384 = vadd.xlane.f32.xlu1 %v8383_v26 }
0x2e8d   :  { %v10493_v50 = vpop.f32.mrb[128].mxu0 }
0x2e8e   :  { %v8378_v45 = vadd.f32 %v10493_v50, %v8176_v3  ;;  %v8366_v12 = vpop.f32.mrb[129].mxu0 }
0x2e8f   :  { %v8377_v14 = vadd.f32 %v8366_v12, %v8175_v24 }
0x2e90   :  { %v8382_v11 = vadd.f32 %v12075_v61, %v8378_v45 }
0x2e91   :  { %v8381_v54 = vadd.f32 %v12075_v61, %v8377_v14 }
0x2e92   :  { %v8392_v56 = vsel %vm1862_vm8, %v8382_v11, 0.0 }
0x2e93   :  { %8393 = vadd.xlane.f32.xlu0 %v8392_v56  ;;  %v8389_v32 = vsel %vm1862_vm8, %v8381_v54, 0.0 }
0x2e94   :  { %8390 = vadd.xlane.f32.xlu1 %v8389_v32 }
0x2e97   :  { %6729 = vadd.xlane.f32.xlu0 %v6728_v52 }
0x2e98   :  { %6726 = vadd.xlane.f32.xlu1 %v6725_v42 }
0x2e9b   :  { %6735 = vadd.xlane.f32.xlu0 %v6734_v22 }
0x2e9c   :  { %6732 = vadd.xlane.f32.xlu1 %v6731_v51 }
0x2e9f   :  { %6741 = vadd.xlane.f32.xlu0 %v6740_v41 }
0x2ea0   :  { %6738 = vadd.xlane.f32.xlu1 %v6737_v23 }
0x2f18   :  { %v8388_v24 = vpop.xlane.xlu0 %8387 }
0x2f19   :  { %v8396_v7 = vmul.f32 0.03125, %v8388_v24  ;;  %v8385_v62 = vpop.xlane.xlu1 %8384 }
0x2f1a   :  { %v8395_v3 = vmul.f32 0.03125, %v8385_v62 }
0x2f1b   :  { %v15133_v58 = vsub.f32 %v8380_v34, %v8396_v7 }
0x2f1c   :  { %v15135_v63 = vsub.f32 %v8379_v10, %v8395_v3 }
0x2f1d   :  { %v8404_v48 = vmul.f32 %v15133_v58, %v15133_v58 }
0x2f1e   :  { %v8403_v36 = vmul.f32 %v15135_v63, %v15135_v63 }
0x2f1f   :  { %v8410_v49 = vsel %vm1862_vm8, %v8404_v48, 0.0 }
0x2f20   :  { %v8394_v1 = vpop.xlane.xlu0 %8393  ;;  %8411 = vadd.xlane.f32.xlu0 %v8410_v49  ;;  %v8407_v15 = vsel %vm1862_vm8, %v8403_v36, 0.0 }
0x2f21   :  { %v8398_v8 = vmul.f32 0.03125, %v8394_v1  ;;  %v8391_v35 = vpop.xlane.xlu1 %8390  ;;  %8408 = vadd.xlane.f32.xlu1 %v8407_v15 }
0x2f22   :  { %v8397_v31 = vmul.f32 0.03125, %v8391_v35 }
0x2f23   :  { %v15143_v59 = vsub.f32 %v8382_v11, %v8398_v8 }
0x2f24   :  { %v15145_v47 = vsub.f32 %v8381_v54, %v8397_v31  ;;  %v6730_v53 = vpop.xlane.xlu0 %6729 }
0x2f25   :  { %v6744_v25 = vmul.f32 0.015625, %v6730_v53  ;;  %v6727_v17 = vpop.xlane.xlu1 %6726  ;;  %v8406_v13 = vmul.f32 %v15143_v59, %v15143_v59 }
0x2f26   :  { %v6743_v37 = vmul.f32 0.015625, %v6727_v17  ;;  %v8405_v29 = vmul.f32 %v15145_v47, %v15145_v47 }
0x2f27   :  { %v6750_v16 = vadd.f32 1e-05, %v6744_v25  ;;  %v8416_v61 = vsel %vm1862_vm8, %v8406_v13, 0.0 }
0x2f28   :  { %v6749_v34 = vadd.f32 1e-05, %v6743_v37  ;;  %8417 = vadd.xlane.f32.xlu0 %v8416_v61  ;;  %v6736_v60 = vpop.xlane.xlu0 %6735  ;;  %v8413_v10 = vsel %vm1862_vm8, %v8405_v29, 0.0 }
0x2f29   :  { %12005 = vrsqrt.f32 %v6750_v16  ;;  %v6746_v9 = vmul.f32 0.015625, %v6736_v60  ;;  %8414 = vadd.xlane.f32.xlu1 %v8413_v10  ;;  %v6733_v33 = vpop.xlane.xlu1 %6732  ;;  %v12078_v10 = vld [vmem:[%s15448_s16] ss:$0 sm:$0xff] }
0x2f2a   :  { %12007 = vrsqrt.f32 %v6749_v34  ;;  %v6745_v55 = vmul.f32 0.015625, %v6733_v33 }
0x2f2b   :  { %v6752_v57 = vadd.f32 1e-05, %v6746_v9 }
0x2f2c   :  { %v6751_v26 = vadd.f32 1e-05, %v6745_v55  ;;  %v6742_v50 = vpop.xlane.xlu0 %6741  ;;  %v12079_v55 = vld [vmem:[%s15449_s0] ss:$0 sm:$0xff] }
0x2f2d   :  { %12009 = vrsqrt.f32 %v6752_v57  ;;  %v6748_v43 = vmul.f32 0.015625, %v6742_v50  ;;  %v6739_v45 = vpop.xlane.xlu1 %6738 }
0x2f2e   :  { %12011 = vrsqrt.f32 %v6751_v26  ;;  %v6747_v12 = vmul.f32 0.015625, %v6739_v45 }
0x2f2f   :  { %v6754_v27 = vadd.f32 1e-05, %v6748_v43 }
0x2f30   :  { %v6753_v40 = vadd.f32 1e-05, %v6747_v12 }
0x2f31   :  { %12013 = vrsqrt.f32 %v6754_v27 }
0x2f32   :  { %12015 = vrsqrt.f32 %v6753_v40 }
0x2f33   :  { %v12006_v14 = vpop.eup %12005 }
0x2f34   :  { %v12008_v2 = vpop.eup %12007  ;;  %v6762_v11 = vmul.f32 %v12006_v14, %v15096_v4 }
0x2f35   :  { %v6761_v54 = vmul.f32 %v12008_v2, %v15099_v18 }
0x2f36   :  { %v6768_v56 = vmul.f32 %v12076_v0, %v6762_v11 }
0x2f37   :  { %v12010_v20 = vpop.eup %12009  ;;  %v6767_v38 = vmul.f32 %v12076_v0, %v6761_v54 }
0x2f38   :  { %v12012_v32 = vpop.eup %12011  ;;  %v15155_v52 = vadd.f32 %v12077_v19, %v6768_v56  ;;  %v6764_v44 = vmul.f32 %v12010_v20, %v15102_v6 }
0x2f39   :  { %v15158_v42 = vadd.f32 %v12077_v19, %v6767_v38  ;;  %v6763_v46 = vmul.f32 %v12012_v32, %v15108_v39 }
0x2f3a   :  { %v8446_v22 = vsel %vm313_vm0, %v15155_v52, 0.0  ;;  %v6770_v4 = vmul.f32 %v12076_v0, %v6764_v44 }
0x2f3b   :  { %v12014_v5 = vpop.eup %12013  ;;  %8447 = vadd.xlane.f32.xlu0 %v8446_v22  ;;  %v8443_v18 = vsel %vm313_vm0, %v15158_v42, 0.0  ;;  %v6769_v51 = vmul.f32 %v12076_v0, %v6763_v46 }
0x2f3c   :  { %v12016_v30 = vpop.eup %12015  ;;  %8444 = vadd.xlane.f32.xlu1 %v8443_v18  ;;  %v15165_v41 = vadd.f32 %v12077_v19, %v6770_v4  ;;  %v6766_v6 = vmul.f32 %v12014_v5, %v15114_v28 }
0x2f3d   :  { %v15168_v23 = vadd.f32 %v12077_v19, %v6769_v51  ;;  %v6765_v39 = vmul.f32 %v12016_v30, %v15120_v21 }
0x2f3e   :  { %v8452_v24 = vsel %vm313_vm0, %v15165_v41, 0.0  ;;  %v6772_v7 = vmul.f32 %v12076_v0, %v6766_v6 }
0x2f3f   :  { %8453 = vadd.xlane.f32.xlu0 %v8452_v24  ;;  %v8449_v62 = vsel %vm313_vm0, %v15168_v23, 0.0  ;;  %v6771_v3 = vmul.f32 %v12076_v0, %v6765_v39 }
0x2f40   :  { %8450 = vadd.xlane.f32.xlu1 %v8449_v62  ;;  %v15175_v48 = vadd.f32 %v12077_v19, %v6772_v7 }
0x2f41   :  { %v15177_v36 = vadd.f32 %v12077_v19, %v6771_v3 }
0x2f42   :  { %v8458_v28 = vsel %vm2031_vm10, %v15175_v48, 0.0 }
0x2f43   :  { %8459 = vadd.xlane.f32.xlu0 %v8458_v28  ;;  %v8455_v21 = vsel %vm313_vm0, %v15177_v36, 0.0 }
0x2f44   :  { %8456 = vadd.xlane.f32.xlu1 %v8455_v21 }
0x2fad   :  { %v8412_v49 = vpop.xlane.xlu0 %8411 }
0x2fae   :  { %v8420_v1 = vmul.f32 0.03125, %v8412_v49  ;;  %v8409_v15 = vpop.xlane.xlu1 %8408 }
0x2faf   :  { %v8419_v8 = vmul.f32 0.03125, %v8409_v15 }
0x2fb0   :  { %v8424_v35 = vadd.f32 1e-05, %v8420_v1 }
0x2fb1   :  { %v8423_v31 = vadd.f32 1e-05, %v8419_v8 }
0x2fb2   :  { %12017 = vrsqrt.f32 %v8424_v35 }
0x2fb3   :  { %12019 = vrsqrt.f32 %v8423_v31 }
0x2fb5   :  { %v8418_v53 = vpop.xlane.xlu0 %8417 }
0x2fb6   :  { %v8422_v25 = vmul.f32 0.03125, %v8418_v53  ;;  %v8415_v17 = vpop.xlane.xlu1 %8414 }
0x2fb7   :  { %v8421_v13 = vmul.f32 0.03125, %v8415_v17 }
0x2fb8   :  { %v8426_v37 = vadd.f32 1e-05, %v8422_v25 }
0x2fb9   :  { %v8425_v29 = vadd.f32 1e-05, %v8421_v13 }
0x2fba   :  { %12021 = vrsqrt.f32 %v8426_v37 }
0x2fbb   :  { %12023 = vrsqrt.f32 %v8425_v29 }
0x2fbc   :  { %v12018_v16 = vpop.eup %12017 }
0x2fbd   :  { %v12020_v61 = vpop.eup %12019  ;;  %v8432_v34 = vmul.f32 %v12018_v16, %v15133_v58 }
0x2fbe   :  { %v8431_v60 = vmul.f32 %v12020_v61, %v15135_v63 }
0x2fbf   :  { %v8436_v9 = vmul.f32 %v12078_v10, %v8432_v34 }
0x2fc0   :  { %v8435_v33 = vmul.f32 %v12078_v10, %v8431_v60 }
0x2fc1   :  { %v8440_v57 = vadd.f32 %v12079_v55, %v8436_v9 }
0x2fc2   :  { %v8439_v26 = vadd.f32 %v12079_v55, %v8435_v33 }
0x2fc3   :  { %v8550_v50 = vsel %vm1862_vm8, %v8440_v57, 0.0 }
0x2fc4   :  { %v12022_v43 = vpop.eup %12021  ;;  %8551 = vadd.xlane.f32.xlu0 %v8550_v50  ;;  %v8547_v45 = vsel %vm1862_vm8, %v8439_v26, 0.0 }
0x2fc5   :  { %v12024_v12 = vpop.eup %12023  ;;  %8548 = vadd.xlane.f32.xlu1 %v8547_v45  ;;  %v8434_v27 = vmul.f32 %v12022_v43, %v15143_v59 }
0x2fc6   :  { %v8433_v58 = vmul.f32 %v12024_v12, %v15145_v47 }
0x2fc7   :  { %v8438_v40 = vmul.f32 %v12078_v10, %v8434_v27 }
0x2fc8   :  { %v8448_v63 = vpop.xlane.xlu0 %8447  ;;  %v8437_v14 = vmul.f32 %v12078_v10, %v8433_v58 }
0x2fc9   :  { %v8462_v2 = vmul.f32 0.015625, %v8448_v63  ;;  %v8445_v11 = vpop.xlane.xlu1 %8444  ;;  %v8442_v54 = vadd.f32 %v12079_v55, %v8438_v40 }
0x2fca   :  { %v8461_v0 = vmul.f32 0.015625, %v8445_v11  ;;  %v8441_v56 = vadd.f32 %v12079_v55, %v8437_v14 }
0x2fcb   :  { %v15192_v20 = vsub.f32 %v15155_v52, %v8462_v2  ;;  %v8556_v38 = vsel %vm1862_vm8, %v8442_v54, 0.0 }
0x2fcc   :  { %v15196_v32 = vsub.f32 %v15158_v42, %v8461_v0  ;;  %8557 = vadd.xlane.f32.xlu0 %v8556_v38  ;;  %v8454_v59 = vpop.xlane.xlu0 %8453  ;;  %v8553_v47 = vsel %vm1862_vm8, %v8441_v56, 0.0 }
0x2fcd   :  { %v8464_v19 = vmul.f32 0.015625, %v8454_v59  ;;  %8554 = vadd.xlane.f32.xlu1 %v8553_v47  ;;  %v8451_v44 = vpop.xlane.xlu1 %8450  ;;  %v8474_v46 = vmul.f32 %v15192_v20, %v15192_v20 }
0x2fce   :  { %v8463_v22 = vmul.f32 0.015625, %v8451_v44  ;;  %v8473_v52 = vmul.f32 %v15196_v32, %v15196_v32 }
0x2fcf   :  { %v15204_v4 = vsub.f32 %v15165_v41, %v8464_v19  ;;  %v8482_v42 = vsel %vm313_vm0, %v8474_v46, 0.0  ;;  %v9035_v19 = vld [vmem:[%s15498_s13] ss:$0 sm:$0xff] }
0x2fd0   :  { %v15208_v5 = vsub.f32 %v15168_v23, %v8463_v22  ;;  %8483 = vadd.xlane.f32.xlu0 %v8482_v42  ;;  %v8460_v18 = vpop.xlane.xlu0 %8459  ;;  %v8479_v51 = vsel %vm313_vm0, %v8473_v52, 0.0  ;;  %v9036_v22 = vld [vmem:[%s15499_s3] ss:$0 sm:$0xff] }
0x2fd1   :  { %v8466_v30 = vmul.f32 0.015625, %v8460_v18  ;;  %8480 = vadd.xlane.f32.xlu1 %v8479_v51  ;;  %v8457_v6 = vpop.xlane.xlu1 %8456  ;;  %v8476_v39 = vmul.f32 %v15204_v4, %v15204_v4 }
0x2fd2   :  { %v8465_v24 = vmul.f32 0.015625, %v8457_v6  ;;  %v8475_v41 = vmul.f32 %v15208_v5, %v15208_v5 }
0x2fd3   :  { %v15216_v7 = vsub.f32 %v15175_v48, %v8466_v30  ;;  %v8488_v23 = vsel %vm313_vm0, %v8476_v39, 0.0 }
0x2fd4   :  { %v15220_v62 = vsub.f32 %v15177_v36, %v8465_v24  ;;  %8489 = vadd.xlane.f32.xlu0 %v8488_v23  ;;  %v8485_v3 = vsel %vm313_vm0, %v8475_v41, 0.0 }
0x2fd5   :  { %8486 = vadd.xlane.f32.xlu1 %v8485_v3  ;;  %v8478_v28 = vmul.f32 %v15216_v7, %v15216_v7 }
0x2fd6   :  { %v8477_v21 = vmul.f32 %v15220_v62, %v15220_v62 }
0x2fd7   :  { %v8494_v49 = vsel %vm2031_vm10, %v8478_v28, 0.0 }
0x2fd8   :  { %8495 = vadd.xlane.f32.xlu0 %v8494_v49  ;;  %v8491_v48 = vsel %vm313_vm0, %v8477_v21, 0.0 }
0x2fd9   :  { %8492 = vadd.xlane.f32.xlu1 %v8491_v48 }
0x3051   :  { %v8552_v1 = vpop.xlane.xlu0 %8551 }
0x3052   :  { %v8560_v15 = vmul.f32 0.03125, %v8552_v1  ;;  %v8549_v36 = vpop.xlane.xlu1 %8548 }
0x3053   :  { %v8559_v8 = vmul.f32 0.03125, %v8549_v36 }
0x3054   :  { %v15229_v35 = vsub.f32 %v8440_v57, %v8560_v15 }
0x3055   :  { %v15231_v31 = vsub.f32 %v8439_v26, %v8559_v8 }
0x3056   :  { %v8568_v53 = vmul.f32 %v15229_v35, %v15229_v35 }
0x3057   :  { %v8567_v25 = vmul.f32 %v15231_v31, %v15231_v31 }
0x3058   :  { %v8574_v17 = vsel %vm1862_vm8, %v8568_v53, 0.0 }
0x3059   :  { %v8558_v13 = vpop.xlane.xlu0 %8557  ;;  %8575 = vadd.xlane.f32.xlu0 %v8574_v17  ;;  %v8571_v37 = vsel %vm1862_vm8, %v8567_v25, 0.0 }
0x305a   :  { %v8562_v29 = vmul.f32 0.03125, %v8558_v13  ;;  %v8555_v16 = vpop.xlane.xlu1 %8554  ;;  %8572 = vadd.xlane.f32.xlu1 %v8571_v37 }
0x305b   :  { %v8561_v61 = vmul.f32 0.03125, %v8555_v16 }
0x305c   :  { %v15239_v34 = vsub.f32 %v8442_v54, %v8562_v29 }
0x305d   :  { %v15241_v60 = vsub.f32 %v8441_v56, %v8561_v61  ;;  %v8484_v10 = vpop.xlane.xlu0 %8483 }
0x305e   :  { %v8498_v9 = vmul.f32 0.015625, %v8484_v10  ;;  %v8481_v33 = vpop.xlane.xlu1 %8480  ;;  %v8570_v55 = vmul.f32 %v15239_v34, %v15239_v34 }
0x305f   :  { %v8497_v57 = vmul.f32 0.015625, %v8481_v33  ;;  %v8569_v26 = vmul.f32 %v15241_v60, %v15241_v60 }
0x3060   :  { %v8504_v50 = vadd.f32 1e-05, %v8498_v9  ;;  %v8580_v43 = vsel %vm1862_vm8, %v8570_v55, 0.0  ;;  %v9037_v9 = vld [vmem:[%s15500_s19] ss:$0 sm:$0xff] }
0x3061   :  { %v8503_v45 = vadd.f32 1e-05, %v8497_v57  ;;  %8581 = vadd.xlane.f32.xlu0 %v8580_v43  ;;  %v8490_v12 = vpop.xlane.xlu0 %8489  ;;  %v8577_v27 = vsel %vm1862_vm8, %v8569_v26, 0.0  ;;  %v9038_v57 = vld [vmem:[%s15501_s30] ss:$0 sm:$0xff] }
0x3062   :  { %12025 = vrsqrt.f32 %v8504_v50  ;;  %v8500_v58 = vmul.f32 0.015625, %v8490_v12  ;;  %8578 = vadd.xlane.f32.xlu1 %v8577_v27  ;;  %v8487_v40 = vpop.xlane.xlu1 %8486 }
0x3063   :  { %12027 = vrsqrt.f32 %v8503_v45  ;;  %v8499_v63 = vmul.f32 0.015625, %v8487_v40 }
0x3064   :  { %v8506_v14 = vadd.f32 1e-05, %v8500_v58 }
0x3065   :  { %v8505_v2 = vadd.f32 1e-05, %v8499_v63  ;;  %v8496_v11 = vpop.xlane.xlu0 %8495 }
0x3066   :  { %12029 = vrsqrt.f32 %v8506_v14  ;;  %v8502_v54 = vmul.f32 0.015625, %v8496_v11  ;;  %v8493_v0 = vpop.xlane.xlu1 %8492 }
0x3067   :  { %12031 = vrsqrt.f32 %v8505_v2  ;;  %v8501_v56 = vmul.f32 0.015625, %v8493_v0 }
0x3068   :  { %v8508_v38 = vadd.f32 1e-05, %v8502_v54 }
0x3069   :  { %v8507_v59 = vadd.f32 1e-05, %v8501_v56 }
0x306a   :  { %12033 = vrsqrt.f32 %v8508_v38 }
0x306b   :  { %12035 = vrsqrt.f32 %v8507_v59 }
0x306c   :  { %v12026_v47 = vpop.eup %12025 }
0x306d   :  { %v12028_v44 = vpop.eup %12027  ;;  %v8516_v46 = vmul.f32 %v12026_v47, %v15192_v20 }
0x306e   :  { %v8515_v52 = vmul.f32 %v12028_v44, %v15196_v32 }
0x306f   :  { %v8529_v42 = vmul.f32 %v9035_v19, %v8516_v46 }
0x3070   :  { %v12030_v18 = vpop.eup %12029  ;;  %v8528_v51 = vmul.f32 %v9035_v19, %v8515_v52 }
0x3071   :  { %v12032_v30 = vpop.eup %12031  ;;  %v8542_v6 = vadd.f32 %v9036_v22, %v8529_v42  ;;  %v8518_v39 = vmul.f32 %v12030_v18, %v15204_v4 }
0x3072   :  { %v8541_v24 = vadd.f32 %v9036_v22, %v8528_v51  ;;  %v8517_v41 = vmul.f32 %v12032_v30, %v15208_v5 }
0x3073   :  { %8622 = vst.msk [vmem:[%s12551_s17 + $0x8] sm:$0xff] %vm313_vm0, %v8542_v6  ;;  %v8531_v23 = vmul.f32 %v9035_v19, %v8518_v39 }
0x3074   :  { %v12034_v20 = vpop.eup %12033  ;;  %8621 = vst.msk [vmem:[%s12551_s17] sm:$0xff] %vm313_vm0, %v8541_v24  ;;  %v8530_v32 = vmul.f32 %v9035_v19, %v8517_v41 }
0x3075   :  { %v12036_v3 = vpop.eup %12035  ;;  %v8544_v28 = vadd.f32 %v9036_v22, %v8531_v23  ;;  %v8520_v21 = vmul.f32 %v12034_v20, %v15216_v7 }
0x3076   :  { %v8543_v49 = vadd.f32 %v9036_v22, %v8530_v32  ;;  %v8519_v48 = vmul.f32 %v12036_v3, %v15220_v62 }
0x3077   :  { %8624 = vst.msk [vmem:[%s12551_s17 + $0x18] sm:$0xff] %vm313_vm0, %v8544_v28  ;;  %v8533_v4 = vmul.f32 %v9035_v19, %v8520_v21 }
0x3078   :  { %8623 = vst.msk [vmem:[%s12551_s17 + $0x10] sm:$0xff] %vm313_vm0, %v8543_v49  ;;  %v8532_v5 = vmul.f32 %v9035_v19, %v8519_v48 }
0x3079   :  { %v8546_v1 = vadd.f32 %v9036_v22, %v8533_v4 }
0x307a   :  { %v8545_v15 = vadd.f32 %v9036_v22, %v8532_v5 }
0x307b   :  { %8626 = vst.msk [vmem:[%s12551_s17 + $0x28] sm:$0x3f] %vm2031_vm10, %v8546_v1 }
0x307c   :  { %8625 = vst.msk [vmem:[%s12551_s17 + $0x20] sm:$0xff] %vm313_vm0, %v8545_v15 }
0x30e6   :  { %v8576_v36 = vpop.xlane.xlu0 %8575 }
0x30e7   :  { %v8584_v8 = vmul.f32 0.03125, %v8576_v36  ;;  %v8573_v53 = vpop.xlane.xlu1 %8572 }
0x30e8   :  { %v8583_v7 = vmul.f32 0.03125, %v8573_v53 }
0x30e9   :  { %v8588_v25 = vadd.f32 1e-05, %v8584_v8 }
0x30ea   :  { %v8587_v62 = vadd.f32 1e-05, %v8583_v7 }
0x30eb   :  { %12037 = vrsqrt.f32 %v8588_v25 }
0x30ec   :  { %12039 = vrsqrt.f32 %v8587_v62 }
0x30ee   :  { %v8582_v17 = vpop.xlane.xlu0 %8581 }
0x30ef   :  { %v8586_v13 = vmul.f32 0.03125, %v8582_v17  ;;  %v8579_v37 = vpop.xlane.xlu1 %8578 }
0x30f0   :  { %v8585_v29 = vmul.f32 0.03125, %v8579_v37 }
0x30f1   :  { %v8590_v16 = vadd.f32 1e-05, %v8586_v13 }
0x30f2   :  { %v8589_v61 = vadd.f32 1e-05, %v8585_v29 }
0x30f3   :  { %12041 = vrsqrt.f32 %v8590_v16 }
0x30f4   :  { %12043 = vrsqrt.f32 %v8589_v61 }
0x30f5   :  { %v12038_v10 = vpop.eup %12037 }
0x30f6   :  { %v12040_v33 = vpop.eup %12039  ;;  %v8596_v55 = vmul.f32 %v12038_v10, %v15229_v35 }
0x30f7   :  { %v8595_v26 = vmul.f32 %v12040_v33, %v15231_v31 }
0x30f8   :  { %v8607_v50 = vmul.f32 %v9037_v9, %v8596_v55 }
0x30f9   :  { %v8606_v43 = vmul.f32 %v9037_v9, %v8595_v26 }
0x30fa   :  { %v8618_v45 = vadd.f32 %v9038_v57, %v8607_v50 }
0x30fb   :  { %v8617_v12 = vadd.f32 %v9038_v57, %v8606_v43 }
0x30fc   :  { %8628 = vst.msk [vmem:[%s12556_s27 + $0x8] sm:$0xff] %vm1862_vm8, %v8618_v45 }
0x30fd   :  { %v12042_v27 = vpop.eup %12041  ;;  %8627 = vst.msk [vmem:[%s12556_s27] sm:$0xff] %vm1862_vm8, %v8617_v12 }
0x30fe   :  { %v12044_v58 = vpop.eup %12043  ;;  %v8598_v40 = vmul.f32 %v12042_v27, %v15239_v34 }
0x30ff   :  { %v8597_v63 = vmul.f32 %v12044_v58, %v15241_v60 }
0x3100   :  { %v8609_v35 = vmul.f32 %v9037_v9, %v8598_v40 }
0x3101   :  { %v8608_v14 = vmul.f32 %v9037_v9, %v8597_v63 }
0x3102   :  { %v8620_v2 = vadd.f32 %v9038_v57, %v8609_v35 }
0x3103   :  { %v8619_v11 = vadd.f32 %v9038_v57, %v8608_v14 }
0x3104   :  { %8630 = vst.msk [vmem:[%s12556_s27 + $0x18] sm:$0xff] %vm1862_vm8, %v8620_v2 }
0x3105   :  { %8629 = vst.msk [vmem:[%s12556_s27 + $0x10] sm:$0xff] %vm1862_vm8, %v8619_v11 }
0x3106   :  { %8639 = vsyncpa [#allocation3], 1 }
0x3107   :  { %8640 = vsyncpa [#allocation5], 1 }
0x3108   :  { %8641 = vsyncpa [#allocation8], 1 }
0x3109   :  { %8642 = vsyncpa [#allocation11], 1 }
0x310a   :  { %8643 = vsyncpa [#allocation14], 1 }

</bundles_post_ra>
